<compile_context>
chip_gen: v6e
topology: v6e:2x2x1
jax: 0.10.0
libtpu: 0.0.40
codegen_flags: <defaults>
</compile_context>

<pallas_src>
import math
import numpy as np

import jax
import jax.numpy as jnp
from jax.experimental import pallas as pl
from jax.experimental.pallas import tpu as pltpu


# ----------------------------------------------------------------------------
# Fused kernel
# ----------------------------------------------------------------------------

def _make_kernel(block_meta, sn_mul):
    """block_meta: tuple of (H, W, Cin, Cout, optimized) per DBlock."""
    n_blocks = len(block_meta)

    def kernel(*refs):
        x_ref = refs[0]
        w_refs = refs[1:1 + 4 * n_blocks]      # per block: w1, w2, wsc, pool^T
        wfc_ref = refs[1 + 4 * n_blocks]
        o_ref = refs[2 + 4 * n_blocks]

        # input image, channel-major (Cin, H*W); sn_mul folded into the load.
        x = x_ref[0]
        if sn_mul != 1.0:
            x = x * jnp.float32(sn_mul)

        for bi, (h, w, cin, cout, optimized) in enumerate(block_meta):
            n = h * w
            w1_ref = w_refs[4 * bi + 0]        # (cout, 9*cin)   f32
            w2_ref = w_refs[4 * bi + 1]        # (cout, 9*cout)  f32
            wsc_ref = w_refs[4 * bi + 2]       # (cout, cin)     f32
            pt_ref = w_refs[4 * bi + 3]        # (n, n//4)       bf16 (exact)

            # column index along the flat spatial (lane) axis; w is a power of 2.
            col = jax.lax.broadcasted_iota(jnp.int32, (1, n), 1) & (w - 1)
            not_first_col = col >= 1           # valid positions for a dw=-1 tap
            not_last_col = col <= w - 2        # valid positions for a dw=+1 tap

            def shift_tap(a, ofs, ci):
                """t[:, p] = a[:, p + ofs], zero-filled past the ends (lane shift)."""
                if ofs == 0:
                    return a
                if ofs > 0:
                    return jnp.concatenate(
                        [a[:, ofs:], jnp.zeros((ci, ofs), jnp.float32)], axis=1)
                return jnp.concatenate(
                    [jnp.zeros((ci, -ofs), jnp.float32), a[:, :ofs]], axis=1)

            def conv3x3(a, w_ref, ci):
                """3x3 / pad=1 conv as ONE MXU dot on a (9*ci, n) im2col slab."""
                taps = []
                for dh in (-1, 0, 1):
                    for dw in (-1, 0, 1):
                        t = shift_tap(a, dh * w + dw, ci)
                        if dw == -1:           # zero columns that wrapped a row
                            t = jnp.where(not_first_col, t, 0.0)
                        elif dw == 1:
                            t = jnp.where(not_last_col, t, 0.0)
                        taps.append(t)
                slab = jnp.concatenate(taps, axis=0)          # (9*ci, n)
                return jnp.dot(w_ref[...], slab,
                               preferred_element_type=jnp.float32)

            def avg_pool(a):
                """2x2 average pool: (C, n) @ Pt(n, n//4); Pt is bf16-exact."""
                return jnp.dot(a, pt_ref[...].astype(jnp.float32),
                               preferred_element_type=jnp.float32)

            # residual branch: [relu] -> conv1 -> relu -> conv2 -> pool
            r = x if optimized else jnp.maximum(x, 0.0)
            r = conv3x3(r, w1_ref, cin)
            r = jnp.maximum(r, 0.0)
            r = conv3x3(r, w2_ref, cout)
            res = avg_pool(r)                                  # (cout, n//4)

            # shortcut branch (learnable_sc is always true for these blocks)
            if optimized:    # conv_sc(avg_pool(x))
                sc = jnp.dot(wsc_ref[...], avg_pool(x),
                             preferred_element_type=jnp.float32)
            else:            # avg_pool(conv_sc(x))
                sc = avg_pool(jnp.dot(wsc_ref[...], x,
                                      preferred_element_type=jnp.float32))

            x = sc + res                                       # (cout, n//4)

        # head: relu -> spatial sum -> bias-free fc
        feat = jnp.sum(jnp.maximum(x, 0.0), axis=1, keepdims=True)      # (C, 1)
        o_ref[0] = jnp.sum(feat * wfc_ref[...], axis=0, keepdims=True)  # (1, n_out)

    return kernel


def _pool_matrix_t(h, w):
    """(h*w, h/2*w/2) matrix so that act(C, h*w) @ Pt == 2x2 average pooling."""
    ho, wo = h // 2, w // 2
    p = np.zeros((h * w, ho * wo), dtype=np.float32)
    for r in range(h):
        for c in range(w):
            p[r * w + c, (r // 2) * wo + (c // 2)] = 0.25
    return jnp.asarray(p, dtype=jnp.bfloat16)      # 0 / 0.25 are bf16-exact


def big_regressor_forward(x_nchw, params, sn_mul=1.0):
    B, Cin, H, W = x_nchw.shape
    blocks = params["blocks"]
    wfc = params["wfc"]
    n_out = wfc.shape[1]

    block_meta = []
    # NCHW -> channel-major flat (B, C, H*W): a pure reshape, no host transpose.
    inputs = [x_nchw.astype(jnp.float32).reshape(B, Cin, H * W)]
    h, w, cin = H, W, Cin
    for blk in blocks:
        assert (w & (w - 1)) == 0 and w >= 4
        cout = blk["w1"].shape[0]
        block_meta.append((h, w, cin, cout, bool(blk["optimized"])))
        inputs += [blk["w1"], blk["w2"], blk["wsc"], _pool_matrix_t(h, w)]
        h, w, cin = h // 2, w // 2, cout
    inputs.append(wfc)

    kernel = _make_kernel(tuple(block_meta), float(sn_mul))

    # image: one (Cin, H*W) tile per grid step; weights: whole-array blocks with
    # constant index_maps (the pipeline skips their re-DMA across grid steps).
    in_specs = [pl.BlockSpec((1, Cin, H * W), lambda b: (b, 0, 0))]
    for a in inputs[1:]:
        in_specs.append(pl.BlockSpec(a.shape, lambda b, _n=a.ndim: (0,) * _n))

    out = pl.pallas_call(
        kernel,
        grid=(B,),
        in_specs=in_specs,
        out_specs=pl.BlockSpec((1, 1, n_out), lambda b: (b, 0, 0)),
        out_shape=jax.ShapeDtypeStruct((B, 1, n_out), jnp.float32),
        compiler_params=pltpu.CompilerParams(
            dimension_semantics=("parallel",)),   # v7x: one image per TensorCore
    )(*inputs)
    return out.reshape(B, n_out)


# ----------------------------------------------------------------------------
# Deterministic parameter construction (orthogonal init, mirroring __init__).
# ----------------------------------------------------------------------------

def build_params(key, in_ch=4, image_size=32, ch=32, n_outputs=1):
    log_im = int(math.log2(image_size))
    assert 2 ** log_im == image_size and image_size >= 32
    assert ch % 2 ** (log_im - 4) == 0
    to_ch = ch // 2 ** (log_im - 4)
    ortho = jax.nn.initializers.orthogonal()

    blocks = []
    w = image_size
    first = True
    from_ch = in_ch
    while w > 4:
        key, k1, k2, k3 = jax.random.split(key, 4)
        blocks.append(dict(
            optimized=first,
            # conv1: 3x3, stored (Cout, 9*Cin) with (kh, kw, cin) column order
            w1=ortho(k1, (to_ch, 9 * from_ch), jnp.float32),
            # conv2: 3x3 on Cout channels
            w2=ortho(k2, (to_ch, 9 * to_ch), jnp.float32),
            # conv_sc: 1x1, stored (Cout, Cin)
            wsc=ortho(k3, (to_ch, from_ch), jnp.float32),
        ))
        w //= 2
        first = False
        from_ch = to_ch
        if w > 8:
            to_ch *= 2

    key, kfc = jax.random.split(key)
    wfc = ortho(kfc, (to_ch, n_outputs), jnp.float32)   # Linear(to_ch, n_out, bias=False)
    return dict(blocks=blocks, wfc=wfc)


# ----------------------------------------------------------------------------
# Pure-JAX reference (lax.conv, HIGHEST precision) for the correctness check.
# ----------------------------------------------------------------------------

def _ref_conv3x3(x_nhwc, w_flat):
    cout = w_flat.shape[0]
    cin = x_nhwc.shape[-1]
    w_hwio = w_flat.reshape(cout, 3, 3, cin).transpose(1, 2, 3, 0)
    return jax.lax.conv_general_dilated(
        x_nhwc, w_hwio, window_strides=(1, 1), padding=((1, 1), (1, 1)),
        dimension_numbers=("NHWC", "HWIO", "NHWC"),
        precision=jax.lax.Precision.HIGHEST)


def _ref_pool(z):
    B, H, W, C = z.shape
    return z.reshape(B, H // 2, 2, W // 2, 2, C).mean(axis=(2, 4))


def _ref_dblock(x, blk):
    h = x if blk["optimized"] else jax.nn.relu(x)
    h = _ref_conv3x3(h, blk["w1"])
    h = _ref_conv3x3(jax.nn.relu(h), blk["w2"])
    res = _ref_pool(h)
    wsc_t = blk["wsc"].T                     # (Cin, Cout)
    if blk["optimized"]:
        sc = jnp.einsum("bhwc,cd->bhwd", _ref_pool(x), wsc_t,
                        precision=jax.lax.Precision.HIGHEST)
    else:
        sc = _ref_pool(jnp.einsum("bhwc,cd->bhwd", x, wsc_t,
                                  precision=jax.lax.Precision.HIGHEST))
    return sc + res


def reference_forward(x_nchw, params, sn_mul=1.0):
    x = jnp.transpose(x_nchw, (0, 2, 3, 1)).astype(jnp.float32) * sn_mul
    for blk in params["blocks"]:
        x = _ref_dblock(x, blk)
    feat = jnp.sum(jax.nn.relu(x), axis=(1, 2))
    return jnp.dot(feat, params["wfc"], precision=jax.lax.Precision.HIGHEST)


# ----------------------------------------------------------------------------
if __name__ == "__main__":
    key = jax.random.PRNGKey(0)
    pkey, xkey = jax.random.split(key)

    # Model: num_images=4 channels, image_size=32 (module asserts >=32), ch=32.
    params = build_params(pkey, in_ch=4, image_size=32, ch=32, n_outputs=1)

    # PyTorch input layout: NCHW (2, 4, 32, 32).
    x = jax.random.normal(xkey, (2, 4, 32, 32), dtype=jnp.float32)

    fwd = jax.jit(lambda xx: big_regressor_forward(xx, params))
    out = jax.block_until_ready(fwd(x))

    assert out.shape == (2, 1), out.shape
    ref = reference_forward(x, params)
    assert jnp.allclose(out, ref, rtol=2e-2, atol=2e-2), (out, ref)

    print("KERNEL_OK")
</pallas_src>

<mosaic_0001>
module attributes {stable_mosaic.version = 11 : i64} {
  func.func @kernel(%arg0: i32, %arg1: memref<1x4x1024xf32, #tpu.memory_space<vmem>>, %arg2: memref<16x36xf32, #tpu.memory_space<vmem>>, %arg3: memref<16x144xf32, #tpu.memory_space<vmem>>, %arg4: memref<16x4xf32, #tpu.memory_space<vmem>>, %arg5: memref<1024x256xbf16, #tpu.memory_space<vmem>>, %arg6: memref<32x144xf32, #tpu.memory_space<vmem>>, %arg7: memref<32x288xf32, #tpu.memory_space<vmem>>, %arg8: memref<32x16xf32, #tpu.memory_space<vmem>>, %arg9: memref<256x64xbf16, #tpu.memory_space<vmem>>, %arg10: memref<32x288xf32, #tpu.memory_space<vmem>>, %arg11: memref<32x288xf32, #tpu.memory_space<vmem>>, %arg12: memref<32x32xf32, #tpu.memory_space<vmem>>, %arg13: memref<64x16xbf16, #tpu.memory_space<vmem>>, %arg14: memref<32x1xf32, #tpu.memory_space<vmem>>, %arg15: memref<1x1x1xf32, #tpu.memory_space<vmem>>) attributes {dimension_semantics = [#tpu.dimension_semantics<parallel>], iteration_bounds = array<i64: 2>, scalar_prefetch = 0 : i64, scratch_operands = 0 : i64, tpu.core_type = #tpu.core_type<tc>, window_params = [{transform_indices = @transform_0, window_bounds = array<i64: 1, 4, 1024>}, {pipeline_mode = #tpu.pipeline_mode<synchronous>, transform_indices = @transform_1, window_bounds = array<i64: 16, 36>}, {pipeline_mode = #tpu.pipeline_mode<synchronous>, transform_indices = @transform_2, window_bounds = array<i64: 16, 144>}, {pipeline_mode = #tpu.pipeline_mode<synchronous>, transform_indices = @transform_3, window_bounds = array<i64: 16, 4>}, {pipeline_mode = #tpu.pipeline_mode<synchronous>, transform_indices = @transform_4, window_bounds = array<i64: 1024, 256>}, {pipeline_mode = #tpu.pipeline_mode<synchronous>, transform_indices = @transform_5, window_bounds = array<i64: 32, 144>}, {pipeline_mode = #tpu.pipeline_mode<synchronous>, transform_indices = @transform_6, window_bounds = array<i64: 32, 288>}, {pipeline_mode = #tpu.pipeline_mode<synchronous>, transform_indices = @transform_7, window_bounds = array<i64: 32, 16>}, {pipeline_mode = #tpu.pipeline_mode<synchronous>, transform_indices = @transform_8, window_bounds = array<i64: 256, 64>}, {pipeline_mode = #tpu.pipeline_mode<synchronous>, transform_indices = @transform_9, window_bounds = array<i64: 32, 288>}, {pipeline_mode = #tpu.pipeline_mode<synchronous>, transform_indices = @transform_10, window_bounds = array<i64: 32, 288>}, {pipeline_mode = #tpu.pipeline_mode<synchronous>, transform_indices = @transform_11, window_bounds = array<i64: 32, 32>}, {pipeline_mode = #tpu.pipeline_mode<synchronous>, transform_indices = @transform_12, window_bounds = array<i64: 64, 16>}, {pipeline_mode = #tpu.pipeline_mode<synchronous>, transform_indices = @transform_13, window_bounds = array<i64: 32, 1>}, {transform_indices = @transform_14, window_bounds = array<i64: 1, 1, 1>}]} {
    %c0 = arith.constant 0 : index
    %c0_0 = arith.constant 0 : index
    %c0_1 = arith.constant 0 : index
    %0 = vector.load %arg1[%c0, %c0_0, %c0_1] : memref<1x4x1024xf32, #tpu.memory_space<vmem>>, vector<1x4x1024xf32>
    %1 = vector.shape_cast %0 : vector<1x4x1024xf32> to vector<4x1024xf32>
    %2 = tpu.iota {dimensions = array<i32: 1>} : vector<1x1024xi32>
    %c31_i32 = arith.constant 31 : i32
    %3 = vector.broadcast %c31_i32 : i32 to vector<1x1024xi32>
    %4 = arith.andi %2, %3 : vector<1x1024xi32>
    %c1_i32 = arith.constant 1 : i32
    %5 = vector.broadcast %c1_i32 : i32 to vector<1x1024xi32>
    %6 = arith.cmpi sge, %4, %5 : vector<1x1024xi32>
    %c30_i32 = arith.constant 30 : i32
    %7 = vector.broadcast %c30_i32 : i32 to vector<1x1024xi32>
    %8 = arith.cmpi sle, %4, %7 : vector<1x1024xi32>
    %cst = arith.constant 0.000000e+00 : f32
    %9 = vector.broadcast %cst : f32 to vector<4x33xf32>
    %10 = vector.extract_strided_slice %1 {offsets = [0, 0], sizes = [4, 991], strides = [1, 1]} : vector<4x1024xf32> to vector<4x991xf32>
    %11 = tpu.concatenate %9, %10 in 1 : vector<4x33xf32>, vector<4x991xf32> -> vector<4x1024xf32>
    %cst_2 = arith.constant 0.000000e+00 : f32
    %12 = vector.shape_cast %6 : vector<1x1024xi1> to vector<1x1024xi1>
    %13 = vector.broadcast %12 : vector<1x1024xi1> to vector<4x1024xi1>
    %14 = vector.broadcast %cst_2 : f32 to vector<4x1024xf32>
    %15 = arith.select %13, %11, %14 : vector<4x1024xi1>, vector<4x1024xf32>
    %cst_3 = arith.constant 0.000000e+00 : f32
    %16 = vector.broadcast %cst_3 : f32 to vector<4x32xf32>
    %17 = vector.extract_strided_slice %1 {offsets = [0, 0], sizes = [4, 992], strides = [1, 1]} : vector<4x1024xf32> to vector<4x992xf32>
    %18 = tpu.concatenate %16, %17 in 1 : vector<4x32xf32>, vector<4x992xf32> -> vector<4x1024xf32>
    %cst_4 = arith.constant 0.000000e+00 : f32
    %19 = vector.broadcast %cst_4 : f32 to vector<4x31xf32>
    %20 = vector.extract_strided_slice %1 {offsets = [0, 0], sizes = [4, 993], strides = [1, 1]} : vector<4x1024xf32> to vector<4x993xf32>
    %21 = tpu.concatenate %19, %20 in 1 : vector<4x31xf32>, vector<4x993xf32> -> vector<4x1024xf32>
    %cst_5 = arith.constant 0.000000e+00 : f32
    %22 = vector.shape_cast %8 : vector<1x1024xi1> to vector<1x1024xi1>
    %23 = vector.broadcast %22 : vector<1x1024xi1> to vector<4x1024xi1>
    %24 = vector.broadcast %cst_5 : f32 to vector<4x1024xf32>
    %25 = arith.select %23, %21, %24 : vector<4x1024xi1>, vector<4x1024xf32>
    %cst_6 = arith.constant 0.000000e+00 : f32
    %26 = vector.broadcast %cst_6 : f32 to vector<4x1xf32>
    %27 = vector.extract_strided_slice %1 {offsets = [0, 0], sizes = [4, 1023], strides = [1, 1]} : vector<4x1024xf32> to vector<4x1023xf32>
    %28 = tpu.concatenate %26, %27 in 1 : vector<4x1xf32>, vector<4x1023xf32> -> vector<4x1024xf32>
    %cst_7 = arith.constant 0.000000e+00 : f32
    %29 = vector.shape_cast %6 : vector<1x1024xi1> to vector<1x1024xi1>
    %30 = vector.broadcast %29 : vector<1x1024xi1> to vector<4x1024xi1>
    %31 = vector.broadcast %cst_7 : f32 to vector<4x1024xf32>
    %32 = arith.select %30, %28, %31 : vector<4x1024xi1>, vector<4x1024xf32>
    %33 = vector.extract_strided_slice %1 {offsets = [0, 1], sizes = [4, 1023], strides = [1, 1]} : vector<4x1024xf32> to vector<4x1023xf32>
    %cst_8 = arith.constant 0.000000e+00 : f32
    %34 = vector.broadcast %cst_8 : f32 to vector<4x1xf32>
    %35 = tpu.concatenate %33, %34 in 1 : vector<4x1023xf32>, vector<4x1xf32> -> vector<4x1024xf32>
    %cst_9 = arith.constant 0.000000e+00 : f32
    %36 = vector.shape_cast %8 : vector<1x1024xi1> to vector<1x1024xi1>
    %37 = vector.broadcast %36 : vector<1x1024xi1> to vector<4x1024xi1>
    %38 = vector.broadcast %cst_9 : f32 to vector<4x1024xf32>
    %39 = arith.select %37, %35, %38 : vector<4x1024xi1>, vector<4x1024xf32>
    %40 = vector.extract_strided_slice %1 {offsets = [0, 31], sizes = [4, 993], strides = [1, 1]} : vector<4x1024xf32> to vector<4x993xf32>
    %cst_10 = arith.constant 0.000000e+00 : f32
    %41 = vector.broadcast %cst_10 : f32 to vector<4x31xf32>
    %42 = tpu.concatenate %40, %41 in 1 : vector<4x993xf32>, vector<4x31xf32> -> vector<4x1024xf32>
    %cst_11 = arith.constant 0.000000e+00 : f32
    %43 = vector.shape_cast %6 : vector<1x1024xi1> to vector<1x1024xi1>
    %44 = vector.broadcast %43 : vector<1x1024xi1> to vector<4x1024xi1>
    %45 = vector.broadcast %cst_11 : f32 to vector<4x1024xf32>
    %46 = arith.select %44, %42, %45 : vector<4x1024xi1>, vector<4x1024xf32>
    %47 = vector.extract_strided_slice %1 {offsets = [0, 32], sizes = [4, 992], strides = [1, 1]} : vector<4x1024xf32> to vector<4x992xf32>
    %cst_12 = arith.constant 0.000000e+00 : f32
    %48 = vector.broadcast %cst_12 : f32 to vector<4x32xf32>
    %49 = tpu.concatenate %47, %48 in 1 : vector<4x992xf32>, vector<4x32xf32> -> vector<4x1024xf32>
    %50 = vector.extract_strided_slice %1 {offsets = [0, 33], sizes = [4, 991], strides = [1, 1]} : vector<4x1024xf32> to vector<4x991xf32>
    %cst_13 = arith.constant 0.000000e+00 : f32
    %51 = vector.broadcast %cst_13 : f32 to vector<4x33xf32>
    %52 = tpu.concatenate %50, %51 in 1 : vector<4x991xf32>, vector<4x33xf32> -> vector<4x1024xf32>
    %cst_14 = arith.constant 0.000000e+00 : f32
    %53 = vector.shape_cast %8 : vector<1x1024xi1> to vector<1x1024xi1>
    %54 = vector.broadcast %53 : vector<1x1024xi1> to vector<4x1024xi1>
    %55 = vector.broadcast %cst_14 : f32 to vector<4x1024xf32>
    %56 = arith.select %54, %52, %55 : vector<4x1024xi1>, vector<4x1024xf32>
    %57 = tpu.concatenate %15, %18, %25, %32, %1, %39, %46, %49, %56 in 0 : vector<4x1024xf32>, vector<4x1024xf32>, vector<4x1024xf32>, vector<4x1024xf32>, vector<4x1024xf32>, vector<4x1024xf32>, vector<4x1024xf32>, vector<4x1024xf32>, vector<4x1024xf32> -> vector<36x1024xf32>
    %c0_15 = arith.constant 0 : index
    %c0_16 = arith.constant 0 : index
    %58 = vector.load %arg2[%c0_15, %c0_16] : memref<16x36xf32, #tpu.memory_space<vmem>>, vector<16x36xf32>
    %cst_17 = arith.constant dense<0.000000e+00> : vector<16x1024xf32>
    %59 = tpu.matmul %58, %57, %cst_17 {dimension_numbers = #tpu.dot_dimension_numbers<[1], [0], [0], [1], [0, 0, 1, 1], [], []>} : vector<16x36xf32>, vector<36x1024xf32>, vector<16x1024xf32> -> vector<16x1024xf32>
    %cst_18 = arith.constant 0.000000e+00 : f32
    %60 = vector.broadcast %cst_18 : f32 to vector<16x1024xf32>
    %61 = arith.maximumf %59, %60 : vector<16x1024xf32>
    %cst_19 = arith.constant 0.000000e+00 : f32
    %62 = vector.broadcast %cst_19 : f32 to vector<16x33xf32>
    %63 = vector.extract_strided_slice %61 {offsets = [0, 0], sizes = [16, 991], strides = [1, 1]} : vector<16x1024xf32> to vector<16x991xf32>
    %64 = tpu.concatenate %62, %63 in 1 : vector<16x33xf32>, vector<16x991xf32> -> vector<16x1024xf32>
    %cst_20 = arith.constant 0.000000e+00 : f32
    %65 = vector.shape_cast %6 : vector<1x1024xi1> to vector<1x1024xi1>
    %66 = vector.broadcast %65 : vector<1x1024xi1> to vector<16x1024xi1>
    %67 = vector.broadcast %cst_20 : f32 to vector<16x1024xf32>
    %68 = arith.select %66, %64, %67 : vector<16x1024xi1>, vector<16x1024xf32>
    %cst_21 = arith.constant 0.000000e+00 : f32
    %69 = vector.broadcast %cst_21 : f32 to vector<16x32xf32>
    %70 = vector.extract_strided_slice %61 {offsets = [0, 0], sizes = [16, 992], strides = [1, 1]} : vector<16x1024xf32> to vector<16x992xf32>
    %71 = tpu.concatenate %69, %70 in 1 : vector<16x32xf32>, vector<16x992xf32> -> vector<16x1024xf32>
    %cst_22 = arith.constant 0.000000e+00 : f32
    %72 = vector.broadcast %cst_22 : f32 to vector<16x31xf32>
    %73 = vector.extract_strided_slice %61 {offsets = [0, 0], sizes = [16, 993], strides = [1, 1]} : vector<16x1024xf32> to vector<16x993xf32>
    %74 = tpu.concatenate %72, %73 in 1 : vector<16x31xf32>, vector<16x993xf32> -> vector<16x1024xf32>
    %cst_23 = arith.constant 0.000000e+00 : f32
    %75 = vector.shape_cast %8 : vector<1x1024xi1> to vector<1x1024xi1>
    %76 = vector.broadcast %75 : vector<1x1024xi1> to vector<16x1024xi1>
    %77 = vector.broadcast %cst_23 : f32 to vector<16x1024xf32>
    %78 = arith.select %76, %74, %77 : vector<16x1024xi1>, vector<16x1024xf32>
    %cst_24 = arith.constant 0.000000e+00 : f32
    %79 = vector.broadcast %cst_24 : f32 to vector<16x1xf32>
    %80 = vector.extract_strided_slice %61 {offsets = [0, 0], sizes = [16, 1023], strides = [1, 1]} : vector<16x1024xf32> to vector<16x1023xf32>
    %81 = tpu.concatenate %79, %80 in 1 : vector<16x1xf32>, vector<16x1023xf32> -> vector<16x1024xf32>
    %cst_25 = arith.constant 0.000000e+00 : f32
    %82 = vector.shape_cast %6 : vector<1x1024xi1> to vector<1x1024xi1>
    %83 = vector.broadcast %82 : vector<1x1024xi1> to vector<16x1024xi1>
    %84 = vector.broadcast %cst_25 : f32 to vector<16x1024xf32>
    %85 = arith.select %83, %81, %84 : vector<16x1024xi1>, vector<16x1024xf32>
    %86 = vector.extract_strided_slice %61 {offsets = [0, 1], sizes = [16, 1023], strides = [1, 1]} : vector<16x1024xf32> to vector<16x1023xf32>
    %cst_26 = arith.constant 0.000000e+00 : f32
    %87 = vector.broadcast %cst_26 : f32 to vector<16x1xf32>
    %88 = tpu.concatenate %86, %87 in 1 : vector<16x1023xf32>, vector<16x1xf32> -> vector<16x1024xf32>
    %cst_27 = arith.constant 0.000000e+00 : f32
    %89 = vector.shape_cast %8 : vector<1x1024xi1> to vector<1x1024xi1>
    %90 = vector.broadcast %89 : vector<1x1024xi1> to vector<16x1024xi1>
    %91 = vector.broadcast %cst_27 : f32 to vector<16x1024xf32>
    %92 = arith.select %90, %88, %91 : vector<16x1024xi1>, vector<16x1024xf32>
    %93 = vector.extract_strided_slice %61 {offsets = [0, 31], sizes = [16, 993], strides = [1, 1]} : vector<16x1024xf32> to vector<16x993xf32>
    %cst_28 = arith.constant 0.000000e+00 : f32
    %94 = vector.broadcast %cst_28 : f32 to vector<16x31xf32>
    %95 = tpu.concatenate %93, %94 in 1 : vector<16x993xf32>, vector<16x31xf32> -> vector<16x1024xf32>
    %cst_29 = arith.constant 0.000000e+00 : f32
    %96 = vector.shape_cast %6 : vector<1x1024xi1> to vector<1x1024xi1>
    %97 = vector.broadcast %96 : vector<1x1024xi1> to vector<16x1024xi1>
    %98 = vector.broadcast %cst_29 : f32 to vector<16x1024xf32>
    %99 = arith.select %97, %95, %98 : vector<16x1024xi1>, vector<16x1024xf32>
    %100 = vector.extract_strided_slice %61 {offsets = [0, 32], sizes = [16, 992], strides = [1, 1]} : vector<16x1024xf32> to vector<16x992xf32>
    %cst_30 = arith.constant 0.000000e+00 : f32
    %101 = vector.broadcast %cst_30 : f32 to vector<16x32xf32>
    %102 = tpu.concatenate %100, %101 in 1 : vector<16x992xf32>, vector<16x32xf32> -> vector<16x1024xf32>
    %103 = vector.extract_strided_slice %61 {offsets = [0, 33], sizes = [16, 991], strides = [1, 1]} : vector<16x1024xf32> to vector<16x991xf32>
    %cst_31 = arith.constant 0.000000e+00 : f32
    %104 = vector.broadcast %cst_31 : f32 to vector<16x33xf32>
    %105 = tpu.concatenate %103, %104 in 1 : vector<16x991xf32>, vector<16x33xf32> -> vector<16x1024xf32>
    %cst_32 = arith.constant 0.000000e+00 : f32
    %106 = vector.shape_cast %8 : vector<1x1024xi1> to vector<1x1024xi1>
    %107 = vector.broadcast %106 : vector<1x1024xi1> to vector<16x1024xi1>
    %108 = vector.broadcast %cst_32 : f32 to vector<16x1024xf32>
    %109 = arith.select %107, %105, %108 : vector<16x1024xi1>, vector<16x1024xf32>
    %110 = tpu.concatenate %68, %71, %78, %85, %61, %92, %99, %102, %109 in 0 : vector<16x1024xf32>, vector<16x1024xf32>, vector<16x1024xf32>, vector<16x1024xf32>, vector<16x1024xf32>, vector<16x1024xf32>, vector<16x1024xf32>, vector<16x1024xf32>, vector<16x1024xf32> -> vector<144x1024xf32>
    %c0_33 = arith.constant 0 : index
    %c0_34 = arith.constant 0 : index
    %111 = vector.load %arg3[%c0_33, %c0_34] : memref<16x144xf32, #tpu.memory_space<vmem>>, vector<16x144xf32>
    %cst_35 = arith.constant dense<0.000000e+00> : vector<16x1024xf32>
    %112 = tpu.matmul %111, %110, %cst_35 {dimension_numbers = #tpu.dot_dimension_numbers<[1], [0], [0], [1], [0, 0, 1, 1], [], []>} : vector<16x144xf32>, vector<144x1024xf32>, vector<16x1024xf32> -> vector<16x1024xf32>
    %c0_36 = arith.constant 0 : index
    %c0_37 = arith.constant 0 : index
    %113 = vector.load %arg5[%c0_36, %c0_37] : memref<1024x256xbf16, #tpu.memory_space<vmem>>, vector<1024x256xbf16>
    %114 = arith.extf %113 : vector<1024x256xbf16> to vector<1024x256xf32>
    %cst_38 = arith.constant dense<0.000000e+00> : vector<16x256xf32>
    %115 = tpu.matmul %112, %114, %cst_38 {dimension_numbers = #tpu.dot_dimension_numbers<[1], [0], [0], [1], [0, 0, 1, 1], [], []>} : vector<16x1024xf32>, vector<1024x256xf32>, vector<16x256xf32> -> vector<16x256xf32>
    %c0_39 = arith.constant 0 : index
    %c0_40 = arith.constant 0 : index
    %116 = vector.load %arg4[%c0_39, %c0_40] : memref<16x4xf32, #tpu.memory_space<vmem>>, vector<16x4xf32>
    %c0_41 = arith.constant 0 : index
    %c0_42 = arith.constant 0 : index
    %117 = vector.load %arg5[%c0_41, %c0_42] : memref<1024x256xbf16, #tpu.memory_space<vmem>>, vector<1024x256xbf16>
    %118 = arith.extf %117 : vector<1024x256xbf16> to vector<1024x256xf32>
    %cst_43 = arith.constant dense<0.000000e+00> : vector<4x256xf32>
    %119 = tpu.matmul %1, %118, %cst_43 {dimension_numbers = #tpu.dot_dimension_numbers<[1], [0], [0], [1], [0, 0, 1, 1], [], []>} : vector<4x1024xf32>, vector<1024x256xf32>, vector<4x256xf32> -> vector<4x256xf32>
    %cst_44 = arith.constant dense<0.000000e+00> : vector<16x256xf32>
    %120 = tpu.matmul %116, %119, %cst_44 {dimension_numbers = #tpu.dot_dimension_numbers<[1], [0], [0], [1], [0, 0, 1, 1], [], []>} : vector<16x4xf32>, vector<4x256xf32>, vector<16x256xf32> -> vector<16x256xf32>
    %121 = arith.addf %120, %115 : vector<16x256xf32>
    %122 = tpu.iota {dimensions = array<i32: 1>} : vector<1x256xi32>
    %c15_i32 = arith.constant 15 : i32
    %123 = vector.broadcast %c15_i32 : i32 to vector<1x256xi32>
    %124 = arith.andi %122, %123 : vector<1x256xi32>
    %c1_i32_45 = arith.constant 1 : i32
    %125 = vector.broadcast %c1_i32_45 : i32 to vector<1x256xi32>
    %126 = arith.cmpi sge, %124, %125 : vector<1x256xi32>
    %c14_i32 = arith.constant 14 : i32
    %127 = vector.broadcast %c14_i32 : i32 to vector<1x256xi32>
    %128 = arith.cmpi sle, %124, %127 : vector<1x256xi32>
    %cst_46 = arith.constant 0.000000e+00 : f32
    %129 = vector.broadcast %cst_46 : f32 to vector<16x256xf32>
    %130 = arith.maximumf %121, %129 : vector<16x256xf32>
    %cst_47 = arith.constant 0.000000e+00 : f32
    %131 = vector.broadcast %cst_47 : f32 to vector<16x17xf32>
    %132 = vector.extract_strided_slice %130 {offsets = [0, 0], sizes = [16, 239], strides = [1, 1]} : vector<16x256xf32> to vector<16x239xf32>
    %133 = tpu.concatenate %131, %132 in 1 : vector<16x17xf32>, vector<16x239xf32> -> vector<16x256xf32>
    %cst_48 = arith.constant 0.000000e+00 : f32
    %134 = vector.shape_cast %126 : vector<1x256xi1> to vector<1x256xi1>
    %135 = vector.broadcast %134 : vector<1x256xi1> to vector<16x256xi1>
    %136 = vector.broadcast %cst_48 : f32 to vector<16x256xf32>
    %137 = arith.select %135, %133, %136 : vector<16x256xi1>, vector<16x256xf32>
    %cst_49 = arith.constant 0.000000e+00 : f32
    %138 = vector.broadcast %cst_49 : f32 to vector<16x16xf32>
    %139 = vector.extract_strided_slice %130 {offsets = [0, 0], sizes = [16, 240], strides = [1, 1]} : vector<16x256xf32> to vector<16x240xf32>
    %140 = tpu.concatenate %138, %139 in 1 : vector<16x16xf32>, vector<16x240xf32> -> vector<16x256xf32>
    %cst_50 = arith.constant 0.000000e+00 : f32
    %141 = vector.broadcast %cst_50 : f32 to vector<16x15xf32>
    %142 = vector.extract_strided_slice %130 {offsets = [0, 0], sizes = [16, 241], strides = [1, 1]} : vector<16x256xf32> to vector<16x241xf32>
    %143 = tpu.concatenate %141, %142 in 1 : vector<16x15xf32>, vector<16x241xf32> -> vector<16x256xf32>
    %cst_51 = arith.constant 0.000000e+00 : f32
    %144 = vector.shape_cast %128 : vector<1x256xi1> to vector<1x256xi1>
    %145 = vector.broadcast %144 : vector<1x256xi1> to vector<16x256xi1>
    %146 = vector.broadcast %cst_51 : f32 to vector<16x256xf32>
    %147 = arith.select %145, %143, %146 : vector<16x256xi1>, vector<16x256xf32>
    %cst_52 = arith.constant 0.000000e+00 : f32
    %148 = vector.broadcast %cst_52 : f32 to vector<16x1xf32>
    %149 = vector.extract_strided_slice %130 {offsets = [0, 0], sizes = [16, 255], strides = [1, 1]} : vector<16x256xf32> to vector<16x255xf32>
    %150 = tpu.concatenate %148, %149 in 1 : vector<16x1xf32>, vector<16x255xf32> -> vector<16x256xf32>
    %cst_53 = arith.constant 0.000000e+00 : f32
    %151 = vector.shape_cast %126 : vector<1x256xi1> to vector<1x256xi1>
    %152 = vector.broadcast %151 : vector<1x256xi1> to vector<16x256xi1>
    %153 = vector.broadcast %cst_53 : f32 to vector<16x256xf32>
    %154 = arith.select %152, %150, %153 : vector<16x256xi1>, vector<16x256xf32>
    %155 = vector.extract_strided_slice %130 {offsets = [0, 1], sizes = [16, 255], strides = [1, 1]} : vector<16x256xf32> to vector<16x255xf32>
    %cst_54 = arith.constant 0.000000e+00 : f32
    %156 = vector.broadcast %cst_54 : f32 to vector<16x1xf32>
    %157 = tpu.concatenate %155, %156 in 1 : vector<16x255xf32>, vector<16x1xf32> -> vector<16x256xf32>
    %cst_55 = arith.constant 0.000000e+00 : f32
    %158 = vector.shape_cast %128 : vector<1x256xi1> to vector<1x256xi1>
    %159 = vector.broadcast %158 : vector<1x256xi1> to vector<16x256xi1>
    %160 = vector.broadcast %cst_55 : f32 to vector<16x256xf32>
    %161 = arith.select %159, %157, %160 : vector<16x256xi1>, vector<16x256xf32>
    %162 = vector.extract_strided_slice %130 {offsets = [0, 15], sizes = [16, 241], strides = [1, 1]} : vector<16x256xf32> to vector<16x241xf32>
    %cst_56 = arith.constant 0.000000e+00 : f32
    %163 = vector.broadcast %cst_56 : f32 to vector<16x15xf32>
    %164 = tpu.concatenate %162, %163 in 1 : vector<16x241xf32>, vector<16x15xf32> -> vector<16x256xf32>
    %cst_57 = arith.constant 0.000000e+00 : f32
    %165 = vector.shape_cast %126 : vector<1x256xi1> to vector<1x256xi1>
    %166 = vector.broadcast %165 : vector<1x256xi1> to vector<16x256xi1>
    %167 = vector.broadcast %cst_57 : f32 to vector<16x256xf32>
    %168 = arith.select %166, %164, %167 : vector<16x256xi1>, vector<16x256xf32>
    %169 = vector.extract_strided_slice %130 {offsets = [0, 16], sizes = [16, 240], strides = [1, 1]} : vector<16x256xf32> to vector<16x240xf32>
    %cst_58 = arith.constant 0.000000e+00 : f32
    %170 = vector.broadcast %cst_58 : f32 to vector<16x16xf32>
    %171 = tpu.concatenate %169, %170 in 1 : vector<16x240xf32>, vector<16x16xf32> -> vector<16x256xf32>
    %172 = vector.extract_strided_slice %130 {offsets = [0, 17], sizes = [16, 239], strides = [1, 1]} : vector<16x256xf32> to vector<16x239xf32>
    %cst_59 = arith.constant 0.000000e+00 : f32
    %173 = vector.broadcast %cst_59 : f32 to vector<16x17xf32>
    %174 = tpu.concatenate %172, %173 in 1 : vector<16x239xf32>, vector<16x17xf32> -> vector<16x256xf32>
    %cst_60 = arith.constant 0.000000e+00 : f32
    %175 = vector.shape_cast %128 : vector<1x256xi1> to vector<1x256xi1>
    %176 = vector.broadcast %175 : vector<1x256xi1> to vector<16x256xi1>
    %177 = vector.broadcast %cst_60 : f32 to vector<16x256xf32>
    %178 = arith.select %176, %174, %177 : vector<16x256xi1>, vector<16x256xf32>
    %179 = tpu.concatenate %137, %140, %147, %154, %130, %161, %168, %171, %178 in 0 : vector<16x256xf32>, vector<16x256xf32>, vector<16x256xf32>, vector<16x256xf32>, vector<16x256xf32>, vector<16x256xf32>, vector<16x256xf32>, vector<16x256xf32>, vector<16x256xf32> -> vector<144x256xf32>
    %c0_61 = arith.constant 0 : index
    %c0_62 = arith.constant 0 : index
    %180 = vector.load %arg6[%c0_61, %c0_62] : memref<32x144xf32, #tpu.memory_space<vmem>>, vector<32x144xf32>
    %cst_63 = arith.constant dense<0.000000e+00> : vector<32x256xf32>
    %181 = tpu.matmul %180, %179, %cst_63 {dimension_numbers = #tpu.dot_dimension_numbers<[1], [0], [0], [1], [0, 0, 1, 1], [], []>} : vector<32x144xf32>, vector<144x256xf32>, vector<32x256xf32> -> vector<32x256xf32>
    %cst_64 = arith.constant 0.000000e+00 : f32
    %182 = vector.broadcast %cst_64 : f32 to vector<32x256xf32>
    %183 = arith.maximumf %181, %182 : vector<32x256xf32>
    %cst_65 = arith.constant 0.000000e+00 : f32
    %184 = vector.broadcast %cst_65 : f32 to vector<32x17xf32>
    %185 = vector.extract_strided_slice %183 {offsets = [0, 0], sizes = [32, 239], strides = [1, 1]} : vector<32x256xf32> to vector<32x239xf32>
    %186 = tpu.concatenate %184, %185 in 1 : vector<32x17xf32>, vector<32x239xf32> -> vector<32x256xf32>
    %cst_66 = arith.constant 0.000000e+00 : f32
    %187 = vector.shape_cast %126 : vector<1x256xi1> to vector<1x256xi1>
    %188 = vector.broadcast %187 : vector<1x256xi1> to vector<32x256xi1>
    %189 = vector.broadcast %cst_66 : f32 to vector<32x256xf32>
    %190 = arith.select %188, %186, %189 : vector<32x256xi1>, vector<32x256xf32>
    %cst_67 = arith.constant 0.000000e+00 : f32
    %191 = vector.broadcast %cst_67 : f32 to vector<32x16xf32>
    %192 = vector.extract_strided_slice %183 {offsets = [0, 0], sizes = [32, 240], strides = [1, 1]} : vector<32x256xf32> to vector<32x240xf32>
    %193 = tpu.concatenate %191, %192 in 1 : vector<32x16xf32>, vector<32x240xf32> -> vector<32x256xf32>
    %cst_68 = arith.constant 0.000000e+00 : f32
    %194 = vector.broadcast %cst_68 : f32 to vector<32x15xf32>
    %195 = vector.extract_strided_slice %183 {offsets = [0, 0], sizes = [32, 241], strides = [1, 1]} : vector<32x256xf32> to vector<32x241xf32>
    %196 = tpu.concatenate %194, %195 in 1 : vector<32x15xf32>, vector<32x241xf32> -> vector<32x256xf32>
    %cst_69 = arith.constant 0.000000e+00 : f32
    %197 = vector.shape_cast %128 : vector<1x256xi1> to vector<1x256xi1>
    %198 = vector.broadcast %197 : vector<1x256xi1> to vector<32x256xi1>
    %199 = vector.broadcast %cst_69 : f32 to vector<32x256xf32>
    %200 = arith.select %198, %196, %199 : vector<32x256xi1>, vector<32x256xf32>
    %cst_70 = arith.constant 0.000000e+00 : f32
    %201 = vector.broadcast %cst_70 : f32 to vector<32x1xf32>
    %202 = vector.extract_strided_slice %183 {offsets = [0, 0], sizes = [32, 255], strides = [1, 1]} : vector<32x256xf32> to vector<32x255xf32>
    %203 = tpu.concatenate %201, %202 in 1 : vector<32x1xf32>, vector<32x255xf32> -> vector<32x256xf32>
    %cst_71 = arith.constant 0.000000e+00 : f32
    %204 = vector.shape_cast %126 : vector<1x256xi1> to vector<1x256xi1>
    %205 = vector.broadcast %204 : vector<1x256xi1> to vector<32x256xi1>
    %206 = vector.broadcast %cst_71 : f32 to vector<32x256xf32>
    %207 = arith.select %205, %203, %206 : vector<32x256xi1>, vector<32x256xf32>
    %208 = vector.extract_strided_slice %183 {offsets = [0, 1], sizes = [32, 255], strides = [1, 1]} : vector<32x256xf32> to vector<32x255xf32>
    %cst_72 = arith.constant 0.000000e+00 : f32
    %209 = vector.broadcast %cst_72 : f32 to vector<32x1xf32>
    %210 = tpu.concatenate %208, %209 in 1 : vector<32x255xf32>, vector<32x1xf32> -> vector<32x256xf32>
    %cst_73 = arith.constant 0.000000e+00 : f32
    %211 = vector.shape_cast %128 : vector<1x256xi1> to vector<1x256xi1>
    %212 = vector.broadcast %211 : vector<1x256xi1> to vector<32x256xi1>
    %213 = vector.broadcast %cst_73 : f32 to vector<32x256xf32>
    %214 = arith.select %212, %210, %213 : vector<32x256xi1>, vector<32x256xf32>
    %215 = vector.extract_strided_slice %183 {offsets = [0, 15], sizes = [32, 241], strides = [1, 1]} : vector<32x256xf32> to vector<32x241xf32>
    %cst_74 = arith.constant 0.000000e+00 : f32
    %216 = vector.broadcast %cst_74 : f32 to vector<32x15xf32>
    %217 = tpu.concatenate %215, %216 in 1 : vector<32x241xf32>, vector<32x15xf32> -> vector<32x256xf32>
    %cst_75 = arith.constant 0.000000e+00 : f32
    %218 = vector.shape_cast %126 : vector<1x256xi1> to vector<1x256xi1>
    %219 = vector.broadcast %218 : vector<1x256xi1> to vector<32x256xi1>
    %220 = vector.broadcast %cst_75 : f32 to vector<32x256xf32>
    %221 = arith.select %219, %217, %220 : vector<32x256xi1>, vector<32x256xf32>
    %222 = vector.extract_strided_slice %183 {offsets = [0, 16], sizes = [32, 240], strides = [1, 1]} : vector<32x256xf32> to vector<32x240xf32>
    %cst_76 = arith.constant 0.000000e+00 : f32
    %223 = vector.broadcast %cst_76 : f32 to vector<32x16xf32>
    %224 = tpu.concatenate %222, %223 in 1 : vector<32x240xf32>, vector<32x16xf32> -> vector<32x256xf32>
    %225 = vector.extract_strided_slice %183 {offsets = [0, 17], sizes = [32, 239], strides = [1, 1]} : vector<32x256xf32> to vector<32x239xf32>
    %cst_77 = arith.constant 0.000000e+00 : f32
    %226 = vector.broadcast %cst_77 : f32 to vector<32x17xf32>
    %227 = tpu.concatenate %225, %226 in 1 : vector<32x239xf32>, vector<32x17xf32> -> vector<32x256xf32>
    %cst_78 = arith.constant 0.000000e+00 : f32
    %228 = vector.shape_cast %128 : vector<1x256xi1> to vector<1x256xi1>
    %229 = vector.broadcast %228 : vector<1x256xi1> to vector<32x256xi1>
    %230 = vector.broadcast %cst_78 : f32 to vector<32x256xf32>
    %231 = arith.select %229, %227, %230 : vector<32x256xi1>, vector<32x256xf32>
    %232 = tpu.concatenate %190, %193, %200, %207, %183, %214, %221, %224, %231 in 0 : vector<32x256xf32>, vector<32x256xf32>, vector<32x256xf32>, vector<32x256xf32>, vector<32x256xf32>, vector<32x256xf32>, vector<32x256xf32>, vector<32x256xf32>, vector<32x256xf32> -> vector<288x256xf32>
    %c0_79 = arith.constant 0 : index
    %c0_80 = arith.constant 0 : index
    %233 = vector.load %arg7[%c0_79, %c0_80] : memref<32x288xf32, #tpu.memory_space<vmem>>, vector<32x288xf32>
    %cst_81 = arith.constant dense<0.000000e+00> : vector<32x256xf32>
    %234 = tpu.matmul %233, %232, %cst_81 {dimension_numbers = #tpu.dot_dimension_numbers<[1], [0], [0], [1], [0, 0, 1, 1], [], []>} : vector<32x288xf32>, vector<288x256xf32>, vector<32x256xf32> -> vector<32x256xf32>
    %c0_82 = arith.constant 0 : index
    %c0_83 = arith.constant 0 : index
    %235 = vector.load %arg9[%c0_82, %c0_83] : memref<256x64xbf16, #tpu.memory_space<vmem>>, vector<256x64xbf16>
    %236 = arith.extf %235 : vector<256x64xbf16> to vector<256x64xf32>
    %cst_84 = arith.constant dense<0.000000e+00> : vector<32x64xf32>
    %237 = tpu.matmul %234, %236, %cst_84 {dimension_numbers = #tpu.dot_dimension_numbers<[1], [0], [0], [1], [0, 0, 1, 1], [], []>} : vector<32x256xf32>, vector<256x64xf32>, vector<32x64xf32> -> vector<32x64xf32>
    %c0_85 = arith.constant 0 : index
    %c0_86 = arith.constant 0 : index
    %238 = vector.load %arg8[%c0_85, %c0_86] : memref<32x16xf32, #tpu.memory_space<vmem>>, vector<32x16xf32>
    %cst_87 = arith.constant dense<0.000000e+00> : vector<32x256xf32>
    %239 = tpu.matmul %238, %121, %cst_87 {dimension_numbers = #tpu.dot_dimension_numbers<[1], [0], [0], [1], [0, 0, 1, 1], [], []>} : vector<32x16xf32>, vector<16x256xf32>, vector<32x256xf32> -> vector<32x256xf32>
    %c0_88 = arith.constant 0 : index
    %c0_89 = arith.constant 0 : index
    %240 = vector.load %arg9[%c0_88, %c0_89] : memref<256x64xbf16, #tpu.memory_space<vmem>>, vector<256x64xbf16>
    %241 = arith.extf %240 : vector<256x64xbf16> to vector<256x64xf32>
    %cst_90 = arith.constant dense<0.000000e+00> : vector<32x64xf32>
    %242 = tpu.matmul %239, %241, %cst_90 {dimension_numbers = #tpu.dot_dimension_numbers<[1], [0], [0], [1], [0, 0, 1, 1], [], []>} : vector<32x256xf32>, vector<256x64xf32>, vector<32x64xf32> -> vector<32x64xf32>
    %243 = arith.addf %242, %237 : vector<32x64xf32>
    %244 = tpu.iota {dimensions = array<i32: 1>} : vector<1x64xi32>
    %c7_i32 = arith.constant 7 : i32
    %245 = vector.broadcast %c7_i32 : i32 to vector<1x64xi32>
    %246 = arith.andi %244, %245 : vector<1x64xi32>
    %c1_i32_91 = arith.constant 1 : i32
    %247 = vector.broadcast %c1_i32_91 : i32 to vector<1x64xi32>
    %248 = arith.cmpi sge, %246, %247 : vector<1x64xi32>
    %c6_i32 = arith.constant 6 : i32
    %249 = vector.broadcast %c6_i32 : i32 to vector<1x64xi32>
    %250 = arith.cmpi sle, %246, %249 : vector<1x64xi32>
    %cst_92 = arith.constant 0.000000e+00 : f32
    %251 = vector.broadcast %cst_92 : f32 to vector<32x64xf32>
    %252 = arith.maximumf %243, %251 : vector<32x64xf32>
    %cst_93 = arith.constant 0.000000e+00 : f32
    %253 = vector.broadcast %cst_93 : f32 to vector<32x9xf32>
    %254 = vector.extract_strided_slice %252 {offsets = [0, 0], sizes = [32, 55], strides = [1, 1]} : vector<32x64xf32> to vector<32x55xf32>
    %255 = tpu.concatenate %253, %254 in 1 : vector<32x9xf32>, vector<32x55xf32> -> vector<32x64xf32>
    %cst_94 = arith.constant 0.000000e+00 : f32
    %256 = vector.shape_cast %248 : vector<1x64xi1> to vector<1x64xi1>
    %257 = vector.broadcast %256 : vector<1x64xi1> to vector<32x64xi1>
    %258 = vector.broadcast %cst_94 : f32 to vector<32x64xf32>
    %259 = arith.select %257, %255, %258 : vector<32x64xi1>, vector<32x64xf32>
    %cst_95 = arith.constant 0.000000e+00 : f32
    %260 = vector.broadcast %cst_95 : f32 to vector<32x8xf32>
    %261 = vector.extract_strided_slice %252 {offsets = [0, 0], sizes = [32, 56], strides = [1, 1]} : vector<32x64xf32> to vector<32x56xf32>
    %262 = tpu.concatenate %260, %261 in 1 : vector<32x8xf32>, vector<32x56xf32> -> vector<32x64xf32>
    %cst_96 = arith.constant 0.000000e+00 : f32
    %263 = vector.broadcast %cst_96 : f32 to vector<32x7xf32>
    %264 = vector.extract_strided_slice %252 {offsets = [0, 0], sizes = [32, 57], strides = [1, 1]} : vector<32x64xf32> to vector<32x57xf32>
    %265 = tpu.concatenate %263, %264 in 1 : vector<32x7xf32>, vector<32x57xf32> -> vector<32x64xf32>
    %cst_97 = arith.constant 0.000000e+00 : f32
    %266 = vector.shape_cast %250 : vector<1x64xi1> to vector<1x64xi1>
    %267 = vector.broadcast %266 : vector<1x64xi1> to vector<32x64xi1>
    %268 = vector.broadcast %cst_97 : f32 to vector<32x64xf32>
    %269 = arith.select %267, %265, %268 : vector<32x64xi1>, vector<32x64xf32>
    %cst_98 = arith.constant 0.000000e+00 : f32
    %270 = vector.broadcast %cst_98 : f32 to vector<32x1xf32>
    %271 = vector.extract_strided_slice %252 {offsets = [0, 0], sizes = [32, 63], strides = [1, 1]} : vector<32x64xf32> to vector<32x63xf32>
    %272 = tpu.concatenate %270, %271 in 1 : vector<32x1xf32>, vector<32x63xf32> -> vector<32x64xf32>
    %cst_99 = arith.constant 0.000000e+00 : f32
    %273 = vector.shape_cast %248 : vector<1x64xi1> to vector<1x64xi1>
    %274 = vector.broadcast %273 : vector<1x64xi1> to vector<32x64xi1>
    %275 = vector.broadcast %cst_99 : f32 to vector<32x64xf32>
    %276 = arith.select %274, %272, %275 : vector<32x64xi1>, vector<32x64xf32>
    %277 = vector.extract_strided_slice %252 {offsets = [0, 1], sizes = [32, 63], strides = [1, 1]} : vector<32x64xf32> to vector<32x63xf32>
    %cst_100 = arith.constant 0.000000e+00 : f32
    %278 = vector.broadcast %cst_100 : f32 to vector<32x1xf32>
    %279 = tpu.concatenate %277, %278 in 1 : vector<32x63xf32>, vector<32x1xf32> -> vector<32x64xf32>
    %cst_101 = arith.constant 0.000000e+00 : f32
    %280 = vector.shape_cast %250 : vector<1x64xi1> to vector<1x64xi1>
    %281 = vector.broadcast %280 : vector<1x64xi1> to vector<32x64xi1>
    %282 = vector.broadcast %cst_101 : f32 to vector<32x64xf32>
    %283 = arith.select %281, %279, %282 : vector<32x64xi1>, vector<32x64xf32>
    %284 = vector.extract_strided_slice %252 {offsets = [0, 7], sizes = [32, 57], strides = [1, 1]} : vector<32x64xf32> to vector<32x57xf32>
    %cst_102 = arith.constant 0.000000e+00 : f32
    %285 = vector.broadcast %cst_102 : f32 to vector<32x7xf32>
    %286 = tpu.concatenate %284, %285 in 1 : vector<32x57xf32>, vector<32x7xf32> -> vector<32x64xf32>
    %cst_103 = arith.constant 0.000000e+00 : f32
    %287 = vector.shape_cast %248 : vector<1x64xi1> to vector<1x64xi1>
    %288 = vector.broadcast %287 : vector<1x64xi1> to vector<32x64xi1>
    %289 = vector.broadcast %cst_103 : f32 to vector<32x64xf32>
    %290 = arith.select %288, %286, %289 : vector<32x64xi1>, vector<32x64xf32>
    %291 = vector.extract_strided_slice %252 {offsets = [0, 8], sizes = [32, 56], strides = [1, 1]} : vector<32x64xf32> to vector<32x56xf32>
    %cst_104 = arith.constant 0.000000e+00 : f32
    %292 = vector.broadcast %cst_104 : f32 to vector<32x8xf32>
    %293 = tpu.concatenate %291, %292 in 1 : vector<32x56xf32>, vector<32x8xf32> -> vector<32x64xf32>
    %294 = vector.extract_strided_slice %252 {offsets = [0, 9], sizes = [32, 55], strides = [1, 1]} : vector<32x64xf32> to vector<32x55xf32>
    %cst_105 = arith.constant 0.000000e+00 : f32
    %295 = vector.broadcast %cst_105 : f32 to vector<32x9xf32>
    %296 = tpu.concatenate %294, %295 in 1 : vector<32x55xf32>, vector<32x9xf32> -> vector<32x64xf32>
    %cst_106 = arith.constant 0.000000e+00 : f32
    %297 = vector.shape_cast %250 : vector<1x64xi1> to vector<1x64xi1>
    %298 = vector.broadcast %297 : vector<1x64xi1> to vector<32x64xi1>
    %299 = vector.broadcast %cst_106 : f32 to vector<32x64xf32>
    %300 = arith.select %298, %296, %299 : vector<32x64xi1>, vector<32x64xf32>
    %301 = tpu.concatenate %259, %262, %269, %276, %252, %283, %290, %293, %300 in 0 : vector<32x64xf32>, vector<32x64xf32>, vector<32x64xf32>, vector<32x64xf32>, vector<32x64xf32>, vector<32x64xf32>, vector<32x64xf32>, vector<32x64xf32>, vector<32x64xf32> -> vector<288x64xf32>
    %c0_107 = arith.constant 0 : index
    %c0_108 = arith.constant 0 : index
    %302 = vector.load %arg10[%c0_107, %c0_108] : memref<32x288xf32, #tpu.memory_space<vmem>>, vector<32x288xf32>
    %cst_109 = arith.constant dense<0.000000e+00> : vector<32x64xf32>
    %303 = tpu.matmul %302, %301, %cst_109 {dimension_numbers = #tpu.dot_dimension_numbers<[1], [0], [0], [1], [0, 0, 1, 1], [], []>} : vector<32x288xf32>, vector<288x64xf32>, vector<32x64xf32> -> vector<32x64xf32>
    %cst_110 = arith.constant 0.000000e+00 : f32
    %304 = vector.broadcast %cst_110 : f32 to vector<32x64xf32>
    %305 = arith.maximumf %303, %304 : vector<32x64xf32>
    %cst_111 = arith.constant 0.000000e+00 : f32
    %306 = vector.broadcast %cst_111 : f32 to vector<32x9xf32>
    %307 = vector.extract_strided_slice %305 {offsets = [0, 0], sizes = [32, 55], strides = [1, 1]} : vector<32x64xf32> to vector<32x55xf32>
    %308 = tpu.concatenate %306, %307 in 1 : vector<32x9xf32>, vector<32x55xf32> -> vector<32x64xf32>
    %cst_112 = arith.constant 0.000000e+00 : f32
    %309 = vector.shape_cast %248 : vector<1x64xi1> to vector<1x64xi1>
    %310 = vector.broadcast %309 : vector<1x64xi1> to vector<32x64xi1>
    %311 = vector.broadcast %cst_112 : f32 to vector<32x64xf32>
    %312 = arith.select %310, %308, %311 : vector<32x64xi1>, vector<32x64xf32>
    %cst_113 = arith.constant 0.000000e+00 : f32
    %313 = vector.broadcast %cst_113 : f32 to vector<32x8xf32>
    %314 = vector.extract_strided_slice %305 {offsets = [0, 0], sizes = [32, 56], strides = [1, 1]} : vector<32x64xf32> to vector<32x56xf32>
    %315 = tpu.concatenate %313, %314 in 1 : vector<32x8xf32>, vector<32x56xf32> -> vector<32x64xf32>
    %cst_114 = arith.constant 0.000000e+00 : f32
    %316 = vector.broadcast %cst_114 : f32 to vector<32x7xf32>
    %317 = vector.extract_strided_slice %305 {offsets = [0, 0], sizes = [32, 57], strides = [1, 1]} : vector<32x64xf32> to vector<32x57xf32>
    %318 = tpu.concatenate %316, %317 in 1 : vector<32x7xf32>, vector<32x57xf32> -> vector<32x64xf32>
    %cst_115 = arith.constant 0.000000e+00 : f32
    %319 = vector.shape_cast %250 : vector<1x64xi1> to vector<1x64xi1>
    %320 = vector.broadcast %319 : vector<1x64xi1> to vector<32x64xi1>
    %321 = vector.broadcast %cst_115 : f32 to vector<32x64xf32>
    %322 = arith.select %320, %318, %321 : vector<32x64xi1>, vector<32x64xf32>
    %cst_116 = arith.constant 0.000000e+00 : f32
    %323 = vector.broadcast %cst_116 : f32 to vector<32x1xf32>
    %324 = vector.extract_strided_slice %305 {offsets = [0, 0], sizes = [32, 63], strides = [1, 1]} : vector<32x64xf32> to vector<32x63xf32>
    %325 = tpu.concatenate %323, %324 in 1 : vector<32x1xf32>, vector<32x63xf32> -> vector<32x64xf32>
    %cst_117 = arith.constant 0.000000e+00 : f32
    %326 = vector.shape_cast %248 : vector<1x64xi1> to vector<1x64xi1>
    %327 = vector.broadcast %326 : vector<1x64xi1> to vector<32x64xi1>
    %328 = vector.broadcast %cst_117 : f32 to vector<32x64xf32>
    %329 = arith.select %327, %325, %328 : vector<32x64xi1>, vector<32x64xf32>
    %330 = vector.extract_strided_slice %305 {offsets = [0, 1], sizes = [32, 63], strides = [1, 1]} : vector<32x64xf32> to vector<32x63xf32>
    %cst_118 = arith.constant 0.000000e+00 : f32
    %331 = vector.broadcast %cst_118 : f32 to vector<32x1xf32>
    %332 = tpu.concatenate %330, %331 in 1 : vector<32x63xf32>, vector<32x1xf32> -> vector<32x64xf32>
    %cst_119 = arith.constant 0.000000e+00 : f32
    %333 = vector.shape_cast %250 : vector<1x64xi1> to vector<1x64xi1>
    %334 = vector.broadcast %333 : vector<1x64xi1> to vector<32x64xi1>
    %335 = vector.broadcast %cst_119 : f32 to vector<32x64xf32>
    %336 = arith.select %334, %332, %335 : vector<32x64xi1>, vector<32x64xf32>
    %337 = vector.extract_strided_slice %305 {offsets = [0, 7], sizes = [32, 57], strides = [1, 1]} : vector<32x64xf32> to vector<32x57xf32>
    %cst_120 = arith.constant 0.000000e+00 : f32
    %338 = vector.broadcast %cst_120 : f32 to vector<32x7xf32>
    %339 = tpu.concatenate %337, %338 in 1 : vector<32x57xf32>, vector<32x7xf32> -> vector<32x64xf32>
    %cst_121 = arith.constant 0.000000e+00 : f32
    %340 = vector.shape_cast %248 : vector<1x64xi1> to vector<1x64xi1>
    %341 = vector.broadcast %340 : vector<1x64xi1> to vector<32x64xi1>
    %342 = vector.broadcast %cst_121 : f32 to vector<32x64xf32>
    %343 = arith.select %341, %339, %342 : vector<32x64xi1>, vector<32x64xf32>
    %344 = vector.extract_strided_slice %305 {offsets = [0, 8], sizes = [32, 56], strides = [1, 1]} : vector<32x64xf32> to vector<32x56xf32>
    %cst_122 = arith.constant 0.000000e+00 : f32
    %345 = vector.broadcast %cst_122 : f32 to vector<32x8xf32>
    %346 = tpu.concatenate %344, %345 in 1 : vector<32x56xf32>, vector<32x8xf32> -> vector<32x64xf32>
    %347 = vector.extract_strided_slice %305 {offsets = [0, 9], sizes = [32, 55], strides = [1, 1]} : vector<32x64xf32> to vector<32x55xf32>
    %cst_123 = arith.constant 0.000000e+00 : f32
    %348 = vector.broadcast %cst_123 : f32 to vector<32x9xf32>
    %349 = tpu.concatenate %347, %348 in 1 : vector<32x55xf32>, vector<32x9xf32> -> vector<32x64xf32>
    %cst_124 = arith.constant 0.000000e+00 : f32
    %350 = vector.shape_cast %250 : vector<1x64xi1> to vector<1x64xi1>
    %351 = vector.broadcast %350 : vector<1x64xi1> to vector<32x64xi1>
    %352 = vector.broadcast %cst_124 : f32 to vector<32x64xf32>
    %353 = arith.select %351, %349, %352 : vector<32x64xi1>, vector<32x64xf32>
    %354 = tpu.concatenate %312, %315, %322, %329, %305, %336, %343, %346, %353 in 0 : vector<32x64xf32>, vector<32x64xf32>, vector<32x64xf32>, vector<32x64xf32>, vector<32x64xf32>, vector<32x64xf32>, vector<32x64xf32>, vector<32x64xf32>, vector<32x64xf32> -> vector<288x64xf32>
    %c0_125 = arith.constant 0 : index
    %c0_126 = arith.constant 0 : index
    %355 = vector.load %arg11[%c0_125, %c0_126] : memref<32x288xf32, #tpu.memory_space<vmem>>, vector<32x288xf32>
    %cst_127 = arith.constant dense<0.000000e+00> : vector<32x64xf32>
    %356 = tpu.matmul %355, %354, %cst_127 {dimension_numbers = #tpu.dot_dimension_numbers<[1], [0], [0], [1], [0, 0, 1, 1], [], []>} : vector<32x288xf32>, vector<288x64xf32>, vector<32x64xf32> -> vector<32x64xf32>
    %c0_128 = arith.constant 0 : index
    %c0_129 = arith.constant 0 : index
    %357 = vector.load %arg13[%c0_128, %c0_129] : memref<64x16xbf16, #tpu.memory_space<vmem>>, vector<64x16xbf16>
    %358 = arith.extf %357 : vector<64x16xbf16> to vector<64x16xf32>
    %cst_130 = arith.constant dense<0.000000e+00> : vector<32x16xf32>
    %359 = tpu.matmul %356, %358, %cst_130 {dimension_numbers = #tpu.dot_dimension_numbers<[1], [0], [0], [1], [0, 0, 1, 1], [], []>} : vector<32x64xf32>, vector<64x16xf32>, vector<32x16xf32> -> vector<32x16xf32>
    %c0_131 = arith.constant 0 : index
    %c0_132 = arith.constant 0 : index
    %360 = vector.load %arg12[%c0_131, %c0_132] : memref<32x32xf32, #tpu.memory_space<vmem>>, vector<32x32xf32>
    %cst_133 = arith.constant dense<0.000000e+00> : vector<32x64xf32>
    %361 = tpu.matmul %360, %243, %cst_133 {dimension_numbers = #tpu.dot_dimension_numbers<[1], [0], [0], [1], [0, 0, 1, 1], [], []>} : vector<32x32xf32>, vector<32x64xf32>, vector<32x64xf32> -> vector<32x64xf32>
    %c0_134 = arith.constant 0 : index
    %c0_135 = arith.constant 0 : index
    %362 = vector.load %arg13[%c0_134, %c0_135] : memref<64x16xbf16, #tpu.memory_space<vmem>>, vector<64x16xbf16>
    %363 = arith.extf %362 : vector<64x16xbf16> to vector<64x16xf32>
    %cst_136 = arith.constant dense<0.000000e+00> : vector<32x16xf32>
    %364 = tpu.matmul %361, %363, %cst_136 {dimension_numbers = #tpu.dot_dimension_numbers<[1], [0], [0], [1], [0, 0, 1, 1], [], []>} : vector<32x64xf32>, vector<64x16xf32>, vector<32x16xf32> -> vector<32x16xf32>
    %365 = arith.addf %364, %359 : vector<32x16xf32>
    %cst_137 = arith.constant 0.000000e+00 : f32
    %366 = vector.broadcast %cst_137 : f32 to vector<32x16xf32>
    %367 = arith.maximumf %365, %366 : vector<32x16xf32>
    %cst_138 = arith.constant dense<0.000000e+00> : vector<32xf32>
    %368 = vector.multi_reduction <add>, %367, %cst_138 [1] : vector<32x16xf32> to vector<32xf32>
    %369 = vector.shape_cast %368 : vector<32xf32> to vector<32x1xf32>
    %c0_139 = arith.constant 0 : index
    %c0_140 = arith.constant 0 : index
    %370 = vector.load %arg14[%c0_139, %c0_140] : memref<32x1xf32, #tpu.memory_space<vmem>>, vector<32x1xf32>
    %371 = arith.mulf %369, %370 : vector<32x1xf32>
    %cst_141 = arith.constant dense<0.000000e+00> : vector<1xf32>
    %372 = vector.multi_reduction <add>, %371, %cst_141 [0] : vector<32x1xf32> to vector<1xf32>
    %373 = vector.shape_cast %372 : vector<1xf32> to vector<1x1xf32>
    %c0_142 = arith.constant 0 : index
    %c0_143 = arith.constant 0 : index
    %c0_144 = arith.constant 0 : index
    %374 = vector.load %arg15[%c0_142, %c0_143, %c0_144] : memref<1x1x1xf32, #tpu.memory_space<vmem>>, vector<1x1x1xf32>
    %375 = vector.shape_cast %374 : vector<1x1x1xf32> to vector<1x1xf32>
    %376 = vector.shape_cast %373 : vector<1x1xf32> to vector<1x1x1xf32>
    tpu.vector_store %arg15[%c0_142, %c0_143, %c0_144], %376 {strides = array<i32>} : memref<1x1x1xf32, #tpu.memory_space<vmem>>, vector<1x1x1xf32>,
    return
  }
  func.func @transform_0(%arg0: i32) -> (i32, i32, i32) {
    %c0_i32 = arith.constant 0 : i32
    %c0_i32_0 = arith.constant 0 : i32
    %c0_i32_1 = arith.constant 0 : i32
    return %arg0, %c0_i32, %c0_i32_0 : i32, i32, i32
  }
  func.func @transform_1(%arg0: i32) -> (i32, i32) {
    %c0_i32 = arith.constant 0 : i32
    %c0_i32_0 = arith.constant 0 : i32
    %c0_i32_1 = arith.constant 0 : i32
    return %c0_i32, %c0_i32_0 : i32, i32
  }
  func.func @transform_2(%arg0: i32) -> (i32, i32) {
    %c0_i32 = arith.constant 0 : i32
    %c0_i32_0 = arith.constant 0 : i32
    %c0_i32_1 = arith.constant 0 : i32
    return %c0_i32, %c0_i32_0 : i32, i32
  }
  func.func @transform_3(%arg0: i32) -> (i32, i32) {
    %c0_i32 = arith.constant 0 : i32
    %c0_i32_0 = arith.constant 0 : i32
    %c0_i32_1 = arith.constant 0 : i32
    return %c0_i32, %c0_i32_0 : i32, i32
  }
  func.func @transform_4(%arg0: i32) -> (i32, i32) {
    %c0_i32 = arith.constant 0 : i32
    %c0_i32_0 = arith.constant 0 : i32
    %c0_i32_1 = arith.constant 0 : i32
    return %c0_i32, %c0_i32_0 : i32, i32
  }
  func.func @transform_5(%arg0: i32) -> (i32, i32) {
    %c0_i32 = arith.constant 0 : i32
    %c0_i32_0 = arith.constant 0 : i32
    %c0_i32_1 = arith.constant 0 : i32
    return %c0_i32, %c0_i32_0 : i32, i32
  }
  func.func @transform_6(%arg0: i32) -> (i32, i32) {
    %c0_i32 = arith.constant 0 : i32
    %c0_i32_0 = arith.constant 0 : i32
    %c0_i32_1 = arith.constant 0 : i32
    return %c0_i32, %c0_i32_0 : i32, i32
  }
  func.func @transform_7(%arg0: i32) -> (i32, i32) {
    %c0_i32 = arith.constant 0 : i32
    %c0_i32_0 = arith.constant 0 : i32
    %c0_i32_1 = arith.constant 0 : i32
    return %c0_i32, %c0_i32_0 : i32, i32
  }
  func.func @transform_8(%arg0: i32) -> (i32, i32) {
    %c0_i32 = arith.constant 0 : i32
    %c0_i32_0 = arith.constant 0 : i32
    %c0_i32_1 = arith.constant 0 : i32
    return %c0_i32, %c0_i32_0 : i32, i32
  }
  func.func @transform_9(%arg0: i32) -> (i32, i32) {
    %c0_i32 = arith.constant 0 : i32
    %c0_i32_0 = arith.constant 0 : i32
    %c0_i32_1 = arith.constant 0 : i32
    return %c0_i32, %c0_i32_0 : i32, i32
  }
  func.func @transform_10(%arg0: i32) -> (i32, i32) {
    %c0_i32 = arith.constant 0 : i32
    %c0_i32_0 = arith.constant 0 : i32
    %c0_i32_1 = arith.constant 0 : i32
    return %c0_i32, %c0_i32_0 : i32, i32
  }
  func.func @transform_11(%arg0: i32) -> (i32, i32) {
    %c0_i32 = arith.constant 0 : i32
    %c0_i32_0 = arith.constant 0 : i32
    %c0_i32_1 = arith.constant 0 : i32
    return %c0_i32, %c0_i32_0 : i32, i32
  }
  func.func @transform_12(%arg0: i32) -> (i32, i32) {
    %c0_i32 = arith.constant 0 : i32
    %c0_i32_0 = arith.constant 0 : i32
    %c0_i32_1 = arith.constant 0 : i32
    return %c0_i32, %c0_i32_0 : i32, i32
  }
  func.func @transform_13(%arg0: i32) -> (i32, i32) {
    %c0_i32 = arith.constant 0 : i32
    %c0_i32_0 = arith.constant 0 : i32
    %c0_i32_1 = arith.constant 0 : i32
    return %c0_i32, %c0_i32_0 : i32, i32
  }
  func.func @transform_14(%arg0: i32) -> (i32, i32, i32) {
    %c0_i32 = arith.constant 0 : i32
    %c0_i32_0 = arith.constant 0 : i32
    %c0_i32_1 = arith.constant 0 : i32
    return %arg0, %c0_i32, %c0_i32_0 : i32, i32, i32
  }
}

</mosaic_0001>

<bundles_post_ra>
// kernel: _lambda_.1
= control target key start
LH: loop header
LB: loop body
LE: loop exit
PB: predicated region body
PF: predicated region fallthrough
CT: control target
= control target key end

     0   :  { %19 = vsyncpa [#allocation3], 0  ;;  %s11592_s0 = inlined_call_operand.vmem [shape: f32[2,4,1024], index: 0, kind: input, shape index: {}]   ;;  %s11593_s1 = inlined_call_operand.hbm [shape: f32[16,36], index: 1, kind: input, shape index: {}]   ;;  %s11594_s2 = inlined_call_operand.hbm [shape: f32[16,144], index: 2, kind: input, shape index: {}]   ;;  %s11595_s3 = inlined_call_operand.hbm [shape: f32[16,4], index: 3, kind: input, shape index: {}]   ;;  %s11596_s4 = inlined_call_operand.hbm [shape: bf16[1024,256], index: 4, kind: input, shape index: {}]   ;;  %s11597_s5 = inlined_call_operand.hbm [shape: f32[32,144], index: 5, kind: input, shape index: {}]   ;;  %s11598_s6 = inlined_call_operand.hbm [shape: f32[32,288], index: 6, kind: input, shape index: {}]   ;;  %s11599_s7 = inlined_call_operand.hbm [shape: f32[32,16], index: 7, kind: input, shape index: {}]   ;;  %s11600_s8 = inlined_call_operand.vmem [shape: bf16[256,64], index: 8, kind: input, shape index: {}]   ;;  %s11601_s9 = inlined_call_operand.vmem [shape: f32[32,288], index: 9, kind: input, shape index: {}]   ;;  %s11602_s10 = inlined_call_operand.vmem [shape: f32[32,288], index: 10, kind: input, shape index: {}]   ;;  %s11603_s11 = inlined_call_operand.hbm [shape: f32[32,32], index: 11, kind: input, shape index: {}]   ;;  %s11604_s12 = inlined_call_operand.hbm [shape: bf16[64,16], index: 12, kind: input, shape index: {}]   ;;  %s11605_s13 = inlined_call_operand.hbm [shape: f32[32,1], index: 13, kind: input, shape index: {}]   ;;  %s11606_s14 = inlined_call_operand.vmem [shape: f32[2,1,1], index: 14, kind: output, shape index: {}]  }
   0x1   :  { %20 = vsyncpa [#allocation5], 0 }
   0x2   :  { %21 = vsyncpa [#allocation8], 0 }
   0x3   :  { %22 = vsyncpa [#allocation11], 0 }
   0x4   :  { %23 = vsyncpa [#allocation14], 0 }
   0x5   :  { %24 = vsyncpa [#allocation17], 0  ;;  %s7153_s29 = smov 0  }
   0x6 LB: > { %s7039_s30 = smov [#allocation4]   ;;  %s7159_s16 = sadd.s32 4294967295, %s7037_s29   ;;  %s7037_s29 = sphi %s7153_s29, %s30_s29  }
   0x7   : > { %s385_s15 = sshll.u32 %s7039_s30, 4  ;;  %p5841_p0 = scmp.ge.s32.totalorder %s7037_s29, 1  ;;  %s386_s15 = int_to_ptr.vmem [resolvable:$true] %s385_s15 }
   0x8   : > { %p360_p1 = scmp.lt.s32.totalorder %s7037_s29, 3  ;;  %p6672_p2 = scmp.eq.s32.totalorder %s7159_s16, 0 }
   0x9   : > { %s7040_s19 = smov [#allocation7]   ;;  %s7041_s21 = smov [#allocation10]  }
   0xa   : > { %p7164_p3 = pnand %p5841_p0, %p360_p1  ;;  %s411_s20 = sshll.u32 %s7040_s19, 4  ;;  %s7176_s20 = int_to_ptr.vmem [resolvable:$true] %s411_s20 }
   0xb   : > { %s437_s22 = sshll.u32 %s7041_s21, 4  ;;  %s6758_s24 = scalar_lea.vmem %s386_s15, 512  ;;  %s7178_s22 = int_to_ptr.vmem [resolvable:$true] %s437_s22 }
   0xc   : > { %p6641_p4 = pneg %p7164_p3  ;;  %p6759_p7 = scmp.ne.s32.totalorder %s386_s15, %s6758_s24 }
   0xd   : > { %p6766_p10 = scmp.lt.s32.totalorder %s386_s15, %s386_s15  ;;  %p6767_p11 = scmp.lt.s32.totalorder %s6758_s24, %s6758_s24 }
   0xe   : > { %p7172_p5 = pnand %p6672_p2, %p6641_p4 }
   0xf   : > { %p6768_p12 = por %p6767_p11, %p6766_p10 }
  0x10   : > { %p7182_p6 = pneg %p7172_p5 }
  0x12   : > { %p6761_p8 = pnand %p6759_p7, %p7182_p6 }
  0x14   : > { %p6762_p9 = pneg %p6761_p8 }
  0x16   : > { %p6769_p13 = pnand %p6768_p12, %p6762_p9 }
  0x18   : > { %6772 = shalt.err (!%p6769_p13)
}
  0x19   : > { %s11607_s25 = smov 256   ;;  %s11608_s26 = smov 16  }
  0x1a   : > { %6647 = dma.hbm_to_vmem [thread:$0]  (!%p7172_p5), %s11594_s2, 512, %s386_s15, [#allocation5], %s11607_s25, %s11607_s25, %s11608_s26  }
  0x1b   : > { %s6784_s30 = scalar_lea.vmem %s7176_s20, 16384  ;;  %p6792_p7 = scmp.lt.s32.totalorder %s7176_s20, %s7176_s20 }
  0x1c   : > { %p6785_p0 = scmp.ne.s32.totalorder %s7176_s20, %s6784_s30  ;;  %p6793_p8 = scmp.lt.s32.totalorder %s6784_s30, %s6784_s30 }
  0x1e   : > { %p6787_p1 = pnand %p6785_p0, %p7182_p6  ;;  %p6794_p9 = por %p6793_p8, %p6792_p7 }
  0x20   : > { %p6788_p4 = pneg %p6787_p1 }
  0x22   : > { %p6795_p10 = pnand %p6794_p9, %p6788_p4 }
  0x24   : > { %6798 = shalt.err (!%p6795_p10)
}
  0x25   : > { %s11609_s19 = smov 128   ;;  %s11611_s21 = smov 8  }
  0x26   : > { %6653 = dma.hbm_to_vmem [thread:$0]  (!%p7172_p5), %s11596_s4, 16384, %s7176_s20, [#allocation8], %s11609_s19, %s11609_s19, %s11611_s21  }
  0x27   : > { %s6810_s27 = scalar_lea.vmem %s7178_s22, 1536  ;;  %p6818_p0 = scmp.lt.s32.totalorder %s7178_s22, %s7178_s22 }
  0x28   : > { %p6811_p11 = scmp.ne.s32.totalorder %s7178_s22, %s6810_s27  ;;  %p6819_p1 = scmp.lt.s32.totalorder %s6810_s27, %s6810_s27 }
  0x2a   : > { %p6813_p12 = pnand %p6811_p11, %p7182_p6  ;;  %p6820_p4 = por %p6819_p1, %p6818_p0 }
  0x2c   : > { %p6814_p13 = pneg %p6813_p12 }
  0x2e   : > { %p6821_p7 = pnand %p6820_p4, %p6814_p13 }
  0x30   : > { %6824 = shalt.err (!%p6821_p7)
}
  0x31   : > { %s7046_s28 = smov 384   ;;  %s7047_s30 = smov 24  }
  0x32   : > { %6659 = dma.hbm_to_vmem [thread:$0]  (!%p7172_p5), %s11598_s6, 1536, %s7178_s22, [#allocation11], %s7046_s28, %s7046_s28, %s7047_s30  }
  0x33   : > { %s7048_s20 = smov [#allocation13]   ;;  %s7049_s26 = smov [#allocation2]  }
  0x34   : > { %s472_s24 = sshll.u32 %s7048_s20, 4  ;;  %s372_s19 = sshll.u32 %s7049_s26, 4  ;;  %s473_s24 = int_to_ptr.vmem [resolvable:$true] %s472_s24  ;;  %s373_s19 = int_to_ptr.vmem [resolvable:$true] %s372_s19 }
  0x35   : > { %s6836_s27 = scalar_lea.vmem %s473_s24, 512  ;;  %p6844_p11 = scmp.lt.s32.totalorder %s473_s24, %s473_s24 }
  0x36   : > { %p6837_p8 = scmp.ne.s32.totalorder %s473_s24, %s6836_s27  ;;  %p6845_p12 = scmp.lt.s32.totalorder %s6836_s27, %s6836_s27 }
  0x38   : > { %p6839_p9 = pnand %p6837_p8, %p7182_p6  ;;  %p6846_p13 = por %p6845_p12, %p6844_p11 }
  0x3a   : > { %p6840_p10 = pneg %p6839_p9 }
  0x3c   : > { %p6847_p0 = pnand %p6846_p13, %p6840_p10 }
  0x3e   : > { %6850 = shalt.err (!%p6847_p0)
}
  0x3f   : > { %s12019_s22 = smov 128   ;;  %s6862_s26 = scalar_lea.vmem %s373_s19, 256 }
  0x40   : > { %6665 = dma.hbm_to_vmem [thread:$0]  (!%p7172_p5), %s11603_s11, 512, %s473_s24, [#allocation14], %s12019_s22, %s12019_s22, %s11611_s21  }
  0x41   : > { %p6863_p1 = scmp.ne.s32.totalorder %s373_s19, %s6862_s26  ;;  %p6870_p8 = scmp.lt.s32.totalorder %s373_s19, %s373_s19 }
  0x42   : > { %p6871_p9 = scmp.lt.s32.totalorder %s6862_s26, %s6862_s26 }
  0x43   : > { %p6865_p4 = pnand %p6863_p1, %p7182_p6 }
  0x44   : > { %p6872_p11 = por %p6871_p9, %p6870_p8 }
  0x45   : > { %p6866_p7 = pneg %p6865_p4 }
  0x47   : > { %p6873_p10 = pnand %p6872_p11, %p6866_p7 }
  0x49   : > { %6876 = shalt.err (!%p6873_p10)
}
  0x4a   : > { %6644 = dma.hbm_to_vmem [thread:$0]  (!%p7172_p5), %s11593_s1, 256, %s373_s19, [#allocation3], %s12019_s22, %s12019_s22, %s11611_s21  }
  0x4b   : > { %s7050_s20 = smov [#allocation6]   ;;  %s7051_s27 = smov [#allocation9]  }
  0x4c   : > { %s398_s24 = sshll.u32 %s7050_s20, 4  ;;  %s424_s25 = sshll.u32 %s7051_s27, 4  ;;  %s399_s24 = int_to_ptr.vmem [resolvable:$true] %s398_s24  ;;  %s425_s25 = int_to_ptr.vmem [resolvable:$true] %s424_s25 }
  0x4d   : > { %s6888_s28 = scalar_lea.vmem %s399_s24, 256  ;;  %p6896_p1 = scmp.lt.s32.totalorder %s399_s24, %s399_s24 }
  0x4e   : > { %p6889_p12 = scmp.ne.s32.totalorder %s399_s24, %s6888_s28  ;;  %p6897_p4 = scmp.lt.s32.totalorder %s6888_s28, %s6888_s28 }
  0x50   : > { %p6891_p13 = pnand %p6889_p12, %p7182_p6  ;;  %p6898_p7 = por %p6897_p4, %p6896_p1 }
  0x52   : > { %p6892_p0 = pneg %p6891_p13 }
  0x54   : > { %p6899_p8 = pnand %p6898_p7, %p6892_p0 }
  0x56   : > { %6902 = shalt.err (!%p6899_p8)
}
  0x57   : > { %6650 = dma.hbm_to_vmem [thread:$0]  (!%p7172_p5), %s11595_s3, 256, %s399_s24, [#allocation5], %s12019_s22, %s12019_s22, %s11611_s21  }
  0x58   : > { %s6914_s30 = scalar_lea.vmem %s425_s25, 1024  ;;  %p6922_p12 = scmp.lt.s32.totalorder %s425_s25, %s425_s25 }
  0x59   : > { %p6915_p9 = scmp.ne.s32.totalorder %s425_s25, %s6914_s30  ;;  %p6923_p13 = scmp.lt.s32.totalorder %s6914_s30, %s6914_s30 }
  0x5b   : > { %p6917_p11 = pnand %p6915_p9, %p7182_p6  ;;  %p6924_p1 = por %p6923_p13, %p6922_p12 }
  0x5d   : > { %p6918_p10 = pneg %p6917_p11 }
  0x5f   : > { %p6925_p0 = pnand %p6924_p1, %p6918_p10 }
  0x61   : > { %6928 = shalt.err (!%p6925_p0)
}
  0x62   : > { %s12020_s15 = smov 16   ;;  %s12021_s20 = smov 256  }
  0x63   : > { %6656 = dma.hbm_to_vmem [thread:$0]  (!%p7172_p5), %s11597_s5, 1024, %s425_s25, [#allocation8], %s12021_s20, %s12021_s20, %s12020_s15  }
  0x64   : > { %s7052_s24 = smov [#allocation12]   ;;  %s7053_s26 = smov [#allocation15]  }
  0x65   : > { %s450_s19 = sshll.u32 %s7052_s24, 4  ;;  %s485_s21 = sshll.u32 %s7053_s26, 4  ;;  %s451_s19 = int_to_ptr.vmem [resolvable:$true] %s450_s19  ;;  %s486_s21 = int_to_ptr.vmem [resolvable:$true] %s485_s21 }
  0x66   : > { %s6940_s30 = scalar_lea.vmem %s451_s19, 512  ;;  %p6948_p9 = scmp.lt.s32.totalorder %s451_s19, %s451_s19 }
  0x67   : > { %p6941_p4 = scmp.ne.s32.totalorder %s451_s19, %s6940_s30  ;;  %p6949_p11 = scmp.lt.s32.totalorder %s6940_s30, %s6940_s30 }
  0x69   : > { %p6943_p7 = pnand %p6941_p4, %p7182_p6  ;;  %p6950_p10 = por %p6949_p11, %p6948_p9 }
  0x6b   : > { %p6944_p8 = pneg %p6943_p7 }
  0x6d   : > { %p6951_p12 = pnand %p6950_p10, %p6944_p8 }
  0x6f   : > { %6954 = shalt.err (!%p6951_p12)
}
  0x70   : > { %s12022_s27 = smov 8   ;;  %s6966_s20 = scalar_lea.vmem %s486_s21, 512 }
  0x71   : > { %6662 = dma.hbm_to_vmem [thread:$0]  (!%p7172_p5), %s11599_s7, 512, %s451_s19, [#allocation11], %s12019_s22, %s12019_s22, %s12022_s27  }
  0x72   : > { %p6967_p13 = scmp.ne.s32.totalorder %s486_s21, %s6966_s20  ;;  %p6974_p4 = scmp.lt.s32.totalorder %s486_s21, %s486_s21 }
  0x73   : > { %p6975_p7 = scmp.lt.s32.totalorder %s6966_s20, %s6966_s20 }
  0x74   : > { %p6969_p1 = pnand %p6967_p13, %p7182_p6 }
  0x75   : > { %p6976_p9 = por %p6975_p7, %p6974_p4 }
  0x76   : > { %p6970_p0 = pneg %p6969_p1 }
  0x78   : > { %p6977_p8 = pnand %p6976_p9, %p6970_p0 }
  0x7a   : > { %6980 = shalt.err (!%p6977_p8)
}
  0x7b   : > { %s7054_s28 = smov 64   ;;  %s7055_s24 = smov 4  }
  0x7c   : > { %6668 = dma.hbm_to_vmem [thread:$0]  (!%p7172_p5), %s11604_s12, 512, %s486_s21, [#allocation14], %s7054_s28, %s7054_s28, %s7055_s24  }
  0x7d   : > { %s7056_s19 = smov [#allocation16]  }
  0x7e   : > { %s498_s25 = sshll.u32 %s7056_s19, 4  ;;  %s499_s25 = int_to_ptr.vmem [resolvable:$true] %s498_s25 }
  0x7f   : > { %s6992_s15 = scalar_lea.vmem %s499_s25, 512  ;;  %p7000_p13 = scmp.lt.s32.totalorder %s499_s25, %s499_s25 }
  0x80   : > { %p6993_p11 = scmp.ne.s32.totalorder %s499_s25, %s6992_s15  ;;  %p7001_p1 = scmp.lt.s32.totalorder %s6992_s15, %s6992_s15 }
  0x82   : > { %p6995_p10 = pnand %p6993_p11, %p7182_p6  ;;  %p7002_p0 = por %p7001_p1, %p7000_p13 }
  0x84   : > { %p6996_p12 = pneg %p6995_p10 }
  0x86   : > { %p7003_p4 = pnand %p7002_p0, %p6996_p12 }
  0x88   : > { %7006 = shalt.err (!%p7003_p4)
}
  0x89   : > { %6671 = dma.hbm_to_vmem [thread:$0]  (!%p7172_p5), %s11605_s13, 512, %s499_s25, [#allocation17], %s12019_s22, %s12019_s22, %s12022_s27  }
  0x8a   : > { %522 = sbr.rel (%p7164_p3) target bundleno = 4008 (0xfa8), region = 76 }
  0x8f   : > { %7012 = dma.done.wait (%p6672_p2), [#allocation3], 256  }
  0x90   : > { %7014 = vsyncadd (%p6672_p2), [#allocation3], 4294967040 }
  0x91   : > { %7016 = dma.done.wait (%p6672_p2), [#allocation5], 768  }
  0x92   : > { %7018 = vsyncadd (%p6672_p2), [#allocation5], 4294966528 }
  0x93   : > { %7020 = dma.done.wait (%p6672_p2), [#allocation8], 17408  }
  0x94   : > { %7022 = vsyncadd (%p6672_p2), [#allocation8], 4294949888 }
  0x95   : > { %7024 = dma.done.wait (%p6672_p2), [#allocation11], 2048  }
  0x96   : > { %7026 = vsyncadd (%p6672_p2), [#allocation11], 4294965248 }
  0x97   : > { %7028 = dma.done.wait (%p6672_p2), [#allocation14], 1024  }
  0x98   : > { %7030 = vsyncadd (%p6672_p2), [#allocation14], 4294966272 }
  0x99   : > { %7032 = dma.done.wait (%p6672_p2), [#allocation17], 512  }
  0x9a   : > { %7034 = vsyncadd (%p6672_p2), [#allocation17], 4294966784  ;;  %p602_p3 = scmp.lt.s32.totalorder %s7159_s16, 1  ;;  %s7057_s27 = smov 95   ;;  %v11635_v5 = vmov 0.0   ;;  %v614_v9 = vlaneseq  ;;  %vm11617_vm0 = vcmask 777216  }
  0x9b   : > { %s7058_s28 = smov 96   ;;  %s7059_s24 = smov 127   ;;  %1201 = vmatprep.mubr.f32.mxu0 %v11635_v5  ;;  %1278 = vmatprep.mubr.f32.mxu1 %v11635_v5  ;;  %vm11621_vm2 = vcmask 1043456   ;;  %vm11620_vm3 = vcmask 793600   ;;  %vm11618_vm4 = vcmask 785408   ;;  %vm11619_vm5 = vcmask 1039360  }
  0x9c   : > { %s12896_s16 = smov (!%p602_p3, %s7159_s16), 1  ;;  %s7060_s26 = smov 97   ;;  %v7468_v10 = vand.u32 127, %v614_v9  ;;  %vm11624_vm9 = vcmask 7168   ;;  %vm11616_vm10 = vcmask 252928   ;;  %vm11615_vm11 = vcmask 261120  }
  0x9d   : > { %s6192_s17 = sshll.u32 %s12896_s16, 5  ;;  %s7061_s30 = smov 1   ;;  %vm11614_vm12 = vcmask 269312   ;;  %vm11613_vm13 = vcmask 293888   ;;  %v8428_v38 = vld [vmem:[#allocation4] sm:$0xff] }
  0x9e   : > { %s7324_s22 = scalar_lea.vmem %s11592_s0, %s6192_s17  ;;  %s7062_s19 = smov 31   ;;  %12027 = vst [vmem:[#allocation28_spill] sm:$0xff] %v7468_v10  ;;  %v7475_v11 = vadd.s32 128, %v7468_v10  ;;  %v623_v22 = vand.u32 31, %v7468_v10 }
  0x9f   : > { %v7327_v0 = vld [vmem:[%s7324_s22 + $0x8] sm:$0xff]  ;;  %v7330_v1 = vld [vmem:[%s7324_s22] sm:$0xff]  ;;  %s7063_s25 = smov 32   ;;  %s7064_s15 = smov 33   ;;  %v7381_v4 = vld [vmem:[%s7324_s22 + $0x10] sm:$0xff] }
  0xa0   : > { %948 = vrot.lane.b32.xlu1 %v7327_v0, %s7057_s27  ;;  %922 = vrot.lane.b32.xlu0 %v7327_v0, %s7058_s28  ;;  %v7338_v2 = vcombine.high %v7330_v1, %v7330_v1  ;;  %v7378_v3 = vcombine.high %v7327_v0, %v7327_v0  ;;  %v7403_v6 = vcombine.high %v7381_v4, %v7381_v4  ;;  %v7406_v7 = vld [vmem:[%s7324_s22 + $0x18] sm:$0xff]  ;;  %v624_v14 = vand.u32 31, %v7475_v11  ;;  %s7066_s20 = smov 113   ;;  %s7067_s21 = smov 112  }
  0xa1   : > { %v7458_v8 = vcombine.high %v7406_v7, %v7406_v7  ;;  %12028 = vst [vmem:[#allocation29_spill] sm:$0xff] %v7475_v11  ;;  %vm7518_vm7 = vcmp.le.s32.totalorder %v623_v22, 30  ;;  %vm7531_vm8 = vcmp.ge.s32.totalorder %v623_v22, 1  ;;  %v618_v22 = vadd.s32 384, %v7468_v10  ;;  %s7068_s17 = smov 15   ;;  %s7069_s18 = smov 16  }
  0xa2   : > { %12023 = vst [vmem:[#allocation24_spill] sm:$0xff] %v7338_v2  ;;  %12024 = vst [vmem:[#allocation25_spill] sm:$0xff] %v7378_v3  ;;  %vm7492_vm1 = vcmp.le.s32.totalorder %v624_v14, 30  ;;  %vm7510_vm6 = vcmp.ge.s32.totalorder %v624_v14, 1  ;;  %s7070_s23 = smov 17  }
  0xa3   : > { %12025 = vst [vmem:[#allocation26_spill] sm:$0xff] %v7403_v6  ;;  %12026 = vst [vmem:[#allocation27_spill] sm:$0xff] %v7458_v8 }
  0xa4   : > { %840 = vrot.lane.b32.xlu1 %v7327_v0, %s7059_s24  ;;  %920 = vrot.lane.b32.xlu0 %v7338_v2, %s7058_s28 }
  0xa8   : > { %946 = vrot.lane.b32.xlu1 %v7338_v2, %s7057_s27  ;;  %838 = vrot.lane.b32.xlu0 %v7338_v2, %s7059_s24 }
  0xac   : > { %881 = vrot.lane.b32.xlu1 %v7327_v0, %s7060_s26  ;;  %879 = vrot.lane.b32.xlu0 %v7338_v2, %s7060_s26 }
  0xb0   : > { %944 = vrot.lane.b32.xlu1 %v7330_v1, %s7057_s27  ;;  %918 = vrot.lane.b32.xlu0 %v7330_v1, %s7058_s28 }
  0xb4   : > { %877 = vrot.lane.b32.xlu1 %v7330_v1, %s7060_s26  ;;  %836 = vrot.lane.b32.xlu0 %v7330_v1, %s7059_s24 }
  0xb8   : > { %797 = vrot.lane.b32.xlu1 %v7338_v2, %s7061_s30  ;;  %795 = vrot.lane.b32.xlu0 %v7330_v1, %s7061_s30 }
  0xbc   : > { %740 = vrot.lane.b32.xlu1 %v7338_v2, %s7062_s19  ;;  %738 = vrot.lane.b32.xlu0 %v7330_v1, %s7062_s19 }
  0xc0   : > { %714 = vrot.lane.b32.xlu1 %v7338_v2, %s7063_s25  ;;  %712 = vrot.lane.b32.xlu0 %v7330_v1, %s7063_s25 }
  0xc4   : > { %657 = vrot.lane.b32.xlu1 %v7338_v2, %s7064_s15  ;;  %655 = vrot.lane.b32.xlu0 %v7330_v1, %s7064_s15 }
  0xc8   : > { %926 = vrot.lane.b32.xlu1 %v7381_v4, %s7058_s28  ;;  %924 = vrot.lane.b32.xlu0 %v7378_v3, %s7058_s28 }
  0xcc   : > { %952 = vrot.lane.b32.xlu1 %v7381_v4, %s7057_s27  ;;  %950 = vrot.lane.b32.xlu0 %v7378_v3, %s7057_s27 }
  0xd0   : > { %844 = vrot.lane.b32.xlu1 %v7381_v4, %s7059_s24  ;;  %842 = vrot.lane.b32.xlu0 %v7378_v3, %s7059_s24 }
  0xd4   : > { %885 = vrot.lane.b32.xlu1 %v7381_v4, %s7060_s26  ;;  %883 = vrot.lane.b32.xlu0 %v7378_v3, %s7060_s26 }
  0xd8   : > { %930 = vrot.lane.b32.xlu1 %v7406_v7, %s7058_s28  ;;  %928 = vrot.lane.b32.xlu0 %v7403_v6, %s7058_s28 }
  0xdc   : > { %956 = vrot.lane.b32.xlu1 %v7406_v7, %s7057_s27  ;;  %954 = vrot.lane.b32.xlu0 %v7403_v6, %s7057_s27 }
  0xe0   : > { %801 = vrot.lane.b32.xlu1 %v7378_v3, %s7061_s30  ;;  %799 = vrot.lane.b32.xlu0 %v7327_v0, %s7061_s30 }
  0xe4   : > { %848 = vrot.lane.b32.xlu1 %v7406_v7, %s7059_s24  ;;  %846 = vrot.lane.b32.xlu0 %v7403_v6, %s7059_s24 }
  0xe8   : > { %889 = vrot.lane.b32.xlu1 %v7406_v7, %s7060_s26  ;;  %887 = vrot.lane.b32.xlu0 %v7403_v6, %s7060_s26 }
  0xec   : > { %744 = vrot.lane.b32.xlu1 %v7378_v3, %s7062_s19  ;;  %742 = vrot.lane.b32.xlu0 %v7327_v0, %s7062_s19 }
  0xf0   : > { %805 = vrot.lane.b32.xlu1 %v7403_v6, %s7061_s30  ;;  %803 = vrot.lane.b32.xlu0 %v7381_v4, %s7061_s30 }
  0xf4   : > { %718 = vrot.lane.b32.xlu1 %v7378_v3, %s7063_s25  ;;  %716 = vrot.lane.b32.xlu0 %v7327_v0, %s7063_s25 }
  0xf8   : > { %661 = vrot.lane.b32.xlu1 %v7378_v3, %s7064_s15  ;;  %659 = vrot.lane.b32.xlu0 %v7327_v0, %s7064_s15 }
  0xfc   : > { %748 = vrot.lane.b32.xlu1 %v7403_v6, %s7062_s19  ;;  %746 = vrot.lane.b32.xlu0 %v7381_v4, %s7062_s19 }
 0x100   : > { %722 = vrot.lane.b32.xlu1 %v7403_v6, %s7063_s25  ;;  %720 = vrot.lane.b32.xlu0 %v7381_v4, %s7063_s25 }
 0x104   : > { %665 = vrot.lane.b32.xlu1 %v7403_v6, %s7064_s15  ;;  %663 = vrot.lane.b32.xlu0 %v7381_v4, %s7064_s15 }
 0x108   : > { %958 = vrot.lane.b32.xlu1 %v7458_v8, %s7057_s27  ;;  %932 = vrot.lane.b32.xlu0 %v7458_v8, %s7058_s28 }
 0x10c   : > { %891 = vrot.lane.b32.xlu1 %v7458_v8, %s7060_s26  ;;  %850 = vrot.lane.b32.xlu0 %v7458_v8, %s7059_s24 }
 0x110   : > { %809 = vrot.lane.b32.xlu1 %v7458_v8, %s7061_s30  ;;  %807 = vrot.lane.b32.xlu0 %v7406_v7, %s7061_s30 }
 0x112   : > { %v7477_v12 = vpop.permute.xlu1 %948  ;;  %v7479_v13 = vpop.permute.xlu0 %922 }
 0x114   : > { %752 = vrot.lane.b32.xlu1 %v7458_v8, %s7062_s19  ;;  %750 = vrot.lane.b32.xlu0 %v7406_v7, %s7062_s19 }
 0x116   : > { %v7486_v15 = vpop.permute.xlu1 %840  ;;  %v921_v16 = vpop.permute.xlu0 %920 }
 0x117   : > { %v936_v27 = vsel %vm11618_vm4, %v921_v16, %v7479_v13 }
 0x118   : > { %726 = vrot.lane.b32.xlu1 %v7458_v8, %s7063_s25  ;;  %724 = vrot.lane.b32.xlu0 %v7406_v7, %s7063_s25  ;;  %v1056_v33 = vrot.slane %v936_v27, 4 }
 0x11a   : > { %v947_v18 = vpop.permute.xlu1 %946  ;;  %v839_v19 = vpop.permute.xlu0 %838 }
 0x11b   : > { %v962_v20 = vsel %vm11617_vm0, %v947_v18, %v7477_v12  ;;  %v854_v28 = vsel %vm11619_vm5, %v839_v19, %v7486_v15 }
 0x11c   : > { %v978_v21 = vsel %vm7492_vm1, %v962_v20, 0.0  ;;  %669 = vrot.lane.b32.xlu1 %v7458_v8, %s7064_s15  ;;  %667 = vrot.lane.b32.xlu0 %v7406_v7, %s7064_s15  ;;  %v870_v34 = vsel %vm7492_vm1, %v854_v28, 0.0 }
 0x11d   : > { %5866 = vmatprep.subr.msk.mxu0 %vm11621_vm2, %v978_v21  ;;  %v1039_v40 = vrot.slane %v870_v34, 4 }
 0x11e   : > { %v7506_v23 = vpop.permute.xlu1 %881  ;;  %v880_v24 = vpop.permute.xlu0 %879 }
 0x11f   : > { %v895_v25 = vsel %vm11620_vm3, %v880_v24, %v7506_v23  ;;  %v1089_v52 = vsel %vm11621_vm2, %v7338_v2, %v1039_v40  ;;  %v7585_v40 = vld [vmem:[#allocation2] sm:$0xff] }
 0x120   : > { %v911_v32 = vsel %vm7510_vm6, %v895_v25, 0.0 }
 0x121   : > { %v1097_v39 = vsel %vm11621_vm2, %v911_v32, %v1056_v33 }
 0x122   : > { %v945_v30 = vpop.permute.xlu1 %944  ;;  %v919_v31 = vpop.permute.xlu0 %918 }
 0x123   : > { %v961_v35 = vsel %vm11617_vm0, %v945_v30, %v947_v18  ;;  %v935_v36 = vsel %vm11618_vm4, %v919_v31, %v921_v16 }
 0x124   : > { %v977_v37 = vsel %vm7518_vm7, %v961_v35, 0.0  ;;  %v1055_v43 = vrot.slane %v935_v36, 4  ;;  %v626_v35 = vand.u32 31, %v618_v22 }
 0x125   : > { %5867 = vmatpush1.msk.msra.mxu0 %vm11621_vm2, %v977_v37 }
 0x126   : > { %v878_v41 = vpop.permute.xlu1 %877  ;;  %1161 = vmatprep.subr.mxu0 %v1097_v39  ;;  %v837_v42 = vpop.permute.xlu0 %836  ;;  %vm7591_vm14 = vcmp.le.s32.totalorder %v626_v35, 30 }
 0x127   : > { %v894_v44 = vsel %vm11620_vm3, %v878_v41, %v880_v24  ;;  %v853_v45 = vsel %vm11619_vm5, %v837_v42, %v839_v19  ;;  %v617_v24 = vadd.s32 256, %v7468_v10 }
 0x128   : > { %v910_v46 = vsel %vm7531_vm8, %v894_v44, 0.0  ;;  %v869_v47 = vsel %vm7518_vm7, %v853_v45, 0.0  ;;  %v12040_v44 = vmov 0 }
 0x129   : > { %v1038_v48 = vrot.slane %v869_v47, 4  ;;  %v1096_v49 = vsel %vm11621_vm2, %v910_v46, %v1055_v43  ;;  %v625_v39 = vand.u32 31, %v617_v24  ;;  %v12037_v43 = vmov 0 }
 0x12a   : > { %v7543_v50 = vpop.permute.xlu1 %797  ;;  %1162 = vmatpush1.msra.mxu0 %v1096_v49  ;;  %v796_v51 = vpop.permute.xlu0 %795  ;;  %v12038_v43 = vsel %vm7591_vm14, 4294967295, %v12037_v43  ;;  %v7603_v49 = vld [vmem:[#allocation2 + $0x8] sm:$0xff] }
 0x12b   : > { %v812_v53 = vsel %vm11624_vm9, %v796_v51, %v7543_v50  ;;  %v827_v54 = vsel %vm11624_vm9, 0.0, %v796_v51  ;;  %1163 = vmatprep.subr.mxu0 %v1089_v52  ;;  %v1088_v55 = vsel %vm11621_vm2, %v7330_v1, %v1038_v48  ;;  %12039 = vst [vmem:[#allocation30_spill] sm:$0xff] %v12038_v43  ;;  %vm7595_vm15 = vcmp.le.s32.totalorder %v625_v39, 30 }
 0x12c   : > { %v828_v56 = vsel %vm7531_vm8, %v827_v54, 0.0  ;;  %v829_v57 = vsel %vm7510_vm6, %v812_v53, 0.0  ;;  %1164 = vmatpush1.msra.mxu0 %v1088_v55  ;;  %v12041_v44 = vsel %vm7595_vm15, 4294967295, %v12040_v44 }
 0x12d   : > { %v1010_v60 = vrot.slane %v828_v56, 4  ;;  %v1011_v61 = vrot.slane %v829_v57, 4  ;;  %12042 = vst [vmem:[#allocation31_spill] sm:$0xff] %v12041_v44 }
 0x12e   : > { %v7556_v58 = vpop.permute.xlu1 %740  ;;  %v739_v59 = vpop.permute.xlu0 %738 }
 0x12f   : > { %v755_v62 = vsel %vm11616_vm10, %v739_v59, %v7556_v58  ;;  %v770_v63 = vsel %vm11616_vm10, 0.0, %v739_v59 }
 0x130   : > { %v788_v1 = vsel %vm7492_vm1, %v755_v62, 0.0  ;;  %v787_v9 = vsel %vm7518_vm7, %v770_v63, 0.0  ;;  %v620_v62 = vadd.s32 640, %v7468_v10 }
 0x131   : > { %v1081_v14 = vsel %vm11621_vm2, %v788_v1, %v1011_v61  ;;  %v1080_v16 = vsel %vm11621_vm2, %v787_v9, %v1010_v60 }
 0x132   : > { %v7567_v18 = vpop.permute.xlu1 %714  ;;  %1165 = vmatprep.subr.mxu0 %v1081_v14  ;;  %v713_v19 = vpop.permute.xlu0 %712 }
 0x133   : > { %1166 = vmatpush1.msra.mxu0 %v1080_v16  ;;  %v729_v20 = vsel %vm11615_vm11, %v713_v19, %v7567_v18  ;;  %v737_v21 = vsel %vm11615_vm11, 0.0, %v713_v19 }
 0x134   : > { %v986_v28 = vrot.slane %v737_v21, 4  ;;  %v987_v30 = vrot.slane %v729_v20, 4 }
 0x136   : > { %v7574_v25 = vpop.permute.xlu1 %657  ;;  %v656_v27 = vpop.permute.xlu0 %655 }
 0x137   : > { %v672_v31 = vsel %vm11614_vm12, %v656_v27, %v7574_v25  ;;  %v687_v32 = vsel %vm11614_vm12, 0.0, %v656_v27  ;;  %vm7629_vm12 = vcmp.ge.s32.totalorder %v625_v39, 1 }
 0x138   : > { %v705_v33 = vsel %vm7510_vm6, %v672_v31, 0.0  ;;  %v704_v34 = vsel %vm7531_vm8, %v687_v32, 0.0  ;;  %v628_v31 = vand.u32 31, %v620_v62 }
 0x139   : > { %v1073_v36 = vsel %vm11621_vm2, %v705_v33, %v987_v30  ;;  %v1072_v37 = vsel %vm11621_vm2, %v704_v34, %v986_v28 }
 0x13a   : > { %v7587_v41 = vpop.permute.xlu1 %926  ;;  %1167 = vmatprep.subr.mxu0 %v1073_v36  ;;  %v925_v42 = vpop.permute.xlu0 %924  ;;  %vm7654_vm10 = vcmp.le.s32.totalorder %v628_v31, 30  ;;  %v12051_v36 = vmov 0 }
 0x13b   : > { %1168 = vmatpush1.msra.mxu0 %v1072_v37  ;;  %v938_v57 = vsel %vm11618_vm4, %v925_v42, %v7587_v41  ;;  %v12052_v36 = vsel %vm7654_vm10, 4294967295, %v12051_v36 }
 0x13c   : > { %5868 = vmatmul.mubr.msk.f32.vlgmr.msra.gmra.mxu0 %vm11613_vm13, %v7585_v40  ;;  %v1058_v14 = vrot.slane %v938_v57, 4  ;;  %12053 = vst [vmem:[#allocation34_spill] sm:$0xff] %v12052_v36 }
 0x13d   : > { %1207 = vmatprep.mubr.f32.mxu0 %v11635_v5 }
 0x13e   : > { %v953_v45 = vpop.permute.xlu1 %952  ;;  %v951_v46 = vpop.permute.xlu0 %950 }
 0x13f   : > { %v964_v47 = vsel %vm11617_vm0, %v951_v46, %v953_v45  ;;  %v963_v48 = vsel %vm11617_vm0, %v7477_v12, %v951_v46  ;;  %v937_v12 = vsel %vm11618_vm4, %v7479_v13, %v925_v42  ;;  %v12045_v13 = vmov 0 }
 0x140   : > { %v980_v51 = vsel %vm7591_vm14, %v964_v47, 0.0  ;;  %v979_v52 = vsel %vm7595_vm15, %v963_v48, 0.0  ;;  %5869 = vmatmul.mubr.msk.f32.gmra.mxu0 %vm11613_vm13, %v7603_v49  ;;  %vm7623_vm13 = vcmp.ge.s32.totalorder %v626_v35, 1  ;;  %v12046_v13 = vsel %vm7629_vm12, 4294967295, %v12045_v13 }
 0x141   : > { %5870 = vmatprep.subr.msk.mxu1 %vm11621_vm2, %v980_v51  ;;  %1355 = vmatprep.mubr.f32.mxu0 %v11635_v5  ;;  %12047 = vst [vmem:[#allocation32_spill] sm:$0xff] %v12046_v13  ;;  %v1057_v63 = vrot.slane %v937_v12, 4  ;;  %v12048_v35 = vmov 0 }
 0x142   : > { %v845_v53 = vpop.permute.xlu1 %844  ;;  %5871 = vmatpush1.msk.msra.mxu1 %vm11621_vm2, %v979_v52  ;;  %v843_v54 = vpop.permute.xlu0 %842 }
 0x143   : > { %v855_v55 = vsel %vm11619_vm5, %v7486_v15, %v843_v54  ;;  %v856_v56 = vsel %vm11619_vm5, %v843_v54, %v845_v53  ;;  %v619_v15 = vadd.s32 512, %v7468_v10 }
 0x144   : > { %v872_v59 = vsel %vm7591_vm14, %v856_v56, 0.0  ;;  %v871_v61 = vsel %vm7595_vm15, %v855_v55, 0.0 }
 0x145   : > { %v1041_v16 = vrot.slane %v872_v59, 4  ;;  %v1040_v21 = vrot.slane %v871_v61, 4  ;;  %v627_v30 = vand.u32 31, %v619_v15 }
 0x146   : > { %v886_v1 = vpop.permute.xlu1 %885  ;;  %v884_v9 = vpop.permute.xlu0 %883 }
 0x147   : > { %v896_v19 = vsel %vm11620_vm3, %v7506_v23, %v884_v9  ;;  %v897_v20 = vsel %vm11620_vm3, %v884_v9, %v886_v1  ;;  %v1091_v23 = vsel %vm11621_vm2, %v7378_v3, %v1041_v16  ;;  %v1090_v34 = vsel %vm11621_vm2, %v7327_v0, %v1040_v21 }
 0x148   : > { %v913_v22 = vsel %vm7623_vm13, %v897_v20, 0.0  ;;  %v912_v24 = vsel %vm7629_vm12, %v896_v19, 0.0  ;;  %vm7650_vm11 = vcmp.le.s32.totalorder %v627_v30, 30 }
 0x149   : > { %v1099_v27 = vsel %vm11621_vm2, %v913_v22, %v1058_v14  ;;  %v1098_v28 = vsel %vm11621_vm2, %v912_v24, %v1057_v63  ;;  %v12049_v35 = vsel %vm7650_vm11, 4294967295, %v12048_v35 }
 0x14a   : > { %v7644_v32 = vpop.permute.xlu1 %930  ;;  %1238 = vmatprep.subr.mxu1 %v1099_v27  ;;  %v929_v33 = vpop.permute.xlu0 %928  ;;  %12050 = vst [vmem:[#allocation33_spill] sm:$0xff] %v12049_v35 }
 0x14b   : > { %1239 = vmatpush1.msra.mxu1 %v1098_v28  ;;  %v940_v12 = vsel %vm11618_vm4, %v929_v33, %v7644_v32 }
 0x14c   : > { %1240 = vmatprep.subr.mxu1 %v1091_v23  ;;  %v1060_v63 = vrot.slane %v940_v12, 4 }
 0x14d   : > { %1241 = vmatpush1.msra.mxu1 %v1090_v34 }
 0x14e   : > { %v7658_v37 = vpop.permute.xlu1 %956  ;;  %v955_v39 = vpop.permute.xlu0 %954 }
 0x14f   : > { %v965_v42 = vsel %vm11617_vm0, %v953_v45, %v955_v39  ;;  %v966_v46 = vsel %vm11617_vm0, %v955_v39, %v7658_v37  ;;  %v939_v45 = vsel %vm11618_vm4, %v7587_v41, %v929_v33  ;;  %vm7685_vm0 = vcmp.ge.s32.totalorder %v627_v30, 1 }
 0x150   : > { %v981_v0 = vsel %vm7650_vm11, %v965_v42, 0.0  ;;  %v982_v47 = vsel %vm7654_vm10, %v966_v46, 0.0  ;;  %v12054_v41 = vmov 0  ;;  %vm7689_vm4 = vcmp.ge.s32.totalorder %v628_v31, 1 }
 0x151   : > { %5874 = vmatprep.subr.msk.mxu0 %vm11621_vm2, %v982_v47  ;;  %v12055_v41 = vsel %vm7685_vm0, 4294967295, %v12054_v41  ;;  %v1059_v62 = vrot.slane %v939_v45, 4 }
 0x152   : > { %v802_v48 = vpop.permute.xlu1 %801  ;;  %5875 = vmatpush1.msk.msra.mxu0 %vm11621_vm2, %v981_v0  ;;  %v800_v51 = vpop.permute.xlu0 %799  ;;  %12056 = vst [vmem:[#allocation35_spill] sm:$0xff] %v12055_v41  ;;  %v8157_v41 = vld [vmem:[#allocation4 + $0x8] sm:$0xff] }
 0x153   : > { %v813_v57 = vsel %vm11624_vm9, %v7543_v50, %v800_v51  ;;  %v814_v61 = vsel %vm11624_vm9, %v800_v51, %v802_v48 }
 0x154   : > { %v830_v14 = vsel %vm7629_vm12, %v813_v57, 0.0  ;;  %v831_v21 = vsel %vm7623_vm13, %v814_v61, 0.0 }
 0x155   : > { %v1012_v31 = vrot.slane %v830_v14, 4  ;;  %v1013_v23 = vrot.slane %v831_v21, 4 }
 0x156   : > { %v7669_v52 = vpop.permute.xlu1 %848  ;;  %v847_v54 = vpop.permute.xlu0 %846 }
 0x157   : > { %v857_v55 = vsel %vm11619_vm5, %v845_v53, %v847_v54  ;;  %v858_v56 = vsel %vm11619_vm5, %v847_v54, %v7669_v52  ;;  %v12057_v53 = vmov 0  ;;  %vm12060_vm5 = vcmask 252928  }
 0x158   : > { %v874_v59 = vsel %vm7654_vm10, %v858_v56, 0.0  ;;  %v873_v15 = vsel %vm7650_vm11, %v857_v55, 0.0  ;;  %v12058_v53 = vsel %vm7689_vm4, 4294967295, %v12057_v53 }
 0x159   : > { %12059 = vst [vmem:[#allocation36_spill] sm:$0xff] %v12058_v53  ;;  %v1043_v16 = vrot.slane %v874_v59, 4  ;;  %v1042_v22 = vrot.slane %v873_v15, 4 }
 0x15a   : > { %v7693_v9 = vpop.permute.xlu1 %889  ;;  %v888_v50 = vpop.permute.xlu0 %887 }
 0x15b   : > { %v898_v19 = vsel %vm11620_vm3, %v886_v1, %v888_v50  ;;  %v899_v20 = vsel %vm11620_vm3, %v888_v50, %v7693_v9  ;;  %vm12061_vm3 = vmmov %vm12060_vm5  ;;  %v1093_v42 = vsel %vm11621_vm2, %v7403_v6, %v1043_v16  ;;  %v1092_v46 = vsel %vm11621_vm2, %v7381_v4, %v1042_v22 }
 0x15c   : > { %v914_v24 = vsel %vm7685_vm0, %v898_v19, 0.0  ;;  %v915_v27 = vsel %vm7689_vm4, %v899_v20, 0.0 }
 0x15d   : > { %v1101_v28 = vsel %vm11621_vm2, %v915_v27, %v1060_v63  ;;  %v1100_v30 = vsel %vm11621_vm2, %v914_v24, %v1059_v62 }
 0x15e   : > { %v745_v33 = vpop.permute.xlu1 %744  ;;  %1315 = vmatprep.subr.mxu0 %v1101_v28  ;;  %v743_v1 = vpop.permute.xlu0 %742 }
 0x15f   : > { %v756_v34 = vsel %vm12060_vm5, %v7556_v58, %v743_v1  ;;  %v757_v39 = vsel %vm12061_vm3, %v743_v1, %v745_v33  ;;  %1316 = vmatpush1.msra.mxu0 %v1100_v30  ;;  %vm12062_vm3 = vcmask 261120  }
 0x160   : > { %1317 = vmatprep.subr.mxu0 %v1093_v42  ;;  %v790_v0 = vsel %vm7591_vm14, %v757_v39, 0.0  ;;  %v789_v47 = vsel %vm7595_vm15, %v756_v34, 0.0  ;;  %vm12063_vm5 = vmmov %vm12062_vm3  ;;  %v621_v39 = vadd.s32 768, %v7468_v10 }
 0x161   : > { %1318 = vmatpush1.msra.mxu0 %v1092_v46  ;;  %v1083_v51 = vsel %vm11621_vm2, %v790_v0, %v1013_v23  ;;  %v1082_v58 = vsel %vm11621_vm2, %v789_v47, %v1012_v31  ;;  %vm12064_vm2 = vcmask 269312  }
 0x162   : > { %v7721_v54 = vpop.permute.xlu1 %805  ;;  %1242 = vmatprep.subr.mxu1 %v1083_v51  ;;  %v804_v45 = vpop.permute.xlu0 %803  ;;  %vm12065_vm15 = vmmov %vm12064_vm2 }
 0x163   : > { %1243 = vmatpush1.msra.mxu1 %v1082_v58  ;;  %v815_v57 = vsel %vm11624_vm9, %v802_v48, %v804_v45  ;;  %v816_v59 = vsel %vm11624_vm9, %v804_v45, %v7721_v54  ;;  %vm12070_vm9 = vcmask 293888   ;;  %v629_v58 = vand.u32 31, %v621_v39 }
 0x164   : > { %v832_v16 = vsel %vm7685_vm0, %v815_v57, 0.0 }
 0x165   : > { %v1014_v24 = vrot.slane %v832_v16, 4 }
 0x166   : > { %v719_v12 = vpop.permute.xlu1 %718  ;;  %v717_v55 = vpop.permute.xlu0 %716 }
 0x167   : > { %v730_v4 = vsel %vm12062_vm3, %v7567_v18, %v717_v55  ;;  %v731_v56 = vsel %vm12063_vm5, %v717_v55, %v719_v12  ;;  %v833_v18 = vsel %vm7689_vm4, %v816_v59, 0.0  ;;  %vm12066_vm3 = vcmask 1043456  }
 0x168   : > { %v988_v62 = vrot.slane %v730_v4, 4  ;;  %v989_v63 = vrot.slane %v731_v56, 4  ;;  %vm12067_vm5 = vmmov %vm12066_vm3  ;;  %v1015_v27 = vrot.slane %v833_v18, 4 }
 0x16a   : > { %v662_v61 = vpop.permute.xlu1 %661  ;;  %v660_v15 = vpop.permute.xlu0 %659 }
 0x16b   : > { %v673_v50 = vsel %vm12064_vm2, %v7574_v25, %v660_v15  ;;  %v674_v14 = vsel %vm12065_vm15, %v660_v15, %v662_v61  ;;  %vm12068_vm2 = vcmask 252928  }
 0x16c   : > { %v707_v48 = vsel %vm7623_vm13, %v674_v14, 0.0  ;;  %v706_v19 = vsel %vm7629_vm12, %v673_v50, 0.0  ;;  %vm12069_vm15 = vmmov %vm12068_vm2  ;;  %v12082_v14 = vmov 0 }
 0x16d   : > { %v1075_v20 = vsel %vm12066_vm3, %v707_v48, %v989_v63  ;;  %v1074_v21 = vsel %vm12067_vm5, %v706_v19, %v988_v62  ;;  %vm12071_vm5 = vmmov %vm12066_vm3  ;;  %v12077_v62 = vmov 0 }
 0x16e   : > { %v7742_v22 = vpop.permute.xlu1 %748  ;;  %1244 = vmatprep.subr.mxu1 %v1075_v20  ;;  %v747_v25 = vpop.permute.xlu0 %746 }
 0x16f   : > { %v758_v28 = vsel %vm12068_vm2, %v745_v33, %v747_v25  ;;  %v759_v30 = vsel %vm12069_vm15, %v747_v25, %v7742_v22  ;;  %1245 = vmatpush1.msra.mxu1 %v1074_v21  ;;  %v622_v33 = vadd.s32 896, %v7468_v10  ;;  %vm12072_vm2 = vcmask 261120  }
 0x170   : > { %v791_v31 = vsel %vm7650_vm11, %v758_v28, 0.0  ;;  %5872 = vmatmul.mubr.msk.f32.vlgmr.msra.gmra.mxu1 %vm12070_vm9, %v7585_v40  ;;  %v792_v1 = vsel %vm7654_vm10, %v759_v30, 0.0  ;;  %vm12073_vm9 = vmmov %vm12072_vm2  ;;  %vm12074_vm15 = vcmask 293888   ;;  %vm12087_vm10 = vcmask 785408  }
 0x171   : > { %v1085_v23 = vsel %vm12066_vm3, %v792_v1, %v1015_v27  ;;  %v1084_v34 = vsel %vm12071_vm5, %v791_v31, %v1014_v24  ;;  %1284 = vmatprep.mubr.f32.mxu1 %v11635_v5  ;;  %v630_v45 = vand.u32 31, %v622_v33  ;;  %vm12075_vm3 = vcmask 269312  }
 0x172   : > { %v7758_v42 = vpop.permute.xlu1 %722  ;;  %1319 = vmatprep.subr.mxu0 %v1085_v23  ;;  %v721_v46 = vpop.permute.xlu0 %720  ;;  %vm12076_vm5 = vmmov %vm12075_vm3 }
 0x173   : > { %v733_v0 = vsel %vm12072_vm2, %v721_v46, %v7758_v42  ;;  %1320 = vmatpush1.msra.mxu0 %v1084_v34  ;;  %v732_v47 = vsel %vm12073_vm9, %v719_v12, %v721_v46  ;;  %vm7775_vm2 = vcmp.le.s32.totalorder %v629_v58, 30  ;;  %vm12080_vm9 = vcmask 1043456  }
 0x174   : > { %5873 = vmatmul.mubr.msk.f32.gmra.mxu1 %vm12074_vm15, %v7603_v49  ;;  %v991_v51 = vrot.slane %v733_v0, 4  ;;  %v990_v56 = vrot.slane %v732_v47, 4  ;;  %v12078_v62 = vsel %vm7775_vm2, 4294967295, %v12077_v62  ;;  %vm12081_vm15 = vmmov %vm12080_vm9  ;;  %vm7781_vm11 = vcmp.le.s32.totalorder %v630_v45, 30 }
 0x175   : > { %1432 = vmatprep.mubr.f32.mxu1 %v11635_v5  ;;  %12079 = vst [vmem:[#allocation37_spill] sm:$0xff] %v12078_v62  ;;  %v12083_v14 = vsel %vm7781_vm11, 4294967295, %v12082_v14 }
 0x176   : > { %v7766_v55 = vpop.permute.xlu1 %665  ;;  %v664_v4 = vpop.permute.xlu0 %663  ;;  %12084 = vst [vmem:[#allocation38_spill] sm:$0xff] %v12083_v14 }
 0x177   : > { %v675_v57 = vsel %vm12075_vm3, %v662_v61, %v664_v4  ;;  %v676_v59 = vsel %vm12076_vm5, %v664_v4, %v7766_v55  ;;  %vm12085_vm3 = vcmask 777216  }
 0x178   : > { %v708_v12 = vsel %vm7685_vm0, %v675_v57, 0.0  ;;  %v709_v15 = vsel %vm7689_vm4, %v676_v59, 0.0  ;;  %vm12086_vm5 = vmmov %vm12085_vm3 }
 0x179   : > { %v1077_v63 = vsel %vm12080_vm9, %v709_v15, %v991_v51  ;;  %v1076_v50 = vsel %vm12081_vm15, %v708_v12, %v990_v56  ;;  %vm12088_vm0 = vmmov %vm12087_vm10  ;;  %vm12089_vm9 = vcmask 293888  }
 0x17a   : > { %v959_v61 = vpop.permute.xlu1 %958  ;;  %1321 = vmatprep.subr.mxu0 %v1077_v63  ;;  %v933_v16 = vpop.permute.xlu0 %932 }
 0x17b   : > { %v967_v18 = vsel %vm12085_vm3, %v7658_v37, %v959_v61  ;;  %v976_v48 = vsel %vm12086_vm5, %v959_v61, 0.0  ;;  %v941_v19 = vsel %vm12087_vm10, %v7644_v32, %v933_v16  ;;  %v943_v20 = vsel %vm12088_vm0, %v933_v16, 0.0  ;;  %1322 = vmatpush1.msra.mxu0 %v1076_v50  ;;  %vm12096_vm0 = vmmov %vm12081_vm15 }
 0x17c   : > { %v983_v21 = vsel %vm7775_vm2, %v967_v18, 0.0  ;;  %v984_v25 = vsel %vm7781_vm11, %v976_v48, 0.0  ;;  %5876 = vmatmul.mubr.msk.f32.vlgmr.msra.gmra.mxu0 %vm12089_vm9, %v7585_v40  ;;  %v1062_v24 = vrot.slane %v943_v20, 4  ;;  %vm7798_vm3 = vcmp.ge.s32.totalorder %v629_v58, 1 }
 0x17d   : > { %5878 = vmatprep.subr.msk.mxu1 %vm12081_vm15, %v984_v25  ;;  %v12090_v37 = vmov 0  ;;  %vm7802_vm10 = vcmp.ge.s32.totalorder %v630_v45, 1  ;;  %v12093_v32 = vmov 0  ;;  %1361 = vmatprep.mubr.f32.mxu0 %v11635_v5  ;;  %v1061_v27 = vrot.slane %v941_v19, 4 }
 0x17e   : > { %v12091_v37 = vsel %vm7798_vm3, 4294967295, %v12090_v37  ;;  %v12094_v32 = vsel %vm7802_vm10, 4294967295, %v12093_v32  ;;  %v892_v28 = vpop.permute.xlu1 %891  ;;  %5879 = vmatpush1.msk.msra.mxu1 %vm12096_vm0, %v983_v21  ;;  %v851_v30 = vpop.permute.xlu0 %850  ;;  %vm12097_vm5 = vcmask 793600   ;;  %vm12099_vm15 = vcmask 1039360  }
 0x17f   : > { %12092 = vst [vmem:[#allocation39_spill] sm:$0xff] %v12091_v37  ;;  %12095 = vst [vmem:[#allocation40_spill] sm:$0xff] %v12094_v32  ;;  %v900_v31 = vsel %vm12097_vm5, %v7693_v9, %v892_v28  ;;  %v859_v23 = vsel %vm12099_vm15, %v7669_v52, %v851_v30  ;;  %vm12101_vm0 = vcmask 293888  }
 0x180   : > { %vm12098_vm9 = vmmov %vm12097_vm5  ;;  %v916_v39 = vsel %vm7798_vm3, %v900_v31, 0.0  ;;  %v875_v33 = vsel %vm7775_vm2, %v859_v23, 0.0  ;;  %5877 = vmatmul.mubr.msk.f32.gmra.mxu0 %vm12101_vm0, %v7603_v49  ;;  %vm12102_vm5 = vcmask 1043456  }
 0x181   : > { %v909_v1 = vsel %vm12098_vm9, %v892_v28, 0.0  ;;  %vm12100_vm4 = vmmov %vm12099_vm15  ;;  %v1044_v9 = vrot.slane %v875_v33, 4  ;;  %vm12104_vm9 = vcmask 7168  }
 0x182   : > { %v868_v34 = vsel %vm12100_vm4, %v851_v30, 0.0  ;;  %v917_v0 = vsel %vm7802_vm10, %v909_v1, 0.0  ;;  %vm12103_vm4 = vmmov %vm12102_vm5  ;;  %v810_v58 = vpop.permute.xlu1 %809  ;;  %v808_v45 = vpop.permute.xlu0 %807 }
 0x183   : > { %v876_v46 = vsel %vm7781_vm11, %v868_v34, 0.0  ;;  %v1103_v52 = vsel %vm12102_vm5, %v917_v0, %v1062_v24  ;;  %v1102_v51 = vsel %vm12103_vm4, %v916_v39, %v1061_v27  ;;  %v817_v4 = vsel %vm12104_vm9, %v7721_v54, %v808_v45  ;;  %vm12105_vm15 = vmmov %vm12104_vm9 }
 0x184   : > { %v1045_v47 = vrot.slane %v876_v46, 4  ;;  %1392 = vmatprep.subr.mxu1 %v1103_v52  ;;  %v818_v56 = vsel %vm12105_vm15, %v808_v45, %v810_v58  ;;  %vm12106_vm14 = vmmov %vm12103_vm4  ;;  %v834_v12 = vsel %vm7798_vm3, %v817_v4, 0.0  ;;  %vm12108_vm5 = vcmask 252928  }
 0x185   : > { %1393 = vmatpush1.msra.mxu1 %v1102_v51  ;;  %vm12107_vm0 = vmmov %vm12103_vm4  ;;  %v835_v15 = vsel %vm7802_vm10, %v818_v56, 0.0  ;;  %v1016_v61 = vrot.slane %v834_v12, 4  ;;  %vm12112_vm15 = vcmask 261120  }
 0x186   : > { %v1095_v57 = vsel %vm12106_vm14, %v7458_v8, %v1045_v47  ;;  %v1094_v59 = vsel %vm12107_vm0, %v7406_v7, %v1044_v9  ;;  %v1017_v63 = vrot.slane %v835_v15, 4  ;;  %v753_v50 = vpop.permute.xlu1 %752  ;;  %v751_v54 = vpop.permute.xlu0 %750  ;;  %vm12109_vm4 = vmmov %vm12108_vm5 }
 0x187   : > { %1394 = vmatprep.subr.mxu1 %v1095_v57  ;;  %v760_v16 = vsel %vm12108_vm5, %v7742_v22, %v751_v54  ;;  %v761_v18 = vsel %vm12109_vm4, %v751_v54, %v753_v50  ;;  %vm12110_vm14 = vmmov %vm12107_vm0  ;;  %vm12114_vm5 = vcmask 269312  }
 0x188   : > { %1395 = vmatpush1.msra.mxu1 %v1094_v59  ;;  %v793_v7 = vsel %vm7775_vm2, %v760_v16, 0.0  ;;  %v794_v48 = vsel %vm7781_vm11, %v761_v18, 0.0  ;;  %vm12111_vm9 = vmmov %vm12107_vm0 }
 0x189   : > { %v1087_v19 = vsel %vm12110_vm14, %v794_v48, %v1017_v63  ;;  %v1086_v20 = vsel %vm12111_vm9, %v793_v7, %v1016_v61  ;;  %vm12113_vm0 = vmmov %vm12112_vm15 }
 0x18a   : > { %1396 = vmatprep.subr.mxu1 %v1087_v19  ;;  %v727_v21 = vpop.permute.xlu1 %726  ;;  %v725_v25 = vpop.permute.xlu0 %724  ;;  %vm12115_vm4 = vmmov %vm12114_vm5 }
 0x18b   : > { %1397 = vmatpush1.msra.mxu1 %v1086_v20  ;;  %v734_v24 = vsel %vm12112_vm15, %v7758_v42, %v725_v25  ;;  %v735_v22 = vsel %vm12113_vm0, %v725_v25, %v727_v21  ;;  %vm12116_vm14 = vmmov %vm12111_vm9  ;;  %vm12117_vm15 = vcmask 293888  }
 0x18c   : > { %v992_v27 = vrot.slane %v734_v24, 4  ;;  %v993_v28 = vrot.slane %v735_v22, 4  ;;  %vm12118_vm0 = vmmov %vm12117_vm15 }
 0x18e   : > { %v670_v30 = vpop.permute.xlu1 %669  ;;  %v668_v31 = vpop.permute.xlu0 %667 }
 0x18f   : > { %v677_v1 = vsel %vm12114_vm5, %v7766_v55, %v668_v31  ;;  %v678_v23 = vsel %vm12115_vm4, %v668_v31, %v670_v30  ;;  %vm2089_vm5 = vcmask 130048   ;;  %vm12149_vm4 = vcmask 785408  }
 0x190   : > { %v710_v34 = vsel %vm7798_vm3, %v677_v1, 0.0  ;;  %v711_v39 = vsel %vm7802_vm10, %v678_v23, 0.0  ;;  %5910 = vmatprep.mubr.msk.f32.mxu0 %vm2089_vm5, %v8157_v41 }
 0x191   : > { %v1079_v33 = vsel %vm12116_vm14, %v711_v39, %v993_v28  ;;  %v1078_v42 = vsel %vm12111_vm9, %v710_v34, %v992_v27  ;;  %vm12150_vm14 = vmmov %vm12149_vm4 }
 0x192   : > { %1398 = vmatprep.subr.mxu1 %v1079_v33  ;;  %vm12151_vm9 = vmmov %vm12149_vm4 }
 0x193   : > { %1399 = vmatpush1.msra.mxu1 %v1078_v42 }
 0x194   : > { %5880 = vmatmul.mubr.msk.f32.vlgmr.msra.gmra.mxu1 %vm12117_vm15, %v7585_v40  ;;  %vm12152_vm15 = vmmov %vm12149_vm4 }
 0x195   : > { %1438 = vmatprep.mubr.f32.mxu1 %v11635_v5 }
 0x198   : > { %5881 = vmatmul.mubr.msk.f32.gmra.mxu1 %vm12118_vm0, %v7603_v49  ;;  %vm12153_vm0 = vcmask 793600  }
 0x199   : > { %5936 = vmatprep.mubr.msk.f32.mxu1 %vm2089_vm5, %v8157_v41 }
 0x1fc   : > { %v1203_v55 = vpop.f32.mrf.mxu0 }
 0x1fd   : > { %v7863_v46 = vmax.f32 %v1203_v55, 0.0 }
 0x1fe   : > { %v1205_v0 = vpop.f32.mrf.mxu0 }
 0x1ff   : > { %1941 = vrot.lane.b32.xlu1 %v7863_v46, %s7058_s28  ;;  %v7873_v40 = vmax.f32 %v1205_v0, 0.0 }
 0x200   : > { %v1209_v56 = vpop.f32.mrf.mxu0 }
 0x201   : > { %v7953_v12 = vmax.f32 %v1209_v56, 0.0 }
 0x202   : > { %v1211_v57 = vpop.f32.mrf.mxu0 }
 0x203   : > { %1861 = vrot.lane.b32.xlu1 %v7863_v46, %s7060_s26  ;;  %v7951_v59 = vmax.f32 %v1211_v57, 0.0 }
 0x207   : > { %1781 = vrot.lane.b32.xlu1 %v7863_v46, %s7059_s24 }
 0x20b   : > { %2005 = vrot.lane.b32.xlu1 %v7863_v46, %s7057_s27 }
 0x20f   : > { %1943 = vrot.lane.b32.xlu1 %v7873_v40, %s7058_s28 }
 0x213   : > { %1863 = vrot.lane.b32.xlu1 %v7873_v40, %s7060_s26 }
 0x217   : > { %1783 = vrot.lane.b32.xlu1 %v7873_v40, %s7059_s24 }
 0x21b   : > { %1703 = vrot.lane.b32.xlu1 %v7873_v40, %s7061_s30 }
 0x230   : > { %v1280_v49 = vpop.f32.mrf.mxu1 }
 0x231   : > { %v7883_v9 = vmax.f32 %v1280_v49, 0.0 }
 0x232   : > { %v1282_v47 = vpop.f32.mrf.mxu1 }
 0x233   : > { %12119 = vst [vmem:[#allocation41_spill] sm:$0xff] %v7883_v9  ;;  %v7885_v52 = vmax.f32 %v1282_v47, 0.0  ;;  %1945 = vrot.lane.b32.xlu0 %v7883_v9, %s7058_s28 }
 0x234   : > { %v1286_v51 = vpop.f32.mrf.mxu1 }
 0x235   : > { %12120 = vst [vmem:[#allocation42_spill] sm:$0xff] %v7885_v52  ;;  %1707 = vrot.lane.b32.xlu1 %v7885_v52, %s7061_s30  ;;  %v7919_v58 = vmax.f32 %v1286_v51, 0.0 }
 0x236   : > { %v1288_v45 = vpop.f32.mrf.mxu1 }
 0x237   : > { %1865 = vrot.lane.b32.xlu0 %v7883_v9, %s7060_s26  ;;  %12121 = vst [vmem:[#allocation43_spill] sm:$0xff] %v7919_v58  ;;  %v7937_v4 = vmax.f32 %v1288_v45, 0.0 }
 0x239   : > { %1623 = vrot.lane.b32.xlu1 %v7873_v40, %s7062_s19  ;;  %12122 = vst [vmem:[#allocation44_spill] sm:$0xff] %v7937_v4 }
 0x23b   : > { %1785 = vrot.lane.b32.xlu0 %v7883_v9, %s7059_s24 }
 0x23c   : > { %v1357_v61 = vpop.f32.mrf.mxu0 }
 0x23d   : > { %1627 = vrot.lane.b32.xlu1 %v7885_v52, %s7062_s19  ;;  %v8001_v18 = vmax.f32 %v1357_v61, 0.0 }
 0x23e   : > { %v1359_v42 = vpop.f32.mrf.mxu0 }
 0x23f   : > { %1701 = vrot.lane.b32.xlu0 %v7863_v46, %s7061_s30  ;;  %v8075_v0 = vmax.f32 %v1359_v42, 0.0 }
 0x241   : > { %1559 = vrot.lane.b32.xlu1 %v7873_v40, %s7063_s25 }
 0x243   : > { %1705 = vrot.lane.b32.xlu0 %v7883_v9, %s7061_s30 }
 0x245   : > { %1563 = vrot.lane.b32.xlu1 %v7885_v52, %s7063_s25 }
 0x247   : > { %1621 = vrot.lane.b32.xlu0 %v7863_v46, %s7062_s19 }
 0x249   : > { %1479 = vrot.lane.b32.xlu1 %v7873_v40, %s7064_s15 }
 0x24b   : > { %1625 = vrot.lane.b32.xlu0 %v7883_v9, %s7062_s19 }
 0x24d   : > { %1483 = vrot.lane.b32.xlu1 %v7885_v52, %s7064_s15 }
 0x24f   : > { %1557 = vrot.lane.b32.xlu0 %v7863_v46, %s7063_s25 }
 0x251   : > { %2007 = vrot.lane.b32.xlu1 %v7873_v40, %s7057_s27 }
 0x253   : > { %1561 = vrot.lane.b32.xlu0 %v7883_v9, %s7063_s25 }
 0x254   : > { %v1434_v19 = vpop.f32.mrf.mxu1 }
 0x255   : > { %1961 = vrot.lane.b32.xlu1 %v7919_v58, %s7058_s28  ;;  %v8023_v20 = vmax.f32 %v1434_v19, 0.0 }
 0x256   : > { %v1436_v27 = vpop.f32.mrf.mxu1 }
 0x257   : > { %1477 = vrot.lane.b32.xlu0 %v7863_v46, %s7064_s15  ;;  %v8049_v31 = vmax.f32 %v1436_v27, 0.0  ;;  %v1363_v27 = vpop.f32.mrf.mxu0 }
 0x258   : > { %v1440_v42 = vpop.f32.mrf.mxu1  ;;  %v8109_v5 = vmax.f32 %v1363_v27, 0.0 }
 0x259   : > { %1881 = vrot.lane.b32.xlu1 %v7919_v58, %s7060_s26  ;;  %12124 = vst [vmem:[#allocation46_spill] sm:$0xff] %v8049_v31  ;;  %v8119_v8 = vmax.f32 %v1440_v42, 0.0  ;;  %v1365_v3 = vpop.f32.mrf.mxu0 }
 0x25a   : > { %12131 = vst [vmem:[#allocation53_spill] sm:$0xff] %v8109_v5  ;;  %v8129_v2 = vmax.f32 %v1365_v3, 0.0  ;;  %v1442_v37 = vpop.f32.mrf.mxu1 }
 0x25b   : > { %1481 = vrot.lane.b32.xlu0 %v7883_v9, %s7064_s15  ;;  %v8155_v36 = vmax.f32 %v1442_v37, 0.0 }
 0x25d   : > { %1801 = vrot.lane.b32.xlu1 %v7919_v58, %s7059_s24 }
 0x25f   : > { %2009 = vrot.lane.b32.xlu0 %v7883_v9, %s7057_s27 }
 0x261   : > { %2025 = vrot.lane.b32.xlu1 %v7919_v58, %s7057_s27 }
 0x263   : > { %1947 = vrot.lane.b32.xlu0 %v7885_v52, %s7058_s28 }
 0x265   : > { %1963 = vrot.lane.b32.xlu1 %v7937_v4, %s7058_s28 }
 0x267   : > { %1867 = vrot.lane.b32.xlu0 %v7885_v52, %s7060_s26 }
 0x269   : > { %1883 = vrot.lane.b32.xlu1 %v7937_v4, %s7060_s26 }
 0x26b   : > { %1787 = vrot.lane.b32.xlu0 %v7885_v52, %s7059_s24 }
 0x26d   : > { %1803 = vrot.lane.b32.xlu1 %v7937_v4, %s7059_s24 }
 0x26f   : > { %2011 = vrot.lane.b32.xlu0 %v7885_v52, %s7057_s27 }
 0x271   : > { %1719 = vrot.lane.b32.xlu1 %v7951_v59, %s7061_s30  ;;  %v7965_v15 = vpop.permute.xlu1 %1941 }
 0x273   : > { %1957 = vrot.lane.b32.xlu0 %v7953_v12, %s7058_s28 }
 0x275   : > { %1723 = vrot.lane.b32.xlu1 %v7937_v4, %s7061_s30  ;;  %v7973_v63 = vpop.permute.xlu1 %1861 }
 0x277   : > { %1877 = vrot.lane.b32.xlu0 %v7953_v12, %s7060_s26 }
 0x279   : > { %1639 = vrot.lane.b32.xlu1 %v7951_v59, %s7062_s19  ;;  %v7981_v50 = vpop.permute.xlu1 %1781 }
 0x27b   : > { %1797 = vrot.lane.b32.xlu0 %v7953_v12, %s7059_s24 }
 0x27d   : > { %1643 = vrot.lane.b32.xlu1 %v7937_v4, %s7062_s19  ;;  %v7989_v54 = vpop.permute.xlu1 %2005 }
 0x27f   : > { %1717 = vrot.lane.b32.xlu0 %v7953_v12, %s7061_s30 }
 0x281   : > { %1575 = vrot.lane.b32.xlu1 %v7951_v59, %s7063_s25  ;;  %v7997_v16 = vpop.permute.xlu1 %1943 }
 0x283   : > { %1721 = vrot.lane.b32.xlu0 %v7919_v58, %s7061_s30 }
 0x285   : > { %1579 = vrot.lane.b32.xlu1 %v7937_v4, %s7063_s25  ;;  %v8007_v7 = vpop.permute.xlu1 %1863 }
 0x287   : > { %1637 = vrot.lane.b32.xlu0 %v7953_v12, %s7062_s19 }
 0x289   : > { %1495 = vrot.lane.b32.xlu1 %v7951_v59, %s7064_s15  ;;  %v8015_v48 = vpop.permute.xlu1 %1783 }
 0x28b   : > { %1641 = vrot.lane.b32.xlu0 %v7919_v58, %s7062_s19 }
 0x28d   : > { %1499 = vrot.lane.b32.xlu1 %v7937_v4, %s7064_s15  ;;  %v8025_v21 = vpop.permute.xlu1 %1703 }
 0x28f   : > { %1573 = vrot.lane.b32.xlu0 %v7953_v12, %s7063_s25 }
 0x291   : > { %2027 = vrot.lane.b32.xlu1 %v7937_v4, %s7057_s27 }
 0x293   : > { %1577 = vrot.lane.b32.xlu0 %v7919_v58, %s7063_s25 }
 0x295   : > { %1949 = vrot.lane.b32.xlu1 %v8001_v18, %s7058_s28 }
 0x297   : > { %1493 = vrot.lane.b32.xlu0 %v7953_v12, %s7064_s15 }
 0x299   : > { %1869 = vrot.lane.b32.xlu1 %v8001_v18, %s7060_s26 }
 0x29b   : > { %1497 = vrot.lane.b32.xlu0 %v7919_v58, %s7064_s15 }
 0x29d   : > { %1789 = vrot.lane.b32.xlu1 %v8001_v18, %s7059_s24 }
 0x29f   : > { %2021 = vrot.lane.b32.xlu0 %v7953_v12, %s7057_s27 }
 0x2a1   : > { %2013 = vrot.lane.b32.xlu1 %v8001_v18, %s7057_s27 }
 0x2a3   : > { %1959 = vrot.lane.b32.xlu0 %v7951_v59, %s7058_s28 }
 0x2a5   : > { %1953 = vrot.lane.b32.xlu1 %v8023_v20, %s7058_s28  ;;  %v8031_v25 = vpop.permute.xlu0 %1945 }
 0x2a7   : > { %v8033_v24 = vpop.permute.xlu1 %1707  ;;  %1879 = vrot.lane.b32.xlu0 %v7951_v59, %s7060_s26 }
 0x2a8   : > { %12123 = vst [vmem:[#allocation45_spill] sm:$0xff] %v8033_v24 }
 0x2a9   : > { %1873 = vrot.lane.b32.xlu1 %v8023_v20, %s7060_s26  ;;  %v8039_v22 = vpop.permute.xlu0 %1865 }
 0x2ab   : > { %v8041_v28 = vpop.permute.xlu1 %1623  ;;  %1799 = vrot.lane.b32.xlu0 %v7951_v59, %s7059_s24 }
 0x2ad   : > { %1793 = vrot.lane.b32.xlu1 %v8023_v20, %s7059_s24  ;;  %v8047_v30 = vpop.permute.xlu0 %1785 }
 0x2af   : > { %v8051_v1 = vpop.permute.xlu1 %1627  ;;  %2023 = vrot.lane.b32.xlu0 %v7951_v59, %s7057_s27 }
 0x2b0   : > { %12125 = vst [vmem:[#allocation47_spill] sm:$0xff] %v8051_v1 }
 0x2b1   : > { %1955 = vrot.lane.b32.xlu1 %v8049_v31, %s7058_s28  ;;  %v8057_v23 = vpop.permute.xlu0 %1701 }
 0x2b3   : > { %v8059_v34 = vpop.permute.xlu1 %1559  ;;  %1709 = vrot.lane.b32.xlu0 %v8001_v18, %s7061_s30 }
 0x2b5   : > { %1875 = vrot.lane.b32.xlu1 %v8049_v31, %s7060_s26  ;;  %v8065_v39 = vpop.permute.xlu0 %1705 }
 0x2b6   : > { %12126 = vst [vmem:[#allocation48_spill] sm:$0xff] %v8065_v39 }
 0x2b7   : > { %v8067_v33 = vpop.permute.xlu1 %1563  ;;  %1713 = vrot.lane.b32.xlu0 %v8023_v20, %s7061_s30 }
 0x2b8   : > { %12127 = vst [vmem:[#allocation49_spill] sm:$0xff] %v8067_v33 }
 0x2b9   : > { %1795 = vrot.lane.b32.xlu1 %v8049_v31, %s7059_s24  ;;  %v8073_v55 = vpop.permute.xlu0 %1621 }
 0x2bb   : > { %v8077_v49 = vpop.permute.xlu1 %1479  ;;  %1629 = vrot.lane.b32.xlu0 %v8001_v18, %s7062_s19 }
 0x2bd   : > { %1711 = vrot.lane.b32.xlu1 %v8075_v0, %s7061_s30  ;;  %v8083_v47 = vpop.permute.xlu0 %1625 }
 0x2be   : > { %12128 = vst [vmem:[#allocation50_spill] sm:$0xff] %v8083_v47 }
 0x2bf   : > { %v8085_v51 = vpop.permute.xlu1 %1483  ;;  %1633 = vrot.lane.b32.xlu0 %v8023_v20, %s7062_s19 }
 0x2c0   : > { %12129 = vst [vmem:[#allocation51_spill] sm:$0xff] %v8085_v51 }
 0x2c1   : > { %1715 = vrot.lane.b32.xlu1 %v8049_v31, %s7061_s30  ;;  %v8091_v45 = vpop.permute.xlu0 %1557 }
 0x2c3   : > { %v8093_v56 = vpop.permute.xlu1 %2007  ;;  %1951 = vrot.lane.b32.xlu0 %v8075_v0, %s7058_s28 }
 0x2c5   : > { %1631 = vrot.lane.b32.xlu1 %v8075_v0, %s7062_s19  ;;  %v8099_v57 = vpop.permute.xlu0 %1561 }
 0x2c6   : > { %12130 = vst [vmem:[#allocation52_spill] sm:$0xff] %v8099_v57 }
 0x2c7   : > { %v8101_v61 = vpop.permute.xlu1 %1961  ;;  %1871 = vrot.lane.b32.xlu0 %v8075_v0, %s7060_s26 }
 0x2c9   : > { %1635 = vrot.lane.b32.xlu1 %v8049_v31, %s7062_s19  ;;  %v8107_v19 = vpop.permute.xlu0 %1477 }
 0x2cb   : > { %v8111_v10 = vpop.permute.xlu1 %1881  ;;  %1791 = vrot.lane.b32.xlu0 %v8075_v0, %s7059_s24 }
 0x2cd   : > { %1567 = vrot.lane.b32.xlu1 %v8075_v0, %s7063_s25  ;;  %v8117_v11 = vpop.permute.xlu0 %1481 }
 0x2ce   : > { %12132 = vst [vmem:[#allocation54_spill] sm:$0xff] %v8117_v11 }
 0x2cf   : > { %v8121_v6 = vpop.permute.xlu1 %1801  ;;  %1965 = vrot.lane.b32.xlu0 %v8109_v5, %s7058_s28 }
 0x2d1   : > { %1969 = vrot.lane.b32.xlu1 %v8119_v8, %s7058_s28  ;;  %v8127_v27 = vpop.permute.xlu0 %2009 }
 0x2d3   : > { %v8131_v62 = vpop.permute.xlu1 %2025  ;;  %1885 = vrot.lane.b32.xlu0 %v8109_v5, %s7060_s26 }
 0x2d5   : > { %1887 = vrot.lane.b32.xlu1 %v8129_v2, %s7060_s26  ;;  %v8137_v42 = vpop.permute.xlu0 %1947 }
 0x2d7   : > { %v8139_v14 = vpop.permute.xlu1 %1963  ;;  %1805 = vrot.lane.b32.xlu0 %v8109_v5, %s7059_s24 }
 0x2d9   : > { %1807 = vrot.lane.b32.xlu1 %v8129_v2, %s7059_s24  ;;  %v8145_v3 = vpop.permute.xlu0 %1867 }
 0x2da   : > { %12133 = vst [vmem:[#allocation55_spill] sm:$0xff] %v8145_v3 }
 0x2db   : > { %v8147_v35 = vpop.permute.xlu1 %1883  ;;  %1565 = vrot.lane.b32.xlu0 %v8001_v18, %s7063_s25 }
 0x2dd   : > { %1727 = vrot.lane.b32.xlu1 %v8129_v2, %s7061_s30  ;;  %v8153_v32 = vpop.permute.xlu0 %1787 }
 0x2de   : > { %12134 = vst [vmem:[#allocation56_spill] sm:$0xff] %v8153_v32 }
 0x2df   : > { %v8159_v53 = vpop.permute.xlu1 %1803  ;;  %2029 = vrot.lane.b32.xlu0 %v8109_v5, %s7057_s27 }
 0x2e0   : > { %12135 = vst [vmem:[#allocation57_spill] sm:$0xff] %v8159_v53 }
 0x2e1   : > { %1731 = vrot.lane.b32.xlu1 %v8155_v36, %s7061_s30  ;;  %v8169_v11 = vpop.permute.xlu0 %2011 }
 0x2e2   : > { %12136 = vst [vmem:[#allocation58_spill] sm:$0xff] %v8169_v11 }
 0x2e3   : > { %v8171_v37 = vpop.permute.xlu1 %1719  ;;  %1889 = vrot.lane.b32.xlu0 %v8119_v8, %s7060_s26 }
 0x2e5   : > { %1647 = vrot.lane.b32.xlu1 %v8129_v2, %s7062_s19  ;;  %v1958_v51 = vpop.permute.xlu0 %1957 }
 0x2e7   : > { %v8177_v57 = vpop.permute.xlu1 %1723  ;;  %1809 = vrot.lane.b32.xlu0 %v8119_v8, %s7059_s24 }
 0x2e8   : > { %12137 = vst [vmem:[#allocation59_spill] sm:$0xff] %v8177_v57 }
 0x2e9   : > { %1651 = vrot.lane.b32.xlu1 %v8155_v36, %s7062_s19  ;;  %v1878_v33 = vpop.permute.xlu0 %1877 }
 0x2eb   : > { %v8183_v47 = vpop.permute.xlu1 %1639  ;;  %1725 = vrot.lane.b32.xlu0 %v8109_v5, %s7061_s30 }
 0x2ed   : > { %1583 = vrot.lane.b32.xlu1 %v8129_v2, %s7063_s25  ;;  %v1798_v11 = vpop.permute.xlu0 %1797 }
 0x2ef   : > { %v8189_v1 = vpop.permute.xlu1 %1643  ;;  %1729 = vrot.lane.b32.xlu0 %v8119_v8, %s7061_s30 }
 0x2f0   : > { %12138 = vst [vmem:[#allocation60_spill] sm:$0xff] %v8189_v1 }
 0x2f1   : > { %1587 = vrot.lane.b32.xlu1 %v8155_v36, %s7063_s25  ;;  %v8195_v39 = vpop.permute.xlu0 %1717 }
 0x2f3   : > { %v8197_v24 = vpop.permute.xlu1 %1575  ;;  %1645 = vrot.lane.b32.xlu0 %v8109_v5, %s7062_s19 }
 0x2f5   : > { %1503 = vrot.lane.b32.xlu1 %v8129_v2, %s7064_s15  ;;  %v8203_v57 = vpop.permute.xlu0 %1721 }
 0x2f6   : > { %12139 = vst [vmem:[#allocation61_spill] sm:$0xff] %v8203_v57 }
 0x2f7   : > { %v8205_v9 = vpop.permute.xlu1 %1579  ;;  %1649 = vrot.lane.b32.xlu0 %v8119_v8, %s7062_s19 }
 0x2f8   : > { %12140 = vst [vmem:[#allocation62_spill] sm:$0xff] %v8205_v9 }
 0x2f9   : > { %1571 = vrot.lane.b32.xlu1 %v8049_v31, %s7063_s25  ;;  %v8211_v1 = vpop.permute.xlu0 %1637 }
 0x2fb   : > { %v8213_v52 = vpop.permute.xlu1 %1495  ;;  %1581 = vrot.lane.b32.xlu0 %v8109_v5, %s7063_s25 }
 0x2fd   : > { %1487 = vrot.lane.b32.xlu1 %v8075_v0, %s7064_s15  ;;  %v8219_v58 = vpop.permute.xlu0 %1641 }
 0x2fe   : > { %12141 = vst [vmem:[#allocation63_spill] sm:$0xff] %v8219_v58 }
 0x2ff   : > { %v8221_v57 = vpop.permute.xlu1 %1499  ;;  %1585 = vrot.lane.b32.xlu0 %v8119_v8, %s7063_s25 }
 0x300   : > { %12142 = vst [vmem:[#allocation64_spill] sm:$0xff] %v8221_v57 }
 0x301   : > { %1507 = vrot.lane.b32.xlu1 %v8155_v36, %s7064_s15  ;;  %v8227_v9 = vpop.permute.xlu0 %1573 }
 0x303   : > { %v8229_v4 = vpop.permute.xlu1 %2027  ;;  %1967 = vrot.lane.b32.xlu0 %v8129_v2, %s7058_s28 }
 0x304   : > { %12143 = vst [vmem:[#allocation65_spill] sm:$0xff] %v8229_v4 }
 0x305   : > { %1491 = vrot.lane.b32.xlu1 %v8049_v31, %s7064_s15  ;;  %v8235_v32 = vpop.permute.xlu0 %1577 }
 0x306   : > { %12144 = vst [vmem:[#allocation66_spill] sm:$0xff] %v8235_v32 }
 0x307   : > { %v8237_v58 = vpop.permute.xlu1 %1949  ;;  %1971 = vrot.lane.b32.xlu0 %v8155_v36, %s7058_s28 }
 0x309   : > { %2033 = vrot.lane.b32.xlu1 %v8119_v8, %s7057_s27  ;;  %v8243_v57 = vpop.permute.xlu0 %1493 }
 0x30b   : > { %v8245_v44 = vpop.permute.xlu1 %1869  ;;  %1891 = vrot.lane.b32.xlu0 %v8155_v36, %s7060_s26  ;;  %s12014_s26 = smov 9  }
 0x30c   : > { %12145 = vst [vmem:[#allocation67_spill] sm:$0xff] %v8245_v44 }
 0x30d   : > { %2017 = vrot.lane.b32.xlu1 %v8023_v20, %s7057_s27  ;;  %v8251_v4 = vpop.permute.xlu0 %1497 }
 0x30e   : > { %12146 = vst [vmem:[#allocation68_spill] sm:$0xff] %v8251_v4 }
 0x30f   : > { %v8253_v32 = vpop.permute.xlu1 %1789  ;;  %1811 = vrot.lane.b32.xlu0 %v8155_v36, %s7059_s24 }
 0x310   : > { %12147 = vst [vmem:[#allocation69_spill] sm:$0xff] %v8253_v32 }
 0x311   : > { %2019 = vrot.lane.b32.xlu1 %v8049_v31, %s7057_s27  ;;  %v8259_v43 = vpop.permute.xlu0 %2021  ;;  %v1974_v31 = vsel %vm12151_vm9, %v7997_v16, %v8031_v25  ;;  %vm12156_vm9 = vmmov %vm12153_vm0 }
 0x313   : > { %v8261_v53 = vpop.permute.xlu1 %2013  ;;  %1501 = vrot.lane.b32.xlu0 %v8109_v5, %s7064_s15  ;;  %v1973_v5 = vsel %vm12152_vm15, %v7965_v15, %v7997_v16  ;;  %vm12157_vm15 = vcmask 1039360  }
 0x314   : > { %12148 = vst [vmem:[#allocation70_spill] sm:$0xff] %v8261_v53 }
 0x315   : > { %v1960_v3 = vpop.permute.xlu0 %1959 }
 0x316   : > { %v1981_v44 = vsel %vm12149_vm4, %v1960_v3, %v8101_v61  ;;  %v1980_v4 = vsel %vm12150_vm14, %v1958_v51, %v1960_v3  ;;  %vm12154_vm4 = vmmov %vm12153_vm0 }
 0x317   : > { %v8268_v32 = vpop.permute.xlu1 %1953  ;;  %1569 = vrot.lane.b32.xlu0 %v8023_v20, %s7063_s25  ;;  %2096 = vmatprep.subr.mxu0 %v1981_v44  ;;  %vm12155_vm14 = vmmov %vm12153_vm0 }
 0x318   : > { %2097 = vmatpush1.msra.mxu0 %v1980_v4  ;;  %v1894_v44 = vsel %vm12155_vm14, %v8007_v7, %v8039_v22 }
 0x319   : > { %2098 = vmatprep.subr.mxu0 %v1974_v31  ;;  %v1880_v53 = vpop.permute.xlu0 %1879 }
 0x31a   : > { %v1900_v13 = vsel %vm12153_vm0, %v1878_v33, %v1880_v53  ;;  %2099 = vmatpush1.msra.mxu0 %v1973_v5  ;;  %v1901_v51 = vsel %vm12154_vm4, %v1880_v53, %v8111_v10  ;;  %v1893_v5 = vsel %vm12156_vm9, %v7973_v63, %v8007_v7  ;;  %vm12158_vm0 = vmmov %vm12157_vm15  ;;  %vm12161_vm9 = vcmask 7168  }
 0x31b   : > { %v8281_v3 = vpop.permute.xlu1 %1873  ;;  %1485 = vrot.lane.b32.xlu0 %v8001_v18, %s7064_s15  ;;  %5882 = vmatprep.subr.msk.mxu0 %vm7510_vm6, %v1901_v51  ;;  %vm12159_vm4 = vmmov %vm12158_vm0  ;;  %v12245_v60 = vld [vmem:[#allocation70_spill] sm:$0xff] }
 0x31c   : > { %5883 = vmatpush1.msk.msra.mxu0 %vm7531_vm8, %v1900_v13  ;;  %vm12160_vm14 = vmmov %vm12158_vm0 }
 0x31d   : > { %5884 = vmatprep.subr.msk.mxu0 %vm7510_vm6, %v1894_v44  ;;  %v1800_v53 = vpop.permute.xlu0 %1799  ;;  %v1813_v63 = vsel %vm12160_vm14, %v7981_v50, %v8015_v48  ;;  %v1740_v50 = vsel %vm12161_vm9, %v8195_v39, %v8171_v37  ;;  %vm12165_vm14 = vcmask 252928  }
 0x31e   : > { %v1820_v4 = vsel %vm12157_vm15, %v1798_v11, %v1800_v53  ;;  %5885 = vmatpush1.msk.msra.mxu0 %vm7531_vm8, %v1893_v5  ;;  %v1821_v13 = vsel %vm12158_vm0, %v1800_v53, %v8121_v6  ;;  %v1814_v11 = vsel %vm12159_vm4, %v8015_v48, %v8047_v30  ;;  %vm12162_vm15 = vmmov %vm12161_vm9 }
 0x31f   : > { %v8302_v15 = vpop.permute.xlu1 %1793  ;;  %1505 = vrot.lane.b32.xlu0 %v8119_v8, %s7064_s15  ;;  %5886 = vmatprep.subr.msk.mxu0 %vm7492_vm1, %v1821_v13  ;;  %v1764_v48 = vsel %vm12162_vm15, 0.0, %v8195_v39  ;;  %vm12163_vm0 = vmmov %vm12161_vm9 }
 0x320   : > { %5887 = vmatpush1.msk.msra.mxu0 %vm7518_vm7, %v1820_v4  ;;  %vm12164_vm4 = vmmov %vm12163_vm0 }
 0x321   : > { %5888 = vmatprep.subr.msk.mxu0 %vm7492_vm1, %v1814_v11  ;;  %v2024_v16 = vpop.permute.xlu0 %2023  ;;  %vm12166_vm9 = vmmov %vm12165_vm14 }
 0x322   : > { %5889 = vmatpush1.msk.msra.mxu0 %vm7518_vm7, %v1813_v63  ;;  %v1684_v39 = vsel %vm12166_vm9, 0.0, %v8211_v1  ;;  %vm12167_vm15 = vmmov %vm12166_vm9 }
 0x323   : > { %v8320_v7 = vpop.permute.xlu1 %1955  ;;  %1489 = vrot.lane.b32.xlu0 %v8023_v20, %s7064_s15  ;;  %2108 = vmatprep.subr.mxu0 %v7951_v59  ;;  %s12012_s15 = smov 119  }
 0x324   : > { %2109 = vmatpush1.msra.mxu0 %v7953_v12  ;;  %v1660_v12 = vsel %vm12165_vm14, %v8211_v1, %v8183_v47 }
 0x325   : > { %2110 = vmatprep.subr.mxu0 %v7873_v40  ;;  %v8327_v31 = vpop.permute.xlu0 %1709  ;;  %v1763_v40 = vsel %vm12164_vm4, 0.0, %v8057_v23  ;;  %vm12169_vm4 = vcmask 261120  }
 0x326   : > { %2111 = vmatpush1.msra.mxu0 %v7863_v46  ;;  %v1733_v46 = vsel %vm12163_vm0, %v8057_v23, %v8025_v21  ;;  %v1653_v23 = vsel %vm12167_vm15, %v8073_v55, %v8041_v28  ;;  %vm12168_vm0 = vmmov %vm12166_vm9 }
 0x327   : > { %v8335_v33 = vpop.permute.xlu1 %1875  ;;  %2031 = vrot.lane.b32.xlu0 %v8129_v2, %s7057_s27  ;;  %5890 = vmatprep.subr.msk.mxu0 %vm7510_vm6, %v1740_v50  ;;  %v1683_v44 = vsel %vm12168_vm0, 0.0, %v8073_v55  ;;  %vm5898_vm14 = vmneg %vm12169_vm4  ;;  %vm12173_vm0 = vcmask 269312  }
 0x328   : > { %5891 = vmatpush1.msk.msra.mxu0 %vm7531_vm8, %v1764_v48  ;;  %vm12170_vm9 = vmmov %vm12169_vm4  ;;  %v1516_v13 = vsel %vm12173_vm0, %v8243_v57, %v8213_v52 }
 0x329   : > { %5892 = vmatprep.subr.msk.mxu0 %vm7510_vm6, %v1733_v46  ;;  %v8350_v59 = vpop.permute.xlu0 %1713  ;;  %v1596_v5 = vsel %vm12170_vm9, %v8227_v9, %v8197_v24  ;;  %vm12171_vm15 = vmmov %vm12169_vm4 }
 0x32a   : > { %5893 = vmatpush1.msk.msra.mxu0 %vm7531_vm8, %v1763_v40  ;;  %v1589_v55 = vsel %vm12171_vm15, %v8091_v45, %v8059_v34  ;;  %vm12174_vm4 = vmmov %vm12173_vm0  ;;  %vm12177_vm15 = vcmask 777216  }
 0x32b   : > { %v8359_v51 = vpop.permute.xlu1 %1795  ;;  %2015 = vrot.lane.b32.xlu0 %v8075_v0, %s7057_s27  ;;  %5894 = vmatprep.subr.msk.mxu0 %vm7492_vm1, %v1660_v12  ;;  %v1540_v11 = vsel %vm12174_vm4, 0.0, %v8243_v57  ;;  %vm12175_vm9 = vmmov %vm12173_vm0  ;;  %v2045_v57 = vsel %vm12177_vm15, %v2024_v16, %v8131_v62  ;;  %v8446_v12 = vld [vmem:[#allocation4 + $0x10] sm:$0xff] }
 0x32c   : > { %5895 = vmatpush1.msk.msra.mxu0 %vm7518_vm7, %v1684_v39 }
 0x32d   : > { %5896 = vmatprep.subr.msk.mxu0 %vm7492_vm1, %v1653_v23  ;;  %v8374_v1 = vpop.permute.xlu0 %1629 }
 0x32e   : > { %5897 = vmatpush1.msk.msra.mxu0 %vm7518_vm7, %v1683_v44 }
 0x32f   : > { %v8382_v53 = vpop.permute.xlu1 %1711  ;;  %2035 = vrot.lane.b32.xlu0 %v8155_v36, %s7057_s27  ;;  %2120 = vmatprep.subr.mxu0 %v1596_v5 }
 0x330   : > { %5899 = vmatpush1.msk.msra.mxu0 %vm5898_vm14, %v8227_v9  ;;  %v1509_v9 = vsel %vm12175_vm9, %v8107_v19, %v8077_v49 }
 0x331   : > { %2122 = vmatprep.subr.mxu0 %v1589_v55  ;;  %v8390_v4 = vpop.permute.xlu0 %1633 }
 0x332   : > { %12172 = vst [vmem:[#allocation71_spill] sm:$0xff] %v8390_v4  ;;  %5901 = vmatpush1.msk.msra.mxu0 %vm5898_vm14, %v8091_v45  ;;  %vm12176_vm14 = vmmov %vm12173_vm0  ;;  %v12234_v4 = vld [vmem:[#allocation64_spill] sm:$0xff] }
 0x333   : > { %v8398_v63 = vpop.permute.xlu1 %1715  ;;  %5902 = vmatprep.subr.msk.mxu0 %vm7510_vm6, %v1516_v13  ;;  %v1539_v45 = vsel %vm12176_vm14, 0.0, %v8107_v19  ;;  %vm12178_vm0 = vmmov %vm12177_vm15  ;;  %vm12187_vm14 = vcmask 793600  }
 0x334   : > { %5903 = vmatpush1.msk.msra.mxu0 %vm7531_vm8, %v1540_v11  ;;  %v2044_v48 = vsel %vm12178_vm0, %v8259_v43, %v2024_v16  ;;  %v8437_v16 = vld [vmem:[#allocation4 + $0x18] sm:$0xff]  ;;  %vm12188_vm15 = vmmov %vm12187_vm14 }
 0x335   : > { %5904 = vmatprep.subr.msk.mxu0 %vm7510_vm6, %v1509_v9  ;;  %v8411_v50 = vpop.permute.xlu0 %1951  ;;  %vm12179_vm6 = vmmov %vm12178_vm0  ;;  %v12190_v9 = vld [vmem:[#allocation67_spill] sm:$0xff] }
 0x336   : > { %5905 = vmatpush1.msk.msra.mxu0 %vm7531_vm8, %v1539_v45  ;;  %v2038_v26 = vsel %vm12179_vm6, %v8093_v56, %v8127_v27  ;;  %vm12180_vm8 = vmmov %vm12178_vm0  ;;  %v12191_v45 = vld [vmem:[#allocation55_spill] sm:$0xff] }
 0x337   : > { %v8419_v46 = vpop.permute.xlu1 %1631  ;;  %5906 = vmatprep.subr.msk.mxu0 %vm7492_vm1, %v2045_v57  ;;  %v2037_v19 = vsel %vm12180_vm8, %v7989_v54, %v8093_v56  ;;  %vm12192_vm0 = vmmov %vm12187_vm14  ;;  %vm12195_vm8 = vcmask 1039360  }
 0x338   : > { %5907 = vmatpush2.msk.msra.mxu0 %vm7518_vm7, %v2044_v48  ;;  %vm12193_vm6 = vmmov %vm12192_vm0 }
 0x339   : > { %5908 = vmatprep.subr.msk.mxu0 %vm7492_vm1, %v2038_v26  ;;  %v8435_v43 = vpop.permute.xlu0 %1871  ;;  %vm12183_vm1 = vcmask 785408   ;;  %v12197_v26 = vld [vmem:[#allocation30_spill] sm:$0xff] }
 0x33a   : > { %5909 = vmatpush2.msk.msra.mxu0 %vm7518_vm7, %v2037_v19  ;;  %vm12184_vm7 = vmmov %vm12183_vm1  ;;  %v12201_v19 = vld [vmem:[#allocation69_spill] sm:$0xff] }
 0x33b   : > { %v8441_v40 = vpop.permute.xlu1 %1635  ;;  %2161 = vmatmul.mubr.f32.vlgmr.msra.gmra.mxu0 %v8428_v38  ;;  %v1982_v23 = vsel %vm12184_vm7, %v8101_v61, %v8139_v14  ;;  %vm12185_vm4 = vmmov %vm12183_vm1  ;;  %vm12198_vm7 = vnez %v12197_v26 }
 0x33c   : > { %12181 = vst [vmem:[#allocation72_spill] sm:$0xff] %v8441_v40  ;;  %5911 = vmatprep.mubr.msk.f32.mxu0 %vm2089_vm5, %v8437_v16  ;;  %v1976_v44 = vsel %vm12185_vm4, %v8137_v42, %v8237_v58  ;;  %vm12186_vm9 = vmmov %vm12183_vm1  ;;  %v12235_v40 = vld [vmem:[#allocation68_spill] sm:$0xff] }
 0x33d   : > { %v8448_v54 = vpop.permute.xlu0 %1791  ;;  %v1975_v55 = vsel %vm12186_vm9, %v8031_v25, %v8137_v42  ;;  %v1896_v25 = vsel %vm12192_vm0, %v12191_v45, %v12190_v9  ;;  %v1895_v42 = vsel %vm12193_vm6, %v8039_v22, %v12191_v45  ;;  %v12199_v22 = vld [vmem:[#allocation31_spill] sm:$0xff]  ;;  %v12208_v45 = vld [vmem:[#allocation42_spill] sm:$0xff] }
 0x33e   : > { %vm12200_vm4 = vnez %v12199_v22 }
 0x33f   : > { %v8450_v17 = vpop.permute.xlu1 %1567  ;;  %2167 = vmatmul.mubr.f32.gmra.mxu0 %v8446_v12 }
 0x340   : > { %12182 = vst [vmem:[#allocation73_spill] sm:$0xff] %v8450_v17  ;;  %5962 = vmatprep.mubr.msk.f32.mxu0 %vm2089_vm5, %v8157_v41 }
 0x341   : > { %v8455_v29 = vpop.permute.xlu0 %1965 }
 0x342   : > { %v1983_v56 = vsel %vm12183_vm1, %v8139_v14, %v8455_v29  ;;  %v1902_v14 = vsel %vm12188_vm15, %v8111_v10, %v8147_v35  ;;  %vm12196_vm1 = vmmov %vm12195_vm8  ;;  %vm12212_vm15 = vcmask 7168  }
 0x343   : > { %v8460_v39 = vpop.permute.xlu1 %1969  ;;  %2173 = vmatprep.subr.mxu1 %v1983_v56  ;;  %v12202_v56 = vld [vmem:[#allocation56_spill] sm:$0xff]  ;;  %vm12203_vm9 = vmmov %vm12196_vm1 }
 0x344   : > { %2174 = vmatpush1.msra.mxu1 %v1982_v23  ;;  %v1816_v23 = vsel %vm12203_vm9, %v12202_v56, %v12201_v19  ;;  %vm12213_vm0 = vmmov %vm12212_vm15 }
 0x345   : > { %2175 = vmatprep.subr.mxu1 %v1976_v44  ;;  %v8468_v5 = vpop.permute.xlu0 %1885  ;;  %vm12216_vm6 = vmmov %vm12213_vm0 }
 0x346   : > { %2176 = vmatpush1.msra.mxu1 %v1975_v55  ;;  %v1903_v13 = vsel %vm12187_vm14, %v8147_v35, %v8468_v5  ;;  %v12194_v35 = vld [vmem:[#allocation57_spill] sm:$0xff]  ;;  %vm12204_vm14 = vmmov %vm12196_vm1 }
 0x347   : > { %v8479_v61 = vpop.permute.xlu1 %1887  ;;  %5912 = vmatprep.subr.msk.mxu1 %vm7623_vm13, %v1903_v13  ;;  %v1822_v48 = vsel %vm12196_vm1, %v8121_v6, %v12194_v35  ;;  %v1815_v44 = vsel %vm12204_vm14, %v8047_v30, %v12202_v56  ;;  %v12206_v13 = vld [vmem:[#allocation44_spill] sm:$0xff]  ;;  %v12210_v30 = vld [vmem:[#allocation59_spill] sm:$0xff]  ;;  %vm12220_vm1 = vcmask 252928  }
 0x348   : > { %5913 = vmatpush1.msk.msra.mxu1 %vm7629_vm12, %v1902_v14  ;;  %v12207_v14 = vld [vmem:[#allocation43_spill] sm:$0xff]  ;;  %vm12221_vm9 = vmmov %vm12220_vm1 }
 0x349   : > { %5914 = vmatprep.subr.msk.mxu1 %vm7623_vm13, %v1896_v25  ;;  %v8493_v10 = vpop.permute.xlu0 %1805  ;;  %vm12224_vm14 = vmmov %vm12220_vm1 }
 0x34a   : > { %5915 = vmatpush1.msk.msra.mxu1 %vm7629_vm12, %v1895_v42  ;;  %v1823_v57 = vsel %vm12195_vm8, %v12194_v35, %v8493_v10  ;;  %v12209_v42 = vld [vmem:[#allocation41_spill] sm:$0xff]  ;;  %vm12217_vm8 = vmmov %vm12213_vm0 }
 0x34b   : > { %5916 = vmatprep.subr.msk.mxu1 %vm12198_vm7, %v1823_v57  ;;  %v8513_v55 = vpop.permute.xlu1 %1807  ;;  %v12211_v35 = vld [vmem:[#allocation61_spill] sm:$0xff] }
 0x34c   : > { %5917 = vmatpush1.msk.msra.mxu1 %vm12200_vm4, %v1822_v48  ;;  %v1742_v57 = vsel %vm12212_vm15, %v12211_v35, %v12210_v30  ;;  %v1741_v48 = vsel %vm12213_vm0, %v8171_v37, %v12211_v35  ;;  %vm12225_vm15 = vmmov %vm12220_vm1  ;;  %vm12228_vm0 = vcmask 261120  }
 0x34d   : > { %5918 = vmatprep.subr.msk.mxu1 %vm12198_vm7, %v1816_v23  ;;  %v8517_v6 = vpop.permute.xlu0 %1565  ;;  %v12214_v23 = vld [vmem:[#allocation45_spill] sm:$0xff] }
 0x34e   : > { %12205 = vst [vmem:[#allocation32_spill] sm:$0xff] %v8517_v6  ;;  %5919 = vmatpush1.msk.msra.mxu1 %vm12200_vm4, %v1815_v44  ;;  %v12215_v44 = vld [vmem:[#allocation48_spill] sm:$0xff] }
 0x34f   : > { %2185 = vmatprep.subr.mxu1 %v12206_v13  ;;  %v8533_v56 = vpop.permute.xlu1 %1727  ;;  %v1735_v13 = vsel %vm12216_vm6, %v12215_v44, %v12214_v23  ;;  %vm12229_vm6 = vmmov %vm12228_vm0 }
 0x350   : > { %2186 = vmatpush1.msra.mxu1 %v12207_v14  ;;  %v1734_v14 = vsel %vm12217_vm8, %v8025_v21, %v12215_v44  ;;  %v12222_v21 = vld [vmem:[#allocation47_spill] sm:$0xff]  ;;  %vm12232_vm8 = vmmov %vm12228_vm0 }
 0x351   : > { %2187 = vmatprep.subr.mxu1 %v12208_v45  ;;  %v8524_v25 = vpop.permute.xlu0 %2029  ;;  %v12218_v45 = vld [vmem:[#allocation60_spill] sm:$0xff] }
 0x352   : > { %2188 = vmatpush1.msra.mxu1 %v12209_v42  ;;  %v12219_v42 = vld [vmem:[#allocation63_spill] sm:$0xff] }
 0x353   : > { %5920 = vmatprep.subr.msk.mxu1 %vm7623_vm13, %v1742_v57  ;;  %v1662_v35 = vsel %vm12220_vm1, %v12219_v42, %v12218_v45  ;;  %v1661_v57 = vsel %vm12221_vm9, %v8183_v47, %v12219_v42  ;;  %v12226_v42 = vld [vmem:[#allocation62_spill] sm:$0xff]  ;;  %vm12233_vm1 = vmmov %vm12228_vm0  ;;  %vm12236_vm9 = vcmask 269312  }
 0x354   : > { %5921 = vmatpush1.msk.msra.mxu1 %vm7629_vm12, %v1741_v48  ;;  %v12223_v48 = vld [vmem:[#allocation50_spill] sm:$0xff] }
 0x355   : > { %5922 = vmatprep.subr.msk.mxu1 %vm7623_vm13, %v1735_v13  ;;  %v8547_v37 = vpop.permute.xlu0 %1889  ;;  %v1655_v44 = vsel %vm12224_vm14, %v12223_v48, %v12222_v21  ;;  %v1654_v13 = vsel %vm12225_vm15, %v8041_v28, %v12223_v48  ;;  %v12230_v28 = vld [vmem:[#allocation49_spill] sm:$0xff]  ;;  %v12231_v48 = vld [vmem:[#allocation52_spill] sm:$0xff]  ;;  %vm12237_vm14 = vmmov %vm12236_vm9 }
 0x356   : > { %5923 = vmatpush1.msk.msra.mxu1 %vm7629_vm12, %v1734_v14  ;;  %v8567_v14 = vpop.permute.xlu1 %1731  ;;  %v1591_v17 = vsel %vm12232_vm8, %v12231_v48, %v12230_v28  ;;  %vm12240_vm15 = vmmov %vm12236_vm9 }
 0x357   : > { %5924 = vmatprep.subr.msk.mxu1 %vm12198_vm7, %v1662_v35  ;;  %v12227_v35 = vld [vmem:[#allocation66_spill] sm:$0xff] }
 0x358   : > { %5925 = vmatpush1.msk.msra.mxu1 %vm12200_vm4, %v1661_v57  ;;  %v1598_v57 = vsel %vm12228_vm0, %v12227_v35, %v12226_v42  ;;  %v1597_v6 = vsel %vm12229_vm6, %v8197_v24, %v12227_v35  ;;  %v1517_v24 = vsel %vm12237_vm14, %v8213_v52, %v12235_v40  ;;  %v12239_v35 = vld [vmem:[#allocation54_spill] sm:$0xff]  ;;  %vm12241_vm0 = vmmov %vm12236_vm9  ;;  %vm12243_vm6 = vcmask 777216  }
 0x359   : > { %5926 = vmatprep.subr.msk.mxu1 %vm12198_vm7, %v1655_v44  ;;  %v8571_v47 = vpop.permute.xlu0 %1809  ;;  %vm12244_vm8 = vmmov %vm12243_vm6 }
 0x35a   : > { %5927 = vmatpush1.msk.msra.mxu1 %vm12200_vm4, %v1654_v13  ;;  %v1590_v13 = vsel %vm12233_vm1, %v8059_v34, %v12231_v48  ;;  %v1510_v48 = vsel %vm12241_vm0, %v8077_v49, %v12239_v35  ;;  %v12246_v49 = vld [vmem:[#allocation58_spill] sm:$0xff] }
 0x35b   : > { %2197 = vmatprep.subr.mxu1 %v1598_v57  ;;  %v1518_v57 = vsel %vm12236_vm9, %v12235_v40, %v12234_v4  ;;  %v12242_v40 = vld [vmem:[#allocation65_spill] sm:$0xff] }
 0x35c   : > { %2198 = vmatpush1.msra.mxu1 %v1597_v6  ;;  %v8595_v6 = vpop.permute.xlu1 %1647 }
 0x35d   : > { %2199 = vmatprep.subr.mxu1 %v1591_v17  ;;  %v8584_v44 = vpop.permute.xlu0 %1725  ;;  %v12238_v17 = vld [vmem:[#allocation51_spill] sm:$0xff] }
 0x35e   : > { %2200 = vmatpush1.msra.mxu1 %v1590_v13  ;;  %v1511_v34 = vsel %vm12240_vm15, %v12239_v35, %v12238_v17  ;;  %v2047_v13 = vsel %vm12243_vm6, %v12242_v40, %v8524_v25  ;;  %vm12254_vm15 = vcmask 793600  }
 0x35f   : > { %5928 = vmatprep.subr.msk.mxu1 %vm7623_vm13, %v1518_v57  ;;  %v2046_v57 = vsel %vm12244_vm8, %v8131_v62, %v12242_v40 }
 0x360   : > { %5929 = vmatpush1.msk.msra.mxu1 %vm7629_vm12, %v1517_v24  ;;  %v8629_v35 = vpop.permute.xlu1 %1651 }
 0x361   : > { %5930 = vmatprep.subr.msk.mxu1 %vm7623_vm13, %v1511_v34  ;;  %v8609_v52 = vpop.permute.xlu0 %1729  ;;  %vm12247_vm13 = vmmov %vm12243_vm6 }
 0x362   : > { %5931 = vmatpush1.msk.msra.mxu1 %vm7629_vm12, %v1510_v48  ;;  %v2040_v24 = vsel %vm12247_vm13, %v12246_v49, %v12245_v60  ;;  %vm12248_vm12 = vmmov %vm12243_vm6 }
 0x363   : > { %5932 = vmatprep.subr.msk.mxu1 %vm12198_vm7, %v2047_v13  ;;  %v2039_v11 = vsel %vm12248_vm12, %v8127_v27, %v12246_v49  ;;  %vm12256_vm6 = vmmov %vm12254_vm15 }
 0x364   : > { %5933 = vmatpush2.msk.msra.mxu1 %vm12200_vm4, %v2046_v57  ;;  %v8642_v48 = vpop.permute.xlu1 %1583 }
 0x365   : > { %5934 = vmatprep.subr.msk.mxu1 %vm12198_vm7, %v2040_v24  ;;  %v8633_v62 = vpop.permute.xlu0 %1645  ;;  %vm12249_vm7 = vcmask 785408  }
 0x366   : > { %5935 = vmatpush2.msk.msra.mxu1 %vm12200_vm4, %v2039_v11  ;;  %vm12250_vm4 = vmmov %vm12249_vm7 }
 0x367   : > { %2238 = vmatmul.mubr.f32.vlgmr.msra.gmra.mxu1 %v8428_v38  ;;  %vm12251_vm1 = vmmov %vm12250_vm4 }
 0x368   : > { %5937 = vmatprep.mubr.msk.f32.mxu1 %vm2089_vm5, %v8437_v16  ;;  %v8649_v26 = vpop.permute.xlu1 %1587  ;;  %vm12252_vm9 = vmmov %vm12251_vm1 }
 0x369   : > { %v8640_v34 = vpop.permute.xlu0 %1649  ;;  %v1977_v11 = vsel %vm12252_vm9, %v8237_v58, %v8411_v50  ;;  %vm12253_vm14 = vmmov %vm12251_vm1 }
 0x36a   : > { %vm12255_vm0 = vmmov %vm12251_vm1 }
 0x36b   : > { %2244 = vmatmul.mubr.f32.gmra.mxu1 %v8446_v12  ;;  %vm12261_vm12 = vmmov %vm12255_vm0 }
 0x36c   : > { %5990 = vmatprep.mubr.msk.f32.mxu1 %vm2089_vm5, %v8157_v41  ;;  %v8657_v49 = vpop.permute.xlu1 %1503  ;;  %v1978_v41 = vsel %vm12251_vm1, %v8411_v50, %v8268_v32  ;;  %vm12264_vm1 = vmmov %vm12256_vm6 }
 0x36d   : > { %v8647_v27 = vpop.permute.xlu0 %1581  ;;  %vm12265_vm9 = vmmov %vm12264_vm1 }
 0x371   : > { %v8651_v22 = vpop.permute.xlu0 %1585 }
 0x375   : > { %v1968_v40 = vpop.permute.xlu0 %1967 }
 0x376   : > { %v1985_v13 = vsel %vm12249_vm7, %v1968_v40, %v8460_v39  ;;  %v1984_v57 = vsel %vm12250_vm4, %v8455_v29, %v1968_v40  ;;  %v1905_v29 = vsel %vm12254_vm15, %v8479_v61, %v8547_v37  ;;  %vm12262_vm7 = vmmov %vm12256_vm6 }
 0x377   : > { %2250 = vmatprep.subr.mxu0 %v1985_v13  ;;  %v1904_v13 = vsel %vm12256_vm6, %v8468_v5, %v8479_v61  ;;  %v1898_v58 = vsel %vm12262_vm7, %v8435_v43, %v8281_v3  ;;  %vm12263_vm4 = vmmov %vm12255_vm0  ;;  %v8689_v5 = vpop.permute.xlu1 %1571 }
 0x378   : > { %2251 = vmatpush1.msra.mxu0 %v1984_v57  ;;  %v12257_v57 = vld [vmem:[#allocation36_spill] sm:$0xff]  ;;  %v1979_v50 = vsel %vm12263_vm4, %v8268_v32, %v8320_v7  ;;  %vm12267_vm15 = vmmov %vm12264_vm1 }
 0x379   : > { %2252 = vmatprep.subr.mxu0 %v1978_v41  ;;  %v1972_v24 = vpop.permute.xlu0 %1971  ;;  %vm12258_vm8 = vnez %v12257_v57  ;;  %v12259_v41 = vld [vmem:[#allocation35_spill] sm:$0xff]  ;;  %vm12276_vm4 = vmmov %vm12264_vm1 }
 0x37a   : > { %2253 = vmatpush1.msra.mxu0 %v1977_v11  ;;  %5964 = vmatprep.subr.msk.mxu1 %vm12253_vm14, %v1972_v24  ;;  %v1986_v40 = vsel %vm12255_vm0, %v8460_v39, %v1972_v24  ;;  %vm12260_vm13 = vnez %v12259_v41  ;;  %v1897_v39 = vsel %vm12264_vm1, %v12190_v9, %v8435_v43  ;;  %vm12266_vm14 = vcmask 1039360   ;;  %v12269_v9 = vld [vmem:[#allocation34_spill] sm:$0xff] }
 0x37b   : > { %5938 = vmatprep.subr.msk.mxu0 %vm12258_vm8, %v1905_v29  ;;  %2328 = vmatpush1.msra.mxu1 %v1986_v40  ;;  %v1825_v32 = vsel %vm12266_vm14, %v8513_v55, %v8571_v47  ;;  %vm12268_vm0 = vmmov %vm12266_vm14  ;;  %vm12270_vm6 = vnez %v12269_v9  ;;  %v8898_v11 = vld [vmem:[#allocation7 + $0x70] sm:$0xff] }
 0x37c   : > { %5939 = vmatpush1.msk.msra.mxu0 %vm12260_vm13, %v1904_v13  ;;  %5965 = vmatprep.subr.msk.mxu1 %vm12261_vm12, %v8320_v7  ;;  %v1824_v43 = vsel %vm12268_vm0, %v8493_v10, %v8513_v55  ;;  %vm12275_vm7 = vmmov %vm12268_vm0  ;;  %v1923_v13 = vsel %vm12276_vm4, %v8335_v33, 0.0  ;;  %v1899_v10 = vsel %vm12264_vm1, %v8281_v3, %v8335_v33  ;;  %v8734_v33 = vpop.permute.xlu1 %1487  ;;  %vm12284_vm4 = vcmask 7168  }
 0x37d   : > { %5940 = vmatprep.subr.msk.mxu0 %vm12258_vm8, %v1898_v58  ;;  %2330 = vmatpush1.msra.mxu1 %v1979_v50  ;;  %v1892_v61 = vpop.permute.xlu0 %1891  ;;  %v1818_v40 = vsel %vm12275_vm7, %v8448_v54, %v8302_v15  ;;  %vm12278_vm14 = vmmov %vm12268_vm0 }
 0x37e   : > { %v1906_v24 = vsel %vm12265_vm9, %v8547_v37, %v1892_v61  ;;  %5941 = vmatpush1.msk.msra.mxu0 %vm12260_vm13, %v1897_v39  ;;  %v1924_v7 = vsel %vm12267_vm15, %v1892_v61, 0.0  ;;  %v12272_v37 = vld [vmem:[#allocation33_spill] sm:$0xff]  ;;  %vm12277_vm9 = vmmov %vm12268_vm0 }
 0x37f   : > { %5942 = vmatprep.subr.msk.mxu0 %vm12270_vm6, %v1825_v32  ;;  %5966 = vmatprep.subr.msk.mxu1 %vm7802_vm10, %v1924_v7  ;;  %vm12273_vm12 = vnez %v12272_v37  ;;  %v1817_v55 = vsel %vm12277_vm9, %v12201_v19, %v8448_v54  ;;  %vm12279_vm15 = vmmov %vm12268_vm0  ;;  %v12281_v19 = vld [vmem:[#allocation53_spill] sm:$0xff] }
 0x380   : > { %5943 = vmatpush1.msk.msra.mxu0 %vm12273_vm12, %v1824_v43  ;;  %5967 = vmatpush1.msk.msra.mxu1 %vm7798_vm3, %v1906_v24  ;;  %vm12283_vm7 = vmmov %vm12268_vm0  ;;  %v1744_v24 = vsel %vm12284_vm4, %v8584_v44, %v8533_v56  ;;  %v12304_v43 = vld [vmem:[#allocation32_spill] sm:$0xff] }
 0x381   : > { %5944 = vmatprep.subr.msk.mxu0 %vm12270_vm6, %v1818_v40  ;;  %5968 = vmatprep.subr.msk.mxu1 %vm7802_vm10, %v1923_v13  ;;  %v1812_v58 = vpop.permute.xlu0 %1811  ;;  %v1819_v61 = vsel %vm12283_vm7, %v8302_v15, %v8359_v51  ;;  %vm12285_vm1 = vmmov %vm12284_vm4  ;;  %v1508_v15 = vpop.permute.xlu1 %1507 }
 0x382   : > { %v1826_v50 = vsel %vm12278_vm14, %v8571_v47, %v1812_v58  ;;  %5945 = vmatpush1.msk.msra.mxu0 %vm12273_vm12, %v1817_v55  ;;  %5969 = vmatpush1.msk.msra.mxu1 %vm7798_vm3, %v1899_v10  ;;  %v1844_v3 = vsel %vm12279_vm15, %v1812_v58, 0.0  ;;  %v1843_v47 = vsel %vm12268_vm0, %v8359_v51, 0.0  ;;  %v1743_v32 = vsel %vm12285_vm1, %v12210_v30, %v8584_v44  ;;  %vm12286_vm9 = vmmov %vm12285_vm1  ;;  %v12288_v51 = vld [vmem:[#allocation46_spill] sm:$0xff] }
 0x383   : > { %2262 = vmatprep.subr.mxu0 %v8129_v2  ;;  %5970 = vmatprep.subr.msk.mxu1 %vm7781_vm11, %v1844_v3  ;;  %vm12287_vm14 = vmmov %vm12285_vm1  ;;  %vm12289_vm15 = vcmask 252928   ;;  %v8892_v3 = vld [vmem:[#allocation7 + $0x78] sm:$0xff] }
 0x384   : > { %2263 = vmatpush1.msra.mxu0 %v12281_v19  ;;  %5971 = vmatpush1.msk.msra.mxu1 %vm7775_vm2, %v1826_v50  ;;  %vm12290_vm0 = vmmov %vm12285_vm1 }
 0x385   : > { %2264 = vmatprep.subr.mxu0 %v8075_v0  ;;  %5972 = vmatprep.subr.msk.mxu1 %vm7781_vm11, %v1843_v47  ;;  %v1502_v2 = vpop.permute.xlu0 %1501  ;;  %v1736_v0 = vsel %vm12287_vm14, %v12214_v23, %v8327_v31  ;;  %vm12291_vm7 = vmmov %vm12290_vm0  ;;  %v11784_v47 = vunpack.c.h.bf16 %v8892_v3 }
 0x386   : > { %2265 = vmatpush1.msra.mxu0 %v8001_v18  ;;  %5973 = vmatpush1.msk.msra.mxu1 %vm7775_vm2, %v1819_v61  ;;  %v1737_v18 = vsel %vm12286_vm9, %v8327_v31, %v8382_v53  ;;  %v1746_v31 = vsel %vm12290_vm0, %v8609_v52, %v8567_v14  ;;  %v1745_v30 = vsel %vm12291_vm7, %v8533_v56, %v8609_v52  ;;  %vm12292_vm4 = vmmov %vm12289_vm15  ;;  %v12300_v52 = vld [vmem:[#allocation72_spill] sm:$0xff]  ;;  %v11783_v61 = vunpack.c.l.bf16 %v8892_v3 }
 0x387   : > { %5946 = vmatprep.subr.msk.mxu0 %vm12258_vm8, %v1744_v24  ;;  %2339 = vmatprep.subr.mxu1 %v8155_v36  ;;  %v1663_v23 = vsel %vm12292_vm4, %v12218_v45, %v8633_v62  ;;  %vm12293_vm1 = vmmov %vm12290_vm0  ;;  %v8908_v24 = vld [vmem:[#allocation7 + $0x68] sm:$0xff] }
 0x388   : > { %5947 = vmatpush1.msk.msra.mxu0 %vm12260_vm13, %v1743_v32  ;;  %2340 = vmatpush1.msra.mxu1 %v8119_v8  ;;  %v1664_v8 = vsel %vm12289_vm15, %v8633_v62, %v8595_v6  ;;  %vm12294_vm9 = vmmov %vm12292_vm4  ;;  %v12301_v62 = vld [vmem:[#allocation71_spill] sm:$0xff]  ;;  %v11777_v32 = vunpack.c.l.bf16 %v8898_v11  ;;  %v11772_v37 = vunpack.c.h.bf16 %v8908_v24 }
 0x389   : > { %5948 = vmatprep.subr.msk.mxu0 %vm12258_vm8, %v1737_v18  ;;  %2341 = vmatprep.subr.mxu1 %v12288_v51  ;;  %v1570_v36 = vpop.permute.xlu0 %1569  ;;  %v1657_v56 = vsel %vm12294_vm9, %v8374_v1, %v8419_v46  ;;  %vm12295_vm14 = vmmov %vm12292_vm4  ;;  %v8925_v51 = vld [vmem:[#allocation7 + $0x178] sm:$0xff] }
 0x38a   : > { %5949 = vmatpush1.msk.msra.mxu0 %vm12260_vm13, %v1736_v0  ;;  %2342 = vmatpush1.msra.mxu1 %v8023_v20  ;;  %v1739_v20 = vsel %vm12293_vm1, %v8350_v59, %v8398_v63  ;;  %v1656_v45 = vsel %vm12295_vm14, %v12222_v21, %v8374_v1  ;;  %vm12296_vm15 = vmmov %vm12290_vm0  ;;  %vm12297_vm0 = vcmask 261120   ;;  %v1492_v21 = vpop.permute.xlu1 %1491  ;;  %v8916_v0 = vld [vmem:[#allocation7 + $0x60] sm:$0xff] }
 0x38b   : > { %5950 = vmatprep.subr.msk.mxu0 %vm12270_vm6, %v1664_v8  ;;  %5974 = vmatprep.subr.msk.mxu1 %vm7802_vm10, %v1746_v31  ;;  %v1738_v14 = vsel %vm12296_vm15, %v8382_v53, %v8350_v59  ;;  %v1600_v1 = vsel %vm12297_vm0, %v8647_v27, %v8642_v48  ;;  %vm12298_vm7 = vmmov %vm12292_vm4  ;;  %v1665_v53 = vsel %vm12292_vm4, %v8595_v6, %v8640_v34  ;;  %v8932_v8 = vld [vmem:[#allocation7 + $0x58] sm:$0xff] }
 0x38c   : > { %5951 = vmatpush1.msk.msra.mxu0 %vm12273_vm12, %v1663_v23  ;;  %5975 = vmatpush1.msk.msra.mxu1 %vm7798_vm3, %v1745_v30  ;;  %v1666_v59 = vsel %vm12298_vm7, %v8640_v34, %v8629_v35  ;;  %vm12299_vm1 = vmmov %vm12297_vm0  ;;  %v12303_v35 = vld [vmem:[#allocation73_spill] sm:$0xff]  ;;  %vm12307_vm7 = vcmask 269312   ;;  %v11766_v30 = vunpack.c.h.bf16 %v8916_v0  ;;  %v8940_v23 = vld [vmem:[#allocation7 + $0x170] sm:$0xff]  ;;  %v11748_v39 = vunpack.c.l.bf16 %v8932_v8 }
 0x38d   : > { %5952 = vmatprep.subr.msk.mxu0 %vm12270_vm6, %v1657_v56  ;;  %5976 = vmatprep.subr.msk.mxu1 %vm7802_vm10, %v1739_v20  ;;  %v1486_v63 = vpop.permute.xlu0 %1485  ;;  %v1599_v44 = vsel %vm12299_vm1, %v12226_v42, %v8647_v27  ;;  %vm12302_vm9 = vmmov %vm12292_vm4  ;;  %v1592_v27 = vsel %vm12297_vm0, %v12230_v28, %v12304_v43  ;;  %v1520_v40 = vsel %vm12307_vm7, %v1502_v2, %v8657_v49  ;;  %v11760_v56 = vunpack.c.l.bf16 %v8916_v0 }
 0x38e   : > { %5953 = vmatpush1.msk.msra.mxu0 %vm12273_vm12, %v1656_v45  ;;  %5977 = vmatpush1.msk.msra.mxu1 %vm7798_vm3, %v1738_v14  ;;  %v1659_v7 = vsel %vm12302_vm9, %v12301_v62, %v12300_v52  ;;  %vm12305_vm14 = vmmov %vm12297_vm0  ;;  %v2034_v55 = vpop.permute.xlu1 %2033  ;;  %v11765_v45 = vunpack.c.h.bf16 %v8925_v51  ;;  %v11759_v14 = vunpack.c.l.bf16 %v8925_v51  ;;  %v11753_v54 = vunpack.c.h.bf16 %v8940_v23 }
 0x38f   : > { %2274 = vmatprep.subr.mxu0 %v1600_v1  ;;  %5978 = vmatprep.subr.msk.mxu1 %vm7781_vm11, %v1666_v59  ;;  %v1593_v6 = vsel %vm12305_vm14, %v12304_v43, %v12303_v35  ;;  %vm12306_vm15 = vmmov %vm12292_vm4  ;;  %v8954_v1 = vld [vmem:[#allocation7 + $0x50] sm:$0xff]  ;;  %v8956_v59 = vld [vmem:[#allocation7 + $0x168] sm:$0xff] }
 0x390   : > { %2275 = vmatpush1.msra.mxu0 %v1599_v44  ;;  %5979 = vmatpush1.msk.msra.mxu1 %vm7775_vm2, %v1665_v53  ;;  %v1658_v34 = vsel %vm12306_vm15, %v8419_v46, %v12301_v62  ;;  %vm12308_vm4 = vmmov %vm12297_vm0  ;;  %v11747_v53 = vunpack.c.l.bf16 %v8940_v23  ;;  %v8970_v44 = vld [vmem:[#allocation7 + $0x160] sm:$0xff]  ;;  %v11736_v52 = vunpack.c.l.bf16 %v8954_v1  ;;  %v11735_v62 = vunpack.c.l.bf16 %v8956_v59 }
 0x391   : > { %2276 = vmatprep.subr.mxu0 %v1593_v6  ;;  %5980 = vmatprep.subr.msk.mxu1 %vm7781_vm11, %v1659_v7  ;;  %v1506_v42 = vpop.permute.xlu0 %1505  ;;  %v1602_v46 = vsel %vm12308_vm4, %v8651_v22, %v8649_v26  ;;  %vm12309_vm1 = vmmov %vm12307_vm7  ;;  %v8984_v7 = vld [vmem:[#allocation7 + $0x40] sm:$0xff]  ;;  %v11729_v6 = vunpack.c.h.bf16 %v8970_v44 }
 0x392   : > { %2277 = vmatpush1.msra.mxu0 %v1592_v27  ;;  %5981 = vmatpush1.msk.msra.mxu1 %vm7775_vm2, %v1658_v34  ;;  %v1519_v13 = vsel %vm12309_vm1, %v12234_v4, %v1502_v2  ;;  %vm12310_vm9 = vmmov %vm12297_vm0  ;;  %v2018_v19 = vpop.permute.xlu1 %2017  ;;  %v11778_v2 = vunpack.c.h.bf16 %v8898_v11  ;;  %v8999_v27 = vld [vmem:[#allocation7 + $0x38] sm:$0xff] }
 0x393   : > { %5954 = vmatprep.subr.msk.mxu0 %vm12258_vm8, %v1520_v40  ;;  %2351 = vmatprep.subr.mxu1 %v1602_v46  ;;  %v1601_v28 = vsel %vm12310_vm9, %v8642_v48, %v8651_v22  ;;  %vm12311_vm14 = vmmov %vm12309_vm1  ;;  %v11718_v40 = vunpack.c.h.bf16 %v8984_v7 }
 0x394   : > { %5955 = vmatpush1.msk.msra.mxu0 %vm12260_vm13, %v1519_v13  ;;  %2352 = vmatpush1.msra.mxu1 %v1601_v28  ;;  %v1513_v10 = vsel %vm12311_vm14, %v1486_v63, %v8734_v33  ;;  %vm12312_vm15 = vmmov %vm12297_vm0  ;;  %v11712_v13 = vunpack.c.l.bf16 %v8984_v7 }
 0x395   : > { %v1595_v26 = vsel %vm12312_vm15, %v1570_v36, %v8689_v5  ;;  %vm12313_vm0 = vmmov %vm12309_vm1  ;;  %5956 = vmatprep.subr.msk.mxu0 %vm12258_vm8, %v1513_v10  ;;  %v1490_v58 = vpop.permute.xlu0 %1489  ;;  %v9015_v10 = vld [vmem:[#allocation7 + $0x30] sm:$0xff] }
 0x396   : > { %v1512_v4 = vsel %vm12313_vm0, %v12238_v17, %v1486_v63  ;;  %2353 = vmatprep.subr.mxu1 %v1595_v26  ;;  %vm12314_vm7 = vmmov %vm12308_vm4  ;;  %v2020_v18 = vpop.permute.xlu1 %2019  ;;  %v11754_v63 = vunpack.c.h.bf16 %v8932_v8  ;;  %v9017_v26 = vld [vmem:[#allocation7 + $0x148] sm:$0xff] }
 0x397   : > { %v1594_v48 = vsel %vm12314_vm7, %v12303_v35, %v1570_v36  ;;  %5957 = vmatpush1.msk.msra.mxu0 %vm12260_vm13, %v1512_v4  ;;  %vm12315_vm4 = vmmov %vm12313_vm0  ;;  %vm12319_vm13 = vcmask 777216   ;;  %v11771_v36 = vunpack.c.l.bf16 %v8908_v24  ;;  %v8986_v35 = vld [vmem:[#allocation7 + $0x158] sm:$0xff] }
 0x398   : > { %2354 = vmatpush1.msra.mxu1 %v1594_v48  ;;  %v1522_v22 = vsel %vm12315_vm4, %v1506_v42, %v1508_v15  ;;  %vm12316_vm1 = vmmov %vm12313_vm0  ;;  %v11717_v46 = vunpack.c.h.bf16 %v8986_v35  ;;  %v11711_v28 = vunpack.c.l.bf16 %v8986_v35  ;;  %vm3621_vm4 = vcmask 916480  }
 0x399   : > { %v1521_v5 = vsel %vm12316_vm1, %v8657_v49, %v1506_v42  ;;  %5982 = vmatprep.subr.msk.mxu1 %vm7802_vm10, %v1522_v22  ;;  %vm12317_vm8 = vmmov %vm12313_vm0  ;;  %v2032_v41 = vpop.permute.xlu0 %2031  ;;  %v11723_v42 = vunpack.c.l.bf16 %v8970_v44  ;;  %v9031_v22 = vld [vmem:[#allocation7 + $0x28] sm:$0xff] }
 0x39a   : > { %5983 = vmatpush1.msk.msra.mxu1 %vm7798_vm3, %v1521_v5  ;;  %v1515_v17 = vsel %vm12317_vm8, %v1490_v58, %v1492_v21  ;;  %vm12318_vm9 = vmmov %vm12313_vm0  ;;  %v2048_v50 = vsel %vm12319_vm13, %v8524_v25, %v2032_v41  ;;  %v8968_v21 = vld [vmem:[#allocation7 + $0x48] sm:$0xff]  ;;  %v9033_v5 = vld [vmem:[#allocation7 + $0x140] sm:$0xff]  ;;  %vm3600_vm8 = vcmask 924672  }
 0x39b   : > { %v1514_v57 = vsel %vm12318_vm9, %v8734_v33, %v1490_v58  ;;  %5984 = vmatprep.subr.msk.mxu1 %vm7802_vm10, %v1515_v17  ;;  %vm12320_vm14 = vmmov %vm12319_vm13  ;;  %v11730_v43 = vunpack.c.h.bf16 %v8968_v21  ;;  %v11724_v34 = vunpack.c.l.bf16 %v8968_v21  ;;  %v11700_v58 = vunpack.c.l.bf16 %v8999_v27 }
 0x39c   : > { %5985 = vmatpush1.msk.msra.mxu1 %vm7798_vm3, %v1514_v57  ;;  %v2049_v49 = vsel %vm12320_vm14, %v2032_v41, %v2034_v55  ;;  %vm12321_vm10 = vmmov %vm12319_vm13  ;;  %v11701_v17 = vunpack.c.h.bf16 %v9015_v10  ;;  %v11702_v57 = vunpack.c.h.bf16 %v9017_v26  ;;  %v11703_v41 = vunpack.c.l.bf16 %v9015_v10 }
 0x39d   : > { %5958 = vmatprep.subr.msk.mxu0 %vm12270_vm6, %v2049_v49  ;;  %v2016_v33 = vpop.permute.xlu0 %2015  ;;  %vm12322_vm3 = vmmov %vm12321_vm10  ;;  %v9047_v49 = vld [vmem:[#allocation7 + $0x20] sm:$0xff] }
 0x39e   : > { %5959 = vmatpush2.msk.msra.mxu0 %vm12273_vm12, %v2048_v50  ;;  %v2041_v25 = vsel %vm12321_vm10, %v12245_v60, %v2016_v33  ;;  %v2042_v29 = vsel %vm12322_vm3, %v2016_v33, %v2018_v19  ;;  %vm12323_vm15 = vmmov %vm12322_vm3  ;;  %v11704_v50 = vunpack.c.l.bf16 %v9017_v26  ;;  %v11707_v33 = vunpack.c.h.bf16 %v9031_v22 }
 0x39f   : > { %5960 = vmatprep.subr.msk.mxu0 %vm12270_vm6, %v2042_v29  ;;  %vm12324_vm6 = vmmov %vm12322_vm3  ;;  %v11709_v29 = vunpack.c.l.bf16 %v9031_v22  ;;  %vm12837_vm10 = vcmask 1039360  }
 0x3a0   : > { %5961 = vmatpush2.msk.msra.mxu0 %vm12273_vm12, %v2041_v25  ;;  %vm12325_vm12 = vmmov %vm12322_vm3  ;;  %v11708_v25 = vunpack.c.h.bf16 %v9033_v5 }
 0x3a1   : > { %2315 = vmatmul.mubr.f32.vlgmr.msra.gmra.mxu0 %v8428_v38  ;;  %v2036_v60 = vpop.permute.xlu0 %2035  ;;  %2788 = vmatprep.subr.mxu0 %v11784_v47  ;;  %v2067_v31 = vsel %vm12325_vm12, %v2020_v18, 0.0  ;;  %vm12326_vm0 = vmmov %vm12322_vm3  ;;  %v9303_v47 = vld [vmem:[#allocation7 + $0xa0] sm:$0xff]  ;;  %vm12841_vm12 = vcmask 7168  }
 0x3a2   : > { %v2050_v9 = vsel %vm12323_vm15, %v2034_v55, %v2036_v60  ;;  %v2068_v15 = vsel %vm12324_vm6, %v2036_v60, 0.0  ;;  %5963 = vmatprep.mubr.msk.f32.mxu0 %vm2089_vm5, %v8437_v16  ;;  %2789 = vmatpush1.msra.mxu0 %v11783_v61  ;;  %v2043_v20 = vsel %vm12326_vm0, %v2018_v19, %v2020_v18  ;;  %v11706_v55 = vunpack.c.h.bf16 %v8999_v27  ;;  %v9049_v19 = vld [vmem:[#allocation7 + $0x138] sm:$0xff]  ;;  %12332 = vst [vmem:[#allocation69_spill] sm:$0xff] %v9303_v47  ;;  %vm12838_vm3 = vmmov %vm12837_vm10 }
 0x3a3   : > { %5986 = vmatprep.subr.msk.mxu1 %vm7781_vm11, %v2068_v15  ;;  %2790 = vmatprep.subr.mxu0 %v11778_v2  ;;  %v11710_v18 = vunpack.c.l.bf16 %v9033_v5  ;;  %v9063_v60 = vld [vmem:[#allocation7 + $0x18] sm:$0xff]  ;;  %v11713_v15 = vunpack.c.h.bf16 %v9047_v49  ;;  %v9287_v2 = vld [vmem:[#allocation7 + $0xa8] sm:$0xff]  ;;  %vm12839_vm15 = vmmov %vm12838_vm3 }
 0x3a4   : > { %5987 = vmatpush2.msk.msra.mxu1 %vm7775_vm2, %v2050_v9  ;;  %2791 = vmatpush1.msra.mxu0 %v11777_v32  ;;  %v9065_v9 = vld [vmem:[#allocation7 + $0x130] sm:$0xff]  ;;  %12330 = vst [vmem:[#allocation30_spill] sm:$0xff] %v9287_v2  ;;  %vm12840_vm6 = vmmov %vm12838_vm3 }
 0x3a5   : > { %2321 = vmatmul.mubr.f32.gmra.mxu0 %v8446_v12  ;;  %5988 = vmatprep.subr.msk.mxu1 %vm7781_vm11, %v2067_v31  ;;  %v11714_v31 = vunpack.c.h.bf16 %v9049_v19  ;;  %vm3382_vm11 = vcmask 31744   ;;  %vm12842_vm0 = vmmov %vm12841_vm12 }
 0x3a6   : > { %5989 = vmatpush2.msk.msra.mxu1 %vm7775_vm2, %v2043_v20  ;;  %2792 = vmatprep.subr.mxu0 %v11772_v37  ;;  %v11715_v20 = vunpack.c.l.bf16 %v9047_v49  ;;  %v9271_v37 = vld [vmem:[#allocation7 + $0xb0] sm:$0xff]  ;;  %vm12825_vm2 = vcmask 1043456  }
 0x3a7   : > { %2392 = vmatmul.mubr.f32.vlgmr.msra.gmra.mxu1 %v8428_v38  ;;  %2793 = vmatpush1.msra.mxu0 %v11771_v36  ;;  %v11742_v38 = vunpack.c.h.bf16 %v8954_v1  ;;  %12328 = vst [vmem:[#allocation55_spill] sm:$0xff] %v9271_v37  ;;  %vm12826_vm7 = vmmov %vm12825_vm2 }
 0x3a8   : > { %5991 = vmatprep.mubr.msk.f32.mxu1 %vm2089_vm5, %v8437_v16  ;;  %2794 = vmatprep.subr.mxu0 %v11766_v30  ;;  %v11741_v16 = vunpack.c.h.bf16 %v8956_v59  ;;  %v9255_v30 = vld [vmem:[#allocation7 + $0xb8] sm:$0xff] }
 0x3a9   : > { %2865 = vmatprep.subr.mxu1 %v11765_v45  ;;  %2795 = vmatpush1.msra.mxu0 %v11760_v56  ;;  %v9239_v56 = vld [vmem:[#allocation7 + $0xc0] sm:$0xff] }
 0x3aa   : > { %2866 = vmatpush1.msra.mxu1 %v11759_v14  ;;  %2796 = vmatprep.subr.mxu0 %v11754_v63  ;;  %v9223_v63 = vld [vmem:[#allocation7 + $0xc8] sm:$0xff] }
 0x3ab   : > { %2398 = vmatmul.mubr.f32.gmra.mxu1 %v8446_v12  ;;  %2867 = vmatprep.subr.mxu1 %v11753_v54  ;;  %v9001_v12 = vld [vmem:[#allocation7 + $0x150] sm:$0xff] }
 0x3ac   : > { %2797 = vmatpush1.msra.mxu0 %v11748_v39  ;;  %2868 = vmatpush1.msra.mxu1 %v11747_v53  ;;  %v11705_v4 = vunpack.c.h.bf16 %v9001_v12  ;;  %v11699_v48 = vunpack.c.l.bf16 %v9001_v12  ;;  %v9207_v39 = vld [vmem:[#allocation7 + $0xd0] sm:$0xff] }
 0x3ad   : > { %2798 = vmatprep.subr.mxu0 %v11742_v38  ;;  %2869 = vmatprep.subr.mxu1 %v11741_v16  ;;  %v9191_v38 = vld [vmem:[#allocation7 + $0xd8] sm:$0xff] }
 0x3ae   : > { %2799 = vmatpush1.msra.mxu0 %v11736_v52  ;;  %2870 = vmatpush1.msra.mxu1 %v11735_v62  ;;  %v9175_v52 = vld [vmem:[#allocation7 + $0xe0] sm:$0xff] }
 0x3af   : > { %2800 = vmatprep.subr.mxu0 %v11730_v43  ;;  %2871 = vmatprep.subr.mxu1 %v11729_v6  ;;  %v9159_v43 = vld [vmem:[#allocation7 + $0xe8] sm:$0xff] }
 0x3b0   : > { %2801 = vmatpush1.msra.mxu0 %v11724_v34  ;;  %2872 = vmatpush1.msra.mxu1 %v11723_v42  ;;  %v9143_v34 = vld [vmem:[#allocation7 + $0xf0] sm:$0xff] }
 0x3b1   : > { %2802 = vmatprep.subr.mxu0 %v11718_v40  ;;  %2873 = vmatprep.subr.mxu1 %v11717_v46  ;;  %v9127_v40 = vld [vmem:[#allocation7 + $0xf8] sm:$0xff] }
 0x3b2   : > { %2803 = vmatpush1.msra.mxu0 %v11712_v13  ;;  %2874 = vmatpush1.msra.mxu1 %v11711_v28  ;;  %v9111_v13 = vld [vmem:[#allocation7] sm:$0xff] }
 0x3b3   : > { %2804 = vmatprep.subr.mxu0 %v11706_v55  ;;  %2875 = vmatprep.subr.mxu1 %v11705_v4  ;;  %v11722_v4 = vunpack.c.l.bf16 %v9065_v9  ;;  %v9095_v55 = vld [vmem:[#allocation7 + $0x8] sm:$0xff] }
 0x3b4   : > { %2805 = vmatpush1.msra.mxu0 %v11700_v58  ;;  %2876 = vmatpush1.msra.mxu1 %v11699_v48  ;;  %v11716_v48 = vunpack.c.l.bf16 %v9049_v19  ;;  %v9079_v58 = vld [vmem:[#allocation7 + $0x10] sm:$0xff] }
 0x3b5   : > { %2806 = vmatprep.subr.mxu0 %v11701_v17  ;;  %2877 = vmatprep.subr.mxu1 %v11702_v57  ;;  %v9081_v17 = vld [vmem:[#allocation7 + $0x128] sm:$0xff]  ;;  %v11719_v57 = vunpack.c.h.bf16 %v9063_v60 }
 0x3b6   : > { %2807 = vmatpush1.msra.mxu0 %v11703_v41  ;;  %2878 = vmatpush1.msra.mxu1 %v11704_v50  ;;  %v11720_v41 = vunpack.c.h.bf16 %v9065_v9  ;;  %v11721_v50 = vunpack.c.l.bf16 %v9063_v60  ;;  %v11728_v28 = vunpack.c.l.bf16 %v9081_v17 }
 0x3b7   : > { %2808 = vmatprep.subr.mxu0 %v11707_v33  ;;  %2879 = vmatprep.subr.mxu1 %v11708_v25  ;;  %v9097_v33 = vld [vmem:[#allocation7 + $0x120] sm:$0xff]  ;;  %v11725_v25 = vunpack.c.h.bf16 %v9079_v58 }
 0x3b8   : > { %2809 = vmatpush1.msra.mxu0 %v11709_v29  ;;  %2880 = vmatpush1.msra.mxu1 %v11710_v18  ;;  %v11726_v29 = vunpack.c.h.bf16 %v9081_v17  ;;  %v11727_v18 = vunpack.c.l.bf16 %v9079_v58  ;;  %v11734_v46 = vunpack.c.l.bf16 %v9097_v33 }
 0x3b9   : > { %2810 = vmatprep.subr.mxu0 %v11713_v15  ;;  %2881 = vmatprep.subr.mxu1 %v11714_v31  ;;  %v9113_v15 = vld [vmem:[#allocation7 + $0x118] sm:$0xff]  ;;  %v11731_v31 = vunpack.c.h.bf16 %v9095_v55 }
 0x3ba   : > { %2811 = vmatpush1.msra.mxu0 %v11715_v20  ;;  %2882 = vmatpush1.msra.mxu1 %v11716_v48  ;;  %v11732_v20 = vunpack.c.h.bf16 %v9097_v33  ;;  %v11733_v48 = vunpack.c.l.bf16 %v9095_v55  ;;  %v11740_v42 = vunpack.c.l.bf16 %v9113_v15 }
 0x3bb   : > { %2812 = vmatprep.subr.mxu0 %v11719_v57  ;;  %2883 = vmatprep.subr.mxu1 %v11720_v41  ;;  %v9129_v57 = vld [vmem:[#allocation7 + $0x110] sm:$0xff]  ;;  %v11737_v41 = vunpack.c.h.bf16 %v9111_v13 }
 0x3bc   : > { %2813 = vmatpush1.msra.mxu0 %v11721_v50  ;;  %2884 = vmatpush1.msra.mxu1 %v11722_v4  ;;  %v11738_v50 = vunpack.c.h.bf16 %v9113_v15  ;;  %v11739_v4 = vunpack.c.l.bf16 %v9111_v13  ;;  %v11746_v6 = vunpack.c.l.bf16 %v9129_v57 }
 0x3bd   : > { %2814 = vmatprep.subr.mxu0 %v11725_v25  ;;  %2885 = vmatprep.subr.mxu1 %v11726_v29  ;;  %v9145_v25 = vld [vmem:[#allocation7 + $0x108] sm:$0xff]  ;;  %v11743_v29 = vunpack.c.h.bf16 %v9127_v40 }
 0x3be   : > { %2815 = vmatpush1.msra.mxu0 %v11727_v18  ;;  %2886 = vmatpush1.msra.mxu1 %v11728_v28  ;;  %v11744_v18 = vunpack.c.h.bf16 %v9129_v57  ;;  %v11745_v28 = vunpack.c.l.bf16 %v9127_v40  ;;  %v11752_v62 = vunpack.c.l.bf16 %v9145_v25 }
 0x3bf   : > { %2816 = vmatprep.subr.mxu0 %v11731_v31  ;;  %2887 = vmatprep.subr.mxu1 %v11732_v20  ;;  %v9161_v31 = vld [vmem:[#allocation7 + $0x100] sm:$0xff]  ;;  %v11749_v20 = vunpack.c.h.bf16 %v9143_v34 }
 0x3c0   : > { %2817 = vmatpush1.msra.mxu0 %v11733_v48  ;;  %2888 = vmatpush1.msra.mxu1 %v11734_v46  ;;  %v11750_v48 = vunpack.c.h.bf16 %v9145_v25  ;;  %v11751_v46 = vunpack.c.l.bf16 %v9143_v34  ;;  %v11758_v16 = vunpack.c.l.bf16 %v9161_v31 }
 0x3c1   : > { %2818 = vmatprep.subr.mxu0 %v11737_v41  ;;  %2889 = vmatprep.subr.mxu1 %v11738_v50  ;;  %v9177_v41 = vld [vmem:[#allocation7 + $0x1f8] sm:$0xff]  ;;  %v11755_v50 = vunpack.c.h.bf16 %v9159_v43 }
 0x3c2   : > { %2819 = vmatpush1.msra.mxu0 %v11739_v4  ;;  %2890 = vmatpush1.msra.mxu1 %v11740_v42  ;;  %v11756_v4 = vunpack.c.h.bf16 %v9161_v31  ;;  %v11757_v42 = vunpack.c.l.bf16 %v9159_v43  ;;  %v11764_v53 = vunpack.c.l.bf16 %v9177_v41 }
 0x3c3   : > { %2820 = vmatprep.subr.mxu0 %v11743_v29  ;;  %2891 = vmatprep.subr.mxu1 %v11744_v18  ;;  %v9193_v29 = vld [vmem:[#allocation7 + $0x1f0] sm:$0xff]  ;;  %v11761_v18 = vunpack.c.h.bf16 %v9175_v52 }
 0x3c4   : > { %2821 = vmatpush2.msra.mxu0 %v11745_v28  ;;  %2892 = vmatpush1.msra.mxu1 %v11746_v6  ;;  %v11762_v28 = vunpack.c.h.bf16 %v9177_v41  ;;  %v11763_v6 = vunpack.c.l.bf16 %v9175_v52  ;;  %v11770_v54 = vunpack.c.l.bf16 %v9193_v29 }
 0x3c5   : > { %2822 = vmatprep.subr.mxu0 %v11749_v20  ;;  %2893 = vmatprep.subr.mxu1 %v11750_v48  ;;  %v9209_v20 = vld [vmem:[#allocation7 + $0x1e8] sm:$0xff]  ;;  %v11767_v48 = vunpack.c.h.bf16 %v9191_v38 }
 0x3c6   : > { %2823 = vmatpush2.msra.mxu0 %v11751_v46  ;;  %2894 = vmatpush1.msra.mxu1 %v11752_v62  ;;  %v11768_v46 = vunpack.c.h.bf16 %v9193_v29  ;;  %v11769_v62 = vunpack.c.l.bf16 %v9191_v38  ;;  %v11776_v14 = vunpack.c.l.bf16 %v9209_v20 }
 0x3c7   : > { %2824 = vmatprep.subr.mxu0 %v11755_v50  ;;  %2895 = vmatprep.subr.mxu1 %v11756_v4  ;;  %v9225_v50 = vld [vmem:[#allocation7 + $0x1e0] sm:$0xff]  ;;  %v11773_v4 = vunpack.c.h.bf16 %v9207_v39 }
 0x3c8   : > { %2825 = vmatpush2.msra.mxu0 %v11757_v42  ;;  %2896 = vmatpush1.msra.mxu1 %v11758_v16  ;;  %v11774_v42 = vunpack.c.h.bf16 %v9209_v20  ;;  %v11775_v16 = vunpack.c.l.bf16 %v9207_v39  ;;  %v11782_v45 = vunpack.c.l.bf16 %v9225_v50 }
 0x3c9   : > { %2826 = vmatprep.subr.mxu0 %v11761_v18  ;;  %2897 = vmatprep.subr.mxu1 %v11762_v28  ;;  %v9241_v18 = vld [vmem:[#allocation7 + $0x1d8] sm:$0xff]  ;;  %v11779_v28 = vunpack.c.h.bf16 %v9223_v63 }
 0x3ca   : > { %2827 = vmatpush2.msra.mxu0 %v11763_v6  ;;  %2898 = vmatpush2.msra.mxu1 %v11764_v53  ;;  %v11780_v6 = vunpack.c.h.bf16 %v9225_v50  ;;  %v11781_v53 = vunpack.c.l.bf16 %v9223_v63  ;;  %v11788_v36 = vunpack.c.l.bf16 %v9241_v18 }
 0x3cb   : > { %2828 = vmatprep.subr.mxu0 %v11767_v48  ;;  %2899 = vmatprep.subr.mxu1 %v11768_v46  ;;  %v9257_v48 = vld [vmem:[#allocation7 + $0x1d0] sm:$0xff]  ;;  %v11785_v46 = vunpack.c.h.bf16 %v9239_v56 }
 0x3cc   : > { %2829 = vmatpush2.msra.mxu0 %v11769_v62  ;;  %2900 = vmatpush2.msra.mxu1 %v11770_v54  ;;  %12327 = vst [vmem:[#allocation67_spill] sm:$0xff] %v9257_v48  ;;  %v11786_v62 = vunpack.c.h.bf16 %v9241_v18  ;;  %v11787_v54 = vunpack.c.l.bf16 %v9239_v56  ;;  %v11792_v32 = vunpack.c.l.bf16 %v9257_v48 }
 0x3cd   : > { %2830 = vmatprep.subr.mxu0 %v11773_v4  ;;  %2901 = vmatprep.subr.mxu1 %v11774_v42  ;;  %v9273_v4 = vld [vmem:[#allocation7 + $0x1c8] sm:$0xff]  ;;  %v11789_v42 = vunpack.c.h.bf16 %v9255_v30 }
 0x3ce   : > { %2831 = vmatpush2.msra.mxu0 %v11775_v16  ;;  %2902 = vmatpush2.msra.mxu1 %v11776_v14  ;;  %12329 = vst [vmem:[#allocation57_spill] sm:$0xff] %v9273_v4  ;;  %v11790_v16 = vunpack.c.h.bf16 %v9257_v48  ;;  %v11791_v14 = vunpack.c.l.bf16 %v9255_v30 }
 0x3cf   : > { %2832 = vmatprep.subr.mxu0 %v11779_v28  ;;  %2903 = vmatprep.subr.mxu1 %v11780_v6  ;;  %v9289_v28 = vld [vmem:[#allocation7 + $0x1c0] sm:$0xff]  ;;  %v11793_v6 = vunpack.c.h.bf16 %v9271_v37 }
 0x3d0   : > { %2833 = vmatpush2.msra.mxu0 %v11781_v53  ;;  %2904 = vmatpush2.msra.mxu1 %v11782_v45  ;;  %12331 = vst [vmem:[#allocation31_spill] sm:$0xff] %v9289_v28  ;;  %v11794_v53 = vunpack.c.h.bf16 %v9273_v4  ;;  %v9319_v45 = vld [vmem:[#allocation7 + $0x98] sm:$0xff]  ;;  %v12343_v61 = vunpack.c.l.bf16 %v9289_v28 }
 0x3d1   : > { %2834 = vmatprep.subr.mxu0 %v11785_v46  ;;  %2905 = vmatprep.subr.mxu1 %v11786_v62  ;;  %v9305_v46 = vld [vmem:[#allocation7 + $0x1b8] sm:$0xff]  ;;  %12334 = vst [vmem:[#allocation44_spill] sm:$0xff] %v9319_v45  ;;  %v9335_v62 = vld [vmem:[#allocation7 + $0x90] sm:$0xff] }
 0x3d2   : > { %2835 = vmatpush2.msra.mxu0 %v11787_v54  ;;  %2906 = vmatpush2.msra.mxu1 %v11788_v36  ;;  %12333 = vst [vmem:[#allocation56_spill] sm:$0xff] %v9305_v46  ;;  %v12337_v36 = vunpack.c.l.bf16 %v9273_v4  ;;  %12338 = vst [vmem:[#allocation42_spill] sm:$0xff] %v9335_v62  ;;  %v12349_v54 = vunpack.c.l.bf16 %v9305_v46 }
 0x3d3   : > { %2836 = vmatprep.subr.mxu0 %v11789_v42  ;;  %2907 = vmatprep.subr.mxu1 %v11790_v16  ;;  %v9321_v42 = vld [vmem:[#allocation7 + $0x1b0] sm:$0xff]  ;;  %v12341_v16 = vunpack.c.h.bf16 %v9289_v28 }
 0x3d4   : > { %2837 = vmatpush2.msra.mxu0 %v11791_v14  ;;  %2908 = vmatpush2.msra.mxu1 %v11792_v32  ;;  %12335 = vst [vmem:[#allocation43_spill] sm:$0xff] %v9321_v42  ;;  %v12336_v32 = vunpack.c.l.bf16 %v9271_v37  ;;  %v9351_v37 = vld [vmem:[#allocation7 + $0x88] sm:$0xff]  ;;  %v12347_v14 = vunpack.c.h.bf16 %v9305_v46  ;;  %v12355_v4 = vunpack.c.l.bf16 %v9321_v42  ;;  %v9412_v46 = vld [vmem:[#allocation7 + $0x180] sm:$0xff] }
 0x3d5   : > { %2838 = vmatprep.subr.mxu0 %v11793_v6  ;;  %2909 = vmatprep.subr.mxu1 %v11794_v53  ;;  %v9337_v6 = vld [vmem:[#allocation7 + $0x1a8] sm:$0xff]  ;;  %v12340_v53 = vunpack.c.h.bf16 %v9287_v2  ;;  %12344 = vst [vmem:[#allocation59_spill] sm:$0xff] %v9351_v37  ;;  %12367 = vst [vmem:[#allocation50_spill] sm:$0xff] %v9412_v46 }
 0x3d6   : > { %2839 = vmatpush2.msra.mxu0 %v12336_v32  ;;  %2910 = vmatpush2.msra.mxu1 %v12337_v36  ;;  %12339 = vst [vmem:[#allocation41_spill] sm:$0xff] %v9337_v6  ;;  %v12342_v36 = vunpack.c.l.bf16 %v9287_v2  ;;  %v9367_v2 = vld [vmem:[#allocation7 + $0x80] sm:$0xff]  ;;  %v12353_v32 = vunpack.c.h.bf16 %v9321_v42  ;;  %v12361_v28 = vunpack.c.l.bf16 %v9337_v6 }
 0x3d7   : > { %2840 = vmatprep.subr.mxu0 %v12340_v53  ;;  %2911 = vmatprep.subr.mxu1 %v12341_v16  ;;  %v9353_v53 = vld [vmem:[#allocation7 + $0x1a0] sm:$0xff]  ;;  %v12346_v16 = vunpack.c.h.bf16 %v9303_v47  ;;  %12350 = vst [vmem:[#allocation45_spill] sm:$0xff] %v9367_v2 }
 0x3d8   : > { %2841 = vmatpush2.msra.mxu0 %v12342_v36  ;;  %2912 = vmatpush2.msra.mxu1 %v12343_v61  ;;  %12345 = vst [vmem:[#allocation61_spill] sm:$0xff] %v9353_v53  ;;  %v12348_v61 = vunpack.c.l.bf16 %v9303_v47  ;;  %v9383_v47 = vld [vmem:[#allocation7 + $0x190] sm:$0xff]  ;;  %v12359_v36 = vunpack.c.h.bf16 %v9337_v6  ;;  %v12368_v6 = vunpack.c.h.bf16 %v9367_v2 }
 0x3d9   : > { %2842 = vmatprep.subr.mxu0 %v12346_v16  ;;  %2913 = vmatprep.subr.mxu1 %v12347_v14  ;;  %v9369_v16 = vld [vmem:[#allocation7 + $0x198] sm:$0xff]  ;;  %v12352_v14 = vunpack.c.h.bf16 %v9319_v45  ;;  %12356 = vst [vmem:[#allocation60_spill] sm:$0xff] %v9383_v47  ;;  %v12373_v42 = vunpack.c.h.bf16 %v9383_v47 }
 0x3da   : > { %2843 = vmatpush2.msra.mxu0 %v12348_v61  ;;  %2914 = vmatpush2.msra.mxu1 %v12349_v54  ;;  %12351 = vst [vmem:[#allocation48_spill] sm:$0xff] %v9369_v16  ;;  %v12354_v54 = vunpack.c.l.bf16 %v9319_v45  ;;  %v9399_v45 = vld [vmem:[#allocation7 + $0x188] sm:$0xff]  ;;  %v12370_v61 = vunpack.c.l.bf16 %v9367_v2  ;;  %v9458_v2 = vld [vmem:[#allocation7 + $0x258] sm:$0xff] }
 0x3db   : > { %2844 = vmatprep.subr.mxu0 %v12352_v14  ;;  %2915 = vmatprep.subr.mxu1 %v12353_v32  ;;  %v9385_v14 = vld [vmem:[#allocation7 + $0x278] sm:$0xff]  ;;  %v12358_v32 = vunpack.c.h.bf16 %v9335_v62  ;;  %12362 = vst [vmem:[#allocation47_spill] sm:$0xff] %v9399_v45  ;;  %12380 = vst [vmem:[#allocation64_spill] sm:$0xff] %v9458_v2 }
 0x3dc   : > { %2845 = vmatpush2.msra.mxu0 %v12354_v54  ;;  %2916 = vmatpush2.msra.mxu1 %v12355_v4  ;;  %12357 = vst [vmem:[#allocation63_spill] sm:$0xff] %v9385_v14  ;;  %v12360_v4 = vunpack.c.l.bf16 %v9335_v62  ;;  %v9424_v54 = vld [vmem:[#allocation7 + $0x378] sm:$0xff] }
 0x3dd   : > { %2846 = vmatprep.subr.mxu0 %v12358_v32  ;;  %2917 = vmatprep.subr.mxu1 %v12359_v36  ;;  %v12363_v32 = vunpack.c.h.bf16 %v9351_v37  ;;  %v12364_v36 = vunpack.c.h.bf16 %v9353_v53  ;;  %12372 = vst [vmem:[#allocation62_spill] sm:$0xff] %v9424_v54 }
 0x3de   : > { %2847 = vmatpush2.msra.mxu0 %v12360_v4  ;;  %2918 = vmatpush2.msra.mxu1 %v12361_v28  ;;  %v12365_v4 = vunpack.c.l.bf16 %v9351_v37  ;;  %v12366_v28 = vunpack.c.l.bf16 %v9353_v53 }
 0x3df   : > { %2848 = vmatprep.subr.mxu0 %v12363_v32  ;;  %2919 = vmatprep.subr.mxu1 %v12364_v36  ;;  %v12369_v32 = vunpack.c.h.bf16 %v9369_v16  ;;  %v12375_v36 = vunpack.c.l.bf16 %v9383_v47 }
 0x3e0   : > { %2849 = vmatpush2.msra.mxu0 %v12365_v4  ;;  %2920 = vmatpush2.msra.mxu1 %v12366_v28  ;;  %v12371_v4 = vunpack.c.l.bf16 %v9369_v16  ;;  %v11819_v28 = vunpack.c.l.bf16 %v9399_v45  ;;  %v12376_v16 = vunpack.c.h.bf16 %v9399_v45 }
 0x3e1   : > { %2850 = vmatprep.subr.mxu0 %v12368_v6  ;;  %2921 = vmatprep.subr.mxu1 %v12369_v32  ;;  %v12374_v6 = vunpack.c.h.bf16 %v9385_v14  ;;  %v11820_v32 = vunpack.c.h.bf16 %v9412_v46 }
 0x3e2   : > { %2851 = vmatpush2.msra.mxu0 %v12370_v61  ;;  %2922 = vmatpush2.msra.mxu1 %v12371_v4  ;;  %v11821_v61 = vunpack.c.l.bf16 %v9412_v46  ;;  %v11824_v4 = vunpack.c.h.bf16 %v9424_v54 }
 0x3e3   : > { %2923 = vmatprep.subr.mxu1 %v12373_v42  ;;  %2942 = vmatprep.subr.mxu0 %v12374_v6  ;;  %v9445_v42 = vld [vmem:[#allocation7 + $0x270] sm:$0xff]  ;;  %v11829_v6 = vunpack.c.l.bf16 %v9385_v14 }
 0x3e4   : > { %2924 = vmatpush2.msra.mxu1 %v12375_v36  ;;  %12377 = vst [vmem:[#allocation66_spill] sm:$0xff] %v9445_v42  ;;  %v11832_v45 = vunpack.c.h.bf16 %v9445_v42 }
 0x3e5   : > { %2925 = vmatprep.subr.mxu1 %v12376_v16  ;;  %v9448_v16 = vld [vmem:[#allocation7 + $0x268] sm:$0xff] }
 0x3e6   : > { %2926 = vmatpush2.msra.mxu1 %v11819_v28  ;;  %12378 = vst [vmem:[#allocation49_spill] sm:$0xff] %v9448_v16  ;;  %v11833_v28 = vunpack.c.l.bf16 %v9445_v42  ;;  %v12383_v14 = vunpack.c.l.bf16 %v9448_v16  ;;  %v9482_v42 = vld [vmem:[#allocation7 + $0x240] sm:$0xff] }
 0x3e7   : > { %2927 = vmatprep.subr.mxu1 %v11820_v32  ;;  %v9452_v32 = vld [vmem:[#allocation7 + $0x260] sm:$0xff]  ;;  %12387 = vst [vmem:[#allocation54_spill] sm:$0xff] %v9482_v42 }
 0x3e8   : > { %2928 = vmatpush2.msra.mxu1 %v11821_v61  ;;  %12379 = vst [vmem:[#allocation52_spill] sm:$0xff] %v9452_v32  ;;  %v9466_v61 = vld [vmem:[#allocation7 + $0x250] sm:$0xff] }
 0x3e9   : > { %3019 = vmatprep.subr.mxu1 %v11824_v4  ;;  %12381 = vst [vmem:[#allocation68_spill] sm:$0xff] %v9466_v61  ;;  %v11838_v4 = vunpack.c.h.bf16 %v9458_v2 }
 0x3fb   : > { %v2162_v36 = vpop.f32.mrf.mxu0 }
 0x3fd   : > { %v2164_v47 = vpop.f32.mrf.mxu0 }
 0x3fe   : > { %2852 = vmatprep.mubr.f32.mxu0 %v2164_v47  ;;  %v9474_v47 = vld [vmem:[#allocation7 + $0x248] sm:$0xff] }
 0x3ff   : > { %2853 = vmatmul.mubr.f32.vlgmr.msra.gmra.mxu0 %v2162_v36  ;;  %v2168_v46 = vpop.f32.mrf.mxu0  ;;  %12384 = vst [vmem:[#allocation51_spill] sm:$0xff] %v9474_v47  ;;  %v11842_v36 = vunpack.c.h.bf16 %v9466_v61 }
 0x400   : > { %2943 = vmatpush1.msra.mxu0 %v11829_v6  ;;  %v12382_v6 = vunpack.c.h.bf16 %v9448_v16 }
 0x401   : > { %2944 = vmatprep.subr.mxu0 %v11832_v45  ;;  %v2170_v53 = vpop.f32.mrf.mxu0  ;;  %v11839_v45 = vunpack.c.l.bf16 %v9458_v2 }
 0x402   : > { %2945 = vmatpush1.msra.mxu0 %v11833_v28  ;;  %2858 = vmatprep.mubr.f32.mxu0 %v2170_v53  ;;  %v12385_v28 = vunpack.c.h.bf16 %v9452_v32  ;;  %v12386_v53 = vunpack.c.l.bf16 %v9452_v32  ;;  %v11851_v32 = vunpack.c.l.bf16 %v9482_v42 }
 0x403   : > { %2946 = vmatprep.subr.mxu0 %v12382_v6  ;;  %2859 = vmatmul.mubr.f32.gmra.mxu0 %v2168_v46  ;;  %v11843_v6 = vunpack.c.l.bf16 %v9466_v61  ;;  %v11846_v46 = vunpack.c.h.bf16 %v9474_v47 }
 0x404   : > { %2947 = vmatpush1.msra.mxu0 %v12383_v14  ;;  %v11847_v14 = vunpack.c.l.bf16 %v9474_v47 }
 0x405   : > { %2948 = vmatprep.subr.mxu0 %v12385_v28  ;;  %v9490_v28 = vld [vmem:[#allocation7 + $0x238] sm:$0xff] }
 0x406   : > { %2949 = vmatpush1.msra.mxu0 %v12386_v53  ;;  %12388 = vst [vmem:[#allocation65_spill] sm:$0xff] %v9490_v28  ;;  %v11850_v53 = vunpack.c.h.bf16 %v9482_v42  ;;  %v11855_v2 = vunpack.c.l.bf16 %v9490_v28 }
 0x407   : > { %2950 = vmatprep.subr.mxu0 %v11838_v4  ;;  %v9498_v4 = vld [vmem:[#allocation7 + $0x230] sm:$0xff] }
 0x408   : > { %2951 = vmatpush1.msra.mxu0 %v11839_v45  ;;  %12389 = vst [vmem:[#allocation70_spill] sm:$0xff] %v9498_v4  ;;  %v11854_v45 = vunpack.c.h.bf16 %v9490_v28  ;;  %v11859_v61 = vunpack.c.l.bf16 %v9498_v4 }
 0x409   : > { %2952 = vmatprep.subr.mxu0 %v11842_v36  ;;  %v9506_v36 = vld [vmem:[#allocation7 + $0x228] sm:$0xff] }
 0x40a   : > { %2953 = vmatpush1.msra.mxu0 %v11843_v6  ;;  %12390 = vst [vmem:[#allocation58_spill] sm:$0xff] %v9506_v36  ;;  %v11858_v6 = vunpack.c.h.bf16 %v9498_v4  ;;  %v11863_v47 = vunpack.c.l.bf16 %v9506_v36 }
 0x40b   : > { %2954 = vmatprep.subr.mxu0 %v11846_v46  ;;  %v9514_v46 = vld [vmem:[#allocation7 + $0x220] sm:$0xff] }
 0x40c   : > { %2955 = vmatpush1.msra.mxu0 %v11847_v14  ;;  %12391 = vst [vmem:[#allocation36_spill] sm:$0xff] %v9514_v46  ;;  %v11862_v14 = vunpack.c.h.bf16 %v9506_v36  ;;  %v11867_v42 = vunpack.c.l.bf16 %v9514_v46 }
 0x40d   : > { %2956 = vmatprep.subr.mxu0 %v11850_v53  ;;  %v9522_v53 = vld [vmem:[#allocation7 + $0x218] sm:$0xff] }
 0x40e   : > { %2957 = vmatpush1.msra.mxu0 %v11851_v32  ;;  %12392 = vst [vmem:[#allocation35_spill] sm:$0xff] %v9522_v53  ;;  %v11866_v32 = vunpack.c.h.bf16 %v9514_v46  ;;  %v11871_v28 = vunpack.c.l.bf16 %v9522_v53 }
 0x40f   : > { %2958 = vmatprep.subr.mxu0 %v11854_v45  ;;  %v9530_v45 = vld [vmem:[#allocation7 + $0x210] sm:$0xff] }
 0x410   : > { %2959 = vmatpush1.msra.mxu0 %v11855_v2  ;;  %12393 = vst [vmem:[#allocation34_spill] sm:$0xff] %v9530_v45  ;;  %v11870_v2 = vunpack.c.h.bf16 %v9522_v53  ;;  %v11875_v4 = vunpack.c.l.bf16 %v9530_v45 }
 0x411   : > { %2960 = vmatprep.subr.mxu0 %v11858_v6  ;;  %v9538_v6 = vld [vmem:[#allocation7 + $0x208] sm:$0xff] }
 0x412   : > { %2961 = vmatpush1.msra.mxu0 %v11859_v61  ;;  %12394 = vst [vmem:[#allocation40_spill] sm:$0xff] %v9538_v6  ;;  %v11874_v61 = vunpack.c.h.bf16 %v9530_v45  ;;  %v11879_v36 = vunpack.c.l.bf16 %v9538_v6 }
 0x413   : > { %2962 = vmatprep.subr.mxu0 %v11862_v14  ;;  %v9546_v14 = vld [vmem:[#allocation7 + $0x200] sm:$0xff] }
 0x414   : > { %2963 = vmatpush1.msra.mxu0 %v11863_v47  ;;  %12395 = vst [vmem:[#allocation33_spill] sm:$0xff] %v9546_v14  ;;  %v11878_v47 = vunpack.c.h.bf16 %v9538_v6  ;;  %v11883_v46 = vunpack.c.l.bf16 %v9546_v14 }
 0x415   : > { %2964 = vmatprep.subr.mxu0 %v11866_v32  ;;  %v9554_v32 = vld [vmem:[#allocation7 + $0x2f8] sm:$0xff] }
 0x416   : > { %2965 = vmatpush1.msra.mxu0 %v11867_v42  ;;  %12396 = vst [vmem:[#allocation39_spill] sm:$0xff] %v9554_v32  ;;  %v11882_v42 = vunpack.c.h.bf16 %v9546_v14  ;;  %v11887_v53 = vunpack.c.l.bf16 %v9554_v32  ;;  %v9607_v14 = vld [vmem:[#allocation7 + $0x370] sm:$0xff] }
 0x417   : > { %2966 = vmatprep.subr.mxu0 %v11870_v2  ;;  %v9562_v2 = vld [vmem:[#allocation7 + $0x2f0] sm:$0xff]  ;;  %12403 = vst [vmem:[#allocation73_spill] sm:$0xff] %v9607_v14  ;;  %v12419_v37 = vunpack.c.h.bf16 %v9607_v14  ;;  %v12421_v16 = vunpack.c.l.bf16 %v9607_v14 }
 0x418   : > { %2967 = vmatpush1.msra.mxu0 %v11871_v28  ;;  %12397 = vst [vmem:[#allocation38_spill] sm:$0xff] %v9562_v2  ;;  %v11886_v28 = vunpack.c.h.bf16 %v9554_v32  ;;  %v11891_v45 = vunpack.c.l.bf16 %v9562_v2  ;;  %v9630_v32 = vld [vmem:[#allocation7 + $0x360] sm:$0xff] }
 0x419   : > { %2968 = vmatprep.subr.mxu0 %v11874_v61  ;;  %v9570_v61 = vld [vmem:[#allocation7 + $0x2e8] sm:$0xff]  ;;  %12411 = vst [vmem:[#allocation76_spill] sm:$0xff] %v9630_v32 }
 0x41a   : > { %2969 = vmatpush1.msra.mxu0 %v11875_v4  ;;  %12398 = vst [vmem:[#allocation53_spill] sm:$0xff] %v9570_v61  ;;  %v11890_v4 = vunpack.c.h.bf16 %v9562_v2  ;;  %v11897_v6 = vunpack.c.l.bf16 %v9570_v61 }
 0x41b   : > { %2970 = vmatprep.subr.mxu0 %v11878_v47  ;;  %v9578_v47 = vld [vmem:[#allocation7 + $0x2e0] sm:$0xff] }
 0x41c   : > { %2971 = vmatpush1.msra.mxu0 %v11879_v36  ;;  %12399 = vst [vmem:[#allocation37_spill] sm:$0xff] %v9578_v47  ;;  %v11894_v36 = vunpack.c.h.bf16 %v9570_v61  ;;  %v12404_v2 = vunpack.c.l.bf16 %v9578_v47 }
 0x41d   : > { %2972 = vmatprep.subr.mxu0 %v11882_v42  ;;  %v9586_v42 = vld [vmem:[#allocation7 + $0x2d8] sm:$0xff] }
 0x41e   : > { %2973 = vmatpush1.msra.mxu0 %v11883_v46  ;;  %12400 = vst [vmem:[#allocation46_spill] sm:$0xff] %v9586_v42  ;;  %v11900_v46 = vunpack.c.h.bf16 %v9578_v47  ;;  %v9635_v47 = vld [vmem:[#allocation7 + $0x2b0] sm:$0xff] }
 0x41f   : > { %2974 = vmatprep.subr.mxu0 %v11886_v28  ;;  %v9594_v28 = vld [vmem:[#allocation7 + $0x2d0] sm:$0xff]  ;;  %12413 = vst [vmem:[#allocation77_spill] sm:$0xff] %v9635_v47  ;;  %v12434_v14 = vunpack.c.l.bf16 %v9635_v47 }
 0x420   : > { %2975 = vmatpush2.msra.mxu0 %v11887_v53  ;;  %12401 = vst [vmem:[#allocation72_spill] sm:$0xff] %v9594_v28  ;;  %v9612_v53 = vld [vmem:[#allocation7 + $0x2c0] sm:$0xff]  ;;  %v12410_v62 = vunpack.c.h.bf16 %v9594_v28 }
 0x421   : > { %2976 = vmatprep.subr.mxu0 %v11890_v4  ;;  %v9602_v4 = vld [vmem:[#allocation7 + $0x2c8] sm:$0xff]  ;;  %12405 = vst [vmem:[#allocation32_spill] sm:$0xff] %v9612_v53 }
 0x422   : > { %2977 = vmatpush2.msra.mxu0 %v11891_v45  ;;  %12402 = vst [vmem:[#allocation71_spill] sm:$0xff] %v9602_v4  ;;  %v12408_v45 = vunpack.c.l.bf16 %v9586_v42  ;;  %v12414_v48 = vunpack.c.h.bf16 %v9602_v4 }
 0x423   : > { %2978 = vmatprep.subr.mxu0 %v11894_v36 }
 0x424   : > { %2979 = vmatpush2.msra.mxu0 %v11897_v6  ;;  %v12406_v6 = vunpack.c.h.bf16 %v9586_v42  ;;  %v12412_v42 = vunpack.c.l.bf16 %v9594_v28 }
 0x425   : > { %2980 = vmatprep.subr.mxu0 %v11900_v46  ;;  %v9618_v46 = vld [vmem:[#allocation7 + $0x368] sm:$0xff] }
 0x426   : > { %2981 = vmatpush2.msra.mxu0 %v12404_v2  ;;  %12407 = vst [vmem:[#allocation74_spill] sm:$0xff] %v9618_v46  ;;  %v9623_v2 = vld [vmem:[#allocation7 + $0x2b8] sm:$0xff] }
 0x427   : > { %v2239_v61 = vpop.f32.mrf.mxu1  ;;  %2982 = vmatprep.subr.mxu0 %v12406_v6  ;;  %12409 = vst [vmem:[#allocation75_spill] sm:$0xff] %v9623_v2  ;;  %v9644_v6 = vld [vmem:[#allocation7 + $0x358] sm:$0xff]  ;;  %v12429_v28 = vunpack.c.l.bf16 %v9623_v2 }
 0x428   : > { %2983 = vmatpush2.msra.mxu0 %v12408_v45  ;;  %12416 = vst [vmem:[#allocation78_spill] sm:$0xff] %v9644_v6  ;;  %v12423_v45 = vunpack.c.l.bf16 %v9612_v53 }
 0x429   : > { %v2241_v36 = vpop.f32.mrf.mxu1  ;;  %2984 = vmatprep.subr.mxu0 %v12410_v62  ;;  %v12420_v62 = vunpack.c.h.bf16 %v9612_v53  ;;  %v12433_v53 = vunpack.c.l.bf16 %v9630_v32 }
 0x42a   : > { %2929 = vmatprep.mubr.f32.mxu1 %v2241_v36  ;;  %2985 = vmatpush2.msra.mxu0 %v12412_v42  ;;  %v12415_v36 = vunpack.c.l.bf16 %v9424_v54  ;;  %v12417_v42 = vunpack.c.l.bf16 %v9602_v4  ;;  %v12427_v4 = vunpack.c.l.bf16 %v9618_v46 }
 0x42b   : > { %2930 = vmatmul.mubr.f32.vlgmr.msra.gmra.mxu1 %v2239_v61  ;;  %2986 = vmatprep.subr.mxu0 %v12414_v48  ;;  %v9649_v61 = vld [vmem:[#allocation7 + $0x2a8] sm:$0xff]  ;;  %v12425_v48 = vunpack.c.h.bf16 %v9618_v46 }
 0x42c   : > { %3020 = vmatpush1.msra.mxu1 %v12415_v36  ;;  %2987 = vmatpush2.msra.mxu0 %v12417_v42  ;;  %12418 = vst [vmem:[#allocation79_spill] sm:$0xff] %v9649_v61  ;;  %v9660_v42 = vld [vmem:[#allocation7 + $0x350] sm:$0xff]  ;;  %v12426_v36 = vunpack.c.h.bf16 %v9623_v2  ;;  %v12439_v46 = vunpack.c.l.bf16 %v9649_v61 }
 0x42d   : > { %3021 = vmatprep.subr.mxu1 %v12419_v37  ;;  %2988 = vmatprep.subr.mxu0 %v12420_v62  ;;  %12422 = vst [vmem:[#allocation80_spill] sm:$0xff] %v9660_v42  ;;  %v9665_v37 = vld [vmem:[#allocation7 + $0x2a0] sm:$0xff]  ;;  %v12431_v62 = vunpack.c.h.bf16 %v9630_v32  ;;  %v12438_v32 = vunpack.c.l.bf16 %v9644_v6 }
 0x42e   : > { %3022 = vmatpush1.msra.mxu1 %v12421_v16  ;;  %2989 = vmatpush2.msra.mxu0 %v12423_v45  ;;  %12424 = vst [vmem:[#allocation81_spill] sm:$0xff] %v9665_v37  ;;  %v9676_v45 = vld [vmem:[#allocation7 + $0x348] sm:$0xff]  ;;  %v12432_v16 = vunpack.c.h.bf16 %v9635_v47  ;;  %v9708_v47 = vld [vmem:[#allocation7 + $0x338] sm:$0xff]  ;;  %v12441_v54 = vunpack.c.h.bf16 %v9665_v37 }
 0x42f   : > { %3023 = vmatprep.subr.mxu1 %v12425_v48  ;;  %2990 = vmatprep.subr.mxu0 %v12426_v36  ;;  %12428 = vst [vmem:[#allocation82_spill] sm:$0xff] %v9676_v45  ;;  %v9681_v48 = vld [vmem:[#allocation7 + $0x298] sm:$0xff]  ;;  %v12436_v36 = vunpack.c.h.bf16 %v9644_v6 }
 0x430   : > { %3024 = vmatpush1.msra.mxu1 %v12427_v4  ;;  %2991 = vmatpush2.msra.mxu0 %v12429_v28  ;;  %12430 = vst [vmem:[#allocation83_spill] sm:$0xff] %v9681_v48  ;;  %v9692_v28 = vld [vmem:[#allocation7 + $0x340] sm:$0xff]  ;;  %v12437_v4 = vunpack.c.h.bf16 %v9649_v61  ;;  %v9764_v61 = vld [vmem:[#allocation7 + $0x318] sm:$0xff] }
 0x431   : > { %3025 = vmatprep.subr.mxu1 %v12431_v62  ;;  %2992 = vmatprep.subr.mxu0 %v12432_v16  ;;  %v9697_v62 = vld [vmem:[#allocation7 + $0x290] sm:$0xff]  ;;  %v12440_v16 = vunpack.c.h.bf16 %v9660_v42  ;;  %12457 = vst [vmem:[#allocation88_spill] sm:$0xff] %v9764_v61 }
 0x432   : > { %3026 = vmatpush1.msra.mxu1 %v12433_v53  ;;  %2993 = vmatpush2.msra.mxu0 %v12434_v14  ;;  %12435 = vst [vmem:[#allocation84_spill] sm:$0xff] %v9697_v62  ;;  %v2245_v53 = vpop.f32.mrf.mxu1  ;;  %v12443_v14 = vunpack.c.l.bf16 %v9660_v42  ;;  %v9737_v42 = vld [vmem:[#allocation7 + $0x328] sm:$0xff]  ;;  %v12451_v6 = vunpack.c.h.bf16 %v9697_v62 }
 0x433   : > { %3027 = vmatprep.subr.mxu1 %v12436_v36  ;;  %2994 = vmatprep.subr.mxu0 %v12437_v4  ;;  %v12444_v36 = vunpack.c.l.bf16 %v9665_v37  ;;  %v9742_v37 = vld [vmem:[#allocation7 + $0x280] sm:$0xff]  ;;  %v12450_v4 = vunpack.c.h.bf16 %v9692_v28 }
 0x434   : > { %3028 = vmatpush1.msra.mxu1 %v12438_v32  ;;  %2995 = vmatpush2.msra.mxu0 %v12439_v46  ;;  %v9719_v32 = vld [vmem:[#allocation7 + $0x288] sm:$0xff]  ;;  %v9724_v46 = vld [vmem:[#allocation7 + $0x330] sm:$0xff]  ;;  %v2247_v2 = vpop.f32.mrf.mxu1  ;;  %12449 = vst [vmem:[#allocation86_spill] sm:$0xff] %v9742_v37 }
 0x435   : > { %3029 = vmatprep.subr.mxu1 %v12440_v16  ;;  %2996 = vmatprep.subr.mxu0 %v12441_v54  ;;  %12442 = vst [vmem:[#allocation85_spill] sm:$0xff] %v9719_v32  ;;  %v12445_v16 = vunpack.c.h.bf16 %v9676_v45  ;;  %v12446_v54 = vunpack.c.h.bf16 %v9681_v48 }
 0x436   : > { %3030 = vmatpush1.msra.mxu1 %v12443_v14  ;;  %2997 = vmatpush2.msra.mxu0 %v12444_v36  ;;  %v12447_v14 = vunpack.c.l.bf16 %v9676_v45  ;;  %v12448_v36 = vunpack.c.l.bf16 %v9681_v48  ;;  %v9752_v45 = vld [vmem:[#allocation7 + $0x320] sm:$0xff]  ;;  %v12456_v48 = vunpack.c.l.bf16 %v9708_v47 }
 0x437   : > { %3031 = vmatprep.subr.mxu1 %v12445_v16  ;;  %2998 = vmatprep.subr.mxu0 %v12446_v54  ;;  %12453 = vst [vmem:[#allocation87_spill] sm:$0xff] %v9752_v45  ;;  %v12454_v16 = vunpack.c.h.bf16 %v9708_v47  ;;  %v12455_v54 = vunpack.c.l.bf16 %v9697_v62 }
 0x438   : > { %3032 = vmatpush1.msra.mxu1 %v12447_v14  ;;  %2999 = vmatpush2.msra.mxu0 %v12448_v36  ;;  %v12452_v14 = vunpack.c.l.bf16 %v9692_v28  ;;  %v12469_v36 = vunpack.c.h.bf16 %v8892_v3 }
 0x439   : > { %3033 = vmatprep.subr.mxu1 %v12450_v4  ;;  %3000 = vmatprep.subr.mxu0 %v12451_v6  ;;  %v9775_v6 = vld [vmem:[#allocation7 + $0x310] sm:$0xff]  ;;  %v9787_v4 = vld [vmem:[#allocation7 + $0x308] sm:$0xff] }
 0x43a   : > { %3034 = vmatpush1.msra.mxu1 %v12452_v14  ;;  %2935 = vmatprep.mubr.f32.mxu1 %v2247_v2  ;;  %v12458_v2 = vunpack.c.h.bf16 %v9719_v32  ;;  %12461 = vst [vmem:[#allocation89_spill] sm:$0xff] %v9775_v6  ;;  %v12462_v14 = vunpack.c.l.bf16 %v9719_v32  ;;  %12466 = vst [vmem:[#allocation90_spill] sm:$0xff] %v9787_v4  ;;  %v9799_v32 = vld [vmem:[#allocation7 + $0x300] sm:$0xff] }
 0x43b   : > { %3035 = vmatprep.subr.mxu1 %v12454_v16  ;;  %3001 = vmatpush2.msra.mxu0 %v12455_v54  ;;  %v12459_v16 = vunpack.c.h.bf16 %v9724_v46  ;;  %v12460_v54 = vunpack.c.l.bf16 %v9724_v46  ;;  %12471 = vst [vmem:[#allocation91_spill] sm:$0xff] %v9799_v32  ;;  %v11957_v62 = vunpack.c.l.bf16 %v9799_v32 }
 0x43c   : > { %3036 = vmatpush1.msra.mxu1 %v12456_v48  ;;  %3002 = vmatprep.subr.mxu0 %v12458_v2  ;;  %v12463_v2 = vunpack.c.h.bf16 %v9737_v42  ;;  %v12467_v48 = vunpack.c.l.bf16 %v9742_v37 }
 0x43d   : > { %3037 = vmatprep.subr.mxu1 %v12459_v16  ;;  %2936 = vmatmul.mubr.f32.gmra.mxu1 %v2245_v53  ;;  %v12464_v16 = vunpack.c.h.bf16 %v9742_v37  ;;  %v12465_v53 = vunpack.c.l.bf16 %v9737_v42  ;;  %v12473_v37 = vunpack.c.l.bf16 %v9764_v61 }
 0x43e   : > { %3038 = vmatpush1.msra.mxu1 %v12460_v54  ;;  %3003 = vmatpush2.msra.mxu0 %v12462_v14  ;;  %v12468_v14 = vunpack.c.h.bf16 %v9752_v45  ;;  %v12472_v54 = vunpack.c.h.bf16 %v9764_v61 }
 0x43f   : > { %3039 = vmatprep.subr.mxu1 %v12463_v2  ;;  %3004 = vmatprep.subr.mxu0 %v12464_v16  ;;  %v12470_v16 = vunpack.c.l.bf16 %v9752_v45  ;;  %v9807_v2 = vld [vmem:[#allocation7 + $0x3f8] sm:$0xff]  ;;  %v9927_v45 = vld [vmem:[#allocation7 + $0x380] sm:$0xff] }
 0x440   : > { %3040 = vmatpush1.msra.mxu1 %v12465_v53  ;;  %3005 = vmatpush2.msra.mxu0 %v12467_v48  ;;  %v11949_v53 = vunpack.c.l.bf16 %v9775_v6  ;;  %v11952_v48 = vunpack.c.h.bf16 %v9787_v4  ;;  %12474 = vst [vmem:[#allocation92_spill] sm:$0xff] %v9807_v2  ;;  %v11961_v61 = vunpack.c.l.bf16 %v9807_v2 }
 0x441   : > { %3041 = vmatprep.subr.mxu1 %v12468_v14  ;;  %3098 = vmatprep.subr.mxu0 %v12469_v36  ;;  %v11953_v14 = vunpack.c.l.bf16 %v9787_v4  ;;  %v12475_v36 = vunpack.c.h.bf16 %v9775_v6 }
 0x442   : > { %3042 = vmatpush1.msra.mxu1 %v12470_v16  ;;  %v11956_v16 = vunpack.c.h.bf16 %v9799_v32 }
 0x443   : > { %3043 = vmatprep.subr.mxu1 %v12472_v54  ;;  %v9815_v54 = vld [vmem:[#allocation7 + $0x3f0] sm:$0xff] }
 0x444   : > { %3044 = vmatpush1.msra.mxu1 %v12473_v37  ;;  %12476 = vst [vmem:[#allocation93_spill] sm:$0xff] %v9815_v54  ;;  %v11960_v37 = vunpack.c.h.bf16 %v9807_v2  ;;  %v11965_v6 = vunpack.c.l.bf16 %v9815_v54 }
 0x445   : > { %3045 = vmatprep.subr.mxu1 %v12475_v36  ;;  %v9823_v36 = vld [vmem:[#allocation7 + $0x3e8] sm:$0xff] }
 0x446   : > { %3046 = vmatpush1.msra.mxu1 %v11949_v53  ;;  %12477 = vst [vmem:[#allocation94_spill] sm:$0xff] %v9823_v36  ;;  %v11964_v53 = vunpack.c.h.bf16 %v9815_v54  ;;  %v11969_v4 = vunpack.c.l.bf16 %v9823_v36 }
 0x447   : > { %3047 = vmatprep.subr.mxu1 %v11952_v48  ;;  %v9831_v48 = vld [vmem:[#allocation7 + $0x3e0] sm:$0xff] }
 0x448   : > { %3048 = vmatpush1.msra.mxu1 %v11953_v14  ;;  %12478 = vst [vmem:[#allocation95_spill] sm:$0xff] %v9831_v48  ;;  %v11968_v14 = vunpack.c.h.bf16 %v9823_v36  ;;  %v11973_v32 = vunpack.c.l.bf16 %v9831_v48 }
 0x449   : > { %3049 = vmatprep.subr.mxu1 %v11956_v16  ;;  %v9839_v16 = vld [vmem:[#allocation7 + $0x3d8] sm:$0xff] }
 0x44a   : > { %3050 = vmatpush1.msra.mxu1 %v11957_v62  ;;  %12479 = vst [vmem:[#allocation96_spill] sm:$0xff] %v9839_v16  ;;  %v11972_v62 = vunpack.c.h.bf16 %v9831_v48  ;;  %v11977_v2 = vunpack.c.l.bf16 %v9839_v16 }
 0x44b   : > { %3051 = vmatprep.subr.mxu1 %v11960_v37  ;;  %v9847_v37 = vld [vmem:[#allocation7 + $0x3d0] sm:$0xff] }
 0x44c   : > { %3052 = vmatpush2.msra.mxu1 %v11961_v61  ;;  %12480 = vst [vmem:[#allocation97_spill] sm:$0xff] %v9847_v37  ;;  %v11976_v61 = vunpack.c.h.bf16 %v9839_v16  ;;  %v11981_v54 = vunpack.c.l.bf16 %v9847_v37 }
 0x44d   : > { %3053 = vmatprep.subr.mxu1 %v11964_v53  ;;  %v9855_v53 = vld [vmem:[#allocation7 + $0x3c8] sm:$0xff] }
 0x44e   : > { %3054 = vmatpush2.msra.mxu1 %v11965_v6  ;;  %12481 = vst [vmem:[#allocation98_spill] sm:$0xff] %v9855_v53  ;;  %v11980_v6 = vunpack.c.h.bf16 %v9847_v37  ;;  %v11985_v36 = vunpack.c.l.bf16 %v9855_v53 }
 0x44f   : > { %3055 = vmatprep.subr.mxu1 %v11968_v14  ;;  %v9863_v14 = vld [vmem:[#allocation7 + $0x3c0] sm:$0xff] }
 0x450   : > { %3056 = vmatpush2.msra.mxu1 %v11969_v4  ;;  %12482 = vst [vmem:[#allocation99_spill] sm:$0xff] %v9863_v14  ;;  %v11984_v4 = vunpack.c.h.bf16 %v9855_v53  ;;  %v11989_v48 = vunpack.c.l.bf16 %v9863_v14 }
 0x451   : > { %3057 = vmatprep.subr.mxu1 %v11972_v62  ;;  %v9871_v62 = vld [vmem:[#allocation7 + $0x3b8] sm:$0xff] }
 0x452   : > { %3058 = vmatpush2.msra.mxu1 %v11973_v32  ;;  %12483 = vst [vmem:[#allocation100_spill] sm:$0xff] %v9871_v62  ;;  %v11988_v32 = vunpack.c.h.bf16 %v9863_v14  ;;  %v11993_v16 = vunpack.c.l.bf16 %v9871_v62 }
 0x453   : > { %3059 = vmatprep.subr.mxu1 %v11976_v61  ;;  %v9879_v61 = vld [vmem:[#allocation7 + $0x3b0] sm:$0xff] }
 0x454   : > { %3060 = vmatpush2.msra.mxu1 %v11977_v2  ;;  %12484 = vst [vmem:[#allocation101_spill] sm:$0xff] %v9879_v61  ;;  %v11992_v2 = vunpack.c.h.bf16 %v9871_v62  ;;  %v11997_v37 = vunpack.c.l.bf16 %v9879_v61 }
 0x455   : > { %3061 = vmatprep.subr.mxu1 %v11980_v6  ;;  %v9887_v6 = vld [vmem:[#allocation7 + $0x3a8] sm:$0xff] }
 0x456   : > { %3062 = vmatpush2.msra.mxu1 %v11981_v54  ;;  %12485 = vst [vmem:[#allocation102_spill] sm:$0xff] %v9887_v6  ;;  %v11996_v54 = vunpack.c.h.bf16 %v9879_v61  ;;  %v12003_v53 = vunpack.c.l.bf16 %v9887_v6 }
 0x457   : > { %3063 = vmatprep.subr.mxu1 %v11984_v4  ;;  %v9895_v4 = vld [vmem:[#allocation7 + $0x3a0] sm:$0xff] }
 0x458   : > { %3064 = vmatpush2.msra.mxu1 %v11985_v36  ;;  %12486 = vst [vmem:[#allocation103_spill] sm:$0xff] %v9895_v4  ;;  %v12000_v36 = vunpack.c.h.bf16 %v9887_v6  ;;  %v12487_v61 = vunpack.c.l.bf16 %v9895_v4 }
 0x459   : > { %3065 = vmatprep.subr.mxu1 %v11988_v32  ;;  %v9903_v32 = vld [vmem:[#allocation7 + $0x398] sm:$0xff] }
 0x45a   : > { %3066 = vmatpush2.msra.mxu1 %v11989_v48  ;;  %v12006_v48 = vunpack.c.h.bf16 %v9895_v4  ;;  %v12488_v6 = vunpack.c.l.bf16 %v9903_v32 }
 0x45b   : > { %3067 = vmatprep.subr.mxu1 %v11992_v2  ;;  %v9911_v2 = vld [vmem:[#allocation7 + $0x390] sm:$0xff] }
 0x45c   : > { %3068 = vmatpush2.msra.mxu1 %v11993_v16  ;;  %v12009_v16 = vunpack.c.h.bf16 %v9903_v32  ;;  %v12010_v14 = vunpack.c.h.bf16 %v9911_v2  ;;  %v12489_v4 = vunpack.c.l.bf16 %v9911_v2 }
 0x45d   : > { %3069 = vmatprep.subr.mxu1 %v11996_v54  ;;  %v9919_v54 = vld [vmem:[#allocation7 + $0x388] sm:$0xff] }
 0x45e   : > { %3070 = vmatpush2.msra.mxu1 %v11997_v37  ;;  %v12011_v62 = vunpack.c.h.bf16 %v9919_v54 }
 0x45f   : > { %3071 = vmatprep.subr.mxu1 %v12000_v36  ;;  %v12493_v36 = vunpack.c.l.bf16 %v8898_v11 }
 0x460   : > { %3072 = vmatpush2.msra.mxu1 %v12003_v53 }
 0x461   : > { %3073 = vmatprep.subr.mxu1 %v12006_v48  ;;  %v2316_v37 = vpop.f32.mrf.mxu0 }
 0x462   : > { %3074 = vmatpush2.msra.mxu1 %v12487_v61 }
 0x463   : > { %3075 = vmatprep.subr.mxu1 %v12009_v16  ;;  %v2318_v53 = vpop.f32.mrf.mxu0  ;;  %v12490_v16 = vunpack.c.l.bf16 %v8892_v3  ;;  %v12494_v3 = vunpack.c.h.bf16 %v9927_v45 }
 0x464   : > { %3076 = vmatpush2.msra.mxu1 %v12488_v6  ;;  %3006 = vmatprep.mubr.f32.mxu0 %v2318_v53  ;;  %v12491_v6 = vunpack.c.h.bf16 %v8898_v11  ;;  %v12497_v11 = vunpack.c.h.bf16 %v8916_v0 }
 0x465   : > { %3077 = vmatprep.subr.mxu1 %v12010_v14  ;;  %v2322_v61 = vpop.f32.mrf.mxu0  ;;  %3007 = vmatmul.mubr.f32.vlgmr.msra.gmra.mxu0 %v2316_v37  ;;  %v2756_v14 = vunpack.c.l.bf16 %v9927_v45  ;;  %v12492_v37 = vunpack.c.l.bf16 %v9919_v54 }
 0x466   : > { %3078 = vmatpush2.msra.mxu1 %v12489_v4  ;;  %3099 = vmatpush1.msra.mxu0 %v12490_v16  ;;  %v12495_v16 = vunpack.c.h.bf16 %v8908_v24 }
 0x467   : > { %3079 = vmatprep.subr.mxu1 %v12011_v62  ;;  %3100 = vmatprep.subr.mxu0 %v12491_v6  ;;  %v2324_v53 = vpop.f32.mrf.mxu0  ;;  %v2393_v48 = vpop.f32.mrf.mxu1  ;;  %v12496_v6 = vunpack.c.l.bf16 %v8908_v24  ;;  %v12502_v24 = vunpack.c.h.bf16 %v8940_v23 }
 0x468   : > { %3080 = vmatpush2.msra.mxu1 %v12492_v37  ;;  %3101 = vmatpush1.msra.mxu0 %v12493_v36  ;;  %v12498_v36 = vunpack.c.h.bf16 %v8925_v51 }
 0x469   : > { %3012 = vmatprep.mubr.f32.mxu0 %v2324_v53  ;;  %3081 = vmatprep.subr.mxu1 %v12494_v3  ;;  %v2395_v4 = vpop.f32.mrf.mxu1  ;;  %v12499_v53 = vunpack.c.l.bf16 %v8916_v0  ;;  %v12501_v3 = vunpack.c.h.bf16 %v8932_v8  ;;  %v12505_v0 = vunpack.c.h.bf16 %v8954_v1 }
 0x46a   : > { %3102 = vmatprep.subr.mxu0 %v12495_v16  ;;  %3013 = vmatmul.mubr.f32.gmra.mxu0 %v2322_v61  ;;  %v12500_v61 = vunpack.c.l.bf16 %v8925_v51  ;;  %v12504_v16 = vunpack.c.l.bf16 %v8940_v23  ;;  %v12506_v51 = vunpack.c.h.bf16 %v8956_v59  ;;  %v12510_v23 = vunpack.c.h.bf16 %v8970_v44 }
 0x46b   : > { %3082 = vmatpush2.msra.mxu1 %v2756_v14  ;;  %3103 = vmatpush1.msra.mxu0 %v12496_v6  ;;  %v2399_v62 = vpop.f32.mrf.mxu1  ;;  %v12508_v6 = vunpack.c.l.bf16 %v8956_v59  ;;  %v12515_v59 = vunpack.c.l.bf16 %v8984_v7 }
 0x46c   : > { %3083 = vmatprep.mubr.f32.mxu1 %v2395_v4  ;;  %3104 = vmatprep.subr.mxu0 %v12497_v11  ;;  %v12503_v4 = vunpack.c.l.bf16 %v8932_v8  ;;  %v12509_v8 = vunpack.c.h.bf16 %v8968_v21  ;;  %v12511_v11 = vunpack.c.l.bf16 %v8968_v21  ;;  %v12518_v21 = vunpack.c.h.bf16 %v9001_v12 }
 0x46d   : > { %3169 = vmatprep.subr.mxu1 %v12498_v36  ;;  %3084 = vmatmul.mubr.f32.vlgmr.msra.gmra.mxu1 %v2393_v48  ;;  %v2401_v37 = vpop.f32.mrf.mxu1  ;;  %v12507_v48 = vunpack.c.l.bf16 %v8954_v1  ;;  %v12512_v36 = vunpack.c.l.bf16 %v8970_v44  ;;  %v12514_v1 = vunpack.c.h.bf16 %v8986_v35  ;;  %v12519_v44 = vunpack.c.l.bf16 %v8999_v27 }
 0x46e   : > { %3105 = vmatpush1.msra.mxu0 %v12499_v53  ;;  %3170 = vmatpush1.msra.mxu1 %v12500_v61  ;;  %v12516_v53 = vunpack.c.l.bf16 %v8986_v35  ;;  %v12517_v61 = vunpack.c.h.bf16 %v8999_v27  ;;  %v12523_v35 = vunpack.c.l.bf16 %v9015_v10  ;;  %v12526_v27 = vunpack.c.h.bf16 %v9033_v5 }
 0x46f   : > { %3106 = vmatprep.subr.mxu0 %v12501_v3  ;;  %3171 = vmatprep.subr.mxu1 %v12502_v24  ;;  %v12521_v3 = vunpack.c.h.bf16 %v9015_v10  ;;  %v12524_v24 = vunpack.c.l.bf16 %v9017_v26  ;;  %v12530_v10 = vunpack.c.h.bf16 %v9049_v19 }
 0x470   : > { %3107 = vmatpush1.msra.mxu0 %v12503_v4  ;;  %3172 = vmatpush1.msra.mxu1 %v12504_v16  ;;  %v12525_v4 = vunpack.c.h.bf16 %v9031_v22  ;;  %v12528_v16 = vunpack.c.l.bf16 %v9033_v5  ;;  %v12535_v5 = vunpack.c.l.bf16 %v9063_v60 }
 0x471   : > { %3089 = vmatprep.mubr.f32.mxu1 %v2401_v37  ;;  %3108 = vmatprep.subr.mxu0 %v12505_v0  ;;  %v12520_v37 = vunpack.c.l.bf16 %v9001_v12  ;;  %v12527_v12 = vunpack.c.l.bf16 %v9031_v22  ;;  %v12529_v0 = vunpack.c.h.bf16 %v9047_v49  ;;  %v12534_v22 = vunpack.c.h.bf16 %v9065_v9 }
 0x472   : > { %3173 = vmatprep.subr.mxu1 %v12506_v51  ;;  %3090 = vmatmul.mubr.f32.gmra.mxu1 %v2399_v62  ;;  %v12513_v62 = vunpack.c.h.bf16 %v8984_v7  ;;  %v12522_v7 = vunpack.c.h.bf16 %v9017_v26  ;;  %v12531_v26 = vunpack.c.l.bf16 %v9047_v49  ;;  %v12532_v51 = vunpack.c.l.bf16 %v9049_v19 }
 0x473   : > { %3109 = vmatpush1.msra.mxu0 %v12507_v48  ;;  %3174 = vmatpush1.msra.mxu1 %v12508_v6  ;;  %v12533_v48 = vunpack.c.h.bf16 %v9063_v60  ;;  %v12536_v6 = vunpack.c.l.bf16 %v9065_v9  ;;  %v12538_v49 = vunpack.c.h.bf16 %v9081_v17  ;;  %v12539_v19 = vunpack.c.l.bf16 %v9079_v58 }
 0x474   : > { %3110 = vmatprep.subr.mxu0 %v12509_v8  ;;  %3175 = vmatprep.subr.mxu1 %v12510_v23  ;;  %v12537_v8 = vunpack.c.h.bf16 %v9079_v58  ;;  %v12540_v23 = vunpack.c.l.bf16 %v9081_v17  ;;  %v12542_v60 = vunpack.c.h.bf16 %v9097_v33  ;;  %v12543_v9 = vunpack.c.l.bf16 %v9095_v55 }
 0x475   : > { %3111 = vmatpush1.msra.mxu0 %v12511_v11  ;;  %3176 = vmatpush1.msra.mxu1 %v12512_v36  ;;  %v12541_v11 = vunpack.c.h.bf16 %v9095_v55  ;;  %v12544_v36 = vunpack.c.l.bf16 %v9097_v33  ;;  %v12546_v58 = vunpack.c.h.bf16 %v9113_v15  ;;  %v12547_v17 = vunpack.c.l.bf16 %v9111_v13 }
 0x476   : > { %3112 = vmatprep.subr.mxu0 %v12513_v62  ;;  %3177 = vmatprep.subr.mxu1 %v12514_v1  ;;  %v12545_v62 = vunpack.c.h.bf16 %v9111_v13  ;;  %v12548_v1 = vunpack.c.l.bf16 %v9113_v15  ;;  %v12550_v55 = vunpack.c.h.bf16 %v9129_v57  ;;  %v12551_v33 = vunpack.c.l.bf16 %v9127_v40 }
 0x477   : > { %3113 = vmatpush1.msra.mxu0 %v12515_v59  ;;  %3178 = vmatpush1.msra.mxu1 %v12516_v53  ;;  %v12549_v59 = vunpack.c.h.bf16 %v9127_v40  ;;  %v12552_v53 = vunpack.c.l.bf16 %v9129_v57  ;;  %v12554_v13 = vunpack.c.h.bf16 %v9145_v25  ;;  %v12555_v15 = vunpack.c.l.bf16 %v9143_v34 }
 0x478   : > { %3114 = vmatprep.subr.mxu0 %v12517_v61  ;;  %3179 = vmatprep.subr.mxu1 %v12518_v21  ;;  %v12553_v61 = vunpack.c.h.bf16 %v9143_v34  ;;  %v12556_v21 = vunpack.c.l.bf16 %v9145_v25  ;;  %v12558_v40 = vunpack.c.h.bf16 %v9161_v31  ;;  %v12559_v57 = vunpack.c.l.bf16 %v9159_v43 }
 0x479   : > { %3115 = vmatpush1.msra.mxu0 %v12519_v44  ;;  %3180 = vmatpush1.msra.mxu1 %v12520_v37  ;;  %v12557_v44 = vunpack.c.h.bf16 %v9159_v43  ;;  %v12560_v37 = vunpack.c.l.bf16 %v9161_v31  ;;  %v12562_v34 = vunpack.c.h.bf16 %v9177_v41  ;;  %v12563_v25 = vunpack.c.l.bf16 %v9175_v52 }
 0x47a   : > { %3116 = vmatprep.subr.mxu0 %v12521_v3  ;;  %3181 = vmatprep.subr.mxu1 %v12522_v7  ;;  %v12561_v3 = vunpack.c.h.bf16 %v9175_v52  ;;  %v12564_v7 = vunpack.c.l.bf16 %v9177_v41  ;;  %v12566_v43 = vunpack.c.h.bf16 %v9193_v29  ;;  %v12567_v31 = vunpack.c.l.bf16 %v9191_v38 }
 0x47b   : > { %3117 = vmatpush1.msra.mxu0 %v12523_v35  ;;  %3182 = vmatpush1.msra.mxu1 %v12524_v24  ;;  %v12565_v35 = vunpack.c.h.bf16 %v9191_v38  ;;  %v12568_v24 = vunpack.c.l.bf16 %v9193_v29  ;;  %v12570_v52 = vunpack.c.h.bf16 %v9209_v20  ;;  %v12571_v41 = vunpack.c.l.bf16 %v9207_v39 }
 0x47c   : > { %3118 = vmatprep.subr.mxu0 %v12525_v4  ;;  %3183 = vmatprep.subr.mxu1 %v12526_v27  ;;  %v12569_v4 = vunpack.c.h.bf16 %v9207_v39  ;;  %v12572_v27 = vunpack.c.l.bf16 %v9209_v20  ;;  %v12574_v38 = vunpack.c.h.bf16 %v9225_v50  ;;  %v12575_v29 = vunpack.c.l.bf16 %v9223_v63 }
 0x47d   : > { %3119 = vmatpush1.msra.mxu0 %v12527_v12  ;;  %3184 = vmatpush1.msra.mxu1 %v12528_v16  ;;  %v12573_v12 = vunpack.c.h.bf16 %v9223_v63  ;;  %v12576_v16 = vunpack.c.l.bf16 %v9225_v50  ;;  %v12578_v39 = vunpack.c.h.bf16 %v9241_v18  ;;  %v12579_v20 = vunpack.c.l.bf16 %v9239_v56  ;;  %v12582_v63 = vld [vmem:[#allocation67_spill] sm:$0xff] }
 0x47e   : > { %3120 = vmatprep.subr.mxu0 %v12529_v0  ;;  %3185 = vmatprep.subr.mxu1 %v12530_v10  ;;  %v12577_v0 = vunpack.c.h.bf16 %v9239_v56  ;;  %v12580_v10 = vunpack.c.l.bf16 %v9241_v18  ;;  %v12584_v50 = vunpack.c.l.bf16 %v9255_v30  ;;  %v12588_v56 = vld [vmem:[#allocation57_spill] sm:$0xff] }
 0x47f   : > { %3121 = vmatpush1.msra.mxu0 %v12531_v26  ;;  %3186 = vmatpush1.msra.mxu1 %v12532_v51  ;;  %v12581_v26 = vunpack.c.h.bf16 %v9255_v30  ;;  %v12583_v51 = vunpack.c.h.bf16 %v12582_v63  ;;  %v12594_v30 = vld [vmem:[#allocation31_spill] sm:$0xff] }
 0x480   : > { %3122 = vmatprep.subr.mxu0 %v12533_v48  ;;  %3187 = vmatprep.subr.mxu1 %v12534_v22  ;;  %v12585_v48 = vunpack.c.l.bf16 %v12582_v63  ;;  %v12586_v22 = vld [vmem:[#allocation55_spill] sm:$0xff] }
 0x481   : > { %3123 = vmatpush1.msra.mxu0 %v12535_v5  ;;  %3188 = vmatpush1.msra.mxu1 %v12536_v6  ;;  %v12587_v5 = vunpack.c.h.bf16 %v12586_v22  ;;  %v12589_v6 = vunpack.c.h.bf16 %v12588_v56  ;;  %v12590_v18 = vunpack.c.l.bf16 %v12586_v22 }
 0x482   : > { %3124 = vmatprep.subr.mxu0 %v12537_v8  ;;  %3189 = vmatprep.subr.mxu1 %v12538_v49  ;;  %v12591_v8 = vunpack.c.l.bf16 %v12588_v56  ;;  %v12592_v49 = vld [vmem:[#allocation30_spill] sm:$0xff] }
 0x483   : > { %3125 = vmatpush1.msra.mxu0 %v12539_v19  ;;  %3190 = vmatpush1.msra.mxu1 %v12540_v23  ;;  %v12593_v19 = vunpack.c.h.bf16 %v12592_v49  ;;  %v12595_v23 = vunpack.c.h.bf16 %v12594_v30 }
 0x484   : > { %3126 = vmatprep.subr.mxu0 %v12541_v11  ;;  %3191 = vmatprep.subr.mxu1 %v12542_v60  ;;  %v12596_v11 = vunpack.c.l.bf16 %v12592_v49  ;;  %v12597_v60 = vunpack.c.l.bf16 %v12594_v30  ;;  %v12646_v49 = vld [vmem:[#allocation25_spill] sm:$0xff] }
 0x485   : > { %3127 = vmatpush1.msra.mxu0 %v12543_v9  ;;  %3192 = vmatpush1.msra.mxu1 %v12544_v36  ;;  %v12598_v9 = vld [vmem:[#allocation69_spill] sm:$0xff] }
 0x486   : > { %3128 = vmatprep.subr.mxu0 %v12545_v62  ;;  %3193 = vmatprep.subr.mxu1 %v12546_v58  ;;  %v12599_v36 = vunpack.c.h.bf16 %v12598_v9  ;;  %v12600_v62 = vld [vmem:[#allocation56_spill] sm:$0xff]  ;;  %v6744_v30 = vld [vmem:[%s7324_s22 + $0x8] sm:$0xff] }
 0x487   : > { %3129 = vmatpush1.msra.mxu0 %v12547_v17  ;;  %3194 = vmatpush1.msra.mxu1 %v12548_v1  ;;  %v12601_v58 = vunpack.c.h.bf16 %v12600_v62  ;;  %v12602_v17 = vunpack.c.l.bf16 %v12598_v9  ;;  %v12603_v1 = vunpack.c.l.bf16 %v12600_v62 }
 0x488   : > { %3130 = vmatprep.subr.mxu0 %v12549_v59  ;;  %3195 = vmatprep.subr.mxu1 %v12550_v55  ;;  %v12604_v59 = vld [vmem:[#allocation44_spill] sm:$0xff] }
 0x489   : > { %3131 = vmatpush2.msra.mxu0 %v12551_v33  ;;  %3196 = vmatpush1.msra.mxu1 %v12552_v53  ;;  %v12605_v55 = vunpack.c.h.bf16 %v12604_v59  ;;  %v12606_v33 = vld [vmem:[#allocation43_spill] sm:$0xff] }
 0x48a   : > { %3132 = vmatprep.subr.mxu0 %v12553_v61  ;;  %3197 = vmatprep.subr.mxu1 %v12554_v13  ;;  %v12607_v53 = vunpack.c.h.bf16 %v12606_v33  ;;  %v12608_v61 = vunpack.c.l.bf16 %v12604_v59  ;;  %v12609_v13 = vunpack.c.l.bf16 %v12606_v33 }
 0x48b   : > { %3133 = vmatpush2.msra.mxu0 %v12555_v15  ;;  %3198 = vmatpush1.msra.mxu1 %v12556_v21  ;;  %v12610_v15 = vld [vmem:[#allocation42_spill] sm:$0xff] }
 0x48c   : > { %3134 = vmatprep.subr.mxu0 %v12557_v44  ;;  %3199 = vmatprep.subr.mxu1 %v12558_v40  ;;  %v12611_v21 = vunpack.c.h.bf16 %v12610_v15  ;;  %v12612_v44 = vld [vmem:[#allocation41_spill] sm:$0xff] }
 0x48d   : > { %3135 = vmatpush2.msra.mxu0 %v12559_v57  ;;  %3200 = vmatpush1.msra.mxu1 %v12560_v37  ;;  %v12613_v40 = vunpack.c.h.bf16 %v12612_v44  ;;  %v12614_v57 = vunpack.c.l.bf16 %v12610_v15  ;;  %v12615_v37 = vunpack.c.l.bf16 %v12612_v44 }
 0x48e   : > { %3136 = vmatprep.subr.mxu0 %v12561_v3  ;;  %3201 = vmatprep.subr.mxu1 %v12562_v34  ;;  %v12616_v3 = vld [vmem:[#allocation59_spill] sm:$0xff] }
 0x48f   : > { %3137 = vmatpush2.msra.mxu0 %v12563_v25  ;;  %3202 = vmatpush2.msra.mxu1 %v12564_v7  ;;  %v12617_v34 = vunpack.c.h.bf16 %v12616_v3  ;;  %v12618_v25 = vld [vmem:[#allocation61_spill] sm:$0xff] }
 0x490   : > { %3138 = vmatprep.subr.mxu0 %v12565_v35  ;;  %3203 = vmatprep.subr.mxu1 %v12566_v43  ;;  %v12619_v7 = vunpack.c.h.bf16 %v12618_v25  ;;  %v12620_v35 = vunpack.c.l.bf16 %v12616_v3  ;;  %v12621_v43 = vunpack.c.l.bf16 %v12618_v25 }
 0x491   : > { %3139 = vmatpush2.msra.mxu0 %v12567_v31  ;;  %3204 = vmatpush2.msra.mxu1 %v12568_v24  ;;  %v12622_v31 = vld [vmem:[#allocation45_spill] sm:$0xff] }
 0x492   : > { %3140 = vmatprep.subr.mxu0 %v12569_v4  ;;  %3205 = vmatprep.subr.mxu1 %v12570_v52  ;;  %v12623_v24 = vunpack.c.h.bf16 %v12622_v31  ;;  %v12624_v4 = vld [vmem:[#allocation48_spill] sm:$0xff] }
 0x493   : > { %3141 = vmatpush2.msra.mxu0 %v12571_v41  ;;  %3206 = vmatpush2.msra.mxu1 %v12572_v27  ;;  %v12625_v52 = vunpack.c.h.bf16 %v12624_v4  ;;  %v12626_v41 = vunpack.c.l.bf16 %v12622_v31  ;;  %v12627_v27 = vunpack.c.l.bf16 %v12624_v4 }
 0x494   : > { %3142 = vmatprep.subr.mxu0 %v12573_v12  ;;  %3207 = vmatprep.subr.mxu1 %v12574_v38  ;;  %v12628_v12 = vld [vmem:[#allocation24_spill] sm:$0xff] }
 0x495   : > { %3143 = vmatpush2.msra.mxu0 %v12575_v29  ;;  %3208 = vmatpush2.msra.mxu1 %v12576_v16  ;;  %v12629_v38 = vld [vmem:[#allocation60_spill] sm:$0xff]  ;;  %v12631_v16 = vld [vmem:[#allocation63_spill] sm:$0xff] }
 0x496   : > { %3144 = vmatprep.subr.mxu0 %v12577_v0  ;;  %3209 = vmatprep.subr.mxu1 %v12578_v39  ;;  %v12630_v29 = vunpack.c.h.bf16 %v12629_v38  ;;  %v12632_v0 = vunpack.c.h.bf16 %v12631_v16  ;;  %v6743_v39 = vld [vmem:[%s7324_s22] sm:$0xff] }
 0x497   : > { %3145 = vmatpush2.msra.mxu0 %v12579_v20  ;;  %3210 = vmatpush2.msra.mxu1 %v12580_v10  ;;  %v12633_v20 = vunpack.c.l.bf16 %v12629_v38  ;;  %v12634_v10 = vunpack.c.l.bf16 %v12631_v16  ;;  %v12684_v16 = vld [vmem:[#allocation70_spill] sm:$0xff] }
 0x498   : > { %3146 = vmatprep.subr.mxu0 %v12581_v26  ;;  %3211 = vmatprep.subr.mxu1 %v12583_v51  ;;  %v12635_v26 = vld [vmem:[#allocation47_spill] sm:$0xff]  ;;  %v12637_v51 = vld [vmem:[#allocation66_spill] sm:$0xff] }
 0x499   : > { %3147 = vmatpush2.msra.mxu0 %v12584_v50  ;;  %3212 = vmatpush2.msra.mxu1 %v12585_v48  ;;  %v12636_v63 = vunpack.c.h.bf16 %v12635_v26  ;;  %v12638_v50 = vunpack.c.h.bf16 %v12637_v51  ;;  %v12639_v48 = vunpack.c.l.bf16 %v12635_v26  ;;  %v12640_v22 = vunpack.c.l.bf16 %v12637_v51 }
 0x49a   : > { %3148 = vmatprep.subr.mxu0 %v12587_v5  ;;  %3213 = vmatprep.subr.mxu1 %v12589_v6  ;;  %v12641_v5 = vld [vmem:[#allocation50_spill] sm:$0xff]  ;;  %v12643_v6 = vld [vmem:[#allocation49_spill] sm:$0xff] }
 0x49b   : > { %3149 = vmatpush2.msra.mxu0 %v12590_v18  ;;  %3214 = vmatpush2.msra.mxu1 %v12591_v8  ;;  %v12642_v56 = vunpack.c.h.bf16 %v12641_v5  ;;  %v12644_v18 = vunpack.c.h.bf16 %v12643_v6  ;;  %v12645_v8 = vunpack.c.l.bf16 %v12641_v5  ;;  %v12695_v5 = vld [vmem:[#allocation36_spill] sm:$0xff] }
 0x49c   : > { %3150 = vmatprep.subr.mxu0 %v12593_v19  ;;  %3215 = vmatprep.subr.mxu1 %v12595_v23  ;;  %v12647_v19 = vunpack.c.l.bf16 %v12643_v6  ;;  %v12648_v23 = vld [vmem:[#allocation52_spill] sm:$0xff]  ;;  %v12697_v6 = vunpack.c.h.bf16 %v9708_v47 }
 0x49d   : > { %3151 = vmatpush2.msra.mxu0 %v12596_v11  ;;  %3216 = vmatpush2.msra.mxu1 %v12597_v60  ;;  %v12649_v11 = vunpack.c.h.bf16 %v12648_v23  ;;  %v12650_v60 = vld [vmem:[#allocation62_spill] sm:$0xff] }
 0x49e   : > { %3152 = vmatprep.subr.mxu0 %v12599_v36  ;;  %3217 = vmatprep.subr.mxu1 %v12601_v58  ;;  %v12651_v9 = vunpack.c.h.bf16 %v12650_v60  ;;  %v12652_v36 = vunpack.c.l.bf16 %v12648_v23  ;;  %v12653_v62 = vunpack.c.l.bf16 %v12650_v60  ;;  %v12654_v58 = vld [vmem:[#allocation64_spill] sm:$0xff]  ;;  %v12704_v23 = vunpack.c.l.bf16 %v9724_v46 }
 0x49f   : > { %3153 = vmatpush2.msra.mxu0 %v12602_v17  ;;  %3218 = vmatpush2.msra.mxu1 %v12603_v1  ;;  %v12655_v17 = vunpack.c.h.bf16 %v12654_v58  ;;  %v12656_v1 = vld [vmem:[#allocation73_spill] sm:$0xff] }
 0x4a0   : > { %3154 = vmatprep.subr.mxu0 %v12605_v55  ;;  %3219 = vmatprep.subr.mxu1 %v12607_v53  ;;  %v12657_v59 = vunpack.c.h.bf16 %v12656_v1  ;;  %v12658_v55 = vunpack.c.l.bf16 %v12654_v58  ;;  %v12659_v33 = vunpack.c.l.bf16 %v12656_v1  ;;  %v12660_v53 = vld [vmem:[#allocation68_spill] sm:$0xff] }
 0x4a1   : > { %3155 = vmatpush2.msra.mxu0 %v12608_v61  ;;  %3220 = vmatpush2.msra.mxu1 %v12609_v13  ;;  %v12661_v61 = vunpack.c.h.bf16 %v12660_v53  ;;  %v12662_v13 = vld [vmem:[#allocation74_spill] sm:$0xff] }
 0x4a2   : > { %3156 = vmatprep.subr.mxu0 %v12611_v21  ;;  %3221 = vmatprep.subr.mxu1 %v12613_v40  ;;  %v12663_v15 = vunpack.c.h.bf16 %v12662_v13  ;;  %v12664_v21 = vunpack.c.l.bf16 %v12660_v53  ;;  %v12665_v44 = vunpack.c.l.bf16 %v12662_v13  ;;  %v12666_v40 = vld [vmem:[#allocation51_spill] sm:$0xff]  ;;  %v12718_v53 = vld [vmem:[#allocation88_spill] sm:$0xff] }
 0x4a3   : > { %3157 = vmatpush2.msra.mxu0 %v12614_v57  ;;  %3222 = vmatpush2.msra.mxu1 %v12615_v37  ;;  %v12667_v57 = vunpack.c.h.bf16 %v12666_v40  ;;  %v12668_v37 = vld [vmem:[#allocation76_spill] sm:$0xff]  ;;  %v12721_v13 = vunpack.c.l.bf16 %v12718_v53 }
 0x4a4   : > { %3158 = vmatprep.subr.mxu0 %v12617_v34  ;;  %3223 = vmatprep.subr.mxu1 %v12619_v7  ;;  %v12669_v3 = vunpack.c.h.bf16 %v12668_v37  ;;  %v12670_v34 = vunpack.c.l.bf16 %v12666_v40  ;;  %v12671_v25 = vunpack.c.l.bf16 %v12668_v37  ;;  %v12672_v7 = vld [vmem:[#allocation54_spill] sm:$0xff] }
 0x4a5   : > { %3159 = vmatpush2.msra.mxu0 %v12620_v35  ;;  %3224 = vmatpush2.msra.mxu1 %v12621_v43  ;;  %v12673_v35 = vunpack.c.h.bf16 %v12672_v7  ;;  %v12674_v43 = vld [vmem:[#allocation78_spill] sm:$0xff] }
 0x4a6   : > { %3160 = vmatprep.subr.mxu0 %v12623_v24  ;;  %3225 = vmatprep.subr.mxu1 %v12625_v52  ;;  %v12675_v31 = vunpack.c.h.bf16 %v12674_v43  ;;  %v12676_v24 = vunpack.c.l.bf16 %v12672_v7  ;;  %v12677_v4 = vunpack.c.l.bf16 %v12674_v43  ;;  %v12678_v52 = vld [vmem:[#allocation65_spill] sm:$0xff] }
 0x4a7   : > { %3161 = vmatpush2.msra.mxu0 %v12626_v41  ;;  %3226 = vmatpush2.msra.mxu1 %v12627_v27  ;;  %v12679_v41 = vunpack.c.h.bf16 %v12678_v52  ;;  %v12680_v27 = vld [vmem:[#allocation80_spill] sm:$0xff]  ;;  %v12682_v38 = vunpack.c.l.bf16 %v12678_v52 }
 0x4a8   : > { %3162 = vmatprep.mubr.f32.mxu0 %v12628_v12  ;;  %3227 = vmatprep.subr.mxu1 %v12630_v29  ;;  %v12681_v12 = vunpack.c.h.bf16 %v12680_v27  ;;  %v12683_v29 = vunpack.c.l.bf16 %v12680_v27 }
 0x4a9   : > { %3240 = vmatprep.subr.mxu0 %v12632_v0  ;;  %3163 = vmatmul.mubr.f32.vlgmr.msra.gmra.mxu0 %v6743_v39  ;;  %v12685_v0 = vunpack.c.h.bf16 %v12684_v16  ;;  %v12686_v39 = vld [vmem:[#allocation82_spill] sm:$0xff] }
 0x4aa   : > { %3228 = vmatpush2.msra.mxu1 %v12633_v20  ;;  %3241 = vmatpush1.msra.mxu0 %v12634_v10  ;;  %v12687_v20 = vunpack.c.h.bf16 %v12686_v39  ;;  %v12688_v10 = vunpack.c.l.bf16 %v12684_v16  ;;  %v12689_v26 = vunpack.c.l.bf16 %v12686_v39 }
 0x4ab   : > { %3229 = vmatprep.subr.mxu1 %v12636_v63  ;;  %3242 = vmatprep.subr.mxu0 %v12638_v50  ;;  %v12690_v63 = vld [vmem:[#allocation58_spill] sm:$0xff]  ;;  %v12692_v50 = vunpack.c.h.bf16 %v9692_v28 }
 0x4ac   : > { %3230 = vmatpush2.msra.mxu1 %v12639_v48  ;;  %3243 = vmatpush1.msra.mxu0 %v12640_v22  ;;  %v12691_v51 = vunpack.c.h.bf16 %v12690_v63  ;;  %v12693_v48 = vunpack.c.l.bf16 %v12690_v63  ;;  %v12694_v22 = vunpack.c.l.bf16 %v9692_v28 }
 0x4ad   : > { %3231 = vmatprep.subr.mxu1 %v12642_v56  ;;  %3244 = vmatprep.subr.mxu0 %v12644_v18  ;;  %v12696_v56 = vunpack.c.h.bf16 %v12695_v5  ;;  %v12698_v18 = vunpack.c.l.bf16 %v12695_v5  ;;  %v12754_v5 = vld [vmem:[#allocation94_spill] sm:$0xff] }
 0x4ae   : > { %3232 = vmatpush2.msra.mxu1 %v12645_v8  ;;  %3233 = vmatprep.mubr.f32.mxu1 %v12646_v49  ;;  %v12699_v8 = vunpack.c.l.bf16 %v9708_v47  ;;  %v12700_v49 = vld [vmem:[#allocation35_spill] sm:$0xff] }
 0x4af   : > { %3245 = vmatpush1.msra.mxu0 %v12647_v19  ;;  %3234 = vmatmul.mubr.f32.vlgmr.msra.gmra.mxu1 %v6744_v30  ;;  %v12701_v19 = vunpack.c.h.bf16 %v12700_v49  ;;  %v12702_v30 = vunpack.c.h.bf16 %v9724_v46  ;;  %v12703_v28 = vunpack.c.l.bf16 %v12700_v49 }
 0x4b0   : > { %3246 = vmatprep.subr.mxu0 %v12649_v11  ;;  %3311 = vmatprep.subr.mxu1 %v12651_v9  ;;  %v12705_v11 = vld [vmem:[#allocation34_spill] sm:$0xff]  ;;  %v12707_v9 = vunpack.c.h.bf16 %v9737_v42 }
 0x4b1   : > { %3247 = vmatpush1.msra.mxu0 %v12652_v36  ;;  %3312 = vmatpush1.msra.mxu1 %v12653_v62  ;;  %v12706_v60 = vunpack.c.h.bf16 %v12705_v11  ;;  %v12708_v47 = vunpack.c.l.bf16 %v12705_v11  ;;  %v12709_v36 = vunpack.c.l.bf16 %v9737_v42  ;;  %v12710_v62 = vld [vmem:[#allocation40_spill] sm:$0xff] }
 0x4b2   : > { %3248 = vmatprep.subr.mxu0 %v12655_v17  ;;  %3313 = vmatprep.subr.mxu1 %v12657_v59  ;;  %v12711_v58 = vunpack.c.h.bf16 %v12710_v62  ;;  %v12712_v17 = vld [vmem:[#allocation87_spill] sm:$0xff]  ;;  %v12714_v46 = vunpack.c.l.bf16 %v12710_v62  ;;  %v12764_v11 = vld [vmem:[#allocation32_spill] sm:$0xff] }
 0x4b3   : > { %3249 = vmatpush1.msra.mxu0 %v12658_v55  ;;  %3314 = vmatpush1.msra.mxu1 %v12659_v33  ;;  %v12713_v1 = vunpack.c.h.bf16 %v12712_v17  ;;  %v12715_v59 = vunpack.c.l.bf16 %v12712_v17  ;;  %v12716_v55 = vld [vmem:[#allocation33_spill] sm:$0xff] }
 0x4b4   : > { %3250 = vmatprep.subr.mxu0 %v12661_v61  ;;  %3315 = vmatprep.subr.mxu1 %v12663_v15  ;;  %v12717_v33 = vunpack.c.h.bf16 %v12716_v55  ;;  %v12719_v61 = vunpack.c.h.bf16 %v12718_v53  ;;  %v12720_v42 = vunpack.c.l.bf16 %v12716_v55  ;;  %v12722_v15 = vld [vmem:[#allocation39_spill] sm:$0xff] }
 0x4b5   : > { %3251 = vmatpush1.msra.mxu0 %v12664_v21  ;;  %3316 = vmatpush1.msra.mxu1 %v12665_v44  ;;  %v12723_v21 = vunpack.c.h.bf16 %v12722_v15  ;;  %v12724_v44 = vld [vmem:[#allocation89_spill] sm:$0xff] }
 0x4b6   : > { %3252 = vmatprep.subr.mxu0 %v12667_v57  ;;  %3317 = vmatprep.subr.mxu1 %v12669_v3  ;;  %v12725_v40 = vunpack.c.h.bf16 %v12724_v44  ;;  %v12726_v57 = vunpack.c.l.bf16 %v12722_v15  ;;  %v12727_v37 = vunpack.c.l.bf16 %v12724_v44  ;;  %v12728_v3 = vld [vmem:[#allocation38_spill] sm:$0xff] }
 0x4b7   : > { %3253 = vmatpush1.msra.mxu0 %v12670_v34  ;;  %3318 = vmatpush1.msra.mxu1 %v12671_v25  ;;  %v12729_v34 = vunpack.c.h.bf16 %v12728_v3  ;;  %v12730_v25 = vld [vmem:[#allocation90_spill] sm:$0xff] }
 0x4b8   : > { %3254 = vmatprep.subr.mxu0 %v12673_v35  ;;  %3319 = vmatprep.subr.mxu1 %v12675_v31  ;;  %v12731_v7 = vunpack.c.h.bf16 %v12730_v25  ;;  %v12732_v35 = vunpack.c.l.bf16 %v12728_v3  ;;  %v12733_v43 = vunpack.c.l.bf16 %v12730_v25  ;;  %v12734_v31 = vld [vmem:[#allocation53_spill] sm:$0xff] }
 0x4b9   : > { %3255 = vmatpush1.msra.mxu0 %v12676_v24  ;;  %3320 = vmatpush1.msra.mxu1 %v12677_v4  ;;  %v12735_v24 = vunpack.c.h.bf16 %v12734_v31  ;;  %v12736_v4 = vld [vmem:[#allocation91_spill] sm:$0xff] }
 0x4ba   : > { %3256 = vmatprep.subr.mxu0 %v12679_v41  ;;  %3321 = vmatprep.subr.mxu1 %v12681_v12  ;;  %v12737_v52 = vunpack.c.h.bf16 %v12736_v4  ;;  %v12738_v41 = vunpack.c.l.bf16 %v12734_v31  ;;  %v12739_v27 = vunpack.c.l.bf16 %v12736_v4  ;;  %v12740_v12 = vld [vmem:[#allocation37_spill] sm:$0xff] }
 0x4bb   : > { %3257 = vmatpush1.msra.mxu0 %v12682_v38  ;;  %3322 = vmatpush1.msra.mxu1 %v12683_v29  ;;  %v12741_v38 = vunpack.c.h.bf16 %v12740_v12  ;;  %v12742_v29 = vld [vmem:[#allocation92_spill] sm:$0xff] }
 0x4bc   : > { %3258 = vmatprep.subr.mxu0 %v12685_v0  ;;  %3323 = vmatprep.subr.mxu1 %v12687_v20  ;;  %v12743_v16 = vunpack.c.h.bf16 %v12742_v29  ;;  %v12744_v0 = vunpack.c.l.bf16 %v12740_v12  ;;  %v12745_v39 = vunpack.c.l.bf16 %v12742_v29  ;;  %v12746_v20 = vld [vmem:[#allocation46_spill] sm:$0xff] }
 0x4bd   : > { %3259 = vmatpush1.msra.mxu0 %v12688_v10  ;;  %3324 = vmatpush1.msra.mxu1 %v12689_v26  ;;  %v12747_v10 = vunpack.c.h.bf16 %v12746_v20  ;;  %v12748_v26 = vld [vmem:[#allocation93_spill] sm:$0xff] }
 0x4be   : > { %3260 = vmatprep.subr.mxu0 %v12691_v51  ;;  %3325 = vmatprep.subr.mxu1 %v12692_v50  ;;  %v12749_v63 = vunpack.c.h.bf16 %v12748_v26  ;;  %v12750_v51 = vunpack.c.l.bf16 %v12746_v20  ;;  %v12751_v50 = vunpack.c.l.bf16 %v12748_v26 }
 0x4bf   : > { %3261 = vmatpush1.msra.mxu0 %v12693_v48  ;;  %3326 = vmatpush1.msra.mxu1 %v12694_v22  ;;  %v12752_v48 = vld [vmem:[#allocation72_spill] sm:$0xff] }
 0x4c0   : > { %3262 = vmatprep.subr.mxu0 %v12696_v56  ;;  %3327 = vmatprep.subr.mxu1 %v12697_v6  ;;  %v12753_v22 = vunpack.c.h.bf16 %v12752_v48  ;;  %v12755_v56 = vunpack.c.h.bf16 %v12754_v5  ;;  %v12756_v6 = vunpack.c.l.bf16 %v12752_v48 }
 0x4c1   : > { %3263 = vmatpush1.msra.mxu0 %v12698_v18  ;;  %3328 = vmatpush1.msra.mxu1 %v12699_v8  ;;  %v12757_v18 = vunpack.c.l.bf16 %v12754_v5  ;;  %v12758_v8 = vld [vmem:[#allocation71_spill] sm:$0xff] }
 0x4c2   : > { %3264 = vmatprep.subr.mxu0 %v12701_v19  ;;  %3329 = vmatprep.subr.mxu1 %v12702_v30  ;;  %v12759_v49 = vunpack.c.h.bf16 %v12758_v8  ;;  %v12760_v19 = vld [vmem:[#allocation95_spill] sm:$0xff] }
 0x4c3   : > { %3265 = vmatpush1.msra.mxu0 %v12703_v28  ;;  %3330 = vmatpush1.msra.mxu1 %v12704_v23  ;;  %v12761_v30 = vunpack.c.h.bf16 %v12760_v19  ;;  %v12762_v28 = vunpack.c.l.bf16 %v12758_v8  ;;  %v12763_v23 = vunpack.c.l.bf16 %v12760_v19  ;;  %v2854_v8 = vpop.f32.mrf.mxu0  ;;  %v6745_v19 = vld [vmem:[%s7324_s22 + $0x10] sm:$0xff] }
 0x4c4   : > { %3266 = vmatprep.subr.mxu0 %v12706_v60  ;;  %3331 = vmatprep.subr.mxu1 %v12707_v9  ;;  %v12765_v60 = vunpack.c.h.bf16 %v12764_v11  ;;  %v12766_v9 = vld [vmem:[#allocation96_spill] sm:$0xff] }
 0x4c5   : > { %3267 = vmatpush1.msra.mxu0 %v12708_v47  ;;  %3332 = vmatpush1.msra.mxu1 %v12709_v36  ;;  %v12767_v47 = vunpack.c.h.bf16 %v12766_v9  ;;  %v12768_v36 = vunpack.c.l.bf16 %v12764_v11  ;;  %v12769_v62 = vunpack.c.l.bf16 %v12766_v9  ;;  %v12820_v11 = vunpack.c.l.bf16 %v9911_v2 }
 0x4c6   : > { %3268 = vmatprep.subr.mxu0 %v12711_v58  ;;  %3333 = vmatprep.subr.mxu1 %v12713_v1  ;;  %v12770_v58 = vld [vmem:[#allocation75_spill] sm:$0xff]  ;;  %v12772_v1 = vld [vmem:[#allocation97_spill] sm:$0xff]  ;;  %v12821_v9 = vmov 0.0  }
 0x4c7   : > { %3269 = vmatpush1.msra.mxu0 %v12714_v46  ;;  %3334 = vmatpush1.msra.mxu1 %v12715_v59  ;;  %v12771_v17 = vunpack.c.h.bf16 %v12770_v58  ;;  %v12773_v46 = vunpack.c.h.bf16 %v12772_v1  ;;  %v12774_v59 = vunpack.c.l.bf16 %v12770_v58  ;;  %v12775_v55 = vunpack.c.l.bf16 %v12772_v1 }
 0x4c8   : > { %3270 = vmatprep.subr.mxu0 %v12717_v33  ;;  %3335 = vmatprep.subr.mxu1 %v12719_v61  ;;  %v12776_v33 = vld [vmem:[#allocation77_spill] sm:$0xff]  ;;  %v12778_v61 = vld [vmem:[#allocation98_spill] sm:$0xff] }
 0x4c9   : > { %3271 = vmatpush1.msra.mxu0 %v12720_v42  ;;  %3336 = vmatpush1.msra.mxu1 %v12721_v13  ;;  %v12777_v53 = vunpack.c.h.bf16 %v12776_v33  ;;  %v12779_v42 = vunpack.c.h.bf16 %v12778_v61  ;;  %v12780_v13 = vunpack.c.l.bf16 %v12776_v33  ;;  %v12781_v15 = vunpack.c.l.bf16 %v12778_v61 }
 0x4ca   : > { %3272 = vmatprep.subr.mxu0 %v12723_v21  ;;  %3337 = vmatprep.subr.mxu1 %v12725_v40  ;;  %v12782_v21 = vld [vmem:[#allocation79_spill] sm:$0xff] }
 0x4cb   : > { %3273 = vmatpush2.msra.mxu0 %v12726_v57  ;;  %3338 = vmatpush1.msra.mxu1 %v12727_v37  ;;  %v12783_v44 = vunpack.c.h.bf16 %v12782_v21  ;;  %v12784_v40 = vld [vmem:[#allocation99_spill] sm:$0xff]  ;;  %v12786_v37 = vunpack.c.l.bf16 %v12782_v21 }
 0x4cc   : > { %3274 = vmatprep.subr.mxu0 %v12729_v34  ;;  %3339 = vmatprep.subr.mxu1 %v12731_v7  ;;  %v12785_v57 = vunpack.c.h.bf16 %v12784_v40  ;;  %v12787_v3 = vunpack.c.l.bf16 %v12784_v40  ;;  %v12788_v34 = vld [vmem:[#allocation81_spill] sm:$0xff]  ;;  %v12790_v7 = vld [vmem:[#allocation100_spill] sm:$0xff] }
 0x4cd   : > { %3275 = vmatpush2.msra.mxu0 %v12732_v35  ;;  %3340 = vmatpush1.msra.mxu1 %v12733_v43  ;;  %v12789_v25 = vunpack.c.h.bf16 %v12788_v34  ;;  %v12791_v35 = vunpack.c.h.bf16 %v12790_v7  ;;  %v12792_v43 = vunpack.c.l.bf16 %v12788_v34  ;;  %v12793_v31 = vunpack.c.l.bf16 %v12790_v7 }
 0x4ce   : > { %3276 = vmatprep.subr.mxu0 %v12735_v24  ;;  %3341 = vmatprep.subr.mxu1 %v12737_v52  ;;  %v12794_v24 = vld [vmem:[#allocation83_spill] sm:$0xff]  ;;  %v12796_v52 = vld [vmem:[#allocation101_spill] sm:$0xff] }
 0x4cf   : > { %3277 = vmatpush2.msra.mxu0 %v12738_v41  ;;  %3342 = vmatpush1.msra.mxu1 %v12739_v27  ;;  %v12795_v4 = vunpack.c.h.bf16 %v12794_v24  ;;  %v12797_v41 = vunpack.c.h.bf16 %v12796_v52  ;;  %v12798_v27 = vunpack.c.l.bf16 %v12794_v24  ;;  %v12799_v12 = vunpack.c.l.bf16 %v12796_v52 }
 0x4d0   : > { %3278 = vmatprep.subr.mxu0 %v12741_v38  ;;  %3343 = vmatprep.subr.mxu1 %v12743_v16  ;;  %v12800_v38 = vld [vmem:[#allocation84_spill] sm:$0xff]  ;;  %v12802_v16 = vld [vmem:[#allocation102_spill] sm:$0xff] }
 0x4d1   : > { %3279 = vmatpush2.msra.mxu0 %v12744_v0  ;;  %3344 = vmatpush2.msra.mxu1 %v12745_v39  ;;  %v12801_v29 = vunpack.c.h.bf16 %v12800_v38  ;;  %v12803_v0 = vunpack.c.h.bf16 %v12802_v16  ;;  %v12804_v39 = vunpack.c.l.bf16 %v12800_v38  ;;  %v12805_v20 = vunpack.c.l.bf16 %v12802_v16 }
 0x4d2   : > { %3280 = vmatprep.subr.mxu0 %v12747_v10  ;;  %3345 = vmatprep.subr.mxu1 %v12749_v63  ;;  %v12806_v10 = vld [vmem:[#allocation85_spill] sm:$0xff]  ;;  %v12808_v63 = vld [vmem:[#allocation103_spill] sm:$0xff] }
 0x4d3   : > { %3281 = vmatpush2.msra.mxu0 %v12750_v51  ;;  %3346 = vmatpush2.msra.mxu1 %v12751_v50  ;;  %v12807_v26 = vunpack.c.h.bf16 %v12806_v10  ;;  %v12809_v51 = vunpack.c.h.bf16 %v12808_v63  ;;  %v12810_v50 = vunpack.c.l.bf16 %v12806_v10  ;;  %v12811_v48 = vunpack.c.l.bf16 %v12808_v63  ;;  %v3097_v10 = vld [vmem:[#allocation6 + $0x8] sm:$0xff] }
 0x4d4   : > { %3282 = vmatprep.subr.mxu0 %v12753_v22  ;;  %3347 = vmatprep.subr.mxu1 %v12755_v56  ;;  %v12812_v22 = vld [vmem:[#allocation86_spill] sm:$0xff]  ;;  %v12814_v56 = vunpack.c.h.bf16 %v9903_v32 }
 0x4d5   : > { %3283 = vmatpush2.msra.mxu0 %v12756_v6  ;;  %3348 = vmatpush2.msra.mxu1 %v12757_v18  ;;  %v12813_v5 = vunpack.c.h.bf16 %v12812_v22  ;;  %v12815_v6 = vunpack.c.l.bf16 %v12812_v22  ;;  %v12816_v18 = vld [vmem:[#allocation26_spill] sm:$0xff] }
 0x4d6   : > { %3284 = vmatprep.subr.mxu0 %v12759_v49  ;;  %3349 = vmatprep.subr.mxu1 %v12761_v30  ;;  %v12817_v49 = vunpack.c.l.bf16 %v9903_v32  ;;  %v12818_v30 = vunpack.c.h.bf16 %v9911_v2  ;;  %v6746_v2 = vld [vmem:[%s7324_s22 + $0x18] sm:$0xff]  ;;  %s7071_s22 = smov 111  }
 0x4d7   : > { %3285 = vmatpush2.msra.mxu0 %v12762_v28  ;;  %3350 = vmatpush2.msra.mxu1 %v12763_v23  ;;  %v12819_v28 = vld [vmem:[#allocation27_spill] sm:$0xff] }
 0x4d8   : > { %3286 = vmatprep.subr.mxu0 %v12765_v60  ;;  %3351 = vmatprep.subr.mxu1 %v12767_v47  ;;  %v2856_v47 = vpop.f32.mrf.mxu0 }
 0x4d9   : > { %3287 = vmatpush2.msra.mxu0 %v12768_v36  ;;  %3352 = vmatpush2.msra.mxu1 %v12769_v62  ;;  %v12822_v36 = vunpack.c.h.bf16 %v9919_v54  ;;  %v12823_v62 = vunpack.c.l.bf16 %v9919_v54 }
 0x4da   : > { %3288 = vmatprep.subr.mxu0 %v12771_v17  ;;  %3353 = vmatprep.subr.mxu1 %v12773_v46  ;;  %v12824_v17 = vunpack.c.h.bf16 %v9927_v45  ;;  %v2860_v1 = vpop.f32.mrf.mxu0 }
 0x4db   : > { %3289 = vmatpush2.msra.mxu0 %v12774_v59  ;;  %3354 = vmatpush2.msra.mxu1 %v12775_v55 }
 0x4dc   : > { %3290 = vmatprep.subr.mxu0 %v12777_v53  ;;  %3355 = vmatprep.subr.mxu1 %v12779_v42  ;;  %v2862_v59 = vpop.f32.mrf.mxu0 }
 0x4dd   : > { %3291 = vmatpush2.msra.mxu0 %v12780_v13  ;;  %3356 = vmatpush2.msra.mxu1 %v12781_v15 }
 0x4de   : > { %3292 = vmatprep.subr.mxu0 %v12783_v44  ;;  %3357 = vmatprep.subr.mxu1 %v12785_v57 }
 0x4df   : > { %3293 = vmatpush2.msra.mxu0 %v12786_v37  ;;  %3358 = vmatpush2.msra.mxu1 %v12787_v3 }
 0x4e0   : > { %3294 = vmatprep.subr.mxu0 %v12789_v25  ;;  %3359 = vmatprep.subr.mxu1 %v12791_v35 }
 0x4e1   : > { %3295 = vmatpush2.msra.mxu0 %v12792_v43  ;;  %3360 = vmatpush2.msra.mxu1 %v12793_v31 }
 0x4e2   : > { %3296 = vmatprep.subr.mxu0 %v12795_v4  ;;  %3361 = vmatprep.subr.mxu1 %v12797_v41 }
 0x4e3   : > { %3297 = vmatpush2.msra.mxu0 %v12798_v27  ;;  %3362 = vmatpush2.msra.mxu1 %v12799_v12 }
 0x4e4   : > { %3298 = vmatprep.subr.mxu0 %v12801_v29  ;;  %3363 = vmatprep.subr.mxu1 %v12803_v0 }
 0x4e5   : > { %3299 = vmatpush2.msra.mxu0 %v12804_v39  ;;  %3364 = vmatpush2.msra.mxu1 %v12805_v20  ;;  %v3096_v20 = vld [vmem:[#allocation6] sm:$0xff] }
 0x4e6   : > { %3300 = vmatprep.subr.mxu0 %v12807_v26  ;;  %3365 = vmatprep.subr.mxu1 %v12809_v51 }
 0x4e7   : > { %3301 = vmatpush2.msra.mxu0 %v12810_v50  ;;  %3366 = vmatpush2.msra.mxu1 %v12811_v48 }
 0x4e8   : > { %3302 = vmatprep.subr.mxu0 %v12813_v5  ;;  %3367 = vmatprep.subr.mxu1 %v12814_v56 }
 0x4e9   : > { %3303 = vmatpush2.msra.mxu0 %v12815_v6  ;;  %3304 = vmatprep.mubr.f32.mxu0 %v12816_v18 }
 0x4ea   : > { %3368 = vmatpush2.msra.mxu1 %v12817_v49  ;;  %3305 = vmatmul.mubr.f32.vlgmr.msra.gmra.mxu0 %v6745_v19  ;;  %v3652_v19 = vld [vmem:[#allocation9 + $0x8] sm:$0xff] }
 0x4eb   : > { %3369 = vmatprep.subr.mxu1 %v12818_v30  ;;  %3375 = vmatprep.mubr.f32.mxu1 %v12819_v28  ;;  %v2931_v23 = vpop.f32.mrf.mxu1 }
 0x4ec   : > { %3370 = vmatpush2.msra.mxu1 %v12820_v11  ;;  %v2932_v60 = vadd.f32 %v2931_v23, %v2854_v8  ;;  %3459 = vmatprep.mubr.f32.mxu0 %v12821_v9 }
 0x4ed   : > { %3371 = vmatprep.subr.mxu1 %v12822_v36  ;;  %v2933_v32 = vpop.f32.mrf.mxu1 }
 0x4ee   : > { %3372 = vmatpush2.msra.mxu1 %v12823_v62  ;;  %v2934_v58 = vadd.f32 %v2933_v32, %v2856_v47 }
 0x4ef   : > { %3373 = vmatprep.subr.mxu1 %v12824_v17 }
 0x4f0   : > { %3374 = vmatpush2.msra.mxu1 %v2756_v14 }
 0x4f1   : > { %3376 = vmatmul.mubr.f32.vlgmr.msra.gmra.mxu1 %v6746_v2 }
 0x4f2   : > { %6026 = vmatprep.mubr.msk.f32.mxu1 %vm2089_vm5, %v3652_v19 }
 0x4fd   : > { %v2937_v46 = vpop.f32.mrf.mxu1 }
 0x4fe   : > { %v2938_v55 = vadd.f32 %v2937_v46, %v2860_v1  ;;  %v12827_v1 = vld [vmem:[#allocation29_spill] sm:$0xff] }
 0x4ff   : > { %v2939_v33 = vpop.f32.mrf.mxu1  ;;  %v3473_v46 = vand.u32 15, %v12827_v1  ;;  %v3653_v1 = vld [vmem:[#allocation9 + $0x10] sm:$0xff] }
 0x500   : > { %v2940_v53 = vadd.f32 %v2939_v33, %v2862_v59  ;;  %v12828_v33 = vld [vmem:[#allocation28_spill] sm:$0xff] }
 0x501   : > { %vm10560_vm1 = vcmp.ge.s32.totalorder %v3473_v46, 1  ;;  %vm10574_vm13 = vcmp.le.s32.totalorder %v3473_v46, 14  ;;  %v3656_v46 = vld [vmem:[#allocation9 + $0x28] sm:$0xff] }
 0x525   : > { %v3008_v61 = vpop.f32.mrf.mxu0 }
 0x526   : > { %v3009_v42 = vadd.f32 %v3008_v61, %v2932_v60 }
 0x527   : > { %v3010_v13 = vpop.f32.mrf.mxu0 }
 0x528   : > { %v3011_v54 = vadd.f32 %v3010_v13, %v2934_v58 }
 0x52a   : > { %v3014_v15 = vpop.f32.mrf.mxu0 }
 0x52b   : > { %v3015_v21 = vadd.f32 %v3014_v15, %v2938_v55 }
 0x52c   : > { %v3016_v44 = vpop.f32.mrf.mxu0 }
 0x52d   : > { %v3017_v40 = vadd.f32 %v3016_v44, %v2940_v53  ;;  %v3085_v57 = vpop.f32.mrf.mxu1  ;;  %v3472_v53 = vand.u32 15, %v12828_v33 }
 0x52e   : > { %v3086_v37 = vadd.f32 %v3085_v57, %v3009_v42  ;;  %v6286_v57 = vld [vmem:[%s11600_s8 + $0x70] sm:$0xff]  }
 0x52f   : > { %v3087_v45 = vpop.f32.mrf.mxu1  ;;  %vm10566_vm9 = vcmp.ge.s32.totalorder %v3472_v53, 1  ;;  %vm10584_vm14 = vcmp.le.s32.totalorder %v3472_v53, 14  ;;  %v3657_v53 = vld [vmem:[#allocation9 + $0x30] sm:$0xff] }
 0x530   : > { %v3088_v14 = vadd.f32 %v3087_v45, %v3011_v54 }
 0x532   : > { %v3091_v3 = vpop.f32.mrf.mxu1 }
 0x533   : > { %v3092_v34 = vadd.f32 %v3091_v3, %v3015_v21 }
 0x534   : > { %v3093_v25 = vpop.f32.mrf.mxu1 }
 0x535   : > { %v3094_v7 = vadd.f32 %v3093_v25, %v3017_v40 }
 0x569   : > { %v3164_v35 = vpop.f32.mrf.mxu0 }
 0x56b   : > { %v3166_v43 = vpop.f32.mrf.mxu0 }
 0x56f   : > { %v3235_v31 = vpop.f32.mrf.mxu1 }
 0x570   : > { %v3236_v27 = vadd.f32 %v3235_v31, %v3164_v35 }
 0x571   : > { %v3237_v4 = vpop.f32.mrf.mxu1 }
 0x572   : > { %v3238_v41 = vadd.f32 %v3237_v4, %v3166_v43 }
 0x5aa   : > { %v3306_v24 = vpop.f32.mrf.mxu0 }
 0x5ab   : > { %v3307_v29 = vadd.f32 %v3306_v24, %v3236_v27 }
 0x5ac   : > { %v3308_v52 = vpop.f32.mrf.mxu0 }
 0x5ad   : > { %v3309_v38 = vadd.f32 %v3308_v52, %v3238_v41 }
 0x5b1   : > { %v3377_v12 = vpop.f32.mrf.mxu1 }
 0x5b2   : > { %v3378_v39 = vadd.f32 %v3377_v12, %v3307_v29 }
 0x5b3   : > { %v3379_v16 = vpop.f32.mrf.mxu1 }
 0x5b4   : > { %v3380_v0 = vadd.f32 %v3379_v16, %v3309_v38 }
 0x5b6   : > { %5992 = vmatprep.subr.msk.mxu0 %vm12825_vm2, %v3380_v0  ;;  %vm3535_vm2 = vcmask 121856  }
 0x5b7   : > { %5993 = vmatpush1.msk.msra.mxu0 %vm12826_vm7, %v3378_v39  ;;  %vm12844_vm7 = vmmov %vm12842_vm0 }
 0x5b8   : > { %5994 = vmatmul.mubr.msk.f32.vlgmr.msra.gmra.mxu0 %vm3382_vm11, %v3096_v20 }
 0x5b9   : > { %3465 = vmatprep.mubr.f32.mxu0 %v12821_v9 }
 0x5bc   : > { %5995 = vmatmul.mubr.msk.f32.gmra.mxu0 %vm3382_vm11, %v3097_v10  ;;  %vm12843_vm11 = vmmov %vm12842_vm0 }
 0x678   : > { %v3461_v26 = vpop.f32.mrf.mxu0 }
 0x679   : > { %v10471_v63 = vadd.f32 %v3461_v26, %v3086_v37 }
 0x67a   : > { %v3463_v50 = vpop.f32.mrf.mxu0 }
 0x67b   : > { %v10474_v51 = vmax.f32 %v10471_v63, 0.0  ;;  %v10480_v48 = vadd.f32 %v3463_v50, %v3088_v14 }
 0x67c   : > { %v3467_v5 = vpop.f32.mrf.mxu0 }
 0x67d   : > { %3592 = vrot.lane.b32.xlu1 %v10474_v51, %s7066_s20  ;;  %3613 = vrot.lane.b32.xlu0 %v10474_v51, %s7067_s21  ;;  %v10487_v22 = vmax.f32 %v10480_v48, 0.0  ;;  %v10493_v56 = vadd.f32 %v3467_v5, %v3092_v34 }
 0x67e   : > { %v3469_v18 = vpop.f32.mrf.mxu0 }
 0x67f   : > { %v10500_v6 = vmax.f32 %v10493_v56, 0.0  ;;  %v10506_v8 = vadd.f32 %v3469_v18, %v3094_v7 }
 0x681   : > { %3572 = vrot.lane.b32.xlu1 %v10474_v51, %s7059_s24  ;;  %3552 = vrot.lane.b32.xlu0 %v10474_v51, %s7061_s30  ;;  %v10513_v49 = vmax.f32 %v10506_v8, 0.0 }
 0x685   : > { %3615 = vrot.lane.b32.xlu1 %v10487_v22, %s7067_s21  ;;  %3594 = vrot.lane.b32.xlu0 %v10487_v22, %s7066_s20 }
 0x689   : > { %3554 = vrot.lane.b32.xlu1 %v10487_v22, %s7061_s30  ;;  %3574 = vrot.lane.b32.xlu0 %v10487_v22, %s7059_s24 }
 0x68d   : > { %3596 = vrot.lane.b32.xlu1 %v10500_v6, %s7066_s20  ;;  %3617 = vrot.lane.b32.xlu0 %v10500_v6, %s7067_s21 }
 0x691   : > { %3576 = vrot.lane.b32.xlu1 %v10500_v6, %s7059_s24  ;;  %3556 = vrot.lane.b32.xlu0 %v10500_v6, %s7061_s30 }
 0x695   : > { %3619 = vrot.lane.b32.xlu1 %v10513_v49, %s7067_s21  ;;  %3531 = vrot.lane.b32.xlu0 %v10500_v6, %s7068_s17 }
 0x699   : > { %3529 = vrot.lane.b32.xlu1 %v10487_v22, %s7068_s17  ;;  %3598 = vrot.lane.b32.xlu0 %v10513_v49, %s7066_s20 }
 0x69d   : > { %3513 = vrot.lane.b32.xlu1 %v10487_v22, %s7069_s18  ;;  %3578 = vrot.lane.b32.xlu0 %v10513_v49, %s7059_s24 }
 0x6a1   : > { %3488 = vrot.lane.b32.xlu1 %v10487_v22, %s7070_s23  ;;  %3527 = vrot.lane.b32.xlu0 %v10474_v51, %s7068_s17 }
 0x6a5   : > { %3558 = vrot.lane.b32.xlu1 %v10513_v49, %s7061_s30  ;;  %3515 = vrot.lane.b32.xlu0 %v10500_v6, %s7069_s18 }
 0x6a9   : > { %3533 = vrot.lane.b32.xlu1 %v10513_v49, %s7068_s17  ;;  %3511 = vrot.lane.b32.xlu0 %v10474_v51, %s7069_s18 }
 0x6ad   : > { %3517 = vrot.lane.b32.xlu1 %v10513_v49, %s7069_s18  ;;  %3490 = vrot.lane.b32.xlu0 %v10500_v6, %s7070_s23 }
 0x6b1   : > { %3492 = vrot.lane.b32.xlu1 %v10513_v49, %s7070_s23  ;;  %3486 = vrot.lane.b32.xlu0 %v10474_v51, %s7070_s23 }
 0x6b5   : > { %3634 = vrot.lane.b32.xlu1 %v10500_v6, %s7071_s22  ;;  %3636 = vrot.lane.b32.xlu0 %v10513_v49, %s7071_s22 }
 0x6b9   : > { %3630 = vrot.lane.b32.xlu1 %v10474_v51, %s7071_s22  ;;  %3632 = vrot.lane.b32.xlu0 %v10487_v22, %s7071_s22 }
 0x6ef   : > { %v3593_v30 = vpop.permute.xlu1 %3592  ;;  %v3614_v28 = vpop.permute.xlu0 %3613 }
 0x6f3   : > { %v3573_v23 = vpop.permute.xlu1 %3572  ;;  %v3553_v11 = vpop.permute.xlu0 %3552 }
 0x6f4   : > { %v3566_v38 = vsel %vm12844_vm7, 0.0, %v3553_v11  ;;  %vm12850_vm7 = vmmov %vm12842_vm0 }
 0x6f7   : > { %v3616_v60 = vpop.permute.xlu1 %3615  ;;  %v3595_v47 = vpop.permute.xlu0 %3594 }
 0x6f8   : > { %v3622_v13 = vsel %vm3621_vm4, %v3614_v28, %v3616_v60  ;;  %v3607_v37 = vsel %vm3600_vm8, %v3595_v47, 0.0  ;;  %v3601_v45 = vsel %vm3600_vm8, %v3593_v30, %v3595_v47 }
 0x6fb   : > { %v3555_v36 = vpop.permute.xlu1 %3554  ;;  %v3575_v32 = vpop.permute.xlu0 %3574 }
 0x6fc   : > { %v3586_v35 = vsel %vm12839_vm15, %v3575_v32, 0.0  ;;  %v3580_v43 = vsel %vm12840_vm6, %v3573_v23, %v3575_v32  ;;  %v3560_v12 = vsel %vm12843_vm11, %v3553_v11, %v3555_v36  ;;  %vm3638_vm15 = vcmask 908288   ;;  %vm12847_vm6 = vmmov %vm12842_vm0 }
 0x6fd   : > { %vm12849_vm11 = vmmov %vm12842_vm0 }
 0x6ff   : > { %v3597_v62 = vpop.permute.xlu1 %3596  ;;  %v3618_v58 = vpop.permute.xlu0 %3617 }
 0x703   : > { %v3577_v17 = vpop.permute.xlu1 %3576  ;;  %v3557_v2 = vpop.permute.xlu0 %3556 }
 0x704   : > { %v3567_v27 = vsel %vm12842_vm0, 0.0, %v3557_v2 }
 0x707   : > { %v3620_v59 = vpop.permute.xlu1 %3619  ;;  %v3532_v55 = vpop.permute.xlu0 %3531 }
 0x708   : > { %5996 = vmatprep.subr.msk.mxu1 %vm3621_vm4, %v3620_v59  ;;  %v3623_v61 = vsel %vm3621_vm4, %v3618_v58, %v3620_v59  ;;  %v3543_v39 = vsel %vm3535_vm2, 0.0, %v3532_v55  ;;  %v3655_v59 = vld [vmem:[#allocation9 + $0x20] sm:$0xff] }
 0x709   : > { %3672 = vmatpush1.msra.mxu1 %v3623_v61 }
 0x70a   : > { %5997 = vmatprep.subr.msk.mxu1 %vm3621_vm4, %v3616_v60 }
 0x70b   : > { %v3530_v54 = vpop.permute.xlu1 %3529  ;;  %3674 = vmatpush1.msra.mxu1 %v3622_v13  ;;  %v3599_v15 = vpop.permute.xlu0 %3598 }
 0x70c   : > { %v3602_v44 = vsel %vm3600_vm8, %v3597_v62, %v3599_v15  ;;  %v3608_v40 = vsel %vm3600_vm8, %v3599_v15, 0.0 }
 0x70d   : > { %5998 = vmatprep.subr.msk.mxu1 %vm10560_vm1, %v3608_v40 }
 0x70e   : > { %5999 = vmatpush1.msk.msra.mxu1 %vm10566_vm9, %v3602_v44 }
 0x70f   : > { %v3514_v14 = vpop.permute.xlu1 %3513  ;;  %6000 = vmatprep.subr.msk.mxu1 %vm10560_vm1, %v3607_v37  ;;  %v3579_v3 = vpop.permute.xlu0 %3578 }
 0x710   : > { %v3581_v25 = vsel %vm12837_vm10, %v3577_v17, %v3579_v3  ;;  %6001 = vmatpush1.msk.msra.mxu1 %vm10566_vm9, %v3601_v45  ;;  %v3587_v7 = vsel %vm12838_vm3, %v3579_v3, 0.0  ;;  %vm10629_vm10 = vmneg %vm2089_vm5  ;;  %vm3494_vm3 = vcmask 138240   ;;  %v3651_v17 = vld [vmem:[#allocation9] sm:$0xff] }
 0x711   : > { %6002 = vmatprep.subr.msk.mxu1 %vm10574_vm13, %v3587_v7 }
 0x712   : > { %6003 = vmatpush1.msk.msra.mxu1 %vm10584_vm14, %v3581_v25 }
 0x713   : > { %v3489_v31 = vpop.permute.xlu1 %3488  ;;  %6004 = vmatprep.subr.msk.mxu1 %vm10574_vm13, %v3586_v35  ;;  %v3528_v24 = vpop.permute.xlu0 %3527 }
 0x714   : > { %6005 = vmatpush1.msk.msra.mxu1 %vm10584_vm14, %v3580_v43  ;;  %v3536_v20 = vsel %vm3535_vm2, %v3528_v24, %v3530_v54  ;;  %v3542_v10 = vsel %vm3535_vm2, 0.0, %v3528_v24 }
 0x715   : > { %3683 = vmatprep.subr.mxu1 %v10513_v49 }
 0x716   : > { %3684 = vmatpush1.msra.mxu1 %v10500_v6 }
 0x717   : > { %v3559_v4 = vpop.permute.xlu1 %3558  ;;  %3685 = vmatprep.subr.mxu1 %v10487_v22  ;;  %v3516_v52 = vpop.permute.xlu0 %3515 }
 0x718   : > { %v3561_v41 = vsel %vm12841_vm12, %v3557_v2, %v3559_v4  ;;  %3686 = vmatpush1.msra.mxu1 %v10474_v51  ;;  %v3654_v2 = vld [vmem:[#allocation9 + $0x18] sm:$0xff]  ;;  %v4081_v4 = vld [vmem:[#allocation10 + $0x8] sm:$0xff]  ;;  %vm12848_vm12 = vmmov %vm12842_vm0 }
 0x719   : > { %6006 = vmatprep.subr.msk.mxu1 %vm10560_vm1, %v3561_v41  ;;  %4168 = vmatprep.mubr.f32.mxu0 %v4081_v4 }
 0x71a   : > { %6007 = vmatpush1.msk.msra.mxu1 %vm10566_vm9, %v3567_v27 }
 0x71b   : > { %v3534_v29 = vpop.permute.xlu1 %3533  ;;  %6008 = vmatprep.subr.msk.mxu1 %vm10560_vm1, %v3560_v12  ;;  %v3512_v16 = vpop.permute.xlu0 %3511 }
 0x71c   : > { %v3537_v0 = vsel %vm3535_vm2, %v3532_v55, %v3534_v29  ;;  %6009 = vmatpush1.msk.msra.mxu1 %vm10566_vm9, %v3566_v38  ;;  %v3519_v5 = vsel %vm2089_vm5, %v3512_v16, %v3514_v14  ;;  %v3658_v55 = vld [vmem:[#allocation9 + $0x38] sm:$0xff] }
 0x71d   : > { %6010 = vmatprep.subr.msk.mxu1 %vm10574_vm13, %v3537_v0 }
 0x71e   : > { %6011 = vmatpush1.msk.msra.mxu1 %vm10584_vm14, %v3543_v39 }
 0x71f   : > { %v3518_v26 = vpop.permute.xlu1 %3517  ;;  %6012 = vmatprep.subr.msk.mxu1 %vm10574_vm13, %v3536_v20  ;;  %v3491_v51 = vpop.permute.xlu0 %3490 }
 0x720   : > { %6013 = vmatpush1.msk.msra.mxu1 %vm10584_vm14, %v3542_v10  ;;  %v3520_v22 = vsel %vm2089_vm5, %v3516_v52, %v3518_v26  ;;  %v3502_v19 = vsel %vm3494_vm3, 0.0, %v3491_v51 }
 0x721   : > { %3695 = vmatprep.subr.mxu1 %v3520_v22 }
 0x722   : > { %6015 = vmatpush1.msk.msra.mxu1 %vm10629_vm10, %v3516_v52 }
 0x723   : > { %v3493_v6 = vpop.permute.xlu1 %3492  ;;  %3697 = vmatprep.subr.mxu1 %v3519_v5  ;;  %v3487_v18 = vpop.permute.xlu0 %3486 }
 0x724   : > { %v3496_v49 = vsel %vm3494_vm3, %v3491_v51, %v3493_v6  ;;  %6017 = vmatpush1.msk.msra.mxu1 %vm10629_vm10, %v3512_v16  ;;  %v3495_v30 = vsel %vm3494_vm3, %v3487_v18, %v3489_v31  ;;  %v3501_v28 = vsel %vm3494_vm3, 0.0, %v3487_v18 }
 0x725   : > { %6018 = vmatprep.subr.msk.mxu1 %vm10560_vm1, %v3496_v49 }
 0x726   : > { %6019 = vmatpush1.msk.msra.mxu1 %vm10566_vm9, %v3502_v19 }
 0x727   : > { %v3635_v23 = vpop.permute.xlu1 %3634  ;;  %6020 = vmatprep.subr.msk.mxu1 %vm10560_vm1, %v3495_v30  ;;  %v3637_v11 = vpop.permute.xlu0 %3636 }
 0x728   : > { %v3640_v60 = vsel %vm3638_vm15, %v3635_v23, %v3637_v11  ;;  %6021 = vmatpush1.msk.msra.mxu1 %vm10566_vm9, %v3501_v28  ;;  %v3646_v47 = vsel %vm3638_vm15, %v3637_v11, 0.0 }
 0x729   : > { %6022 = vmatprep.subr.msk.mxu1 %vm10574_vm13, %v3646_v47 }
 0x72a   : > { %6023 = vmatpush2.msk.msra.mxu1 %vm10584_vm14, %v3640_v60 }
 0x72b   : > { %v3631_v36 = vpop.permute.xlu1 %3630  ;;  %v3633_v32 = vpop.permute.xlu0 %3632 }
 0x72c   : > { %v3639_v62 = vsel %vm3638_vm15, %v3631_v36, %v3633_v32  ;;  %v3645_v58 = vsel %vm3638_vm15, %v3633_v32, 0.0 }
 0x72d   : > { %6024 = vmatprep.subr.msk.mxu1 %vm10574_vm13, %v3645_v58 }
 0x72e   : > { %6025 = vmatpush2.msk.msra.mxu1 %vm10584_vm14, %v3639_v62 }
 0x72f   : > { %3736 = vmatmul.mubr.f32.vlgmr.msra.gmra.mxu1 %v3651_v17 }
 0x730   : > { %6027 = vmatprep.mubr.msk.f32.mxu1 %vm2089_vm5, %v3654_v2 }
 0x733   : > { %3742 = vmatmul.mubr.f32.gmra.mxu1 %v3653_v1 }
 0x734   : > { %6028 = vmatprep.mubr.msk.f32.mxu1 %vm2089_vm5, %v3656_v46 }
 0x737   : > { %3748 = vmatmul.mubr.f32.gmra.mxu1 %v3655_v59 }
 0x738   : > { %6029 = vmatprep.mubr.msk.f32.mxu1 %vm2089_vm5, %v3658_v55 }
 0x73b   : > { %3754 = vmatmul.mubr.f32.gmra.mxu1 %v3657_v53 }
 0x73c   : > { %4257 = vmatprep.mubr.f32.mxu1 %v12821_v9 }
 0x7ef   : > { %v3737_v61 = vpop.f32.mrf.mxu1 }
 0x7f0   : > { %v10669_v13 = vmax.f32 %v3737_v61, 0.0 }
 0x7f1   : > { %v3739_v54 = vpop.f32.mrf.mxu1 }
 0x7f2   : > { %v10671_v15 = vmax.f32 %v3739_v54, 0.0  ;;  %3888 = vrot.lane.b32.xlu0 %v10669_v13, %s7061_s30 }
 0x7f3   : > { %v3743_v44 = vpop.f32.mrf.mxu1 }
 0x7f4   : > { %3890 = vrot.lane.b32.xlu1 %v10671_v15, %s7061_s30  ;;  %v10685_v40 = vmax.f32 %v3743_v44, 0.0 }
 0x7f5   : > { %v3745_v37 = vpop.f32.mrf.mxu1 }
 0x7f6   : > { %3848 = vrot.lane.b32.xlu0 %v10669_v13, %s7068_s17  ;;  %v10691_v45 = vmax.f32 %v3745_v37, 0.0 }
 0x7f7   : > { %v3749_v14 = vpop.f32.mrf.mxu1 }
 0x7f8   : > { %3850 = vrot.lane.b32.xlu1 %v10671_v15, %s7068_s17  ;;  %v10705_v3 = vmax.f32 %v3749_v14, 0.0 }
 0x7f9   : > { %v3751_v25 = vpop.f32.mrf.mxu1 }
 0x7fa   : > { %3816 = vrot.lane.b32.xlu0 %v10669_v13, %s7069_s18  ;;  %v10711_v7 = vmax.f32 %v3751_v25, 0.0 }
 0x7fb   : > { %v3755_v35 = vpop.f32.mrf.mxu1 }
 0x7fc   : > { %3818 = vrot.lane.b32.xlu1 %v10671_v15, %s7069_s18  ;;  %v10729_v43 = vmax.f32 %v3755_v35, 0.0 }
 0x7fd   : > { %v3757_v31 = vpop.f32.mrf.mxu1 }
 0x7fe   : > { %3776 = vrot.lane.b32.xlu0 %v10669_v13, %s7070_s23  ;;  %v10735_v24 = vmax.f32 %v3757_v31, 0.0 }
 0x800   : > { %3778 = vrot.lane.b32.xlu1 %v10671_v15, %s7070_s23 }
 0x802   : > { %3892 = vrot.lane.b32.xlu0 %v10685_v40, %s7061_s30 }
 0x804   : > { %3894 = vrot.lane.b32.xlu1 %v10691_v45, %s7061_s30 }
 0x806   : > { %3852 = vrot.lane.b32.xlu0 %v10685_v40, %s7068_s17 }
 0x808   : > { %3854 = vrot.lane.b32.xlu1 %v10691_v45, %s7068_s17 }
 0x80a   : > { %3820 = vrot.lane.b32.xlu0 %v10685_v40, %s7069_s18 }
 0x80c   : > { %3822 = vrot.lane.b32.xlu1 %v10691_v45, %s7069_s18 }
 0x80e   : > { %3780 = vrot.lane.b32.xlu0 %v10685_v40, %s7070_s23 }
 0x810   : > { %3782 = vrot.lane.b32.xlu1 %v10691_v45, %s7070_s23 }
 0x812   : > { %3896 = vrot.lane.b32.xlu0 %v10705_v3, %s7061_s30 }
 0x814   : > { %3898 = vrot.lane.b32.xlu1 %v10711_v7, %s7061_s30 }
 0x816   : > { %3856 = vrot.lane.b32.xlu0 %v10705_v3, %s7068_s17 }
 0x818   : > { %3858 = vrot.lane.b32.xlu1 %v10711_v7, %s7068_s17 }
 0x81a   : > { %3824 = vrot.lane.b32.xlu0 %v10705_v3, %s7069_s18 }
 0x81c   : > { %3826 = vrot.lane.b32.xlu1 %v10711_v7, %s7069_s18 }
 0x81e   : > { %3784 = vrot.lane.b32.xlu0 %v10705_v3, %s7070_s23 }
 0x820   : > { %3786 = vrot.lane.b32.xlu1 %v10711_v7, %s7070_s23 }
 0x822   : > { %4016 = vrot.lane.b32.xlu0 %v10705_v3, %s7067_s21 }
 0x824   : > { %4018 = vrot.lane.b32.xlu1 %v10711_v7, %s7067_s21 }
 0x826   : > { %3900 = vrot.lane.b32.xlu0 %v10729_v43, %s7061_s30 }
 0x828   : > { %3902 = vrot.lane.b32.xlu1 %v10735_v24, %s7061_s30 }
 0x82a   : > { %4012 = vrot.lane.b32.xlu0 %v10685_v40, %s7067_s21 }
 0x82c   : > { %4014 = vrot.lane.b32.xlu1 %v10691_v45, %s7067_s21 }
 0x82e   : > { %3860 = vrot.lane.b32.xlu0 %v10729_v43, %s7068_s17 }
 0x830   : > { %3862 = vrot.lane.b32.xlu1 %v10735_v24, %s7068_s17  ;;  %s7072_s17 = smov 120  }
 0x832   : > { %3828 = vrot.lane.b32.xlu0 %v10729_v43, %s7069_s18 }
 0x834   : > { %4010 = vrot.lane.b32.xlu1 %v10671_v15, %s7067_s21 }
 0x836   : > { %3788 = vrot.lane.b32.xlu0 %v10729_v43, %s7070_s23 }
 0x838   : > { %3830 = vrot.lane.b32.xlu1 %v10735_v24, %s7069_s18  ;;  %s7073_s18 = smov 121  }
 0x83a   : > { %4020 = vrot.lane.b32.xlu0 %v10729_v43, %s7067_s21 }
 0x83c   : > { %3980 = vrot.lane.b32.xlu1 %v10729_v43, %s7066_s20 }
 0x83e   : > { %4008 = vrot.lane.b32.xlu0 %v10669_v13, %s7067_s21 }
 0x840   : > { %3790 = vrot.lane.b32.xlu1 %v10735_v24, %s7070_s23  ;;  %s7074_s23 = smov 7  }
 0x842   : > { %3978 = vrot.lane.b32.xlu0 %v10711_v7, %s7066_s20 }
 0x844   : > { %3976 = vrot.lane.b32.xlu1 %v10705_v3, %s7066_s20 }
 0x846   : > { %3974 = vrot.lane.b32.xlu0 %v10691_v45, %s7066_s20 }
 0x848   : > { %4022 = vrot.lane.b32.xlu1 %v10735_v24, %s7067_s21 }
 0x84a   : > { %3970 = vrot.lane.b32.xlu0 %v10671_v15, %s7066_s20 }
 0x84c   : > { %3972 = vrot.lane.b32.xlu1 %v10685_v40, %s7066_s20 }
 0x84e   : > { %3982 = vrot.lane.b32.xlu0 %v10735_v24, %s7066_s20 }
 0x850   : > { %3968 = vrot.lane.b32.xlu1 %v10669_v13, %s7066_s20 }
 0x852   : > { %3938 = vrot.lane.b32.xlu0 %v10711_v7, %s7059_s24 }
 0x854   : > { %3940 = vrot.lane.b32.xlu1 %v10729_v43, %s7059_s24 }
 0x856   : > { %3942 = vrot.lane.b32.xlu0 %v10735_v24, %s7059_s24 }
 0x858   : > { %3936 = vrot.lane.b32.xlu1 %v10705_v3, %s7059_s24 }
 0x85a   : > { %3934 = vrot.lane.b32.xlu0 %v10691_v45, %s7059_s24 }
 0x85c   : > { %3932 = vrot.lane.b32.xlu1 %v10685_v40, %s7059_s24 }
 0x85e   : > { %3930 = vrot.lane.b32.xlu0 %v10671_v15, %s7059_s24 }
 0x860   : > { %3928 = vrot.lane.b32.xlu1 %v10669_v13, %s7059_s24 }
 0x862   : > { %4050 = vrot.lane.b32.xlu0 %v10711_v7, %s7071_s22 }
 0x864   : > { %v3889_v52 = vpop.permute.xlu0 %3888  ;;  %4052 = vrot.lane.b32.xlu1 %v10729_v43, %s7071_s22 }
 0x865   : > { %v3916_v44 = vsel %vm12842_vm0, 0.0, %v3889_v52 }
 0x866   : > { %v3891_v41 = vpop.permute.xlu1 %3890  ;;  %4054 = vrot.lane.b32.xlu0 %v10735_v24, %s7071_s22 }
 0x868   : > { %v10803_v27 = vpop.permute.xlu0 %3848  ;;  %4048 = vrot.lane.b32.xlu1 %v10705_v3, %s7071_s22 }
 0x86a   : > { %v10807_v12 = vpop.permute.xlu1 %3850  ;;  %4046 = vrot.lane.b32.xlu0 %v10691_v45, %s7071_s22 }
 0x86c   : > { %v10811_v38 = vpop.permute.xlu0 %3816  ;;  %4044 = vrot.lane.b32.xlu1 %v10685_v40, %s7071_s22 }
 0x86e   : > { %v10815_v29 = vpop.permute.xlu1 %3818  ;;  %4042 = vrot.lane.b32.xlu0 %v10671_v15, %s7071_s22 }
 0x870   : > { %v10819_v16 = vpop.permute.xlu0 %3776  ;;  %4040 = vrot.lane.b32.xlu1 %v10669_v13, %s7071_s22  ;;  %s7075_s22 = smov 8  }
 0x872   : > { %v10823_v0 = vpop.permute.xlu1 %3778 }
 0x874   : > { %v3893_v39 = vpop.permute.xlu0 %3892 }
 0x876   : > { %v3895_v20 = vpop.permute.xlu1 %3894 }
 0x877   : > { %v3905_v55 = vsel %vm12850_vm7, %v3893_v39, %v3895_v20  ;;  %vm12861_vm7 = vcmask 261120  }
 0x878   : > { %v3853_v10 = vpop.permute.xlu0 %3852 }
 0x87a   : > { %v3855_v26 = vpop.permute.xlu1 %3854 }
 0x87c   : > { %v10825_v51 = vpop.permute.xlu0 %3820 }
 0x87e   : > { %v10827_v22 = vpop.permute.xlu1 %3822 }
 0x880   : > { %v10829_v5 = vpop.permute.xlu0 %3780 }
 0x882   : > { %v10831_v6 = vpop.permute.xlu1 %3782 }
 0x884   : > { %v3897_v18 = vpop.permute.xlu0 %3896 }
 0x885   : > { %v3918_v46 = vsel %vm12849_vm11, 0.0, %v3897_v18 }
 0x886   : > { %v3899_v49 = vpop.permute.xlu1 %3898 }
 0x887   : > { %v3906_v1 = vsel %vm12842_vm0, %v3897_v18, %v3899_v49  ;;  %v3864_v18 = vsel %vm3535_vm2, %v10803_v27, %v10807_v12  ;;  %v3876_v49 = vsel %vm3535_vm2, 0.0, %v10803_v27  ;;  %v3833_v27 = vsel %vm2089_vm5, %v10825_v51, %v10827_v22 }
 0x888   : > { %v3857_v19 = vpop.permute.xlu0 %3856 }
 0x889   : > { %v3878_v4 = vsel %vm3535_vm2, 0.0, %v3857_v19 }
 0x88a   : > { %v3859_v30 = vpop.permute.xlu1 %3858 }
 0x88b   : > { %v3866_v31 = vsel %vm3535_vm2, %v3857_v19, %v3859_v30 }
 0x88c   : > { %v3825_v28 = vpop.permute.xlu0 %3824 }
 0x88e   : > { %v3827_v23 = vpop.permute.xlu1 %3826 }
 0x88f   : > { %v3834_v12 = vsel %vm2089_vm5, %v3825_v28, %v3827_v23 }
 0x890   : > { %v10833_v11 = vpop.permute.xlu0 %3784 }
 0x892   : > { %v10835_v60 = vpop.permute.xlu1 %3786 }
 0x894   : > { %v10837_v47 = vpop.permute.xlu0 %4016 }
 0x896   : > { %v10839_v36 = vpop.permute.xlu1 %4018 }
 0x898   : > { %v3901_v32 = vpop.permute.xlu0 %3900 }
 0x899   : > { %v3919_v17 = vsel %vm12848_vm12, 0.0, %v3901_v32  ;;  %vm12852_vm12 = vmmov %vm12842_vm0 }
 0x89a   : > { %v3903_v62 = vpop.permute.xlu1 %3902  ;;  %v3904_v54 = vsel %vm12852_vm12, %v3889_v52, %v3891_v41  ;;  %v3865_v41 = vsel %vm3535_vm2, %v3853_v10, %v3855_v26  ;;  %vm4769_vm12 = vcmask 457728  }
 0x89b   : > { %v3907_v58 = vsel %vm12847_vm6, %v3901_v32, %v3903_v62  ;;  %vm12851_vm6 = vmmov %vm12842_vm0  ;;  %v3832_v62 = vsel %vm2089_vm5, %v10811_v38, %v10815_v29  ;;  %v3806_v29 = vsel %vm3494_vm3, 0.0, %v10833_v11 }
 0x89c   : > { %v10843_v2 = vpop.permute.xlu0 %4012  ;;  %6030 = vmatprep.subr.msk.mxu0 %vm10560_vm1, %v3907_v58  ;;  %v3917_v53 = vsel %vm12851_vm6, 0.0, %v3893_v39  ;;  %v3877_v39 = vsel %vm3535_vm2, 0.0, %v3853_v10  ;;  %vm12865_vm6 = vmmov %vm12861_vm7 }
 0x89d   : > { %6031 = vmatpush1.msk.msra.mxu0 %vm10566_vm9, %v3919_v17 }
 0x89e   : > { %6032 = vmatprep.subr.msk.mxu0 %vm10560_vm1, %v3906_v1  ;;  %v10853_v59 = vpop.permute.xlu1 %4014 }
 0x89f   : > { %6033 = vmatpush1.msk.msra.mxu0 %vm10566_vm9, %v3918_v46 }
 0x8a0   : > { %v3861_v61 = vpop.permute.xlu0 %3860  ;;  %6034 = vmatprep.subr.msk.mxu0 %vm10560_vm1, %v3905_v55 }
 0x8a1   : > { %6035 = vmatpush1.msk.msra.mxu0 %vm10566_vm9, %v3917_v53  ;;  %v3879_v25 = vsel %vm3535_vm2, 0.0, %v3861_v61  ;;  %v4025_v53 = vsel %vm3621_vm4, %v10843_v2, %v10853_v59 }
 0x8a2   : > { %6036 = vmatprep.subr.msk.mxu0 %vm10560_vm1, %v3904_v54  ;;  %v3863_v37 = vpop.permute.xlu1 %3862 }
 0x8a3   : > { %v3867_v14 = vsel %vm3535_vm2, %v3861_v61, %v3863_v37  ;;  %6037 = vmatpush1.msk.msra.mxu0 %vm10566_vm9, %v3916_v44 }
 0x8a4   : > { %v3829_v35 = vpop.permute.xlu0 %3828  ;;  %6038 = vmatprep.subr.msk.mxu0 %vm10574_vm13, %v3867_v14 }
 0x8a5   : > { %6039 = vmatpush1.msk.msra.mxu0 %vm10584_vm14, %v3879_v25 }
 0x8a6   : > { %6040 = vmatprep.subr.msk.mxu0 %vm10574_vm13, %v3866_v31  ;;  %v4011_v52 = vpop.permute.xlu1 %4010 }
 0x8a7   : > { %6041 = vmatpush1.msk.msra.mxu0 %vm10584_vm14, %v3878_v4 }
 0x8a8   : > { %v3789_v20 = vpop.permute.xlu0 %3788  ;;  %6042 = vmatprep.subr.msk.mxu0 %vm10574_vm13, %v3865_v41 }
 0x8a9   : > { %6043 = vmatpush1.msk.msra.mxu0 %vm10584_vm14, %v3877_v39  ;;  %v3807_v22 = vsel %vm3494_vm3, 0.0, %v3789_v20 }
 0x8aa   : > { %6044 = vmatprep.subr.msk.mxu0 %vm10574_vm13, %v3864_v18  ;;  %v3831_v26 = vpop.permute.xlu1 %3830 }
 0x8ab   : > { %6045 = vmatpush1.msk.msra.mxu0 %vm10584_vm14, %v3876_v49  ;;  %v3835_v10 = vsel %vm2089_vm5, %v3829_v35, %v3831_v26 }
 0x8ac   : > { %v4021_v19 = vpop.permute.xlu0 %4020  ;;  %4120 = vmatprep.subr.mxu0 %v3835_v10 }
 0x8ad   : > { %6047 = vmatpush1.msk.msra.mxu0 %vm10629_vm10, %v3829_v35 }
 0x8ae   : > { %4122 = vmatprep.subr.mxu0 %v3834_v12  ;;  %v3981_v30 = vpop.permute.xlu1 %3980 }
 0x8af   : > { %6049 = vmatpush1.msk.msra.mxu0 %vm10629_vm10, %v3825_v28 }
 0x8b0   : > { %v4009_v32 = vpop.permute.xlu0 %4008  ;;  %4124 = vmatprep.subr.mxu0 %v3833_v27 }
 0x8b1   : > { %6051 = vmatpush1.msk.msra.mxu0 %vm10629_vm10, %v10825_v51  ;;  %v3794_v51 = vsel %vm3494_vm3, %v10833_v11, %v10835_v60  ;;  %v3805_v60 = vsel %vm3494_vm3, 0.0, %v10829_v5  ;;  %v3792_v11 = vsel %vm3494_vm3, %v10819_v16, %v10823_v0  ;;  %v4024_v61 = vsel %vm3621_vm4, %v4009_v32, %v4011_v52 }
 0x8b2   : > { %4126 = vmatprep.subr.mxu0 %v3832_v62  ;;  %v3791_v23 = vpop.permute.xlu1 %3790 }
 0x8b3   : > { %v3795_v58 = vsel %vm3494_vm3, %v3789_v20, %v3791_v23  ;;  %6053 = vmatpush1.msk.msra.mxu0 %vm10629_vm10, %v10811_v38  ;;  %v3793_v38 = vsel %vm3494_vm3, %v10829_v5, %v10831_v6  ;;  %v3804_v6 = vsel %vm3494_vm3, 0.0, %v10819_v16  ;;  %v4026_v16 = vsel %vm3621_vm4, %v10837_v47, %v10839_v36 }
 0x8b4   : > { %v3979_v28 = vpop.permute.xlu0 %3978  ;;  %6054 = vmatprep.subr.msk.mxu0 %vm10560_vm1, %v3795_v58 }
 0x8b5   : > { %6055 = vmatpush1.msk.msra.mxu0 %vm10566_vm9, %v3807_v22  ;;  %v3998_v37 = vsel %vm3600_vm8, %v3979_v28, 0.0  ;;  %v4080_v22 = vld [vmem:[#allocation10] sm:$0xff] }
 0x8b6   : > { %6056 = vmatprep.subr.msk.mxu0 %vm10560_vm1, %v3794_v51  ;;  %v3977_v50 = vpop.permute.xlu1 %3976  ;;  %v4083_v51 = vld [vmem:[#allocation10 + $0x18] sm:$0xff] }
 0x8b7   : > { %6057 = vmatpush1.msk.msra.mxu0 %vm10566_vm9, %v3806_v29  ;;  %v3986_v2 = vsel %vm3600_vm8, %v3977_v50, %v3979_v28  ;;  %v11046_v50 = vld [vmem:[%s11600_s8 + $0x38] sm:$0xff]  }
 0x8b8   : > { %v3975_v17 = vpop.permute.xlu0 %3974  ;;  %6058 = vmatprep.subr.msk.mxu0 %vm10560_vm1, %v3793_v38  ;;  %v6223_v34 = vunpack.c.l.bf16 %v11046_v50 }
 0x8b9   : > { %6059 = vmatpush1.msk.msra.mxu0 %vm10566_vm9, %v3805_v60  ;;  %v3997_v14 = vsel %vm3600_vm8, %v3975_v17, 0.0  ;;  %v4082_v60 = vld [vmem:[#allocation10 + $0x10] sm:$0xff] }
 0x8ba   : > { %6060 = vmatprep.subr.msk.mxu0 %vm10560_vm1, %v3792_v11  ;;  %v4023_v1 = vpop.permute.xlu1 %4022  ;;  %v4086_v11 = vld [vmem:[#allocation10 + $0x30] sm:$0xff] }
 0x8bb   : > { %v4027_v5 = vsel %vm3621_vm4, %v4021_v19, %v4023_v1  ;;  %6061 = vmatpush1.msk.msra.mxu0 %vm10566_vm9, %v3804_v6  ;;  %v6224_v6 = vunpack.c.h.bf16 %v11046_v50 }
 0x8bc   : > { %v3971_v46 = vpop.permute.xlu0 %3970  ;;  %6062 = vmatprep.subr.msk.mxu0 %vm3621_vm4, %v4023_v1  ;;  %v4090_v1 = vld [vmem:[#allocation10 + $0x50] sm:$0xff] }
 0x8bd   : > { %4137 = vmatpush2.msra.mxu0 %v4027_v5  ;;  %v3996_v31 = vsel %vm3600_vm8, %v3971_v46, 0.0  ;;  %v4085_v5 = vld [vmem:[#allocation10 + $0x28] sm:$0xff] }
 0x8be   : > { %6063 = vmatprep.subr.msk.mxu0 %vm3621_vm4, %v10839_v36  ;;  %v3973_v0 = vpop.permute.xlu1 %3972 }
 0x8bf   : > { %4139 = vmatpush2.msra.mxu0 %v4026_v16  ;;  %v3985_v25 = vsel %vm3600_vm8, %v3973_v0, %v3975_v17  ;;  %v6252_v0 = vunpack.c.h.bf16 %v6286_v57  ;;  %v6278_v16 = vld [vmem:[%s11600_s8 + $0x30] sm:$0xff]  }
 0x8c0   : > { %v3983_v55 = vpop.permute.xlu0 %3982  ;;  %6064 = vmatprep.subr.msk.mxu0 %vm3621_vm4, %v10853_v59 }
 0x8c1   : > { %4141 = vmatpush2.msra.mxu0 %v4025_v53  ;;  %v3999_v44 = vsel %vm3600_vm8, %v3983_v55, 0.0  ;;  %v3987_v47 = vsel %vm3600_vm8, %v3981_v30, %v3983_v55  ;;  %v4088_v55 = vld [vmem:[#allocation10 + $0x40] sm:$0xff] }
 0x8c2   : > { %6065 = vmatprep.subr.msk.mxu0 %vm3621_vm4, %v4011_v52  ;;  %v3969_v54 = vpop.permute.xlu1 %3968  ;;  %vm12853_vm4 = vcmask 1039360   ;;  %v4431_v53 = vld [vmem:[#allocation12] sm:$0xff] }
 0x8c3   : > { %4143 = vmatpush2.msra.mxu0 %v4024_v61  ;;  %v3984_v4 = vsel %vm3600_vm8, %v3969_v54, %v3971_v46  ;;  %vm12854_vm2 = vmmov %vm12853_vm4  ;;  %v4089_v46 = vld [vmem:[#allocation10 + $0x48] sm:$0xff]  ;;  %v6220_v61 = vunpack.c.h.bf16 %v6278_v16  ;;  %v6251_v54 = vunpack.c.l.bf16 %v6286_v57 }
 0x8c4   : > { %v3939_v36 = vpop.permute.xlu0 %3938  ;;  %6066 = vmatprep.subr.msk.mxu0 %vm10560_vm1, %v3999_v44  ;;  %vm12855_vm10 = vmmov %vm12854_vm2  ;;  %v6285_v44 = vld [vmem:[%s11600_s8 + $0x68] sm:$0xff]  }
 0x8c5   : > { %6067 = vmatpush2.msk.msra.mxu0 %vm10566_vm9, %v3987_v47  ;;  %v3958_v18 = vsel %vm12855_vm10, %v3939_v36, 0.0  ;;  %vm12856_vm8 = vmmov %vm12854_vm2  ;;  %v6277_v47 = vld [vmem:[%s11600_s8 + $0x28] sm:$0xff]  }
 0x8c6   : > { %6068 = vmatprep.subr.msk.mxu0 %vm10560_vm1, %v3998_v37  ;;  %v3941_v59 = vpop.permute.xlu1 %3940  ;;  %v6219_v37 = vunpack.c.l.bf16 %v6278_v16 }
 0x8c7   : > { %6069 = vmatpush2.msk.msra.mxu0 %vm10566_vm9, %v3986_v2  ;;  %v4432_v2 = vld [vmem:[#allocation12 + $0x8] sm:$0xff] }
 0x8c8   : > { %v3943_v35 = vpop.permute.xlu0 %3942  ;;  %6070 = vmatprep.subr.msk.mxu0 %vm10560_vm1, %v3997_v14  ;;  %v6216_v14 = vunpack.c.h.bf16 %v6277_v47 }
 0x8c9   : > { %6071 = vmatpush2.msk.msra.mxu0 %vm10566_vm9, %v3985_v25  ;;  %v3959_v41 = vsel %vm12853_vm4, %v3943_v35, 0.0  ;;  %v3947_v39 = vsel %vm12854_vm2, %v3941_v59, %v3943_v35  ;;  %v6248_v59 = vunpack.c.h.bf16 %v6285_v44  ;;  %v6247_v25 = vunpack.c.l.bf16 %v6285_v44  ;;  %v6284_v35 = vld [vmem:[%s11600_s8 + $0x60] sm:$0xff]  }
 0x8ca   : > { %6072 = vmatprep.subr.msk.mxu0 %vm10560_vm1, %v3996_v31  ;;  %v3937_v52 = vpop.permute.xlu1 %3936  ;;  %vm12857_vm1 = vmmov %vm12854_vm2  ;;  %v6215_v31 = vunpack.c.l.bf16 %v6277_v47  ;;  %vm12868_vm4 = vcmask 7168  }
 0x8cb   : > { %6073 = vmatpush2.msk.msra.mxu0 %vm10566_vm9, %v3984_v4  ;;  %v3946_v42 = vsel %vm12856_vm8, %v3937_v52, %v3939_v36  ;;  %vm12858_vm9 = vmmov %vm12857_vm1  ;;  %v4091_v36 = vld [vmem:[#allocation10 + $0x58] sm:$0xff]  ;;  %v6276_v4 = vld [vmem:[%s11600_s8 + $0x20] sm:$0xff]  }
 0x8cc   : > { %v3935_v20 = vpop.permute.xlu0 %3934  ;;  %6074 = vmatprep.subr.msk.mxu0 %vm10574_vm13, %v3959_v41  ;;  %vm12859_vm3 = vmmov %vm12857_vm1  ;;  %v4433_v52 = vld [vmem:[#allocation12 + $0x10] sm:$0xff]  ;;  %v6244_v41 = vunpack.c.h.bf16 %v6284_v35 }
 0x8cd   : > { %6075 = vmatpush2.msk.msra.mxu0 %vm10584_vm14, %v3947_v39  ;;  %v3957_v21 = vsel %vm12857_vm1, %v3935_v20, 0.0  ;;  %vm12860_vm11 = vmmov %vm12857_vm1  ;;  %v6212_v39 = vunpack.c.h.bf16 %v6276_v4 }
 0x8ce   : > { %6076 = vmatprep.subr.msk.mxu0 %vm10574_vm13, %v3958_v18  ;;  %v3933_v49 = vpop.permute.xlu1 %3932  ;;  %v6243_v18 = vunpack.c.l.bf16 %v6284_v35  ;;  %vm12869_vm2 = vmmov %vm12868_vm4 }
 0x8cf   : > { %v3945_v26 = vsel %vm12858_vm9, %v3933_v49, %v3935_v20  ;;  %6077 = vmatpush2.msk.msra.mxu0 %vm10584_vm14, %v3946_v42  ;;  %v6283_v20 = vld [vmem:[%s11600_s8 + $0x58] sm:$0xff]   ;;  %vm12870_vm10 = vmmov %vm12869_vm2  ;;  %vm4748_vm9 = vcmask 465920  }
 0x8d0   : > { %v3931_v10 = vpop.permute.xlu0 %3930  ;;  %6078 = vmatprep.subr.msk.mxu0 %vm10574_vm13, %v3957_v21  ;;  %v6275_v42 = vld [vmem:[%s11600_s8 + $0x18] sm:$0xff]   ;;  %v6211_v21 = vunpack.c.l.bf16 %v6276_v4  ;;  %vm12873_vm1 = vmmov %vm12869_vm2 }
 0x8d1   : > { %v3956_v19 = vsel %vm12859_vm3, %v3931_v10, 0.0  ;;  %6079 = vmatpush2.msk.msra.mxu0 %vm10584_vm14, %v3945_v26  ;;  %v4434_v49 = vld [vmem:[#allocation12 + $0x18] sm:$0xff]  ;;  %v6240_v26 = vunpack.c.h.bf16 %v6283_v20  ;;  %vm4684_vm3 = vcmask 56320  }
 0x8d2   : > { %6080 = vmatprep.subr.msk.mxu0 %vm10574_vm13, %v3956_v19  ;;  %v3929_v12 = vpop.permute.xlu1 %3928  ;;  %v6207_v19 = vunpack.c.l.bf16 %v6275_v42 }
 0x8d3   : > { %v3944_v30 = vsel %vm12860_vm11, %v3929_v12, %v3931_v10  ;;  %v6208_v10 = vunpack.c.h.bf16 %v6275_v42  ;;  %v6282_v12 = vld [vmem:[%s11600_s8 + $0x50] sm:$0xff]   ;;  %vm4667_vm11 = vcmask 64512  }
 0x8d4   : > { %v4051_v27 = vpop.permute.xlu0 %4050  ;;  %6081 = vmatpush2.msk.msra.mxu0 %vm10584_vm14, %v3944_v30  ;;  %v6236_v30 = vunpack.c.h.bf16 %v6282_v12 }
 0x8d5   : > { %4160 = vmatprep.subr.mxu0 %v10735_v24 }
 0x8d6   : > { %4161 = vmatpush2.msra.mxu0 %v10729_v43  ;;  %v4053_v32 = vpop.permute.xlu1 %4052  ;;  %v4070_v43 = vsel %vm3638_vm15, %v4051_v27, 0.0 }
 0x8d7   : > { %4162 = vmatprep.subr.mxu0 %v10711_v7 }
 0x8d8   : > { %v4055_v62 = vpop.permute.xlu0 %4054  ;;  %4163 = vmatpush2.msra.mxu0 %v10705_v3 }
 0x8d9   : > { %v4059_v23 = vsel %vm3638_vm15, %v4053_v32, %v4055_v62  ;;  %v4071_v58 = vsel %vm3638_vm15, %v4055_v62, 0.0  ;;  %4164 = vmatprep.subr.mxu0 %v10691_v45  ;;  %v6235_v62 = vunpack.c.l.bf16 %v6282_v12 }
 0x8da   : > { %4165 = vmatpush2.msra.mxu0 %v10685_v40  ;;  %6082 = vmatprep.subr.msk.mxu1 %vm10574_vm13, %v4071_v58  ;;  %v4049_v24 = vpop.permute.xlu1 %4048  ;;  %v4084_v40 = vld [vmem:[#allocation10 + $0x20] sm:$0xff]  ;;  %v6281_v58 = vld [vmem:[%s11600_s8 + $0x48] sm:$0xff]  }
 0x8db   : > { %v4058_v7 = vsel %vm3638_vm15, %v4049_v24, %v4051_v27  ;;  %4166 = vmatprep.subr.mxu0 %v10671_v15  ;;  %6083 = vmatpush1.msk.msra.mxu1 %vm10584_vm14, %v4059_v23  ;;  %v6274_v27 = vld [vmem:[%s11600_s8 + $0x10] sm:$0xff]   ;;  %v6232_v24 = vunpack.c.h.bf16 %v6281_v58 }
 0x8dc   : > { %v4047_v3 = vpop.permute.xlu0 %4046  ;;  %4167 = vmatpush2.msra.mxu0 %v10669_v13  ;;  %6084 = vmatprep.subr.msk.mxu1 %vm10574_vm13, %v4070_v43  ;;  %v11036_v13 = vld [vmem:[%s11600_s8 + $0x78] sm:$0xff]   ;;  %v6204_v32 = vunpack.c.h.bf16 %v6274_v27  ;;  %v6203_v23 = vunpack.c.l.bf16 %v6274_v27 }
 0x8dd   : > { %v4069_v45 = vsel %vm3638_vm15, %v4047_v3, 0.0  ;;  %4169 = vmatmul.mubr.f32.vlgmr.msra.gmra.mxu0 %v4080_v22  ;;  %6085 = vmatpush1.msk.msra.mxu1 %vm10584_vm14, %v4058_v7  ;;  %v6273_v22 = vld [vmem:[%s11600_s8 + $0x8] sm:$0xff]   ;;  %v6231_v7 = vunpack.c.l.bf16 %v6281_v58 }
 0x8de   : > { %4475 = vmatprep.subr.mxu0 %v10506_v8  ;;  %6086 = vmatprep.subr.msk.mxu1 %vm10574_vm13, %v4069_v45  ;;  %v4045_v15 = vpop.permute.xlu1 %4044  ;;  %v4087_v8 = vld [vmem:[#allocation10 + $0x38] sm:$0xff]  ;;  %v6200_v43 = vunpack.c.h.bf16 %v6273_v22 }
 0x8df   : > { %4476 = vmatpush1.msra.mxu0 %v10493_v56  ;;  %v4057_v28 = vsel %vm3638_vm15, %v4045_v15, %v4047_v3  ;;  %4174 = vmatprep.mubr.f32.mxu0 %v4084_v40  ;;  %v6256_v56 = vunpack.c.h.bf16 %v11036_v13  ;;  %v6199_v3 = vunpack.c.l.bf16 %v6273_v22  ;;  %v6280_v40 = vld [vmem:[%s11600_s8 + $0x40] sm:$0xff]  }
 0x8e0   : > { %4477 = vmatprep.subr.mxu0 %v10480_v48  ;;  %v4043_v29 = vpop.permute.xlu0 %4042  ;;  %6087 = vmatpush1.msk.msra.mxu1 %vm10584_vm14, %v4057_v28  ;;  %v6228_v45 = vunpack.c.h.bf16 %v6280_v40  ;;  %v6194_v15 = vld [vmem:[%s11600_s8] sm:$0xff]   ;;  %v6227_v28 = vunpack.c.l.bf16 %v6280_v40 }
 0x8e1   : > { %v4068_v38 = vsel %vm3638_vm15, %v4043_v29, 0.0  ;;  %4478 = vmatpush1.msra.mxu0 %v10471_v63  ;;  %v6255_v63 = vunpack.c.l.bf16 %v11036_v13  ;;  %v6196_v13 = vunpack.c.h.bf16 %v6194_v15 }
 0x8e2   : > { %4175 = vmatmul.mubr.f32.gmra.mxu0 %v4083_v51  ;;  %6088 = vmatprep.subr.msk.mxu1 %vm10574_vm13, %v4068_v38  ;;  %v4041_v48 = vpop.permute.xlu1 %4040  ;;  %vm12862_vm13 = vmmov %vm12861_vm7  ;;  %v6195_v51 = vunpack.c.l.bf16 %v6194_v15 }
 0x8e3   : > { %v4056_v17 = vsel %vm3638_vm15, %v4041_v48, %v4043_v29  ;;  %4180 = vmatprep.mubr.f32.mxu0 %v4087_v8  ;;  %6335 = vmatprep.subr.mxu0 %v6256_v56  ;;  %vm12864_vm15 = vmmov %vm12861_vm7 }
 0x8e4   : > { %6089 = vmatpush1.msk.msra.mxu1 %vm10584_vm14, %v4056_v17  ;;  %vm12863_vm14 = vmmov %vm12861_vm7 }
 0x8e5   : > { %6090 = vmatmul.mubr.msk.f32.vlgmr.msra.gmra.mxu1 %vm12861_vm7, %v4082_v60  ;;  %6291 = vmatprep.subr.mxu1 %v6256_v56  ;;  %vm4727_vm7 = vcmask 515072  }
 0x8e6   : > { %4181 = vmatmul.mubr.f32.gmra.mxu0 %v4086_v11  ;;  %4263 = vmatprep.mubr.f32.mxu1 %v12821_v9 }
 0x8e7   : > { %4186 = vmatprep.mubr.f32.mxu0 %v4090_v1  ;;  %6292 = vmatpush3.msra.mxu1 %v6224_v6 }
 0x8e8   : > { %6293 = vmatprep.subr.mxu1 %v6255_v63 }
 0x8e9   : > { %6091 = vmatmul.mubr.msk.f32.gmra.mxu1 %vm12862_vm13, %v4085_v5  ;;  %vm11254_vm13 = vmneg %vm4667_vm11 }
 0x8ea   : > { %4187 = vmatmul.mubr.f32.gmra.mxu0 %v4089_v46  ;;  %4269 = vmatprep.mubr.f32.mxu1 %v12821_v9  ;;  %vm12881_vm11 = vmmov %vm12873_vm1 }
 0x8eb   : > { %4511 = vmatprep.mubr.f32.mxu0 %v12821_v9  ;;  %6294 = vmatpush3.msra.mxu1 %v6223_v34 }
 0x8ec   : > { %6295 = vmatprep.subr.mxu1 %v6252_v0 }
 0x8ed   : > { %6092 = vmatmul.mubr.msk.f32.gmra.mxu1 %vm12863_vm14, %v4088_v55  ;;  %vm4644_vm14 = vcmask 72704  }
 0x8ee   : > { %6094 = vmatmul.mubr.msk.f32.vlgmr.msra.gmra.mxu0 %vm2089_vm5, %v4431_v53  ;;  %4275 = vmatprep.mubr.f32.mxu1 %v12821_v9 }
 0x8ef   : > { %4517 = vmatprep.mubr.f32.mxu0 %v12821_v9  ;;  %6296 = vmatpush3.msra.mxu1 %v6220_v61 }
 0x8f0   : > { %6297 = vmatprep.subr.mxu1 %v6251_v54  ;;  %6336 = vmatpush3.msra.mxu0 %v6224_v6 }
 0x8f1   : > { %6093 = vmatmul.mubr.msk.f32.gmra.mxu1 %vm12864_vm15, %v4091_v36  ;;  %6337 = vmatprep.subr.mxu0 %v6255_v63  ;;  %vm4786_vm15 = vcmask 449536  }
 0x8f2   : > { %6095 = vmatmul.mubr.msk.f32.gmra.mxu0 %vm2089_vm5, %v4432_v2  ;;  %6298 = vmatpush3.msra.mxu1 %v6219_v37 }
 0x8f3   : > { %4523 = vmatprep.mubr.f32.mxu0 %v12821_v9  ;;  %6299 = vmatprep.subr.mxu1 %v6248_v59 }
 0x8f4   : > { %6300 = vmatpush3.msra.mxu1 %v6216_v14  ;;  %6338 = vmatpush3.msra.mxu0 %v6223_v34 }
 0x8f5   : > { %6301 = vmatprep.subr.mxu1 %v6247_v25  ;;  %6339 = vmatprep.subr.mxu0 %v6252_v0 }
 0x8f6   : > { %6096 = vmatmul.mubr.msk.f32.gmra.mxu0 %vm2089_vm5, %v4433_v52  ;;  %6302 = vmatpush3.msra.mxu1 %v6215_v31 }
 0x8f7   : > { %4529 = vmatprep.mubr.f32.mxu0 %v12821_v9  ;;  %6340 = vmatpush3.msra.mxu0 %v6220_v61  ;;  %v6239_v9 = vunpack.c.l.bf16 %v6283_v20 }
 0x8f8   : > { %6303 = vmatprep.subr.mxu1 %v6244_v41  ;;  %6341 = vmatprep.subr.mxu0 %v6251_v54 }
 0x8f9   : > { %6304 = vmatpush3.msra.mxu1 %v6212_v39  ;;  %6342 = vmatpush3.msra.mxu0 %v6219_v37 }
 0x8fa   : > { %6097 = vmatmul.mubr.msk.f32.gmra.mxu0 %vm2089_vm5, %v4434_v49  ;;  %6305 = vmatprep.subr.mxu1 %v6243_v18 }
 0x8fb   : > { %6343 = vmatprep.subr.mxu0 %v6248_v59  ;;  %6306 = vmatpush3.msra.mxu1 %v6211_v21 }
 0x8fc   : > { %6344 = vmatpush3.msra.mxu0 %v6216_v14  ;;  %6307 = vmatprep.subr.mxu1 %v6240_v26 }
 0x8fd   : > { %6345 = vmatprep.subr.mxu0 %v6247_v25  ;;  %6308 = vmatpush3.msra.mxu1 %v6208_v10 }
 0x8fe   : > { %6346 = vmatpush3.msra.mxu0 %v6215_v31  ;;  %6309 = vmatprep.subr.mxu1 %v6239_v9 }
 0x8ff   : > { %6347 = vmatprep.subr.mxu0 %v6244_v41  ;;  %6310 = vmatpush3.msra.mxu1 %v6207_v19 }
 0x900   : > { %6348 = vmatpush3.msra.mxu0 %v6212_v39  ;;  %6311 = vmatprep.subr.mxu1 %v6236_v30 }
 0x901   : > { %6349 = vmatprep.subr.mxu0 %v6243_v18  ;;  %6312 = vmatpush3.msra.mxu1 %v6204_v32 }
 0x902   : > { %6350 = vmatpush3.msra.mxu0 %v6211_v21  ;;  %6313 = vmatprep.subr.mxu1 %v6235_v62 }
 0x903   : > { %6351 = vmatprep.subr.mxu0 %v6240_v26  ;;  %6314 = vmatpush3.msra.mxu1 %v6203_v23 }
 0x904   : > { %6352 = vmatpush3.msra.mxu0 %v6208_v10  ;;  %6315 = vmatprep.subr.mxu1 %v6232_v24 }
 0x905   : > { %6353 = vmatprep.subr.mxu0 %v6239_v9  ;;  %6316 = vmatpush3.msra.mxu1 %v6200_v43 }
 0x906   : > { %6354 = vmatpush3.msra.mxu0 %v6207_v19  ;;  %6317 = vmatprep.subr.mxu1 %v6231_v7 }
 0x907   : > { %6355 = vmatprep.subr.mxu0 %v6236_v30  ;;  %6318 = vmatpush3.msra.mxu1 %v6199_v3 }
 0x908   : > { %6356 = vmatpush3.msra.mxu0 %v6204_v32  ;;  %6319 = vmatprep.subr.mxu1 %v6228_v45 }
 0x909   : > { %6357 = vmatprep.subr.mxu0 %v6235_v62  ;;  %6320 = vmatpush3.msra.mxu1 %v6196_v13 }
 0x90a   : > { %6358 = vmatpush3.msra.mxu0 %v6203_v23  ;;  %6321 = vmatprep.subr.mxu1 %v6227_v28 }
 0x90b   : > { %6359 = vmatprep.subr.mxu0 %v6232_v24  ;;  %6322 = vmatpush3.msra.mxu1 %v6195_v51 }
 0x90c   : > { %6360 = vmatpush3.msra.mxu0 %v6200_v43 }
 0x90d   : > { %6361 = vmatprep.subr.mxu0 %v6231_v7 }
 0x90e   : > { %6362 = vmatpush3.msra.mxu0 %v6199_v3 }
 0x90f   : > { %6363 = vmatprep.subr.mxu0 %v6228_v45 }
 0x910   : > { %6364 = vmatpush3.msra.mxu0 %v6196_v13 }
 0x911   : > { %6365 = vmatprep.subr.mxu0 %v6227_v28 }
 0x912   : > { %6366 = vmatpush3.msra.mxu0 %v6195_v51 }
 0x99d   : > { %v4170_v29 = vpop.f32.mrf.mxu0 }
 0x99f   : > { %v4172_v8 = vpop.f32.mrf.mxu0 }
 0x9a2   : > { %v4176_v50 = vpop.f32.mrf.mxu0 }
 0x9a4   : > { %v4178_v38 = vpop.f32.mrf.mxu0 }
 0x9a5   : > { %v4259_v56 = vpop.f32.mrf.mxu1 }
 0x9a6   : > { %v4182_v48 = vpop.f32.mrf.mxu0  ;;  %v4260_v6 = vadd.f32 %v4259_v56, %v4170_v29 }
 0x9a7   : > { %v4261_v60 = vpop.f32.mrf.mxu1 }
 0x9a8   : > { %v4184_v17 = vpop.f32.mrf.mxu0  ;;  %v4262_v11 = vadd.f32 %v4261_v60, %v4172_v8  ;;  %v4796_v8 = vld [vmem:[%s11601_s9 + $0x8] sm:$0xff] }
 0x9a9   : > { %v4265_v1 = vpop.f32.mrf.mxu1 }
 0x9aa   : > { %v4188_v63 = vpop.f32.mrf.mxu0  ;;  %4410 = vmatprep.mubr.f32.mxu1 %v4262_v11  ;;  %v4266_v34 = vadd.f32 %v4265_v1, %v4176_v50  ;;  %v4797_v50 = vld [vmem:[%s11601_s9 + $0x10] sm:$0xff] }
 0x9ab   : > { %v4267_v57 = vpop.f32.mrf.mxu1  ;;  %4411 = vmatmul.mubr.f32.vlgmr.msra.gmra.mxu1 %v4260_v6 }
 0x9ac   : > { %v4190_v5 = vpop.f32.mrf.mxu0  ;;  %v4268_v46 = vadd.f32 %v4267_v57, %v4178_v38 }
 0x9ad   : > { %v4271_v0 = vpop.f32.mrf.mxu1 }
 0x9ae   : > { %v4513_v16 = vpop.f32.mrf.mxu0  ;;  %4415 = vmatprep.mubr.f32.mxu1 %v4268_v46  ;;  %v4272_v54 = vadd.f32 %v4271_v0, %v4182_v48  ;;  %v5156_v0 = vld [vmem:[%s11602_s10 + $0x38] sm:$0xff] }
 0x9af   : > { %v4273_v55 = vpop.f32.mrf.mxu1  ;;  %4416 = vmatmul.mubr.f32.gmra.mxu1 %v4266_v34 }
 0x9b0   : > { %v4274_v53 = vadd.f32 %v4273_v55, %v4184_v17  ;;  %v4515_v61 = vpop.f32.mrf.mxu0 }
 0x9b1   : > { %4600 = vmatprep.mubr.f32.mxu0 %v4515_v61  ;;  %v4277_v44 = vpop.f32.mrf.mxu1 }
 0x9b2   : > { %v4519_v47 = vpop.f32.mrf.mxu0  ;;  %4601 = vmatmul.mubr.f32.vlgmr.msra.gmra.mxu0 %v4513_v16  ;;  %4420 = vmatprep.mubr.f32.mxu1 %v4274_v53  ;;  %v4278_v59 = vadd.f32 %v4277_v44, %v4188_v63 }
 0x9b3   : > { %v4279_v36 = vpop.f32.mrf.mxu1  ;;  %4421 = vmatmul.mubr.f32.gmra.mxu1 %v4272_v54 }
 0x9b4   : > { %v4280_v37 = vadd.f32 %v4279_v36, %v4190_v5  ;;  %v4521_v2 = vpop.f32.mrf.mxu0  ;;  %v4621_v5 = vand.u32 7, %v12828_v33 }
 0x9b5   : > { %4605 = vmatprep.mubr.f32.mxu0 %v4521_v2 }
 0x9b6   : > { %v4525_v14 = vpop.f32.mrf.mxu0  ;;  %4606 = vmatmul.mubr.f32.gmra.mxu0 %v4519_v47  ;;  %4425 = vmatprep.mubr.f32.mxu1 %v4280_v37  ;;  %vm11209_vm0 = vcmp.ge.s32.totalorder %v4621_v5, 1  ;;  %vm11224_vm8 = vcmp.le.s32.totalorder %v4621_v5, 6 }
 0x9b7   : > { %4426 = vmatmul.mubr.f32.gmra.mxu1 %v4278_v59 }
 0x9b8   : > { %v4527_v25 = vpop.f32.mrf.mxu0  ;;  %4883 = vmatprep.mubr.f32.mxu1 %v4796_v8 }
 0x9b9   : > { %4610 = vmatprep.mubr.f32.mxu0 %v4527_v25 }
 0x9ba   : > { %v4531_v35 = vpop.f32.mrf.mxu0  ;;  %4611 = vmatmul.mubr.f32.gmra.mxu0 %v4525_v14 }
 0x9bc   : > { %v4533_v31 = vpop.f32.mrf.mxu0 }
 0x9bd   : > { %4615 = vmatprep.mubr.f32.mxu0 %v4533_v31 }
 0x9be   : > { %4616 = vmatmul.mubr.f32.gmra.mxu0 %v4531_v35 }
 0x9bf   : > { %6523 = vmatprep.mubr.msk.f32.mxu0 %vm12865_vm6, %v4797_v50  ;;  %v4802_v50 = vld [vmem:[%s11601_s9 + $0x38] sm:$0xff] }
 0xa6b   : > { %v6323_v4 = vpop.f32.mrf.mxu1 }
 0xa6d   : > { %v6324_v52 = vpop.f32.mrf.mxu1 }
 0xa6e   : > { %v6325_v42 = vadd.f32 %v6324_v52, %v6323_v4 }
 0xa6f   : > { %v6326_v41 = vpop.f32.mrf.mxu1 }
 0xa71   : > { %v6327_v20 = vpop.f32.mrf.mxu1 }
 0xa72   : > { %v6367_v39 = vpop.f32.mrf.mxu0  ;;  %v6328_v19 = vadd.f32 %v6327_v20, %v6326_v41 }
 0xa73   : > { %v6329_v10 = vpop.f32.mrf.mxu1 }
 0xa74   : > { %v6368_v18 = vpop.f32.mrf.mxu0 }
 0xa75   : > { %v6369_v49 = vadd.f32 %v6368_v18, %v6367_v39  ;;  %v6330_v62 = vpop.f32.mrf.mxu1 }
 0xa76   : > { %v6370_v21 = vpop.f32.mrf.mxu0  ;;  %v6331_v43 = vadd.f32 %v6330_v62, %v6329_v10 }
 0xa77   : > { %v11116_v26 = vadd.f32 %v6369_v49, %v6325_v42  ;;  %v6332_v7 = vpop.f32.mrf.mxu1 }
 0xa78   : > { %v6371_v9 = vpop.f32.mrf.mxu0 }
 0xa79   : > { %v11119_v12 = vmax.f32 %v11116_v26, 0.0  ;;  %v6372_v30 = vadd.f32 %v6371_v9, %v6370_v21  ;;  %v6333_v45 = vpop.f32.mrf.mxu1 }
 0xa7a   : > { %v6373_v27 = vpop.f32.mrf.mxu0  ;;  %v6334_v28 = vadd.f32 %v6333_v45, %v6332_v7  ;;  %v4795_v45 = vld [vmem:[%s11601_s9] sm:$0xff] }
 0xa7b   : > { %v11121_v32 = vadd.f32 %v6372_v30, %v6328_v19  ;;  %4757 = vrot.lane.b32.xlu1 %v11119_v12, %s7072_s17  ;;  %4695 = vrot.lane.b32.xlu0 %v11119_v12, %s7061_s30 }
 0xa7c   : > { %v6374_v23 = vpop.f32.mrf.mxu0 }
 0xa7d   : > { %v11128_v58 = vmax.f32 %v11121_v32, 0.0  ;;  %v6375_v24 = vadd.f32 %v6374_v23, %v6373_v27 }
 0xa7e   : > { %v6376_v22 = vpop.f32.mrf.mxu0 }
 0xa7f   : > { %4759 = vrot.lane.b32.xlu1 %v11128_v58, %s7072_s17  ;;  %4736 = vrot.lane.b32.xlu0 %v11119_v12, %s7073_s18  ;;  %v11134_v3 = vadd.f32 %v6375_v24, %v6331_v43 }
 0xa80   : > { %v6377_v40 = vpop.f32.mrf.mxu0 }
 0xa81   : > { %v11141_v15 = vmax.f32 %v11134_v3, 0.0  ;;  %v6378_v13 = vadd.f32 %v6377_v40, %v6376_v22 }
 0xa83   : > { %4674 = vrot.lane.b32.xlu1 %v11128_v58, %s7074_s23  ;;  %4697 = vrot.lane.b32.xlu0 %v11128_v58, %s7061_s30  ;;  %v11147_v51 = vadd.f32 %v6378_v13, %v6334_v28 }
 0xa85   : > { %v11154_v29 = vmax.f32 %v11147_v51, 0.0 }
 0xa87   : > { %4761 = vrot.lane.b32.xlu1 %v11141_v15, %s7072_s17  ;;  %4738 = vrot.lane.b32.xlu0 %v11128_v58, %s7073_s18 }
 0xa8b   : > { %4676 = vrot.lane.b32.xlu1 %v11141_v15, %s7074_s23  ;;  %4699 = vrot.lane.b32.xlu0 %v11141_v15, %s7061_s30 }
 0xa8f   : > { %4763 = vrot.lane.b32.xlu1 %v11154_v29, %s7072_s17  ;;  %4740 = vrot.lane.b32.xlu0 %v11141_v15, %s7073_s18 }
 0xa93   : > { %4672 = vrot.lane.b32.xlu1 %v11119_v12, %s7074_s23  ;;  %4701 = vrot.lane.b32.xlu0 %v11154_v29, %s7061_s30 }
 0xa97   : > { %4678 = vrot.lane.b32.xlu1 %v11154_v29, %s7074_s23  ;;  %4742 = vrot.lane.b32.xlu0 %v11154_v29, %s7073_s18 }
 0xa9b   : > { %4659 = vrot.lane.b32.xlu1 %v11141_v15, %s7075_s22  ;;  %4719 = vrot.lane.b32.xlu0 %v11141_v15, %s7059_s24 }
 0xa9f   : > { %4661 = vrot.lane.b32.xlu1 %v11154_v29, %s7075_s22  ;;  %4721 = vrot.lane.b32.xlu0 %v11154_v29, %s7059_s24 }
 0xaa3   : > { %4657 = vrot.lane.b32.xlu1 %v11128_v58, %s7075_s22  ;;  %4717 = vrot.lane.b32.xlu0 %v11128_v58, %s7059_s24 }
 0xaa7   : > { %4655 = vrot.lane.b32.xlu1 %v11119_v12, %s7075_s22  ;;  %4715 = vrot.lane.b32.xlu0 %v11119_v12, %s7059_s24 }
 0xaab   : > { %4636 = vrot.lane.b32.xlu1 %v11141_v15, %s12014_s26  ;;  %4638 = vrot.lane.b32.xlu0 %v11154_v29, %s12014_s26 }
 0xaaf   : > { %4632 = vrot.lane.b32.xlu1 %v11119_v12, %s12014_s26  ;;  %4634 = vrot.lane.b32.xlu0 %v11128_v58, %s12014_s26 }
 0xab3   : > { %4778 = vrot.lane.b32.xlu1 %v11141_v15, %s12012_s15  ;;  %4780 = vrot.lane.b32.xlu0 %v11154_v29, %s12012_s15 }
 0xab7   : > { %4774 = vrot.lane.b32.xlu1 %v11119_v12, %s12012_s15  ;;  %4776 = vrot.lane.b32.xlu0 %v11128_v58, %s12012_s15 }
 0xaed   : > { %v4758_v38 = vpop.permute.xlu1 %4757  ;;  %v4696_v56 = vpop.permute.xlu0 %4695 }
 0xaee   : > { %v4707_v36 = vsel %vm12873_vm1, 0.0, %v4696_v56 }
 0xaf1   : > { %v4760_v48 = vpop.permute.xlu1 %4759  ;;  %v4737_v60 = vpop.permute.xlu0 %4736 }
 0xaf2   : > { %v4749_v39 = vsel %vm4748_vm9, %v4737_v60, 0.0  ;;  %v4801_v60 = vld [vmem:[%s11601_s9 + $0x30] sm:$0xff] }
 0xaf5   : > { %v4675_v17 = vpop.permute.xlu1 %4674  ;;  %v4698_v11 = vpop.permute.xlu0 %4697 }
 0xaf6   : > { %v4708_v44 = vsel %vm12870_vm10, 0.0, %v4698_v11  ;;  %v4686_v41 = vsel %vm4684_vm3, 0.0, %v4675_v17  ;;  %v4800_v11 = vld [vmem:[%s11601_s9 + $0x28] sm:$0xff] }
 0xaf9   : > { %v4762_v6 = vpop.permute.xlu1 %4761  ;;  %v4739_v1 = vpop.permute.xlu0 %4738 }
 0xafa   : > { %v4750_v31 = vsel %vm4748_vm9, %v4739_v1, 0.0  ;;  %v4803_v1 = vld [vmem:[%s11601_s9 + $0x40] sm:$0xff] }
 0xafd   : > { %v4677_v63 = vpop.permute.xlu1 %4676  ;;  %v4700_v57 = vpop.permute.xlu0 %4699 }
 0xafe   : > { %v4709_v61 = vsel %vm12869_vm2, 0.0, %v4700_v57  ;;  %v4687_v35 = vsel %vm4684_vm3, 0.0, %v4677_v63  ;;  %v4804_v63 = vld [vmem:[%s11601_s9 + $0x48] sm:$0xff]  ;;  %v4806_v57 = vld [vmem:[%s11601_s9 + $0x58] sm:$0xff] }
 0xb01   : > { %v4764_v46 = vpop.permute.xlu1 %4763  ;;  %v4741_v34 = vpop.permute.xlu0 %4740 }
 0xb02   : > { %6379 = vmatprep.subr.msk.mxu1 %vm4769_vm12, %v4764_v46  ;;  %v4751_v25 = vsel %vm4748_vm9, %v4741_v34, 0.0 }
 0xb05   : > { %v4673_v16 = vpop.permute.xlu1 %4672  ;;  %v4702_v55 = vpop.permute.xlu0 %4701 }
 0xb06   : > { %v4710_v53 = vsel %vm12868_vm4, 0.0, %v4702_v55  ;;  %v4685_v20 = vsel %vm4684_vm3, 0.0, %v4673_v16  ;;  %vm12876_vm4 = vmmov %vm12865_vm6 }
 0xb07   : > { %6380 = vmatpush3.msk.msra.mxu1 %vm11209_vm0, %v4710_v53  ;;  %vm12877_vm2 = vmmov %vm12876_vm4 }
 0xb08   : > { %6381 = vmatprep.subr.msk.mxu1 %vm4769_vm12, %v4762_v6  ;;  %v4805_v6 = vld [vmem:[%s11601_s9 + $0x50] sm:$0xff]  ;;  %vm12879_vm10 = vmmov %vm12877_vm2 }
 0xb09   : > { %v4679_v33 = vpop.permute.xlu1 %4678  ;;  %6382 = vmatpush3.msk.msra.mxu1 %vm11209_vm0, %v4709_v61  ;;  %v4743_v54 = vpop.permute.xlu0 %4742 }
 0xb0a   : > { %6383 = vmatprep.subr.msk.mxu1 %vm4769_vm12, %v4760_v48  ;;  %v4752_v37 = vsel %vm4748_vm9, %v4743_v54, 0.0  ;;  %v4688_v14 = vsel %vm4684_vm3, 0.0, %v4679_v33 }
 0xb0b   : > { %6384 = vmatpush3.msk.msra.mxu1 %vm11209_vm0, %v4708_v44 }
 0xb0c   : > { %6385 = vmatprep.subr.msk.mxu1 %vm4769_vm12, %v4758_v38 }
 0xb0d   : > { %v4660_v2 = vpop.permute.xlu1 %4659  ;;  %6386 = vmatpush3.msk.msra.mxu1 %vm11209_vm0, %v4707_v36  ;;  %v4720_v59 = vpop.permute.xlu0 %4719 }
 0xb0e   : > { %6387 = vmatprep.subr.msk.mxu1 %vm11209_vm0, %v4752_v37  ;;  %v4730_v10 = vsel %vm4727_vm7, %v4720_v59, 0.0 }
 0xb0f   : > { %6388 = vmatpush3.msk.msra.mxu1 %vm11224_vm8, %v4688_v14 }
 0xb10   : > { %6389 = vmatprep.subr.msk.mxu1 %vm11209_vm0, %v4751_v25 }
 0xb11   : > { %v4662_v4 = vpop.permute.xlu1 %4661  ;;  %6390 = vmatpush3.msk.msra.mxu1 %vm11224_vm8, %v4687_v35  ;;  %v4722_v52 = vpop.permute.xlu0 %4721 }
 0xb12   : > { %6391 = vmatprep.subr.msk.mxu1 %vm11209_vm0, %v4750_v31  ;;  %v4731_v42 = vsel %vm4727_vm7, %v4722_v52, 0.0 }
 0xb13   : > { %6392 = vmatpush3.msk.msra.mxu1 %vm11224_vm8, %v4686_v41 }
 0xb14   : > { %6393 = vmatprep.subr.msk.mxu1 %vm11209_vm0, %v4749_v39 }
 0xb15   : > { %v4658_v49 = vpop.permute.xlu1 %4657  ;;  %6394 = vmatpush3.msk.msra.mxu1 %vm11224_vm8, %v4685_v20  ;;  %v4718_v21 = vpop.permute.xlu0 %4717 }
 0xb16   : > { %6395 = vmatprep.subr.msk.mxu1 %vm11224_vm8, %v4731_v42  ;;  %v4729_v9 = vsel %vm4727_vm7, %v4718_v21, 0.0  ;;  %v5151_v21 = vld [vmem:[%s11602_s10 + $0x10] sm:$0xff] }
 0xb17   : > { %6396 = vmatpush3.msk.msra.mxu1 %vm11254_vm13, %v4662_v4 }
 0xb18   : > { %6397 = vmatprep.subr.msk.mxu1 %vm11224_vm8, %v4730_v10 }
 0xb19   : > { %v4656_v19 = vpop.permute.xlu1 %4655  ;;  %6398 = vmatpush3.msk.msra.mxu1 %vm11254_vm13, %v4660_v2  ;;  %v4716_v30 = vpop.permute.xlu0 %4715 }
 0xb1a   : > { %v4728_v27 = vsel %vm4727_vm7, %v4716_v30, 0.0  ;;  %6399 = vmatprep.subr.msk.mxu1 %vm11224_vm8, %v4729_v9 }
 0xb1b   : > { %6400 = vmatpush3.msk.msra.mxu1 %vm11254_vm13, %v4658_v49  ;;  %v5150_v49 = vld [vmem:[%s11602_s10 + $0x8] sm:$0xff] }
 0xb1c   : > { %6401 = vmatprep.subr.msk.mxu1 %vm11224_vm8, %v4728_v27 }
 0xb1d   : > { %v4637_v62 = vpop.permute.xlu1 %4636  ;;  %6402 = vmatpush3.msk.msra.mxu1 %vm11254_vm13, %v4656_v19  ;;  %v4639_v23 = vpop.permute.xlu0 %4638 }
 0xb1e   : > { %v4648_v24 = vsel %vm4644_vm14, 0.0, %v4639_v23  ;;  %6403 = vmatprep.subr.mxu1 %v11154_v29  ;;  %v4647_v22 = vsel %vm4644_vm14, 0.0, %v4637_v62 }
 0xb1f   : > { %6404 = vmatpush3.msk.msra.mxu1 %vm11209_vm0, %v4648_v24 }
 0xb20   : > { %6405 = vmatprep.subr.mxu1 %v11141_v15  ;;  %v4799_v15 = vld [vmem:[%s11601_s9 + $0x20] sm:$0xff] }
 0xb21   : > { %v4633_v43 = vpop.permute.xlu1 %4632  ;;  %6406 = vmatpush3.msk.msra.mxu1 %vm11209_vm0, %v4647_v22  ;;  %v4635_v7 = vpop.permute.xlu0 %4634 }
 0xb22   : > { %v4646_v40 = vsel %vm4644_vm14, 0.0, %v4635_v7  ;;  %6407 = vmatprep.subr.mxu1 %v11128_v58  ;;  %v4645_v13 = vsel %vm4644_vm14, 0.0, %v4633_v43 }
 0xb23   : > { %6408 = vmatpush3.msk.msra.mxu1 %vm11209_vm0, %v4646_v40 }
 0xb24   : > { %6409 = vmatprep.subr.mxu1 %v11119_v12  ;;  %v4798_v12 = vld [vmem:[%s11601_s9 + $0x18] sm:$0xff] }
 0xb25   : > { %v4779_v28 = vpop.permute.xlu1 %4778  ;;  %6410 = vmatpush3.msk.msra.mxu1 %vm11209_vm0, %v4645_v13  ;;  %v4781_v58 = vpop.permute.xlu0 %4780 }
 0xb26   : > { %v4790_v29 = vsel %vm4786_vm15, %v4781_v58, 0.0  ;;  %4884 = vmatmul.mubr.f32.vlgmr.msra.gmra.mxu1 %v4795_v45  ;;  %v4789_v8 = vsel %vm4786_vm15, %v4779_v28, 0.0 }
 0xb27   : > { %6515 = vmatprep.subr.msk.mxu0 %vm11224_vm8, %v4790_v29  ;;  %4888 = vmatprep.mubr.f32.mxu1 %v4799_v15 }
 0xb28   : > { %6516 = vmatpush3.msk.msra.mxu0 %vm11224_vm8, %v4790_v29 }
 0xb29   : > { %v4775_v38 = vpop.permute.xlu1 %4774  ;;  %6517 = vmatprep.subr.msk.mxu0 %vm11224_vm8, %v4789_v8  ;;  %v4777_v56 = vpop.permute.xlu0 %4776 }
 0xb2a   : > { %v4788_v48 = vsel %vm4786_vm15, %v4777_v56, 0.0  ;;  %6518 = vmatpush3.msk.msra.mxu0 %vm11224_vm8, %v4789_v8  ;;  %4889 = vmatmul.mubr.f32.gmra.mxu1 %v4798_v12  ;;  %v4787_v17 = vsel %vm4786_vm15, %v4775_v38, 0.0 }
 0xb2b   : > { %6519 = vmatprep.subr.msk.mxu0 %vm11224_vm8, %v4788_v48  ;;  %4893 = vmatprep.mubr.f32.mxu1 %v4802_v50 }
 0xb2c   : > { %6520 = vmatpush3.msk.msra.mxu0 %vm11224_vm8, %v4788_v48 }
 0xb2d   : > { %6521 = vmatprep.subr.msk.mxu0 %vm11224_vm8, %v4787_v17 }
 0xb2e   : > { %6522 = vmatpush3.msk.msra.mxu0 %vm11224_vm8, %v4787_v17  ;;  %4894 = vmatmul.mubr.f32.gmra.mxu1 %v4801_v60 }
 0xb2f   : > { %6524 = vmatmul.mubr.msk.f32.vlgmr.msra.gmra.mxu0 %vm12865_vm6, %v4800_v11  ;;  %4898 = vmatprep.mubr.f32.mxu1 %v4805_v6  ;;  %vm12882_vm6 = vmmov %vm12873_vm1 }
 0xb30   : > { %6526 = vmatprep.mubr.msk.f32.mxu0 %vm12876_vm4, %v4803_v1  ;;  %vm12883_vm4 = vmmov %vm12873_vm1 }
 0xb32   : > { %4899 = vmatmul.mubr.f32.gmra.mxu1 %v4804_v63 }
 0xb33   : > { %6527 = vmatmul.mubr.msk.f32.gmra.mxu0 %vm12877_vm2, %v4806_v57  ;;  %5237 = vmatprep.mubr.f32.mxu1 %v5150_v49 }
 0xb34   : > { %6537 = vmatprep.mubr.msk.f32.mxu0 %vm12879_vm10, %v5151_v21  ;;  %vm12893_vm10 = vmmov %vm12873_vm1 }
 0xbe6   : > { %v6411_v5 = vpop.f32.mrf.mxu1 }
 0xbe8   : > { %v6412_v46 = vpop.f32.mrf.mxu1 }
 0xbe9   : > { %v6413_v53 = vadd.f32 %v6412_v46, %v6411_v5 }
 0xbea   : > { %v6414_v34 = vpop.f32.mrf.mxu1 }
 0xbec   : > { %v6415_v16 = vpop.f32.mrf.mxu1 }
 0xbed   : > { %v6416_v61 = vadd.f32 %v6415_v16, %v6414_v34 }
 0xbee   : > { %v6417_v54 = vpop.f32.mrf.mxu1 }
 0xbef   : > { %v6525_v55 = vpop.f32.mrf.mxu0 }
 0xbf0   : > { %v4976_v2 = vadd.f32 %v6525_v55, %v6416_v61  ;;  %v6418_v59 = vpop.f32.mrf.mxu1 }
 0xbf1   : > { %v4970_v33 = vpop.f32.mrf.mxu0  ;;  %v6419_v14 = vadd.f32 %v6418_v59, %v6417_v54 }
 0xbf2   : > { %v4971_v44 = vadd.f32 %v6413_v53, %v4970_v33  ;;  %v11355_v35 = vmax.f32 %v4976_v2, 0.0  ;;  %v6420_v31 = vpop.f32.mrf.mxu1 }
 0xbf3   : > { %v6528_v36 = vpop.f32.mrf.mxu0 }
 0xbf4   : > { %v11349_v37 = vmax.f32 %v4971_v44, 0.0  ;;  %v6421_v52 = vpop.f32.mrf.mxu1 }
 0xbf5   : > { %v4980_v25 = vpop.f32.mrf.mxu0  ;;  %v6422_v39 = vadd.f32 %v6421_v52, %v6420_v31  ;;  %v6290_v31 = vld [vmem:[#allocation15 + $0x18] sm:$0xff]  }
 0xbf6   : > { %5113 = vrot.lane.b32.xlu1 %v11349_v37, %s7072_s17  ;;  %5053 = vrot.lane.b32.xlu0 %v11349_v37, %s7061_s30  ;;  %v4981_v4 = vadd.f32 %v6419_v14, %v4980_v25  ;;  %v6271_v49 = vunpack.c.l.bf16 %v6290_v31 }
 0xbf7   : > { %v4986_v20 = vadd.f32 %v6528_v36, %v6422_v39  ;;  %v6272_v39 = vunpack.c.h.bf16 %v6290_v31 }
 0xbf8   : > { %v11361_v41 = vmax.f32 %v4981_v4, 0.0  ;;  %v5149_v4 = vld [vmem:[%s11602_s10] sm:$0xff] }
 0xbf9   : > { %v11375_v42 = vmax.f32 %v4986_v20, 0.0 }
 0xbfa   : > { %5115 = vrot.lane.b32.xlu1 %v11355_v35, %s7072_s17  ;;  %5093 = vrot.lane.b32.xlu0 %v11349_v37, %s7073_s18 }
 0xbfe   : > { %5035 = vrot.lane.b32.xlu1 %v11355_v35, %s7074_s23  ;;  %5055 = vrot.lane.b32.xlu0 %v11355_v35, %s7061_s30 }
 0xc02   : > { %5117 = vrot.lane.b32.xlu1 %v11361_v41, %s7072_s17  ;;  %5095 = vrot.lane.b32.xlu0 %v11355_v35, %s7073_s18 }
 0xc06   : > { %5037 = vrot.lane.b32.xlu1 %v11361_v41, %s7074_s23  ;;  %5057 = vrot.lane.b32.xlu0 %v11361_v41, %s7061_s30 }
 0xc0a   : > { %5119 = vrot.lane.b32.xlu1 %v11375_v42, %s7072_s17  ;;  %5097 = vrot.lane.b32.xlu0 %v11361_v41, %s7073_s18 }
 0xc0e   : > { %5033 = vrot.lane.b32.xlu1 %v11349_v37, %s7074_s23  ;;  %5059 = vrot.lane.b32.xlu0 %v11375_v42, %s7061_s30  ;;  %s609_s30 = scalar_lea.vmem %s11606_s14, %s12896_s16 }
 0xc12   : > { %5039 = vrot.lane.b32.xlu1 %v11375_v42, %s7074_s23  ;;  %5099 = vrot.lane.b32.xlu0 %v11375_v42, %s7073_s18  ;;  %s12878_s18 = smov 9  }
 0xc16   : > { %5021 = vrot.lane.b32.xlu1 %v11361_v41, %s7075_s22  ;;  %5077 = vrot.lane.b32.xlu0 %v11361_v41, %s7059_s24 }
 0xc1a   : > { %5023 = vrot.lane.b32.xlu1 %v11375_v42, %s7075_s22  ;;  %5079 = vrot.lane.b32.xlu0 %v11375_v42, %s7059_s24 }
 0xc1e   : > { %5019 = vrot.lane.b32.xlu1 %v11355_v35, %s7075_s22  ;;  %5075 = vrot.lane.b32.xlu0 %v11355_v35, %s7059_s24 }
 0xc22   : > { %5017 = vrot.lane.b32.xlu1 %v11349_v37, %s7075_s22  ;;  %5073 = vrot.lane.b32.xlu0 %v11349_v37, %s7059_s24  ;;  %s12880_s22 = smov 119  }
 0xc26   : > { %5001 = vrot.lane.b32.xlu1 %v11361_v41, %s12878_s18  ;;  %5003 = vrot.lane.b32.xlu0 %v11375_v42, %s12878_s18 }
 0xc2a   : > { %4997 = vrot.lane.b32.xlu1 %v11349_v37, %s12878_s18  ;;  %4999 = vrot.lane.b32.xlu0 %v11355_v35, %s12878_s18 }
 0xc2e   : > { %5133 = vrot.lane.b32.xlu1 %v11361_v41, %s12880_s22  ;;  %5135 = vrot.lane.b32.xlu0 %v11375_v42, %s12880_s22 }
 0xc32   : > { %5129 = vrot.lane.b32.xlu1 %v11349_v37, %s12880_s22  ;;  %5131 = vrot.lane.b32.xlu0 %v11355_v35, %s12880_s22 }
 0xc68   : > { %v5114_v10 = vpop.permute.xlu1 %5113  ;;  %v5054_v9 = vpop.permute.xlu0 %5053 }
 0xc69   : > { %v5065_v8 = vsel %vm12883_vm4, 0.0, %v5054_v9 }
 0xc6c   : > { %v5116_v19 = vpop.permute.xlu1 %5115  ;;  %v5094_v30 = vpop.permute.xlu0 %5093 }
 0xc6d   : > { %v5105_v57 = vsel %vm4748_vm9, %v5094_v30, 0.0 }
 0xc70   : > { %v5036_v27 = vpop.permute.xlu1 %5035  ;;  %v5056_v62 = vpop.permute.xlu0 %5055 }
 0xc71   : > { %v5066_v12 = vsel %vm12882_vm6, 0.0, %v5056_v62  ;;  %v5046_v63 = vsel %vm4684_vm3, 0.0, %v5036_v27  ;;  %v5155_v27 = vld [vmem:[%s11602_s10 + $0x30] sm:$0xff] }
 0xc74   : > { %v5118_v23 = vpop.permute.xlu1 %5117  ;;  %v5096_v24 = vpop.permute.xlu0 %5095 }
 0xc75   : > { %v5106_v11 = vsel %vm4748_vm9, %v5096_v24, 0.0  ;;  %v5154_v24 = vld [vmem:[%s11602_s10 + $0x28] sm:$0xff] }
 0xc78   : > { %v5038_v22 = vpop.permute.xlu1 %5037  ;;  %v5058_v43 = vpop.permute.xlu0 %5057 }
 0xc79   : > { %v5067_v28 = vsel %vm12881_vm11, 0.0, %v5058_v43  ;;  %v5047_v17 = vsel %vm4684_vm3, 0.0, %v5038_v22  ;;  %v5159_v22 = vld [vmem:[%s11602_s10 + $0x50] sm:$0xff]  ;;  %v5157_v43 = vld [vmem:[%s11602_s10 + $0x40] sm:$0xff] }
 0xc7c   : > { %v5120_v7 = vpop.permute.xlu1 %5119  ;;  %v5098_v40 = vpop.permute.xlu0 %5097 }
 0xc7d   : > { %6431 = vmatprep.subr.msk.mxu1 %vm4769_vm12, %v5120_v7  ;;  %v5107_v60 = vsel %vm4748_vm9, %v5098_v40, 0.0  ;;  %v5158_v7 = vld [vmem:[%s11602_s10 + $0x48] sm:$0xff]  ;;  %v5160_v40 = vld [vmem:[%s11602_s10 + $0x58] sm:$0xff] }
 0xc80   : > { %v5034_v45 = vpop.permute.xlu1 %5033  ;;  %v5060_v13 = vpop.permute.xlu0 %5059 }
 0xc81   : > { %v5068_v15 = vsel %vm12873_vm1, 0.0, %v5060_v13  ;;  %v5045_v5 = vsel %vm4684_vm3, 0.0, %v5034_v45  ;;  %v6288_v45 = vld [vmem:[#allocation15 + $0x8] sm:$0xff]  }
 0xc82   : > { %6432 = vmatpush3.msk.msra.mxu1 %vm11209_vm0, %v5068_v15  ;;  %v6264_v13 = vunpack.c.h.bf16 %v6288_v45  ;;  %v6258_v15 = vld [vmem:[#allocation15] sm:$0xff]  }
 0xc83   : > { %6433 = vmatprep.subr.msk.mxu1 %vm4769_vm12, %v5118_v23 }
 0xc84   : > { %v5040_v58 = vpop.permute.xlu1 %5039  ;;  %6434 = vmatpush3.msk.msra.mxu1 %vm11209_vm0, %v5067_v28  ;;  %v5100_v29 = vpop.permute.xlu0 %5099  ;;  %v6263_v28 = vunpack.c.l.bf16 %v6288_v45 }
 0xc85   : > { %6435 = vmatprep.subr.msk.mxu1 %vm4769_vm12, %v5116_v19  ;;  %v5108_v50 = vsel %vm4748_vm9, %v5100_v29, 0.0  ;;  %v5048_v48 = vsel %vm4684_vm3, 0.0, %v5040_v58  ;;  %v6260_v58 = vunpack.c.h.bf16 %v6258_v15  ;;  %v6259_v29 = vunpack.c.l.bf16 %v6258_v15 }
 0xc86   : > { %6436 = vmatpush3.msk.msra.mxu1 %vm11209_vm0, %v5066_v12  ;;  %vm5359_vm9 = vcmask 523264  }
 0xc87   : > { %6437 = vmatprep.subr.msk.mxu1 %vm4769_vm12, %v5114_v10  ;;  %v6289_v10 = vld [vmem:[#allocation15 + $0x10] sm:$0xff]   ;;  %vm12884_vm12 = vmmov %vm12877_vm2 }
 0xc88   : > { %v5022_v38 = vpop.permute.xlu1 %5021  ;;  %6438 = vmatpush3.msk.msra.mxu1 %vm11209_vm0, %v5065_v8  ;;  %v5078_v56 = vpop.permute.xlu0 %5077  ;;  %v6268_v62 = vunpack.c.h.bf16 %v6289_v10  ;;  %v6267_v47 = vunpack.c.l.bf16 %v6289_v10 }
 0xc89   : > { %6439 = vmatprep.subr.msk.mxu1 %vm11209_vm0, %v5108_v50  ;;  %v5087_v55 = vsel %vm4727_vm7, %v5078_v56, 0.0 }
 0xc8a   : > { %6440 = vmatpush3.msk.msra.mxu1 %vm11224_vm8, %v5048_v48 }
 0xc8b   : > { %6441 = vmatprep.subr.msk.mxu1 %vm11209_vm0, %v5107_v60 }
 0xc8c   : > { %v5024_v6 = vpop.permute.xlu1 %5023  ;;  %6442 = vmatpush3.msk.msra.mxu1 %vm11224_vm8, %v5047_v17  ;;  %v5080_v1 = vpop.permute.xlu0 %5079 }
 0xc8d   : > { %6443 = vmatprep.subr.msk.mxu1 %vm11209_vm0, %v5106_v11  ;;  %v5088_v46 = vsel %vm4727_vm7, %v5080_v1, 0.0 }
 0xc8e   : > { %6444 = vmatpush3.msk.msra.mxu1 %vm11224_vm8, %v5046_v63 }
 0xc8f   : > { %6445 = vmatprep.subr.msk.mxu1 %vm11209_vm0, %v5105_v57 }
 0xc90   : > { %v5020_v34 = vpop.permute.xlu1 %5019  ;;  %6446 = vmatpush3.msk.msra.mxu1 %vm11224_vm8, %v5045_v5  ;;  %v5076_v16 = vpop.permute.xlu0 %5075 }
 0xc91   : > { %6447 = vmatprep.subr.msk.mxu1 %vm11224_vm8, %v5088_v46  ;;  %v5086_v53 = vsel %vm4727_vm7, %v5076_v16, 0.0 }
 0xc92   : > { %6448 = vmatpush3.msk.msra.mxu1 %vm11254_vm13, %v5024_v6 }
 0xc93   : > { %6449 = vmatprep.subr.msk.mxu1 %vm11224_vm8, %v5087_v55 }
 0xc94   : > { %v5018_v61 = vpop.permute.xlu1 %5017  ;;  %6450 = vmatpush3.msk.msra.mxu1 %vm11254_vm13, %v5022_v38  ;;  %v5074_v33 = vpop.permute.xlu0 %5073 }
 0xc95   : > { %v5085_v54 = vsel %vm4727_vm7, %v5074_v33, 0.0  ;;  %6451 = vmatprep.subr.msk.mxu1 %vm11224_vm8, %v5086_v53  ;;  %v5457_v33 = vld [vmem:[#allocation13] sm:$0xff] }
 0xc96   : > { %6452 = vmatpush3.msk.msra.mxu1 %vm11254_vm13, %v5020_v34 }
 0xc97   : > { %6453 = vmatprep.subr.msk.mxu1 %vm11224_vm8, %v5085_v54  ;;  %v5458_v54 = vld [vmem:[#allocation13 + $0x8] sm:$0xff] }
 0xc98   : > { %v5002_v44 = vpop.permute.xlu1 %5001  ;;  %6454 = vmatpush3.msk.msra.mxu1 %vm11254_vm13, %v5018_v61  ;;  %v5004_v36 = vpop.permute.xlu0 %5003 }
 0xc99   : > { %v5012_v2 = vsel %vm4644_vm14, 0.0, %v5004_v36  ;;  %6455 = vmatprep.subr.mxu1 %v11375_v42  ;;  %v5011_v59 = vsel %vm4644_vm14, 0.0, %v5002_v44 }
 0xc9a   : > { %6456 = vmatpush3.msk.msra.mxu1 %vm11209_vm0, %v5012_v2 }
 0xc9b   : > { %6457 = vmatprep.subr.mxu1 %v11361_v41  ;;  %v5153_v41 = vld [vmem:[%s11602_s10 + $0x20] sm:$0xff] }
 0xc9c   : > { %v4998_v14 = vpop.permute.xlu1 %4997  ;;  %6458 = vmatpush3.msk.msra.mxu1 %vm11209_vm0, %v5011_v59  ;;  %v5000_v25 = vpop.permute.xlu0 %4999 }
 0xc9d   : > { %v5010_v18 = vsel %vm4644_vm14, 0.0, %v5000_v25  ;;  %6459 = vmatprep.subr.mxu1 %v11355_v35  ;;  %v5009_v52 = vsel %vm4644_vm14, 0.0, %v4998_v14 }
 0xc9e   : > { %6460 = vmatpush3.msk.msra.mxu1 %vm11209_vm0, %v5010_v18 }
 0xc9f   : > { %6461 = vmatprep.subr.mxu1 %v11349_v37  ;;  %v5152_v37 = vld [vmem:[%s11602_s10 + $0x18] sm:$0xff] }
 0xca0   : > { %v5134_v20 = vpop.permute.xlu1 %5133  ;;  %6462 = vmatpush3.msk.msra.mxu1 %vm11209_vm0, %v5009_v52  ;;  %v5136_v35 = vpop.permute.xlu0 %5135  ;;  %vm12885_vm0 = vmmov %vm12877_vm2 }
 0xca1   : > { %v5144_v42 = vsel %vm4786_vm15, %v5136_v35, 0.0  ;;  %5238 = vmatmul.mubr.f32.vlgmr.msra.gmra.mxu1 %v5149_v4  ;;  %6579 = vmatprep.subr.mxu1 %v6272_v39  ;;  %v5143_v21 = vsel %vm4786_vm15, %v5134_v20, 0.0  ;;  %vm12887_vm3 = vmmov %vm12885_vm0 }
 0xca2   : > { %6529 = vmatprep.subr.msk.mxu0 %vm11224_vm8, %v5144_v42  ;;  %5242 = vmatprep.mubr.f32.mxu1 %v5153_v41  ;;  %vm12888_vm7 = vmmov %vm12885_vm0 }
 0xca3   : > { %6530 = vmatpush3.msk.msra.mxu0 %vm11224_vm8, %v5144_v42  ;;  %6580 = vmatpush3.msra.mxu1 %v6272_v39  ;;  %vm12889_vm13 = vmmov %vm12885_vm0 }
 0xca4   : > { %v5130_v9 = vpop.permute.xlu1 %5129  ;;  %6531 = vmatprep.subr.msk.mxu0 %vm11224_vm8, %v5143_v21  ;;  %v5132_v19 = vpop.permute.xlu0 %5131  ;;  %6581 = vmatprep.subr.mxu1 %v6271_v49  ;;  %vm12890_vm14 = vmmov %vm12885_vm0 }
 0xca5   : > { %v5142_v30 = vsel %vm4786_vm15, %v5132_v19, 0.0  ;;  %5243 = vmatmul.mubr.f32.gmra.mxu1 %v5152_v37  ;;  %6532 = vmatpush3.msk.msra.mxu0 %vm11224_vm8, %v5143_v21  ;;  %v5141_v23 = vsel %vm4786_vm15, %v5130_v9, 0.0  ;;  %vm12891_vm15 = vmmov %vm12873_vm1 }
 0xca6   : > { %6533 = vmatprep.subr.msk.mxu0 %vm11224_vm8, %v5142_v30  ;;  %5247 = vmatprep.mubr.f32.mxu1 %v5156_v0  ;;  %vm12892_vm2 = vmmov %vm12873_vm1 }
 0xca7   : > { %6534 = vmatpush3.msk.msra.mxu0 %vm11224_vm8, %v5142_v30  ;;  %6582 = vmatpush3.msra.mxu1 %v6271_v49  ;;  %v5671_v30 = vld [vmem:[#allocation16] sm:$0xff] }
 0xca8   : > { %6535 = vmatprep.subr.msk.mxu0 %vm11224_vm8, %v5141_v23  ;;  %6583 = vmatprep.subr.mxu1 %v6268_v62 }
 0xca9   : > { %5248 = vmatmul.mubr.f32.gmra.mxu1 %v5155_v27  ;;  %6536 = vmatpush3.msk.msra.mxu0 %vm11224_vm8, %v5141_v23  ;;  %vm12886_vm8 = vmmov %vm12885_vm0  ;;  %v5672_v27 = vld [vmem:[#allocation16 + $0x8] sm:$0xff] }
 0xcaa   : > { %6538 = vmatmul.mubr.msk.f32.vlgmr.msra.gmra.mxu0 %vm12884_vm12, %v5154_v24  ;;  %6543 = vmatprep.subr.mxu0 %v6272_v39 }
 0xcab   : > { %6544 = vmatpush3.msra.mxu0 %v6272_v39  ;;  %5252 = vmatprep.mubr.f32.mxu1 %v5159_v22  ;;  %v5673_v22 = vld [vmem:[#allocation16 + $0x10] sm:$0xff] }
 0xcac   : > { %6545 = vmatprep.subr.mxu0 %v6271_v49  ;;  %6540 = vmatprep.mubr.msk.f32.mxu0 %vm12885_vm0, %v5157_v43 }
 0xcad   : > { %5253 = vmatmul.mubr.f32.gmra.mxu1 %v5158_v7  ;;  %6546 = vmatpush3.msra.mxu0 %v6271_v49 }
 0xcae   : > { %6541 = vmatmul.mubr.msk.f32.gmra.mxu0 %vm12886_vm8, %v5160_v40  ;;  %6547 = vmatprep.subr.mxu0 %v6268_v62 }
 0xcaf   : > { %6548 = vmatpush3.msra.mxu0 %v6268_v62  ;;  %6584 = vmatpush3.msra.mxu1 %v6268_v62 }
 0xcb0   : > { %6549 = vmatprep.subr.mxu0 %v6267_v47  ;;  %6585 = vmatprep.subr.mxu1 %v6267_v47 }
 0xcb1   : > { %6550 = vmatpush3.msra.mxu0 %v6267_v47  ;;  %6586 = vmatpush3.msra.mxu1 %v6267_v47  ;;  %v5674_v47 = vld [vmem:[#allocation16 + $0x18] sm:$0xff] }
 0xcb2   : > { %6551 = vmatprep.subr.mxu0 %v6264_v13  ;;  %6587 = vmatprep.subr.mxu1 %v6264_v13 }
 0xcb3   : > { %6552 = vmatpush3.msra.mxu0 %v6264_v13  ;;  %6588 = vmatpush3.msra.mxu1 %v6264_v13 }
 0xcb4   : > { %6553 = vmatprep.subr.mxu0 %v6263_v28  ;;  %6589 = vmatprep.subr.mxu1 %v6263_v28 }
 0xcb5   : > { %6554 = vmatpush3.msra.mxu0 %v6263_v28  ;;  %6590 = vmatpush3.msra.mxu1 %v6263_v28 }
 0xcb6   : > { %6555 = vmatprep.subr.mxu0 %v6260_v58  ;;  %6591 = vmatprep.subr.mxu1 %v6260_v58 }
 0xcb7   : > { %6556 = vmatpush3.msra.mxu0 %v6260_v58  ;;  %6592 = vmatpush3.msra.mxu1 %v6260_v58 }
 0xcb8   : > { %6557 = vmatprep.subr.mxu0 %v6259_v29  ;;  %6593 = vmatprep.subr.mxu1 %v6259_v29 }
 0xcb9   : > { %6558 = vmatpush3.msra.mxu0 %v6259_v29  ;;  %6594 = vmatpush3.msra.mxu1 %v6259_v29 }
 0xcba   : > { %6565 = vmatprep.subr.mxu0 %v11147_v51 }
 0xd61   : > { %v6463_v12 = vpop.f32.mrf.mxu1 }
 0xd63   : > { %v6464_v8 = vpop.f32.mrf.mxu1 }
 0xd64   : > { %v6465_v17 = vadd.f32 %v6464_v8, %v6463_v12 }
 0xd65   : > { %v6466_v50 = vpop.f32.mrf.mxu1 }
 0xd67   : > { %v6467_v38 = vpop.f32.mrf.mxu1 }
 0xd68   : > { %v6468_v48 = vadd.f32 %v6467_v38, %v6466_v50 }
 0xd69   : > { %v6469_v56 = vpop.f32.mrf.mxu1 }
 0xd6a   : > { %v6539_v60 = vpop.f32.mrf.mxu0 }
 0xd6b   : > { %v6470_v11 = vpop.f32.mrf.mxu1  ;;  %v5330_v57 = vadd.f32 %v6539_v60, %v6468_v48 }
 0xd6c   : > { %v5324_v6 = vpop.f32.mrf.mxu0  ;;  %v6471_v46 = vadd.f32 %v6470_v11, %v6469_v56 }
 0xd6d   : > { %v5325_v1 = vadd.f32 %v6465_v17, %v5324_v6  ;;  %v6472_v63 = vpop.f32.mrf.mxu1 }
 0xd6e   : > { %v6542_v5 = vpop.f32.mrf.mxu0 }
 0xd6f   : > { %v6473_v34 = vpop.f32.mrf.mxu1  ;;  %6559 = vmatprep.mubr.msk.f32.mxu0 %vm5359_vm9, %v5325_v1 }
 0xd70   : > { %v6474_v16 = vadd.f32 %v6473_v34, %v6472_v63  ;;  %v5334_v55 = vpop.f32.mrf.mxu0  ;;  %6560 = vmatmul.mubr.msk.f32.vlgmr.msra.gmra.mxu0 %vm5359_vm9, %v5330_v57 }
 0xd71   : > { %v5335_v53 = vadd.f32 %v6471_v46, %v5334_v55  ;;  %6566 = vmatpush3.msra.mxu0 %v11147_v51  ;;  %v5459_v51 = vld [vmem:[#allocation13 + $0x10] sm:$0xff] }
 0xd72   : > { %v5340_v61 = vadd.f32 %v6542_v5, %v6474_v16  ;;  %6567 = vmatprep.subr.mxu0 %v11134_v3 }
 0xd73   : > { %6568 = vmatpush3.msra.mxu0 %v11134_v3  ;;  %6562 = vmatprep.mubr.msk.f32.mxu0 %vm5359_vm9, %v5335_v53  ;;  %v5460_v3 = vld [vmem:[#allocation13 + $0x18] sm:$0xff] }
 0xd74   : > { %6569 = vmatprep.subr.mxu0 %v11121_v32  ;;  %6563 = vmatmul.mubr.msk.f32.gmra.mxu0 %vm5359_vm9, %v5340_v61 }
 0xd75   : > { %6570 = vmatpush3.msra.mxu0 %v11121_v32  ;;  %6573 = vmatprep.mubr.msk.f32.mxu0 %vm12887_vm3, %v5457_v33 }
 0xd76   : > { %6571 = vmatprep.subr.mxu0 %v11116_v26 }
 0xd77   : > { %6572 = vmatpush3.msra.mxu0 %v11116_v26 }
 0xd78   : > { %6574 = vmatmul.mubr.msk.f32.vlgmr.msra.gmra.mxu0 %vm12888_vm7, %v5458_v54 }
 0xd79   : > { %6576 = vmatprep.mubr.msk.f32.mxu0 %vm12889_vm13, %v5459_v51 }
 0xd7c   : > { %6577 = vmatmul.mubr.msk.f32.gmra.mxu0 %vm12890_vm14, %v5460_v3 }
 0xe30   : > { %v6561_v44 = vpop.f32.mrf.mxu0 }
 0xe32   : > { %v5438_v36 = vpop.f32.mrf.mxu0 }
 0xe34   : > { %v6564_v2 = vpop.f32.mrf.mxu0 }
 0xe36   : > { %v5448_v59 = vpop.f32.mrf.mxu0 }
 0xe38   : > { %v6575_v32 = vpop.f32.mrf.mxu0 }
 0xe3a   : > { %v5539_v14 = vpop.f32.mrf.mxu0 }
 0xe3b   : > { %6595 = vmatprep.mubr.msk.f32.mxu1 %vm5359_vm9, %v5539_v14 }
 0xe3c   : > { %v6578_v25 = vpop.f32.mrf.mxu0  ;;  %6596 = vmatmul.mubr.msk.f32.vlgmr.msra.gmra.mxu1 %vm5359_vm9, %v6575_v32 }
 0xe3e   : > { %v5549_v31 = vpop.f32.mrf.mxu0 }
 0xe3f   : > { %6598 = vmatprep.mubr.msk.f32.mxu1 %vm5359_vm9, %v5549_v31 }
 0xe40   : > { %6599 = vmatmul.mubr.msk.f32.gmra.mxu1 %vm5359_vm9, %v6578_v25 }
 0xefc   : > { %v6597_v26 = vpop.f32.mrf.mxu1 }
 0xefd   : > { %v5642_v18 = vadd.f32 %v6597_v26, %v6561_v44 }
 0xefe   : > { %v5636_v4 = vpop.f32.mrf.mxu1 }
 0xeff   : > { %v5656_v52 = vmax.f32 %v5642_v18, 0.0  ;;  %v5637_v41 = vadd.f32 %v5636_v4, %v5438_v36 }
 0xf00   : > { %v6600_v39 = vpop.f32.mrf.mxu1 }
 0xf01   : > { %v5655_v20 = vmax.f32 %v5637_v41, 0.0  ;;  %v5662_v35 = vsel %vm2089_vm5, %v5656_v52, 0.0  ;;  %v5652_v37 = vadd.f32 %v6600_v39, %v6564_v2 }
 0xf02   : > { %5663 = vadd.xlane.f32.xlu1 %v5662_v35  ;;  %v5646_v42 = vpop.f32.mrf.mxu1 }
 0xf03   : > { %v5647_v49 = vadd.f32 %v5646_v42, %v5448_v59  ;;  %v5659_v21 = vsel %vm2089_vm5, %v5655_v20, 0.0  ;;  %v5658_v10 = vmax.f32 %v5652_v37, 0.0 }
 0xf04   : > { %5660 = vadd.xlane.f32.xlu0 %v5659_v21 }
 0xf05   : > { %v5657_v0 = vmax.f32 %v5647_v49, 0.0  ;;  %v5668_v19 = vsel %vm2089_vm5, %v5658_v10, 0.0 }
 0xf07   : > { %v5665_v9 = vsel %vm2089_vm5, %v5657_v0, 0.0  ;;  %vm12894_vm5 = vmmov %vm12873_vm1  ;;  %vm5692_vm1 = vcmask 0  }
 0xf08   : > { %5666 = vadd.xlane.f32.xlu0 %v5665_v9 }
 0xf0c   : > { %5669 = vadd.xlane.f32.xlu0 %v5668_v19 }
 0xf8b   : > { %v5664_v62 = vpop.xlane.xlu1 %5663 }
 0xf8c   : > { %v5676_v43 = vmul.f32 %v5672_v27, %v5664_v62 }
 0xf8d   : > { %v5661_v23 = vpop.xlane.xlu0 %5660 }
 0xf8e   : > { %v5675_v24 = vmul.f32 %v5671_v30, %v5661_v23  ;;  %v5680_v13 = vsel %vm12892_vm2, %v5676_v43, 0.0 }
 0xf90   : > { %v5679_v40 = vsel %vm12891_vm15, %v5675_v24, 0.0 }
 0xf91   : > { %v5667_v7 = vpop.xlane.xlu0 %5666  ;;  %v5681_v28 = vadd.f32 %v5680_v13, %v5679_v40 }
 0xf92   : > { %v5677_v45 = vmul.f32 %v5673_v22, %v5667_v7 }
 0xf94   : > { %v5682_v15 = vsel %vm12893_vm10, %v5677_v45, 0.0 }
 0xf95   : > { %v5670_v58 = vpop.xlane.xlu0 %5669  ;;  %v5683_v12 = vadd.f32 %v5682_v15, %v5681_v28 }
 0xf96   : > { %v5678_v29 = vmul.f32 %v5674_v47, %v5670_v58 }
 0xf98   : > { %v5684_v8 = vsel %vm12894_vm5, %v5678_v29, 0.0 }
 0xf99   : > { %v5685_v50 = vadd.f32 %v5684_v8, %v5683_v12 }
 0xf9b   : > { %v5686_v38 = vrot.slane %v5685_v50, 4 }
 0xf9d   : > { %v5687_v56 = vadd.f32 %v5686_v38, %v5685_v50 }
 0xf9f   : > { %v5688_v48 = vrot.slane %v5687_v56, 2 }
 0xfa1   : > { %v5689_v60 = vadd.f32 %v5688_v48, %v5687_v56 }
 0xfa3   : > { %v5690_v17 = vrot.slane %v5689_v60, 1 }
 0xfa5   : > { %v5691_v11 = vadd.f32 %v5690_v17, %v5689_v60 }
 0xfa7   : > { %5693 = vst.msk [vmem:[%s609_s30] sm:$0x1] %vm5692_vm1, %v5691_v11 }
 0xfa8 PF: > { %s30_s29 = sadd.s32 1, %s7037_s29  }
 0xfa9   : > { %p27_p2 = scmp.ge.s32.totalorder %s30_s29, 4  }
 0xfab   :  { %29 = sbr.rel (!%p27_p2) target bundleno = 6 (0x6), region = 147 }
 0xfb0   :  { %5711 = vsyncpa [#allocation3], 1 }
 0xfb1   :  { %5713 = vsyncpa [#allocation3 + $0x1], 1 }
 0xfb2   :  { %5714 = vsyncpa [#allocation5], 1 }
 0xfb3   :  { %5715 = vsyncpa [#allocation8], 1 }
 0xfb4   :  { %5716 = vsyncpa [#allocation11], 1 }
 0xfb5   :  { %5717 = vsyncpa [#allocation14], 1 }
 0xfb6   :  { %5718 = vsyncpa [#allocation17], 1 }

</bundles_post_ra>
